<compile_context>
chip_gen: v7x
topology: tpu7x:2x2x1
jax: 0.10.0
libtpu: 0.0.40
codegen_flags: <defaults>
</compile_context>

<pallas_src>
import jax
import jax.numpy as jnp
from jax import lax
from jax.experimental import pallas as pl
from jax.experimental.pallas import tpu as pltpu


LATENT_DIM = 32
IMG_SIZE = 16
CHANNELS = 3
INIT_SIZE = IMG_SIZE // 4          # 4
_LANES = 128                       # TPU lane width; all channel dims padded to this


# ---------------------------------------------------------------------------
# In-kernel helpers (pure jnp, traced inside the fused kernel)
# ---------------------------------------------------------------------------

def _batchnorm(x, gamma, beta, eps):
    # x: (N, C) f32, gamma/beta: (1, C).  Training-mode BatchNorm2d with biased
    # batch variance, one-pass statistics.
    n = x.shape[0]
    s1 = jnp.sum(x, axis=0, keepdims=True)
    s2 = jnp.sum(x * x, axis=0, keepdims=True)
    mean = s1 * (1.0 / n)
    var = s2 * (1.0 / n) - mean * mean
    inv = lax.rsqrt(var + eps)
    return (x - mean) * (inv * gamma) + beta


def _leaky_relu(x, slope=0.2):
    return jnp.where(x >= 0.0, x, slope * x)


def _upsample2x(x):
    # Nearest-neighbour 2x upsample of an NHWC tensor using only lane-aligned
    # concatenates and re-tiling reshapes (C == 128 everywhere).
    B, H, W, C = x.shape
    # width:  up[..., 2w + r, c] = x[..., w, c]
    x = jnp.concatenate([x, x], axis=3).reshape(B, H, 2 * W, C)
    # height: up[:, 2h + r] = x[:, h]   (major-axis interleave)
    x = jnp.concatenate([x[:, :, None], x[:, :, None]], axis=2)   # (B, H, 2, 2W, C)
    return x.reshape(B, 2 * H, 2 * W, C)


def _conv3x3_fat(x, w9, b):
    # 3x3 "same" convolution as ONE fat-K MXU matmul:
    #   patches (B*H*W, 9*Cin) @ w9 (9*Cin, Cout)
    # x: (B, H, W, Cin) f32 with Cin == 128, w9: bf16, b: (1, Cout) f32.
    B, H, W, Cin = x.shape
    zrow = jnp.zeros((B, 1, W, Cin), x.dtype)
    xh = jnp.concatenate([zrow, x, zrow], axis=1)              # (B, H+2, W,   Cin)
    zcol = jnp.zeros((B, H + 2, 1, Cin), x.dtype)
    xp = jnp.concatenate([zcol, xh, zcol], axis=2)             # (B, H+2, W+2, Cin)
    # Hoist the 3 width (kx) shifts: one sublane-offset slice per kx, reused by
    # all ky taps (3 shifted copies per conv instead of 9 misaligned slices).
    shifted = [xp[:, :, kx:kx + W, :] for kx in range(3)]      # each (B, H+2, W, Cin)
    taps = [shifted[kx][:, ky:ky + H] for ky in range(3) for kx in range(3)]
    patches = jnp.concatenate(taps, axis=-1)                   # (B, H, W, 9*Cin)
    patches = patches.reshape(B * H * W, 9 * Cin).astype(jnp.bfloat16)
    y = jnp.dot(patches, w9, preferred_element_type=jnp.float32)
    return y + b                                               # (B*H*W, Cout) f32


# ---------------------------------------------------------------------------
# Fused generator kernel
# ---------------------------------------------------------------------------

def _generator_kernel(noise_ref, l1w_ref, l1b_ref,
                      bn1g_ref, bn1b_ref,
                      c1w_ref, c1b_ref,
                      bn2g_ref, bn2b_ref,
                      c2w_ref, c2b_ref,
                      bn3g_ref, bn3b_ref,
                      c3w_ref, c3b_ref,
                      o_ref):
    B = noise_ref.shape[0]
    s = INIT_SIZE

    # l1: Linear(latent_dim -> 128*s*s); columns pre-permuted to NHWC order.
    h = jnp.dot(noise_ref[...].astype(jnp.bfloat16), l1w_ref[...],
                preferred_element_type=jnp.float32) + l1b_ref[...]     # (B, s*s*128)

    # BatchNorm2d(128), eps=1e-5, training-mode batch statistics.
    x = _batchnorm(h.reshape(B * s * s, _LANES), bn1g_ref[...], bn1b_ref[...], 1e-5)
    x = x.reshape(B, s, s, _LANES)

    # Upsample x2 -> Conv2d(128,128,3,p=1) -> BN(eps=0.8) -> LeakyReLU(0.2)
    x = _upsample2x(x)                                                 # (B, 2s, 2s, 128)
    x = _conv3x3_fat(x, c1w_ref[...], c1b_ref[...])                    # (B*4*s*s, 128)
    x = _leaky_relu(_batchnorm(x, bn2g_ref[...], bn2b_ref[...], 0.8))
    x = x.reshape(B, 2 * s, 2 * s, _LANES)

    # Upsample x2 -> Conv2d(128,64->pad128) -> BN(eps=0.8) -> LeakyReLU(0.2)
    x = _upsample2x(x)                                                 # (B, 4s, 4s, 128)
    x = _conv3x3_fat(x, c2w_ref[...], c2b_ref[...])                    # (B*16*s*s, 128)
    x = _leaky_relu(_batchnorm(x, bn3g_ref[...], bn3b_ref[...], 0.8))
    x = x.reshape(B, 4 * s, 4 * s, _LANES)

    # Conv2d(64->pad128, 3->pad128) + Tanh; lane-dense (B, H*W, 128) store.
    y = _conv3x3_fat(x, c3w_ref[...], c3b_ref[...])                    # (B*16*s*s, 128)
    o_ref[...] = jnp.tanh(y).reshape(B, 16 * s * s, _LANES)


# ---------------------------------------------------------------------------
# Parameters
# ---------------------------------------------------------------------------

def init_params(key):
    """Random parameters in their 'PyTorch-math' layouts:
    linear as (in, out), convs as (kh, kw, Cin, Cout), BN as (C,)."""
    ks = jax.random.split(key, 14)

    def n(k, shape):
        return 0.05 * jax.random.normal(k, shape, jnp.float32)

    p = {}
    p["l1_w"] = n(ks[0], (LATENT_DIM, 128 * INIT_SIZE ** 2))
    p["l1_b"] = n(ks[1], (128 * INIT_SIZE ** 2,))
    p["bn1_g"] = 1.0 + n(ks[2], (128,))
    p["bn1_b"] = n(ks[3], (128,))
    p["c1_w"] = n(ks[4], (3, 3, 128, 128))
    p["c1_b"] = n(ks[5], (128,))
    p["bn2_g"] = 1.0 + n(ks[6], (128,))
    p["bn2_b"] = n(ks[7], (128,))
    p["c2_w"] = n(ks[8], (3, 3, 128, 64))
    p["c2_b"] = n(ks[9], (64,))
    p["bn3_g"] = 1.0 + n(ks[10], (64,))
    p["bn3_b"] = n(ks[11], (64,))
    p["c3_w"] = n(ks[12], (3, 3, 64, CHANNELS))
    p["c3_b"] = n(ks[13], (CHANNELS,))
    return p


def prepare_params(p):
    """One-time offline repack into the layouts the fused kernel consumes:
    NHWC-permuted l1, im2col conv weights, channel dims zero-padded to the
    128-lane width, bf16 MXU operands.  Padded channels are exactly zero so
    real-channel results are unchanged."""
    s = INIT_SIZE
    q = {}
    # l1: permute output features from NCHW (c, h, w) to NHWC (h, w, c) order.
    w = p["l1_w"].reshape(LATENT_DIM, 128, s, s)
    q["l1_w"] = jnp.transpose(w, (0, 2, 3, 1)).reshape(LATENT_DIM, -1).astype(jnp.bfloat16)
    b = p["l1_b"].reshape(128, s, s)
    q["l1_b"] = jnp.transpose(b, (1, 2, 0)).reshape(1, -1)
    # BatchNorm scale / shift as (1, C) rows; bn3 zero-padded 64 -> 128.
    q["bn1_g"], q["bn1_b"] = p["bn1_g"].reshape(1, -1), p["bn1_b"].reshape(1, -1)
    q["bn2_g"], q["bn2_b"] = p["bn2_g"].reshape(1, -1), p["bn2_b"].reshape(1, -1)
    q["bn3_g"] = jnp.pad(p["bn3_g"], (0, _LANES - 64)).reshape(1, -1)
    q["bn3_b"] = jnp.pad(p["bn3_b"], (0, _LANES - 64)).reshape(1, -1)

    def im2col(w):  # (3, 3, Cin, Cout) -> (9*Cin, Cout) bf16, tap order (ky, kx, ci)
        return w.reshape(-1, w.shape[-1]).astype(jnp.bfloat16)

    q["c1_w"] = im2col(p["c1_w"])                                        # (1152, 128)
    q["c1_b"] = p["c1_b"].reshape(1, -1)
    # conv2: pad Cout 64 -> 128.
    q["c2_w"] = im2col(jnp.pad(p["c2_w"], ((0, 0),) * 3 + ((0, _LANES - 64),)))
    q["c2_b"] = jnp.pad(p["c2_b"], (0, _LANES - 64)).reshape(1, -1)
    # conv3: pad Cin 64 -> 128 and Cout 3 -> 128.
    c3 = jnp.pad(p["c3_w"],
                 ((0, 0), (0, 0), (0, _LANES - 64), (0, _LANES - CHANNELS)))
    q["c3_w"] = im2col(c3)                                               # (1152, 128)
    q["c3_b"] = jnp.pad(p["c3_b"], (0, _LANES - CHANNELS)).reshape(1, -1)
    return q


# ---------------------------------------------------------------------------
# Forward
# ---------------------------------------------------------------------------

@jax.jit
def generator_forward(params, noise):
    B = noise.shape[0]
    hw = IMG_SIZE * IMG_SIZE
    out = pl.pallas_call(
        _generator_kernel,
        out_shape=jax.ShapeDtypeStruct((B, hw, _LANES), jnp.float32),
        compiler_params=pltpu.CompilerParams(vmem_limit_bytes=32 * 1024 * 1024),
    )(noise,
      params["l1_w"], params["l1_b"],
      params["bn1_g"], params["bn1_b"],
      params["c1_w"], params["c1_b"],
      params["bn2_g"], params["bn2_b"],
      params["c2_w"], params["c2_b"],
      params["bn3_g"], params["bn3_b"],
      params["c3_w"], params["c3_b"])
    # Keep only the real 3 channels and present NCHW (tiny: 6 KB of XLA work).
    img = jnp.transpose(out[:, :, :CHANNELS], (0, 2, 1))
    return img.reshape(B, CHANNELS, IMG_SIZE, IMG_SIZE)


if __name__ == "__main__":
    key = jax.random.PRNGKey(0)
    pkey, nkey = jax.random.split(key)
    params = prepare_params(init_params(pkey))
    noise = jax.random.normal(nkey, (2, LATENT_DIM), jnp.float32)

    img = generator_forward(params, noise)
    jax.block_until_ready(img)

    assert img.shape == (2, CHANNELS, IMG_SIZE, IMG_SIZE), img.shape
    assert img.dtype == jnp.float32
    assert bool(jnp.all(jnp.isfinite(img)))
    assert bool(jnp.all(jnp.abs(img) <= 1.0))   # tanh range
    print("KERNEL_OK")
</pallas_src>

<mosaic_0001>
module attributes {stable_mosaic.version = 11 : i64} {
  func.func @_generator_kernel(%arg0: memref<2x32xf32, #tpu.memory_space<vmem>>, %arg1: memref<32x2048xbf16, #tpu.memory_space<vmem>>, %arg2: memref<1x2048xf32, #tpu.memory_space<vmem>>, %arg3: memref<1x128xf32, #tpu.memory_space<vmem>>, %arg4: memref<1x128xf32, #tpu.memory_space<vmem>>, %arg5: memref<1152x128xbf16, #tpu.memory_space<vmem>>, %arg6: memref<1x128xf32, #tpu.memory_space<vmem>>, %arg7: memref<1x128xf32, #tpu.memory_space<vmem>>, %arg8: memref<1x128xf32, #tpu.memory_space<vmem>>, %arg9: memref<1152x128xbf16, #tpu.memory_space<vmem>>, %arg10: memref<1x128xf32, #tpu.memory_space<vmem>>, %arg11: memref<1x128xf32, #tpu.memory_space<vmem>>, %arg12: memref<1x128xf32, #tpu.memory_space<vmem>>, %arg13: memref<1152x128xbf16, #tpu.memory_space<vmem>>, %arg14: memref<1x128xf32, #tpu.memory_space<vmem>>, %arg15: memref<2x256x128xf32, #tpu.memory_space<vmem>>) attributes {dimension_semantics = [], scalar_prefetch = 0 : i64, scratch_operands = 0 : i64, tpu.core_type = #tpu.core_type<tc>} {
    %c0 = arith.constant 0 : index
    %c0_0 = arith.constant 0 : index
    %0 = vector.load %arg0[%c0, %c0_0] : memref<2x32xf32, #tpu.memory_space<vmem>>, vector<2x32xf32>
    %1 = arith.truncf %0 : vector<2x32xf32> to vector<2x32xbf16>
    %c0_1 = arith.constant 0 : index
    %c0_2 = arith.constant 0 : index
    %2 = vector.load %arg1[%c0_1, %c0_2] : memref<32x2048xbf16, #tpu.memory_space<vmem>>, vector<32x2048xbf16>
    %cst = arith.constant dense<0.000000e+00> : vector<2x2048xf32>
    %3 = tpu.matmul %1, %2, %cst {dimension_numbers = #tpu.dot_dimension_numbers<[1], [0], [0], [1], [0, 0, 1, 1], [], []>} : vector<2x32xbf16>, vector<32x2048xbf16>, vector<2x2048xf32> -> vector<2x2048xf32>
    %c0_3 = arith.constant 0 : index
    %c0_4 = arith.constant 0 : index
    %4 = vector.load %arg2[%c0_3, %c0_4] : memref<1x2048xf32, #tpu.memory_space<vmem>>, vector<1x2048xf32>
    %5 = vector.broadcast %4 : vector<1x2048xf32> to vector<2x2048xf32>
    %6 = arith.addf %3, %5 : vector<2x2048xf32>
    %7 = vector.shape_cast %6 : vector<2x2048xf32> to vector<32x128xf32>
    %c0_5 = arith.constant 0 : index
    %c0_6 = arith.constant 0 : index
    %8 = vector.load %arg3[%c0_5, %c0_6] : memref<1x128xf32, #tpu.memory_space<vmem>>, vector<1x128xf32>
    %c0_7 = arith.constant 0 : index
    %c0_8 = arith.constant 0 : index
    %9 = vector.load %arg4[%c0_7, %c0_8] : memref<1x128xf32, #tpu.memory_space<vmem>>, vector<1x128xf32>
    %cst_9 = arith.constant dense<0.000000e+00> : vector<128xf32>
    %10 = vector.multi_reduction <add>, %7, %cst_9 [0] : vector<32x128xf32> to vector<128xf32>
    %11 = vector.shape_cast %10 : vector<128xf32> to vector<1x128xf32>
    %12 = arith.mulf %7, %7 : vector<32x128xf32>
    %cst_10 = arith.constant dense<0.000000e+00> : vector<128xf32>
    %13 = vector.multi_reduction <add>, %12, %cst_10 [0] : vector<32x128xf32> to vector<128xf32>
    %14 = vector.shape_cast %13 : vector<128xf32> to vector<1x128xf32>
    %cst_11 = arith.constant 3.125000e-02 : f32
    %15 = vector.broadcast %cst_11 : f32 to vector<1x128xf32>
    %16 = arith.mulf %11, %15 : vector<1x128xf32>
    %cst_12 = arith.constant 3.125000e-02 : f32
    %17 = vector.broadcast %cst_12 : f32 to vector<1x128xf32>
    %18 = arith.mulf %14, %17 : vector<1x128xf32>
    %19 = arith.mulf %16, %16 : vector<1x128xf32>
    %20 = arith.subf %18, %19 : vector<1x128xf32>
    %cst_13 = arith.constant 9.99999974E-6 : f32
    %21 = vector.broadcast %cst_13 : f32 to vector<1x128xf32>
    %22 = arith.addf %20, %21 : vector<1x128xf32>
    %23 = math.rsqrt %22 : vector<1x128xf32>
    %24 = vector.broadcast %16 : vector<1x128xf32> to vector<32x128xf32>
    %25 = arith.subf %7, %24 : vector<32x128xf32>
    %26 = arith.mulf %23, %8 : vector<1x128xf32>
    %27 = vector.broadcast %26 : vector<1x128xf32> to vector<32x128xf32>
    %28 = arith.mulf %25, %27 : vector<32x128xf32>
    %29 = vector.broadcast %9 : vector<1x128xf32> to vector<32x128xf32>
    %30 = arith.addf %28, %29 : vector<32x128xf32>
    %31 = vector.shape_cast %30 : vector<32x128xf32> to vector<2x4x4x128xf32>
    %32 = tpu.concatenate %31, %31 in 3 : vector<2x4x4x128xf32>, vector<2x4x4x128xf32> -> vector<2x4x4x256xf32>
    %33 = vector.shape_cast %32 : vector<2x4x4x256xf32> to vector<2x4x8x128xf32>
    %34 = vector.shape_cast %33 : vector<2x4x8x128xf32> to vector<2x4x1x8x128xf32>
    %35 = vector.shape_cast %33 : vector<2x4x8x128xf32> to vector<2x4x1x8x128xf32>
    %36 = tpu.concatenate %34, %35 in 2 : vector<2x4x1x8x128xf32>, vector<2x4x1x8x128xf32> -> vector<2x4x2x8x128xf32>
    %37 = vector.shape_cast %36 : vector<2x4x2x8x128xf32> to vector<2x8x8x128xf32>
    %c0_14 = arith.constant 0 : index
    %c0_15 = arith.constant 0 : index
    %38 = vector.load %arg5[%c0_14, %c0_15] : memref<1152x128xbf16, #tpu.memory_space<vmem>>, vector<1152x128xbf16>
    %c0_16 = arith.constant 0 : index
    %c0_17 = arith.constant 0 : index
    %39 = vector.load %arg6[%c0_16, %c0_17] : memref<1x128xf32, #tpu.memory_space<vmem>>, vector<1x128xf32>
    %cst_18 = arith.constant 0.000000e+00 : f32
    %40 = vector.broadcast %cst_18 : f32 to vector<2x1x8x128xf32>
    %41 = tpu.concatenate %40, %37, %40 in 1 : vector<2x1x8x128xf32>, vector<2x8x8x128xf32>, vector<2x1x8x128xf32> -> vector<2x10x8x128xf32>
    %cst_19 = arith.constant 0.000000e+00 : f32
    %42 = vector.broadcast %cst_19 : f32 to vector<2x10x1x128xf32>
    %43 = tpu.concatenate %42, %41, %42 in 2 : vector<2x10x1x128xf32>, vector<2x10x8x128xf32>, vector<2x10x1x128xf32> -> vector<2x10x10x128xf32>
    %44 = vector.extract_strided_slice %43 {offsets = [0, 0, 0, 0], sizes = [2, 10, 8, 128], strides = [1, 1, 1, 1]} : vector<2x10x10x128xf32> to vector<2x10x8x128xf32>
    %45 = vector.extract_strided_slice %43 {offsets = [0, 0, 1, 0], sizes = [2, 10, 8, 128], strides = [1, 1, 1, 1]} : vector<2x10x10x128xf32> to vector<2x10x8x128xf32>
    %46 = vector.extract_strided_slice %43 {offsets = [0, 0, 2, 0], sizes = [2, 10, 8, 128], strides = [1, 1, 1, 1]} : vector<2x10x10x128xf32> to vector<2x10x8x128xf32>
    %47 = vector.extract_strided_slice %44 {offsets = [0, 0, 0, 0], sizes = [2, 8, 8, 128], strides = [1, 1, 1, 1]} : vector<2x10x8x128xf32> to vector<2x8x8x128xf32>
    %48 = vector.extract_strided_slice %45 {offsets = [0, 0, 0, 0], sizes = [2, 8, 8, 128], strides = [1, 1, 1, 1]} : vector<2x10x8x128xf32> to vector<2x8x8x128xf32>
    %49 = vector.extract_strided_slice %46 {offsets = [0, 0, 0, 0], sizes = [2, 8, 8, 128], strides = [1, 1, 1, 1]} : vector<2x10x8x128xf32> to vector<2x8x8x128xf32>
    %50 = vector.extract_strided_slice %44 {offsets = [0, 1, 0, 0], sizes = [2, 8, 8, 128], strides = [1, 1, 1, 1]} : vector<2x10x8x128xf32> to vector<2x8x8x128xf32>
    %51 = vector.extract_strided_slice %45 {offsets = [0, 1, 0, 0], sizes = [2, 8, 8, 128], strides = [1, 1, 1, 1]} : vector<2x10x8x128xf32> to vector<2x8x8x128xf32>
    %52 = vector.extract_strided_slice %46 {offsets = [0, 1, 0, 0], sizes = [2, 8, 8, 128], strides = [1, 1, 1, 1]} : vector<2x10x8x128xf32> to vector<2x8x8x128xf32>
    %53 = vector.extract_strided_slice %44 {offsets = [0, 2, 0, 0], sizes = [2, 8, 8, 128], strides = [1, 1, 1, 1]} : vector<2x10x8x128xf32> to vector<2x8x8x128xf32>
    %54 = vector.extract_strided_slice %45 {offsets = [0, 2, 0, 0], sizes = [2, 8, 8, 128], strides = [1, 1, 1, 1]} : vector<2x10x8x128xf32> to vector<2x8x8x128xf32>
    %55 = vector.extract_strided_slice %46 {offsets = [0, 2, 0, 0], sizes = [2, 8, 8, 128], strides = [1, 1, 1, 1]} : vector<2x10x8x128xf32> to vector<2x8x8x128xf32>
    %56 = tpu.concatenate %47, %48, %49, %50, %51, %52, %53, %54, %55 in 3 : vector<2x8x8x128xf32>, vector<2x8x8x128xf32>, vector<2x8x8x128xf32>, vector<2x8x8x128xf32>, vector<2x8x8x128xf32>, vector<2x8x8x128xf32>, vector<2x8x8x128xf32>, vector<2x8x8x128xf32>, vector<2x8x8x128xf32> -> vector<2x8x8x1152xf32>
    %57 = vector.shape_cast %56 : vector<2x8x8x1152xf32> to vector<128x1152xf32>
    %58 = arith.truncf %57 : vector<128x1152xf32> to vector<128x1152xbf16>
    %cst_20 = arith.constant dense<0.000000e+00> : vector<128x128xf32>
    %59 = tpu.matmul %58, %38, %cst_20 {dimension_numbers = #tpu.dot_dimension_numbers<[1], [0], [0], [1], [0, 0, 1, 1], [], []>} : vector<128x1152xbf16>, vector<1152x128xbf16>, vector<128x128xf32> -> vector<128x128xf32>
    %60 = vector.broadcast %39 : vector<1x128xf32> to vector<128x128xf32>
    %61 = arith.addf %59, %60 : vector<128x128xf32>
    %c0_21 = arith.constant 0 : index
    %c0_22 = arith.constant 0 : index
    %62 = vector.load %arg7[%c0_21, %c0_22] : memref<1x128xf32, #tpu.memory_space<vmem>>, vector<1x128xf32>
    %c0_23 = arith.constant 0 : index
    %c0_24 = arith.constant 0 : index
    %63 = vector.load %arg8[%c0_23, %c0_24] : memref<1x128xf32, #tpu.memory_space<vmem>>, vector<1x128xf32>
    %cst_25 = arith.constant dense<0.000000e+00> : vector<128xf32>
    %64 = vector.multi_reduction <add>, %61, %cst_25 [0] : vector<128x128xf32> to vector<128xf32>
    %65 = vector.shape_cast %64 : vector<128xf32> to vector<1x128xf32>
    %66 = arith.mulf %61, %61 : vector<128x128xf32>
    %cst_26 = arith.constant dense<0.000000e+00> : vector<128xf32>
    %67 = vector.multi_reduction <add>, %66, %cst_26 [0] : vector<128x128xf32> to vector<128xf32>
    %68 = vector.shape_cast %67 : vector<128xf32> to vector<1x128xf32>
    %cst_27 = arith.constant 7.812500e-03 : f32
    %69 = vector.broadcast %cst_27 : f32 to vector<1x128xf32>
    %70 = arith.mulf %65, %69 : vector<1x128xf32>
    %cst_28 = arith.constant 7.812500e-03 : f32
    %71 = vector.broadcast %cst_28 : f32 to vector<1x128xf32>
    %72 = arith.mulf %68, %71 : vector<1x128xf32>
    %73 = arith.mulf %70, %70 : vector<1x128xf32>
    %74 = arith.subf %72, %73 : vector<1x128xf32>
    %cst_29 = arith.constant 8.000000e-01 : f32
    %75 = vector.broadcast %cst_29 : f32 to vector<1x128xf32>
    %76 = arith.addf %74, %75 : vector<1x128xf32>
    %77 = math.rsqrt %76 : vector<1x128xf32>
    %78 = vector.broadcast %70 : vector<1x128xf32> to vector<128x128xf32>
    %79 = arith.subf %61, %78 : vector<128x128xf32>
    %80 = arith.mulf %77, %62 : vector<1x128xf32>
    %81 = vector.broadcast %80 : vector<1x128xf32> to vector<128x128xf32>
    %82 = arith.mulf %79, %81 : vector<128x128xf32>
    %83 = vector.broadcast %63 : vector<1x128xf32> to vector<128x128xf32>
    %84 = arith.addf %82, %83 : vector<128x128xf32>
    %cst_30 = arith.constant 0.000000e+00 : f32
    %85 = vector.broadcast %cst_30 : f32 to vector<128x128xf32>
    %86 = arith.cmpf oge, %84, %85 : vector<128x128xf32>
    %cst_31 = arith.constant 2.000000e-01 : f32
    %87 = vector.broadcast %cst_31 : f32 to vector<128x128xf32>
    %88 = arith.mulf %87, %84 : vector<128x128xf32>
    %89 = arith.select %86, %84, %88 : vector<128x128xi1>, vector<128x128xf32>
    %90 = vector.shape_cast %89 : vector<128x128xf32> to vector<2x8x8x128xf32>
    %91 = tpu.concatenate %90, %90 in 3 : vector<2x8x8x128xf32>, vector<2x8x8x128xf32> -> vector<2x8x8x256xf32>
    %92 = vector.shape_cast %91 : vector<2x8x8x256xf32> to vector<2x8x16x128xf32>
    %93 = vector.shape_cast %92 : vector<2x8x16x128xf32> to vector<2x8x1x16x128xf32>
    %94 = vector.shape_cast %92 : vector<2x8x16x128xf32> to vector<2x8x1x16x128xf32>
    %95 = tpu.concatenate %93, %94 in 2 : vector<2x8x1x16x128xf32>, vector<2x8x1x16x128xf32> -> vector<2x8x2x16x128xf32>
    %96 = vector.shape_cast %95 : vector<2x8x2x16x128xf32> to vector<2x16x16x128xf32>
    %c0_32 = arith.constant 0 : index
    %c0_33 = arith.constant 0 : index
    %97 = vector.load %arg9[%c0_32, %c0_33] : memref<1152x128xbf16, #tpu.memory_space<vmem>>, vector<1152x128xbf16>
    %c0_34 = arith.constant 0 : index
    %c0_35 = arith.constant 0 : index
    %98 = vector.load %arg10[%c0_34, %c0_35] : memref<1x128xf32, #tpu.memory_space<vmem>>, vector<1x128xf32>
    %cst_36 = arith.constant 0.000000e+00 : f32
    %99 = vector.broadcast %cst_36 : f32 to vector<2x1x16x128xf32>
    %100 = tpu.concatenate %99, %96, %99 in 1 : vector<2x1x16x128xf32>, vector<2x16x16x128xf32>, vector<2x1x16x128xf32> -> vector<2x18x16x128xf32>
    %cst_37 = arith.constant 0.000000e+00 : f32
    %101 = vector.broadcast %cst_37 : f32 to vector<2x18x1x128xf32>
    %102 = tpu.concatenate %101, %100, %101 in 2 : vector<2x18x1x128xf32>, vector<2x18x16x128xf32>, vector<2x18x1x128xf32> -> vector<2x18x18x128xf32>
    %103 = vector.extract_strided_slice %102 {offsets = [0, 0, 0, 0], sizes = [2, 18, 16, 128], strides = [1, 1, 1, 1]} : vector<2x18x18x128xf32> to vector<2x18x16x128xf32>
    %104 = vector.extract_strided_slice %102 {offsets = [0, 0, 1, 0], sizes = [2, 18, 16, 128], strides = [1, 1, 1, 1]} : vector<2x18x18x128xf32> to vector<2x18x16x128xf32>
    %105 = vector.extract_strided_slice %102 {offsets = [0, 0, 2, 0], sizes = [2, 18, 16, 128], strides = [1, 1, 1, 1]} : vector<2x18x18x128xf32> to vector<2x18x16x128xf32>
    %106 = vector.extract_strided_slice %103 {offsets = [0, 0, 0, 0], sizes = [2, 16, 16, 128], strides = [1, 1, 1, 1]} : vector<2x18x16x128xf32> to vector<2x16x16x128xf32>
    %107 = vector.extract_strided_slice %104 {offsets = [0, 0, 0, 0], sizes = [2, 16, 16, 128], strides = [1, 1, 1, 1]} : vector<2x18x16x128xf32> to vector<2x16x16x128xf32>
    %108 = vector.extract_strided_slice %105 {offsets = [0, 0, 0, 0], sizes = [2, 16, 16, 128], strides = [1, 1, 1, 1]} : vector<2x18x16x128xf32> to vector<2x16x16x128xf32>
    %109 = vector.extract_strided_slice %103 {offsets = [0, 1, 0, 0], sizes = [2, 16, 16, 128], strides = [1, 1, 1, 1]} : vector<2x18x16x128xf32> to vector<2x16x16x128xf32>
    %110 = vector.extract_strided_slice %104 {offsets = [0, 1, 0, 0], sizes = [2, 16, 16, 128], strides = [1, 1, 1, 1]} : vector<2x18x16x128xf32> to vector<2x16x16x128xf32>
    %111 = vector.extract_strided_slice %105 {offsets = [0, 1, 0, 0], sizes = [2, 16, 16, 128], strides = [1, 1, 1, 1]} : vector<2x18x16x128xf32> to vector<2x16x16x128xf32>
    %112 = vector.extract_strided_slice %103 {offsets = [0, 2, 0, 0], sizes = [2, 16, 16, 128], strides = [1, 1, 1, 1]} : vector<2x18x16x128xf32> to vector<2x16x16x128xf32>
    %113 = vector.extract_strided_slice %104 {offsets = [0, 2, 0, 0], sizes = [2, 16, 16, 128], strides = [1, 1, 1, 1]} : vector<2x18x16x128xf32> to vector<2x16x16x128xf32>
    %114 = vector.extract_strided_slice %105 {offsets = [0, 2, 0, 0], sizes = [2, 16, 16, 128], strides = [1, 1, 1, 1]} : vector<2x18x16x128xf32> to vector<2x16x16x128xf32>
    %115 = tpu.concatenate %106, %107, %108, %109, %110, %111, %112, %113, %114 in 3 : vector<2x16x16x128xf32>, vector<2x16x16x128xf32>, vector<2x16x16x128xf32>, vector<2x16x16x128xf32>, vector<2x16x16x128xf32>, vector<2x16x16x128xf32>, vector<2x16x16x128xf32>, vector<2x16x16x128xf32>, vector<2x16x16x128xf32> -> vector<2x16x16x1152xf32>
    %116 = vector.shape_cast %115 : vector<2x16x16x1152xf32> to vector<512x1152xf32>
    %117 = arith.truncf %116 : vector<512x1152xf32> to vector<512x1152xbf16>
    %cst_38 = arith.constant dense<0.000000e+00> : vector<512x128xf32>
    %118 = tpu.matmul %117, %97, %cst_38 {dimension_numbers = #tpu.dot_dimension_numbers<[1], [0], [0], [1], [0, 0, 1, 1], [], []>} : vector<512x1152xbf16>, vector<1152x128xbf16>, vector<512x128xf32> -> vector<512x128xf32>
    %119 = vector.broadcast %98 : vector<1x128xf32> to vector<512x128xf32>
    %120 = arith.addf %118, %119 : vector<512x128xf32>
    %c0_39 = arith.constant 0 : index
    %c0_40 = arith.constant 0 : index
    %121 = vector.load %arg11[%c0_39, %c0_40] : memref<1x128xf32, #tpu.memory_space<vmem>>, vector<1x128xf32>
    %c0_41 = arith.constant 0 : index
    %c0_42 = arith.constant 0 : index
    %122 = vector.load %arg12[%c0_41, %c0_42] : memref<1x128xf32, #tpu.memory_space<vmem>>, vector<1x128xf32>
    %cst_43 = arith.constant dense<0.000000e+00> : vector<128xf32>
    %123 = vector.multi_reduction <add>, %120, %cst_43 [0] : vector<512x128xf32> to vector<128xf32>
    %124 = vector.shape_cast %123 : vector<128xf32> to vector<1x128xf32>
    %125 = arith.mulf %120, %120 : vector<512x128xf32>
    %cst_44 = arith.constant dense<0.000000e+00> : vector<128xf32>
    %126 = vector.multi_reduction <add>, %125, %cst_44 [0] : vector<512x128xf32> to vector<128xf32>
    %127 = vector.shape_cast %126 : vector<128xf32> to vector<1x128xf32>
    %cst_45 = arith.constant 0.001953125 : f32
    %128 = vector.broadcast %cst_45 : f32 to vector<1x128xf32>
    %129 = arith.mulf %124, %128 : vector<1x128xf32>
    %cst_46 = arith.constant 0.001953125 : f32
    %130 = vector.broadcast %cst_46 : f32 to vector<1x128xf32>
    %131 = arith.mulf %127, %130 : vector<1x128xf32>
    %132 = arith.mulf %129, %129 : vector<1x128xf32>
    %133 = arith.subf %131, %132 : vector<1x128xf32>
    %cst_47 = arith.constant 8.000000e-01 : f32
    %134 = vector.broadcast %cst_47 : f32 to vector<1x128xf32>
    %135 = arith.addf %133, %134 : vector<1x128xf32>
    %136 = math.rsqrt %135 : vector<1x128xf32>
    %137 = vector.broadcast %129 : vector<1x128xf32> to vector<512x128xf32>
    %138 = arith.subf %120, %137 : vector<512x128xf32>
    %139 = arith.mulf %136, %121 : vector<1x128xf32>
    %140 = vector.broadcast %139 : vector<1x128xf32> to vector<512x128xf32>
    %141 = arith.mulf %138, %140 : vector<512x128xf32>
    %142 = vector.broadcast %122 : vector<1x128xf32> to vector<512x128xf32>
    %143 = arith.addf %141, %142 : vector<512x128xf32>
    %cst_48 = arith.constant 0.000000e+00 : f32
    %144 = vector.broadcast %cst_48 : f32 to vector<512x128xf32>
    %145 = arith.cmpf oge, %143, %144 : vector<512x128xf32>
    %cst_49 = arith.constant 2.000000e-01 : f32
    %146 = vector.broadcast %cst_49 : f32 to vector<512x128xf32>
    %147 = arith.mulf %146, %143 : vector<512x128xf32>
    %148 = arith.select %145, %143, %147 : vector<512x128xi1>, vector<512x128xf32>
    %149 = vector.shape_cast %148 : vector<512x128xf32> to vector<2x16x16x128xf32>
    %c0_50 = arith.constant 0 : index
    %c0_51 = arith.constant 0 : index
    %150 = vector.load %arg13[%c0_50, %c0_51] : memref<1152x128xbf16, #tpu.memory_space<vmem>>, vector<1152x128xbf16>
    %c0_52 = arith.constant 0 : index
    %c0_53 = arith.constant 0 : index
    %151 = vector.load %arg14[%c0_52, %c0_53] : memref<1x128xf32, #tpu.memory_space<vmem>>, vector<1x128xf32>
    %cst_54 = arith.constant 0.000000e+00 : f32
    %152 = vector.broadcast %cst_54 : f32 to vector<2x1x16x128xf32>
    %153 = tpu.concatenate %152, %149, %152 in 1 : vector<2x1x16x128xf32>, vector<2x16x16x128xf32>, vector<2x1x16x128xf32> -> vector<2x18x16x128xf32>
    %cst_55 = arith.constant 0.000000e+00 : f32
    %154 = vector.broadcast %cst_55 : f32 to vector<2x18x1x128xf32>
    %155 = tpu.concatenate %154, %153, %154 in 2 : vector<2x18x1x128xf32>, vector<2x18x16x128xf32>, vector<2x18x1x128xf32> -> vector<2x18x18x128xf32>
    %156 = vector.extract_strided_slice %155 {offsets = [0, 0, 0, 0], sizes = [2, 18, 16, 128], strides = [1, 1, 1, 1]} : vector<2x18x18x128xf32> to vector<2x18x16x128xf32>
    %157 = vector.extract_strided_slice %155 {offsets = [0, 0, 1, 0], sizes = [2, 18, 16, 128], strides = [1, 1, 1, 1]} : vector<2x18x18x128xf32> to vector<2x18x16x128xf32>
    %158 = vector.extract_strided_slice %155 {offsets = [0, 0, 2, 0], sizes = [2, 18, 16, 128], strides = [1, 1, 1, 1]} : vector<2x18x18x128xf32> to vector<2x18x16x128xf32>
    %159 = vector.extract_strided_slice %156 {offsets = [0, 0, 0, 0], sizes = [2, 16, 16, 128], strides = [1, 1, 1, 1]} : vector<2x18x16x128xf32> to vector<2x16x16x128xf32>
    %160 = vector.extract_strided_slice %157 {offsets = [0, 0, 0, 0], sizes = [2, 16, 16, 128], strides = [1, 1, 1, 1]} : vector<2x18x16x128xf32> to vector<2x16x16x128xf32>
    %161 = vector.extract_strided_slice %158 {offsets = [0, 0, 0, 0], sizes = [2, 16, 16, 128], strides = [1, 1, 1, 1]} : vector<2x18x16x128xf32> to vector<2x16x16x128xf32>
    %162 = vector.extract_strided_slice %156 {offsets = [0, 1, 0, 0], sizes = [2, 16, 16, 128], strides = [1, 1, 1, 1]} : vector<2x18x16x128xf32> to vector<2x16x16x128xf32>
    %163 = vector.extract_strided_slice %157 {offsets = [0, 1, 0, 0], sizes = [2, 16, 16, 128], strides = [1, 1, 1, 1]} : vector<2x18x16x128xf32> to vector<2x16x16x128xf32>
    %164 = vector.extract_strided_slice %158 {offsets = [0, 1, 0, 0], sizes = [2, 16, 16, 128], strides = [1, 1, 1, 1]} : vector<2x18x16x128xf32> to vector<2x16x16x128xf32>
    %165 = vector.extract_strided_slice %156 {offsets = [0, 2, 0, 0], sizes = [2, 16, 16, 128], strides = [1, 1, 1, 1]} : vector<2x18x16x128xf32> to vector<2x16x16x128xf32>
    %166 = vector.extract_strided_slice %157 {offsets = [0, 2, 0, 0], sizes = [2, 16, 16, 128], strides = [1, 1, 1, 1]} : vector<2x18x16x128xf32> to vector<2x16x16x128xf32>
    %167 = vector.extract_strided_slice %158 {offsets = [0, 2, 0, 0], sizes = [2, 16, 16, 128], strides = [1, 1, 1, 1]} : vector<2x18x16x128xf32> to vector<2x16x16x128xf32>
    %168 = tpu.concatenate %159, %160, %161, %162, %163, %164, %165, %166, %167 in 3 : vector<2x16x16x128xf32>, vector<2x16x16x128xf32>, vector<2x16x16x128xf32>, vector<2x16x16x128xf32>, vector<2x16x16x128xf32>, vector<2x16x16x128xf32>, vector<2x16x16x128xf32>, vector<2x16x16x128xf32>, vector<2x16x16x128xf32> -> vector<2x16x16x1152xf32>
    %169 = vector.shape_cast %168 : vector<2x16x16x1152xf32> to vector<512x1152xf32>
    %170 = arith.truncf %169 : vector<512x1152xf32> to vector<512x1152xbf16>
    %cst_56 = arith.constant dense<0.000000e+00> : vector<512x128xf32>
    %171 = tpu.matmul %170, %150, %cst_56 {dimension_numbers = #tpu.dot_dimension_numbers<[1], [0], [0], [1], [0, 0, 1, 1], [], []>} : vector<512x1152xbf16>, vector<1152x128xbf16>, vector<512x128xf32> -> vector<512x128xf32>
    %172 = vector.broadcast %151 : vector<1x128xf32> to vector<512x128xf32>
    %173 = arith.addf %171, %172 : vector<512x128xf32>
    %174 = math.tanh %173 : vector<512x128xf32>
    %175 = vector.shape_cast %174 : vector<512x128xf32> to vector<2x256x128xf32>
    %c0_57 = arith.constant 0 : index
    %c0_58 = arith.constant 0 : index
    %c0_59 = arith.constant 0 : index
    %176 = vector.load %arg15[%c0_57, %c0_58, %c0_59] : memref<2x256x128xf32, #tpu.memory_space<vmem>>, vector<2x256x128xf32>
    tpu.vector_store %arg15[%c0_57, %c0_58, %c0_59], %175 {strides = array<i32>} : memref<2x256x128xf32, #tpu.memory_space<vmem>>, vector<2x256x128xf32>,
    return
  }
}

</mosaic_0001>

<bundles_post_ra>
// kernel: generator_forward.1
= control target key start
LH: loop header
LB: loop body
LE: loop exit
PB: predicated region body
PF: predicated region fallthrough
CT: control target
= control target key end

     0   :  { %20 = vsyncpa [#allocation3], 0  ;;  %s17737_s0 = inlined_call_operand.vmem [shape: f32[2,32], index: 0, kind: input, shape index: {}]   ;;  %s17738_s1 = inlined_call_operand.hbm [shape: bf16[32,2048], index: 1, kind: input, shape index: {}]   ;;  %s17739_s2 = inlined_call_operand.vmem [shape: f32[1,2048], index: 2, kind: input, shape index: {}]   ;;  %s17740_s3 = inlined_call_operand.vmem [shape: f32[1,128], index: 3, kind: input, shape index: {}]   ;;  %s17741_s4 = inlined_call_operand.hbm [shape: f32[1,128], index: 4, kind: input, shape index: {}]   ;;  %s17742_s5 = inlined_call_operand.hbm [shape: bf16[1152,128], index: 5, kind: input, shape index: {}]   ;;  %s17743_s6 = inlined_call_operand.vmem [shape: f32[1,128], index: 6, kind: input, shape index: {}]   ;;  %s17744_s7 = inlined_call_operand.vmem [shape: f32[1,128], index: 7, kind: input, shape index: {}]   ;;  %s17745_s8 = inlined_call_operand.vmem [shape: f32[1,128], index: 8, kind: input, shape index: {}]   ;;  %s17746_s9 = inlined_call_operand.hbm [shape: bf16[1152,128], index: 9, kind: input, shape index: {}]   ;;  %s17747_s10 = inlined_call_operand.vmem [shape: f32[1,128], index: 10, kind: input, shape index: {}]   ;;  %s17748_s11 = inlined_call_operand.vmem [shape: f32[1,128], index: 11, kind: input, shape index: {}]   ;;  %s17749_s12 = inlined_call_operand.vmem [shape: f32[1,128], index: 12, kind: input, shape index: {}]   ;;  %s17750_s13 = inlined_call_operand.hbm [shape: bf16[1152,128], index: 13, kind: input, shape index: {}]   ;;  %s17751_s14 = inlined_call_operand.vmem [shape: f32[1,128], index: 14, kind: input, shape index: {}]   ;;  %s17752_s15 = inlined_call_operand.vmem [shape: f32[2,256,128], index: 15, kind: output, shape index: {}]  }
   0x1   :  { %21 = vsyncpa [#allocation5], 0 }
   0x2   :  { %22 = vsyncpa [#allocation8], 0  ;;  %s12025_s18 = smov [#allocation4]   ;;  %s11909_s22 = scalar_lea.hbm %s17741_s4, 16 }
   0x3   :  { %s47_s19 = sshll.u32 %s12025_s18, 4  ;;  %p11910_p0 = scmp.ne.s32.totalorder %s17741_s4, %s11909_s22  ;;  %s48_s19 = int_to_ptr.vmem [resolvable:$true] %s47_s19 }
   0x4   :  { %p11913_p1 = scmp.lt.u32.totalorder %s11909_s22, %s17741_s4 }
   0x6   :  { %p11915_p2 = pnand %p11913_p1, %p11910_p0 }
   0x8   :  { %11918 = shalt.err (!%p11915_p2)
}
   0x9   :  { %s11919_s27 = scalar_lea.vmem %s48_s19, 16  ;;  %s11923_s28 = scalar_lea.vmem %s48_s19, 32 }
   0xa   :  { %p11920_p3 = scmp.ne.s32.totalorder %s48_s19, %s11919_s27  ;;  %p11924_p4 = scmp.lt.s32.totalorder %s48_s19, %s48_s19 }
   0xb   :  { %p11925_p5 = scmp.lt.s32.totalorder %s11923_s28, %s11919_s27 }
   0xd   :  { %p11926_p6 = por %p11925_p5, %p11924_p4 }
   0xf   :  { %p11927_p7 = pnand %p11926_p6, %p11920_p3 }
  0x11   :  { %11930 = shalt.err (!%p11927_p7)
}
  0x12   :  { %50 = dma.hbm_to_vmem [thread:$0]  %s17741_s4, 16, %s48_s19, [#allocation5]  }
  0x13   :  { %s12026_s16 = smov [#allocation7]   ;;  %s12027_s18 = smov [#allocation2]  }
  0x14   :  { %s74_s17 = sshll.u32 %s12026_s16, 4  ;;  %s30_s20 = sshll.u32 %s12027_s18, 4  ;;  %s75_s17 = int_to_ptr.vmem [resolvable:$true] %s74_s17  ;;  %s31_s20 = int_to_ptr.vmem [resolvable:$true] %s30_s20 }
  0x15   :  { %s11931_s23 = scalar_lea.hbm %s17746_s9, 9216 }
  0x16   :  { %p11932_p8 = scmp.ne.s32.totalorder %s17746_s9, %s11931_s23  ;;  %p11935_p9 = scmp.lt.u32.totalorder %s11931_s23, %s17746_s9 }
  0x18   :  { %p11937_p10 = pnand %p11935_p9, %p11932_p8 }
  0x1a   :  { %11940 = shalt.err (!%p11937_p10)
}
  0x1b   :  { %s11941_s4 = scalar_lea.vmem %s75_s17, 9216  ;;  %p11946_p12 = scmp.lt.s32.totalorder %s75_s17, %s75_s17 }
  0x1c   :  { %p11942_p11 = scmp.ne.s32.totalorder %s75_s17, %s11941_s4  ;;  %p11947_p13 = scmp.lt.s32.totalorder %s11941_s4, %s11941_s4 }
  0x1e   :  { %p11948_p0 = por %p11947_p13, %p11946_p12 }
  0x20   :  { %p11949_p1 = pnand %p11948_p0, %p11942_p11 }
  0x22   :  { %11952 = shalt.err (!%p11949_p1)
}
  0x23   :  { %s12028_s19 = smov 64   ;;  %s12029_s28 = smov 4  }
  0x24   :  { %80 = dma.hbm_to_vmem [thread:$0]  %s17746_s9, 9216, %s75_s17, [#allocation8], %s12028_s19, %s12028_s19, %s12029_s28  }
  0x25   :  { %s11953_s21 = scalar_lea.hbm %s17738_s1, 4096 }
  0x26   :  { %p11954_p2 = scmp.ne.s32.totalorder %s17738_s1, %s11953_s21  ;;  %p11957_p3 = scmp.lt.u32.totalorder %s11953_s21, %s17738_s1 }
  0x28   :  { %p11959_p4 = pnand %p11957_p3, %p11954_p2 }
  0x2a   :  { %11962 = shalt.err (!%p11959_p4)
}
  0x2b   :  { %s11963_s26 = scalar_lea.vmem %s31_s20, 4096  ;;  %p11968_p6 = scmp.lt.s32.totalorder %s31_s20, %s31_s20 }
  0x2c   :  { %p11964_p5 = scmp.ne.s32.totalorder %s31_s20, %s11963_s26  ;;  %p11969_p7 = scmp.lt.s32.totalorder %s11963_s26, %s11963_s26 }
  0x2e   :  { %p11970_p8 = por %p11969_p7, %p11968_p6 }
  0x30   :  { %p11971_p9 = pnand %p11970_p8, %p11964_p5 }
  0x32   :  { %11974 = shalt.err (!%p11971_p9)
}
  0x33   :  { %s12030_s9 = smov 1024   ;;  %s12031_s4 = smov [#allocation6]  }
  0x34   :  { %36 = dma.hbm_to_vmem [thread:$0]  %s17738_s1, 4096, %s31_s20, [#allocation3], %s12030_s9, %s12030_s9, %s12028_s19  }
  0x35   :  { %s56_s29 = sshll.u32 %s12031_s4, 4  ;;  %s12032_s30 = smov [#allocation9]   ;;  %s57_s29 = int_to_ptr.vmem [resolvable:$true] %s56_s29 }
  0x36   :  { %s92_s16 = sshll.u32 %s12032_s30, 4  ;;  %s11975_s22 = scalar_lea.hbm %s17742_s5, 9216  ;;  %s12158_s16 = int_to_ptr.vmem [resolvable:$true] %s92_s16 }
  0x37   :  { %p11976_p10 = scmp.ne.s32.totalorder %s17742_s5, %s11975_s22  ;;  %p11979_p11 = scmp.lt.u32.totalorder %s11975_s22, %s17742_s5 }
  0x39   :  { %p11981_p12 = pnand %p11979_p11, %p11976_p10 }
  0x3b   :  { %11984 = shalt.err (!%p11981_p12)
}
  0x3c   :  { %s11985_s1 = scalar_lea.vmem %s57_s29, 9216  ;;  %p11990_p0 = scmp.lt.s32.totalorder %s57_s29, %s57_s29 }
  0x3d   :  { %p11986_p13 = scmp.ne.s32.totalorder %s57_s29, %s11985_s1  ;;  %p11991_p1 = scmp.lt.s32.totalorder %s11985_s1, %s11985_s1 }
  0x3f   :  { %p11992_p2 = por %p11991_p1, %p11990_p0 }
  0x41   :  { %p11993_p3 = pnand %p11992_p2, %p11986_p13 }
  0x43   :  { %11996 = shalt.err (!%p11993_p3)
}
  0x44   :  { %62 = dma.hbm_to_vmem [thread:$0]  %s17742_s5, 9216, %s57_s29, [#allocation5], %s12028_s19, %s12028_s19, %s12029_s28  }
  0x45   :  { %s11997_s4 = scalar_lea.hbm %s17750_s13, 9216 }
  0x46   :  { %p11998_p4 = scmp.ne.s32.totalorder %s17750_s13, %s11997_s4  ;;  %p12001_p5 = scmp.lt.u32.totalorder %s11997_s4, %s17750_s13 }
  0x48   :  { %p12003_p6 = pnand %p12001_p5, %p11998_p4 }
  0x4a   :  { %12006 = shalt.err (!%p12003_p6)
}
  0x4b   :  { %s12007_s23 = scalar_lea.vmem %s12158_s16, 9216  ;;  %p12012_p8 = scmp.lt.s32.totalorder %s12158_s16, %s12158_s16 }
  0x4c   :  { %p12008_p7 = scmp.ne.s32.totalorder %s12158_s16, %s12007_s23  ;;  %p12013_p9 = scmp.lt.s32.totalorder %s12007_s23, %s12007_s23 }
  0x4e   :  { %p12014_p10 = por %p12013_p9, %p12012_p8 }
  0x50   :  { %p12015_p11 = pnand %p12014_p10, %p12008_p7 }
  0x52   :  { %12018 = shalt.err (!%p12015_p11)
}
  0x53   :  { %98 = dma.hbm_to_vmem [thread:$0]  %s17750_s13, 9216, %s12158_s16, [#allocation8], %s12028_s19, %s12028_s19, %s12029_s28  }
  0x54   :  { %12019 = dma.done.wait [#allocation3], 4096  }
  0x55   :  { %12020 = vsyncadd [#allocation3], 4294963200 }
  0x56   :  { %12021 = dma.done.wait [#allocation5], 9232  }
  0x57   :  { %12022 = vsyncadd [#allocation5], 4294958064 }
  0x58   :  { %12023 = dma.done.wait [#allocation8], 18432  }
  0x59   :  { %12024 = vsyncadd [#allocation8], 4294948864  ;;  %v17753_v0 = vmov 0   ;;  %v119_v1 = vld [vmem:[#allocation2] sm:$0xff]  ;;  %v120_v8 = vld [vmem:[#allocation2 + $0x8] sm:$0xff]  ;;  %vm395_vm0 = vcmask 261120  }
  0x5a   :  { %431 = vmatprep.mubr.bf16.mxu1 %v17753_v0  ;;  %595 = vmatprep.mubr.bf16.mxu0 %v17753_v0  ;;  %v127_v2 = vld [vmem:[#allocation2 + $0x40] sm:$0xff]  ;;  %v128_v9 = vld [vmem:[#allocation2 + $0x48] sm:$0xff]  ;;  %v125_v24 = vld [vmem:[#allocation2 + $0x30] sm:$0xff]  ;;  %vm17857_vm1 = vcmask 1040384   ;;  %vm17851_vm2 = vcmask 1046528   ;;  %vm17854_vm3 = vcmask 1045504  }
  0x5b   :  { %v135_v3 = vld [vmem:[#allocation2 + $0x80] sm:$0xff]  ;;  %v8953_v4 = vcombine.high %v119_v1, %v127_v2  ;;  %v8952_v5 = vcombine.low %v119_v1, %v127_v2  ;;  %v8955_v12 = vcombine.high %v120_v8, %v128_v9  ;;  %v136_v14 = vld [vmem:[#allocation2 + $0x88] sm:$0xff]  ;;  %v8954_v22 = vcombine.low %v120_v8, %v128_v9  ;;  %v133_v25 = vld [vmem:[#allocation2 + $0x70] sm:$0xff] }
  0x5c   :  { %v143_v6 = vld [vmem:[#allocation2 + $0xc0] sm:$0xff]  ;;  %v144_v15 = vld [vmem:[#allocation2 + $0xc8] sm:$0xff]  ;;  %v121_v27 = vld [vmem:[#allocation2 + $0x10] sm:$0xff]  ;;  %v8965_v31 = vcombine.high %v125_v24, %v133_v25  ;;  %v8964_v37 = vcombine.low %v125_v24, %v133_v25  ;;  %vm12037_vm6 = vmmov 1  }
  0x5d   :  { %v8969_v7 = vcombine.high %v135_v3, %v143_v6  ;;  %399 = vmatprep.subr.bf16.mxu1 %v8953_v4  ;;  %v8968_v10 = vcombine.low %v135_v3, %v143_v6  ;;  %v117_v11 = vld [vmem:[%s17737_s0] sm:$0x3]  ;;  %v8971_v26 = vcombine.high %v136_v14, %v144_v15  ;;  %v129_v28 = vld [vmem:[#allocation2 + $0x50] sm:$0xff]  ;;  %v8970_v33 = vcombine.low %v136_v14, %v144_v15  ;;  %v122_v40 = vld [vmem:[#allocation2 + $0x18] sm:$0xff] }
  0x5e   :  { %400 = vmatpush1.bf16.msra.mxu1 %v8952_v5  ;;  %v123_v13 = vld [vmem:[#allocation2 + $0x20] sm:$0xff]  ;;  %v12200_v17 = vpack.c.bf16 %v117_v11, %v117_v11  ;;  %v141_v30 = vld [vmem:[#allocation2 + $0xb0] sm:$0xff]  ;;  %v8957_v36 = vcombine.high %v121_v27, %v129_v28  ;;  %v8956_v39 = vcombine.low %v121_v27, %v129_v28  ;;  %v130_v41 = vld [vmem:[#allocation2 + $0x58] sm:$0xff] }
  0x5f   :  { %401 = vmatprep.subr.bf16.mxu1 %v8969_v7  ;;  %v131_v16 = vld [vmem:[#allocation2 + $0x60] sm:$0xff]  ;;  %v149_v32 = vld [vmem:[#allocation2 + $0xf0] sm:$0xff]  ;;  %v138_v45 = vld [vmem:[#allocation2 + $0x98] sm:$0xff]  ;;  %v8959_v47 = vcombine.high %v122_v40, %v130_v41  ;;  %v8958_v48 = vcombine.low %v122_v40, %v130_v41 }
  0x60   :  { %v8961_v18 = vcombine.high %v123_v13, %v131_v16  ;;  %v8960_v19 = vcombine.low %v123_v13, %v131_v16  ;;  %v139_v20 = vld [vmem:[#allocation2 + $0xa0] sm:$0xff]  ;;  %v137_v34 = vld [vmem:[#allocation2 + $0x90] sm:$0xff]  ;;  %v8981_v38 = vcombine.high %v141_v30, %v149_v32  ;;  %v8980_v43 = vcombine.low %v141_v30, %v149_v32  ;;  %v146_v46 = vld [vmem:[#allocation2 + $0xd8] sm:$0xff] }
  0x61   :  { %v147_v21 = vld [vmem:[#allocation2 + $0xe0] sm:$0xff]  ;;  %v145_v35 = vld [vmem:[#allocation2 + $0xd0] sm:$0xff]  ;;  %v124_v49 = vld [vmem:[#allocation2 + $0x28] sm:$0xff]  ;;  %v8975_v51 = vcombine.high %v138_v45, %v146_v46  ;;  %v8974_v52 = vcombine.low %v138_v45, %v146_v46  ;;  %v155_v46 = vlaneseq }
  0x62   :  { %402 = vmatpush1.bf16.msra.mxu1 %v8968_v10  ;;  %v8977_v23 = vcombine.high %v139_v20, %v147_v21  ;;  %563 = vmatprep.subr.bf16.mxu0 %v8961_v18  ;;  %v8976_v29 = vcombine.low %v139_v20, %v147_v21  ;;  %v8973_v42 = vcombine.high %v137_v34, %v145_v35  ;;  %v132_v50 = vld [vmem:[#allocation2 + $0x68] sm:$0xff]  ;;  %v126_v57 = vld [vmem:[#allocation2 + $0x38] sm:$0xff]  ;;  %vm12354_vm4 = vmneg %vm17857_vm1 }
  0x63   :  { %440 = vmatprep.subr.bf16.mxu1 %v8955_v12  ;;  %564 = vmatpush1.bf16.msra.mxu0 %v8960_v19  ;;  %v8972_v44 = vcombine.low %v137_v34, %v145_v35  ;;  %v140_v53 = vld [vmem:[#allocation2 + $0xa8] sm:$0xff]  ;;  %v8963_v55 = vcombine.high %v124_v49, %v132_v50  ;;  %v8962_v56 = vcombine.low %v124_v49, %v132_v50  ;;  %v134_v58 = vld [vmem:[#allocation2 + $0x78] sm:$0xff]  ;;  %vm12370_vm5 = vmpackc.low %vm12354_vm4, %vm12354_vm4 }
  0x64   :  { %565 = vmatprep.subr.bf16.mxu0 %v8977_v23  ;;  %v148_v54 = vld [vmem:[#allocation2 + $0xe8] sm:$0xff]  ;;  %v142_v61 = vld [vmem:[#allocation2 + $0xb8] sm:$0xff]  ;;  %v8967_v63 = vcombine.high %v126_v57, %v134_v58  ;;  %v8966_v1 = vcombine.low %v126_v57, %v134_v58  ;;  %vm12853_vm7 = vmpackc.low %vm12037_vm6, %vm12354_vm4 }
  0x65   :  { %8984 = vmatmul.mubr.msk.bf16.vlgmr.msra.gmra.mrb[0].mxu1 %vm395_vm0, %v12200_v17  ;;  %v8979_v59 = vcombine.high %v140_v53, %v148_v54  ;;  %v8978_v60 = vcombine.low %v140_v53, %v148_v54  ;;  %v150_v62 = vld [vmem:[#allocation2 + $0xf8] sm:$0xff]  ;;  %v11559_v4 = vld [vmem:[#allocation6 + $0xc0] sm:$0xff]   ;;  %v11563_v8 = vld [vmem:[#allocation6 + $0xc8] sm:$0xff]   ;;  %v12256_v54 = vshrl.u32 %v155_v46, 7 }
  0x66   :  { %441 = vmatpush1.bf16.msra.mxu1 %v8954_v22  ;;  %472 = vmatprep.mubr.bf16.mxu1 %v17753_v0  ;;  %v8983_v2 = vcombine.high %v142_v61, %v150_v62  ;;  %v8982_v3 = vcombine.low %v142_v61, %v150_v62  ;;  %v11560_v5 = vld [vmem:[#allocation6 + $0x40] sm:$0xff]   ;;  %v11564_v9 = vld [vmem:[#allocation6 + $0x48] sm:$0xff]   ;;  %v11567_v12 = vld [vmem:[#allocation6 + $0xd0] sm:$0xff]  }
  0x67   :  { %442 = vmatprep.subr.bf16.mxu1 %v8971_v26  ;;  %566 = vmatpush1.bf16.msra.mxu0 %v8976_v29  ;;  %v11561_v6 = vld [vmem:[#allocation6 + $0x80] sm:$0xff]   ;;  %v11565_v10 = vld [vmem:[#allocation6 + $0x88] sm:$0xff]   ;;  %v11568_v13 = vld [vmem:[#allocation6 + $0x50] sm:$0xff]   ;;  %v161_v57 = vsub.s32 1, %v12256_v54 }
  0x68   :  { %645 = vmatprep.subr.bf16.mxu0 %v8965_v31  ;;  %v11562_v7 = vld [vmem:[#allocation6] sm:$0xff]   ;;  %v11566_v11 = vld [vmem:[#allocation6 + $0x8] sm:$0xff]   ;;  %v11569_v14 = vld [vmem:[#allocation6 + $0x90] sm:$0xff]  }
  0x69   :  { %v11570_v15 = vld [vmem:[#allocation6 + $0x10] sm:$0xff]   ;;  %v11571_v16 = vld [vmem:[#allocation6 + $0xd8] sm:$0xff]   ;;  %v11575_v20 = vld [vmem:[#allocation6 + $0xe0] sm:$0xff]  }
  0x6a   :  { %443 = vmatpush1.bf16.msra.mxu1 %v8970_v33  ;;  %8988 = vmatmul.mubr.msk.bf16.vlgmr.msra.gmra.mrb[0].mxu0 %vm395_vm0, %v12200_v17  ;;  %v11573_v18 = vld [vmem:[#allocation6 + $0x98] sm:$0xff]   ;;  %v11576_v21 = vld [vmem:[#allocation6 + $0x60] sm:$0xff]   ;;  %v11579_v24 = vld [vmem:[#allocation6 + $0xe8] sm:$0xff]   ;;  %v12034_v33 = vmov 0.0  }
  0x6b   :  { %481 = vmatprep.subr.bf16.mxu1 %v8957_v36  ;;  %646 = vmatpush1.bf16.msra.mxu0 %v8964_v37  ;;  %v11574_v19 = vld [vmem:[#allocation6 + $0x18] sm:$0xff]   ;;  %v11577_v22 = vld [vmem:[#allocation6 + $0xa0] sm:$0xff]   ;;  %v11580_v25 = vld [vmem:[#allocation6 + $0x68] sm:$0xff]   ;;  %v12224_v34 = vrot.slane %v12034_v33, 7 }
  0x6c   :  { %677 = vmatprep.mubr.bf16.mxu0 %v17753_v0  ;;  %647 = vmatprep.subr.bf16.mxu0 %v8981_v38  ;;  %v11578_v23 = vld [vmem:[#allocation6 + $0x20] sm:$0xff]   ;;  %v11581_v26 = vld [vmem:[#allocation6 + $0xa8] sm:$0xff]   ;;  %v11583_v28 = vld [vmem:[#allocation6 + $0xf0] sm:$0xff]  }
  0x6d   :  { %8985 = vmatmul.mubr.msk.bf16.vlgmr.msra.gmra.mrb[4].mxu1 %vm395_vm0, %v12200_v17  ;;  %v11582_v27 = vld [vmem:[#allocation6 + $0x28] sm:$0xff]   ;;  %v11584_v29 = vld [vmem:[#allocation6 + $0x70] sm:$0xff]   ;;  %v11587_v32 = vld [vmem:[#allocation6 + $0xf8] sm:$0xff]   ;;  %v12228_v38 = vsel %vm17857_vm1, 0.0, %v12224_v34  ;;  %v3205_v45 = vrot.slane %v12224_v34, 2 }
  0x6e   :  { %482 = vmatpush1.bf16.msra.mxu1 %v8956_v39  ;;  %513 = vmatprep.mubr.bf16.mxu1 %v17753_v0  ;;  %v11585_v30 = vld [vmem:[#allocation6 + $0xb0] sm:$0xff]   ;;  %v11588_v35 = vld [vmem:[#allocation6 + $0x78] sm:$0xff]   ;;  %v12232_v39 = vsel %vm17857_vm1, %v12224_v34, 0.0  ;;  %v1222_v40 = vrot.slane %v12228_v38, 1  ;;  %v12273_v61 = vld [vmem:[%s17739_s2 + $0x8] sm:$0xff] }
  0x6f   :  { %483 = vmatprep.subr.bf16.mxu1 %v8973_v42  ;;  %648 = vmatpush1.bf16.msra.mxu0 %v8980_v43  ;;  %v11586_v31 = vld [vmem:[#allocation6 + $0x30] sm:$0xff]   ;;  %v11589_v36 = vld [vmem:[#allocation6 + $0xb8] sm:$0xff]   ;;  %v1223_v41 = vrot.slane %v12232_v39, 1  ;;  %v1259_v42 = vrot.slane %v12228_v38, 2  ;;  %v1260_v43 = vrot.slane %v12232_v39, 2 }
  0x70   :  { %10106 = vmatprep.subr.bf16.mxu0 %v11560_v5  ;;  %v11590_v37 = vld [vmem:[#allocation6 + $0x38] sm:$0xff]  }
  0x71   :  { %v3206_v50 = vsel %vm17854_vm3, %v1259_v42, %v3205_v45 }
  0x72   :  { %484 = vmatpush1.bf16.msra.mxu1 %v8972_v44  ;;  %8990 = vmatmul.mubr.msk.bf16.vlgmr.msra.gmra.mrb[4].mxu0 %vm395_vm0, %v12200_v17  ;;  %v3088_v44 = vrot.slane %v12224_v34, 1 }
  0x73   :  { %522 = vmatprep.subr.bf16.mxu1 %v8959_v47  ;;  %10107 = vmatpush3.bf16.msra.mxu0 %v11562_v7  ;;  %v11591_v47 = vld [vmem:[#allocation6 + $0x140] sm:$0xff]  }
  0x74   :  { %10108 = vmatprep.subr.bf16.mxu0 %v11564_v9  ;;  %v3090_v49 = vsel %vm17851_vm2, %v3088_v44, %v1223_v41  ;;  %v194_v9 = vrot.slane %v12273_v61, %v161_v57 }
  0x75   :  { %8986 = vmatmul.mubr.msk.bf16.vlgmr.msra.gmra.mrb[8].mxu1 %vm395_vm0, %v12200_v17 }
  0x76   :  { %523 = vmatpush1.bf16.msra.mxu1 %v8958_v48  ;;  %554 = vmatprep.mubr.bf16.mxu1 %v17753_v0  ;;  %v3089_v48 = vsel %vm17851_vm2, %v1222_v40, %v3088_v44 }
  0x77   :  { %524 = vmatprep.subr.bf16.mxu1 %v8975_v51  ;;  %10109 = vmatpush3.bf16.msra.mxu0 %v11566_v11  ;;  %v3207_v51 = vsel %vm17854_vm3, %v3205_v45, %v1260_v43 }
  0x78   :  { %10110 = vmatprep.subr.bf16.mxu0 %v11568_v13  ;;  %v12254_v53 = vpack.c.bf16 %v3207_v51, %v3206_v50 }
  0x7a   :  { %525 = vmatpush1.bf16.msra.mxu1 %v8974_v52  ;;  %v12252_v52 = vpack.c.bf16 %v3090_v49, %v3089_v48  ;;  %18033 = vst [vmem:[#allocation14_spill] sm:$0xff] %v12254_v53 }
  0x7b   :  { %604 = vmatprep.subr.bf16.mxu1 %v8963_v55  ;;  %10111 = vmatpush3.bf16.msra.mxu0 %v11570_v15  ;;  %v12259_v55 = vsub.s32 0, %v12256_v54 }
  0x7c   :  { %18032 = vst [vmem:[#allocation13_spill] sm:$0xff] %v12252_v52 }
  0x7d   :  { %8987 = vmatmul.mubr.msk.bf16.vlgmr.msra.gmra.mrb[12].mxu1 %vm395_vm0, %v12200_v17  ;;  %18034 = vst [vmem:[#allocation15_spill] sm:$0xff] %v12259_v55 }
  0x7e   :  { %605 = vmatpush1.bf16.msra.mxu1 %v8962_v56  ;;  %636 = vmatprep.mubr.bf16.mxu1 %v17753_v0  ;;  %v12264_v56 = vld [vmem:[%s17739_s2] sm:$0xff] }
  0x7f   :  { %606 = vmatprep.subr.bf16.mxu1 %v8979_v59  ;;  %v158_v58 = vrot.slane %v12264_v56, %v12259_v55  ;;  %v162_v59 = vrot.slane %v12264_v56, %v161_v57 }
  0x82   :  { %607 = vmatpush1.bf16.msra.mxu1 %v8978_v60 }
  0x83   :  { %686 = vmatprep.subr.bf16.mxu1 %v8967_v63 }
  0x85   :  { %8989 = vmatmul.mubr.msk.bf16.vlgmr.msra.gmra.mrb[16].mxu1 %vm395_vm0, %v12200_v17 }
  0x86   :  { %687 = vmatpush1.bf16.msra.mxu1 %v8966_v1  ;;  %718 = vmatprep.mubr.bf16.mxu1 %v17753_v0  ;;  %v165_v1 = vsub.s32 2, %v12256_v54 }
  0x87   :  { %688 = vmatprep.subr.bf16.mxu1 %v8983_v2  ;;  %v12035_v2 = vmov 1966171168  }
  0x88   :  { %v166_v11 = vrot.slane %v12264_v56, %v165_v1 }
  0x8a   :  { %689 = vmatpush1.bf16.msra.mxu1 %v8982_v3  ;;  %v748_v3 = vunpack.c.l.s4 %v12035_v2 }
  0x8b   :  { %10170 = vmatprep.subr.bf16.mxu1 %v11559_v4 }
  0x8d   :  { %8991 = vmatmul.mubr.msk.bf16.vlgmr.msra.gmra.mrb[20].mxu1 %vm395_vm0, %v12200_v17  ;;  %v11572_v17 = vld [vmem:[#allocation6 + $0x58] sm:$0xff]  }
  0x8e   :  { %10171 = vmatpush3.bf16.msra.mxu1 %v11561_v6  ;;  %10112 = vmatprep.subr.bf16.mxu0 %v11572_v17  ;;  %v169_v6 = vsub.s32 3, %v12256_v54 }
  0x8f   :  { %10172 = vmatprep.subr.bf16.mxu1 %v11563_v8  ;;  %10113 = vmatpush3.bf16.msra.mxu0 %v11574_v19  ;;  %v190_v8 = vrot.slane %v12273_v61, %v12259_v55 }
  0x90   :  { %10114 = vmatprep.subr.bf16.mxu0 %v11576_v21  ;;  %v170_v13 = vrot.slane %v12264_v56, %v169_v6 }
  0x92   :  { %10173 = vmatpush3.bf16.msra.mxu1 %v11565_v10 }
  0x93   :  { %10174 = vmatprep.subr.bf16.mxu1 %v11567_v12  ;;  %10115 = vmatpush3.bf16.msra.mxu0 %v11578_v23  ;;  %v749_v12 = vunpack.c.0.s8 %v748_v3  ;;  %v185_v3 = vsub.s32 7, %v12256_v54 }
  0x94   :  { %10116 = vmatprep.subr.bf16.mxu0 %v11580_v25 }
  0x96   :  { %10175 = vmatpush3.bf16.msra.mxu1 %v11569_v14 }
  0x97   :  { %10176 = vmatprep.subr.bf16.mxu1 %v11571_v16  ;;  %10117 = vmatpush3.bf16.msra.mxu0 %v11582_v27  ;;  %v177_v27 = vsub.s32 5, %v12256_v54 }
  0x98   :  { %10118 = vmatprep.subr.bf16.mxu0 %v11584_v29 }
  0x9a   :  { %10177 = vmatpush3.bf16.msra.mxu1 %v11573_v18 }
  0x9b   :  { %10178 = vmatprep.subr.bf16.mxu1 %v11575_v20  ;;  %10119 = vmatpush3.bf16.msra.mxu0 %v11586_v31 }
  0x9c   :  { %10120 = vmatprep.subr.bf16.mxu0 %v11588_v35 }
  0x9e   :  { %10179 = vmatpush3.bf16.msra.mxu1 %v11577_v22  ;;  %v173_v22 = vsub.s32 4, %v12256_v54 }
  0x9f   :  { %10180 = vmatprep.subr.bf16.mxu1 %v11579_v24  ;;  %10121 = vmatpush3.bf16.msra.mxu0 %v11590_v37  ;;  %v12292_v24 = vsub.s32 %v749_v12, %v12256_v54  ;;  %v178_v37 = vrot.slane %v12264_v56, %v177_v27 }
  0xa0   :  { %10234 = vmatprep.subr.bf16.mxu0 %v11591_v47  ;;  %v174_v33 = vrot.slane %v12264_v56, %v173_v22  ;;  %v11599_v47 = vld [vmem:[#allocation6 + $0x1c0] sm:$0xff]  }
  0xa2   :  { %10181 = vmatpush3.bf16.msra.mxu1 %v11581_v26 }
  0xa3   :  { %10182 = vmatprep.subr.bf16.mxu1 %v11583_v28 }
  0xa6   :  { %10183 = vmatpush3.bf16.msra.mxu1 %v11585_v30  ;;  %v206_v30 = vrot.slane %v12273_v61, %v173_v22 }
  0xa7   :  { %10184 = vmatprep.subr.bf16.mxu1 %v11587_v32  ;;  %v210_v32 = vrot.slane %v12273_v61, %v177_v27 }
  0xaa   :  { %10185 = vmatpush3.bf16.msra.mxu1 %v11589_v36 }
  0xab   :  { %10298 = vmatprep.subr.bf16.mxu1 %v11599_v47 }
 0x138   :  { %v433_v60 = vpop.f32.mrb[0].mxu1 }
 0x139   :  { %v434_v62 = vadd.f32 %v433_v60, %v158_v58  ;;  %v435_v63 = vpop.f32.mrb[1].mxu1  ;;  %v181_v60 = vsub.s32 6, %v12256_v54 }
 0x13a   :  { %v436_v4 = vadd.f32 %v435_v63, %v162_v59  ;;  %v437_v5 = vpop.f32.mrb[2].mxu1 }
 0x13b   :  { %v438_v7 = vpop.f32.mrb[3].mxu1 }
 0x13c   :  { %v743_v10 = vcombine.low %v434_v62, %v436_v4 }
 0x13d   :  { %v597_v14 = vpop.f32.mrb[0].mxu0 }
 0x13e   :  { %v12286_v15 = vadd.f32 %v597_v14, %v190_v8  ;;  %v599_v16 = vpop.f32.mrb[1].mxu0  ;;  %v753_v35 = vrot.slane %v743_v10, %v12292_v24  ;;  %v182_v8 = vrot.slane %v12264_v56, %v181_v60 }
 0x13f   :  { %v12288_v18 = vadd.f32 %v599_v16, %v194_v9  ;;  %v601_v19 = vpop.f32.mrb[2].mxu0  ;;  %v186_v9 = vrot.slane %v12264_v56, %v185_v3 }
 0x140   :  { %v474_v17 = vpop.f32.mrb[4].mxu1  ;;  %v602_v23 = vpop.f32.mrb[3].mxu0 }
 0x141   :  { %v475_v20 = vadd.f32 %v474_v17, %v166_v11  ;;  %v476_v21 = vpop.f32.mrb[5].mxu1  ;;  %v809_v28 = vcombine.low %v12286_v15, %v12288_v18  ;;  %v198_v17 = vrot.slane %v12273_v61, %v165_v1 }
 0x142   :  { %v477_v25 = vadd.f32 %v476_v21, %v170_v13  ;;  %v478_v26 = vpop.f32.mrb[6].mxu1 }
 0x143   :  { %v479_v29 = vpop.f32.mrb[7].mxu1 }
 0x144   :  { %v744_v31 = vcombine.low %v475_v20, %v477_v25  ;;  %v202_v20 = vrot.slane %v12273_v61, %v169_v6 }
 0x145   :  { %v679_v44 = vpop.f32.mrb[4].mxu0 }
 0x146   :  { %v760_v36 = vrot.slane %v744_v31, %v12292_v24  ;;  %v680_v45 = vadd.f32 %v679_v44, %v206_v30  ;;  %v681_v46 = vpop.f32.mrb[5].mxu0 }
 0x147   :  { %v682_v51 = vadd.f32 %v681_v46, %v210_v32  ;;  %v683_v57 = vpop.f32.mrb[6].mxu0 }
 0x148   :  { %v775_v48 = vcombine.low %v753_v35, %v760_v36  ;;  %v776_v49 = vcombine.high %v753_v35, %v760_v36  ;;  %v515_v50 = vpop.f32.mrb[8].mxu1  ;;  %v684_v62 = vpop.f32.mrb[7].mxu0  ;;  %v819_v36 = vrot.slane %v809_v28, %v12292_v24 }
 0x149   :  { %v516_v58 = vadd.f32 %v515_v50, %v174_v33  ;;  %v517_v59 = vpop.f32.mrb[9].mxu1  ;;  %v811_v4 = vcombine.low %v680_v45, %v682_v51  ;;  %v218_v45 = vrot.slane %v12273_v61, %v185_v3 }
 0x14a   :  { %v518_v63 = vadd.f32 %v517_v59, %v178_v37  ;;  %v519_v2 = vpop.f32.mrb[10].mxu1  ;;  %v785_v23 = vrot.slane %v775_v48, %v12292_v24  ;;  %v792_v27 = vrot.slane %v776_v49, %v12292_v24  ;;  %v214_v37 = vrot.slane %v12273_v61, %v181_v60 }
 0x14b   :  { %v520_v5 = vpop.f32.mrb[11].mxu1  ;;  %v833_v62 = vrot.slane %v811_v4, %v12292_v24 }
 0x14c   :  { %v745_v7 = vcombine.low %v516_v58, %v518_v63 }
 0x14e   :  { %v767_v18 = vrot.slane %v745_v7, %v12292_v24 }
 0x150   :  { %v556_v10 = vpop.f32.mrb[12].mxu1 }
 0x151   :  { %v557_v11 = vadd.f32 %v556_v10, %v182_v8  ;;  %v558_v12 = vpop.f32.mrb[13].mxu1 }
 0x152   :  { %v559_v13 = vadd.f32 %v558_v12, %v186_v9  ;;  %v560_v14 = vpop.f32.mrb[14].mxu1 }
 0x153   :  { %v561_v15 = vpop.f32.mrb[15].mxu1 }
 0x154   :  { %v746_v16 = vcombine.low %v557_v11, %v559_v13 }
 0x156   :  { %v774_v19 = vrot.slane %v746_v16, %v12292_v24 }
 0x158   :  { %v777_v56 = vcombine.low %v767_v18, %v774_v19  ;;  %v778_v21 = vcombine.high %v767_v18, %v774_v19  ;;  %v638_v22 = vpop.f32.mrb[16].mxu1 }
 0x159   :  { %v639_v25 = vadd.f32 %v638_v22, %v198_v17  ;;  %v640_v26 = vpop.f32.mrb[17].mxu1 }
 0x15a   :  { %v799_v29 = vrot.slane %v777_v56, %v12292_v24  ;;  %v806_v1 = vrot.slane %v778_v21, %v12292_v24  ;;  %v641_v30 = vadd.f32 %v640_v26, %v202_v20  ;;  %v642_v31 = vpop.f32.mrb[18].mxu1 }
 0x15b   :  { %v643_v32 = vpop.f32.mrb[19].mxu1 }
 0x15c   :  { %v12319_v33 = vcombine.low %v785_v23, %v799_v29  ;;  %v12321_v35 = vcombine.low %v792_v27, %v806_v1  ;;  %v810_v6 = vcombine.low %v639_v25, %v641_v30 }
 0x15e   :  { %v826_v44 = vrot.slane %v810_v6, %v12292_v24  ;;  %v890_v9 = vmul.f32 %v12319_v33, %v12319_v33  ;;  %v892_v11 = vmul.f32 %v12321_v35, %v12321_v35 }
 0x160   :  { %v841_v46 = vcombine.low %v819_v36, %v826_v44  ;;  %v842_v47 = vcombine.high %v819_v36, %v826_v44  ;;  %v720_v48 = vpop.f32.mrb[20].mxu1 }
 0x161   :  { %v721_v49 = vadd.f32 %v720_v48, %v214_v37  ;;  %v722_v50 = vpop.f32.mrb[21].mxu1 }
 0x162   :  { %v723_v51 = vadd.f32 %v722_v50, %v218_v45  ;;  %v724_v57 = vpop.f32.mrb[22].mxu1  ;;  %v851_v60 = vrot.slane %v841_v46, %v12292_v24  ;;  %v858_v5 = vrot.slane %v842_v47, %v12292_v24  ;;  %v879_v46 = vld [vmem:[%s17740_s3] sm:$0x1]  ;;  %v12036_v47 = vmov 1935823168  }
 0x163   :  { %v725_v58 = vpop.f32.mrb[23].mxu1  ;;  %v957_v48 = vunpack.c.l.s4 %v12036_v47  ;;  %v11601_v47 = vld [vmem:[#allocation6 + $0x180] sm:$0xff]  }
 0x164   :  { %v812_v59 = vcombine.low %v721_v49, %v723_v51  ;;  %v8992_v58 = vld [vmem:[#allocation4] ss:$0 sm:$0xff] }
 0x165   :  { %v958_v51 = vunpack.c.0.s8 %v957_v48 }
 0x166   :  { %v840_v63 = vrot.slane %v812_v59, %v12292_v24 }
 0x168   :  { %v843_v28 = vcombine.low %v833_v62, %v840_v63  ;;  %v844_v2 = vcombine.high %v833_v62, %v840_v63 }
 0x16a   :  { %v865_v61 = vrot.slane %v843_v28, %v12292_v24  ;;  %v872_v3 = vrot.slane %v844_v2, %v12292_v24 }
 0x16c   :  { %v873_v7 = vcombine.low %v851_v60, %v865_v61  ;;  %v874_v8 = vcombine.low %v858_v5, %v872_v3 }
 0x16e   :  { %v881_v10 = vadd.f32 %v873_v7, %v12319_v33  ;;  %v891_v4 = vmul.f32 %v873_v7, %v873_v7  ;;  %v893_v15 = vmul.f32 %v874_v8, %v874_v8 }
 0x170   :  { %v882_v12 = vadd.f32 %v881_v10, %v12321_v35  ;;  %v894_v13 = vadd.f32 %v891_v4, %v890_v9 }
 0x172   :  { %v883_v14 = vadd.f32 %v882_v12, %v874_v8  ;;  %v895_v16 = vadd.f32 %v894_v13, %v892_v11 }
 0x174   :  { %v884_v17 = vrot.slane %v883_v14, 4  ;;  %v896_v18 = vadd.f32 %v895_v16, %v893_v15  ;;  %v12379_v16 = vsel %vm17851_vm2, %v1222_v40, %v1223_v41 }
 0x176   :  { %v885_v24 = vadd.f32 %v884_v17, %v883_v14  ;;  %v897_v19 = vrot.slane %v896_v18, 4  ;;  %v12386_v17 = vsel %vm17854_vm3, %v1259_v42, %v1260_v43 }
 0x178   :  { %v886_v20 = vrot.slane %v885_v24, 2  ;;  %v898_v56 = vadd.f32 %v897_v19, %v896_v18 }
 0x17a   :  { %v887_v21 = vadd.f32 %v886_v20, %v885_v24  ;;  %v899_v22 = vrot.slane %v898_v56, 2 }
 0x17c   :  { %v888_v23 = vrot.slane %v887_v21, 1  ;;  %v900_v25 = vadd.f32 %v899_v22, %v898_v56 }
 0x17e   :  { %v889_v26 = vadd.f32 %v888_v23, %v887_v21  ;;  %v901_v27 = vrot.slane %v900_v25, 1 }
 0x180   :  { %v902_v29 = vadd.f32 %v901_v27, %v900_v25  ;;  %v903_v1 = vmul.f32 0.03125, %v889_v26 }
 0x182   :  { %v904_v30 = vmul.f32 0.03125, %v902_v29  ;;  %v905_v31 = vmul.f32 %v903_v1, %v903_v1  ;;  %v910_v32 = vsub.f32 %v873_v7, %v903_v1  ;;  %v912_v6 = vsub.f32 %v874_v8, %v903_v1 }
 0x183   :  { %v909_v36 = vsub.f32 %v12319_v33, %v903_v1  ;;  %v911_v37 = vsub.f32 %v12321_v35, %v903_v1  ;;  %v12346_v35 = vsub.s32 %v958_v51, %v12256_v54 }
 0x184   :  { %v906_v44 = vsub.f32 %v904_v30, %v905_v31 }
 0x186   :  { %v907_v45 = vadd.f32 1e-05, %v906_v44 }
 0x188   :  { %11775 = vrsqrt.f32 %v907_v45  ;;  %v11593_v45 = vld [vmem:[#allocation6 + $0x148] sm:$0xff]  }
 0x192   :  { %v11776_v49 = vpop.eup %11775 }
 0x193   :  { %v913_v50 = vmul.f32 %v11776_v49, %v879_v46 }
 0x195   :  { %v917_v57 = vrot.slane %v913_v50, %v12259_v55 }
 0x197   :  { %v919_v59 = vmul.f32 %v917_v57, %v910_v32  ;;  %v921_v62 = vmul.f32 %v917_v57, %v912_v6  ;;  %v918_v33 = vmul.f32 %v917_v57, %v909_v36  ;;  %v920_v63 = vmul.f32 %v917_v57, %v911_v37  ;;  %v11592_v32 = vld [vmem:[#allocation6 + $0x100] sm:$0xff]   ;;  %v11603_v57 = vld [vmem:[#allocation6 + $0x1c8] sm:$0xff]  }
 0x199   :  { %v929_v28 = vadd.f32 %v8992_v58, %v919_v59  ;;  %v928_v2 = vadd.f32 %v8992_v58, %v918_v33  ;;  %v12348_v60 = vadd.f32 %v8992_v58, %v920_v63  ;;  %v12350_v8 = vadd.f32 %v8992_v58, %v921_v62  ;;  %v11594_v63 = vld [vmem:[#allocation6 + $0x108] sm:$0xff]  }
 0x19b   :  { %v940_v5 = vcombine.low %v928_v2, %v928_v2  ;;  %v8993_v61 = vcombine.high %v928_v2, %v928_v2  ;;  %v942_v3 = vcombine.low %v929_v28, %v929_v28  ;;  %v8994_v7 = vcombine.high %v929_v28, %v929_v28 }
 0x19c   :  { %v8995_v14 = vcombine.high %v12348_v60, %v12348_v60  ;;  %v944_v18 = vcombine.low %v12348_v60, %v12348_v60  ;;  %v946_v24 = vcombine.low %v12350_v8, %v12350_v8  ;;  %v8996_v2 = vcombine.high %v12350_v8, %v12350_v8 }
 0x19d   :  { %v962_v9 = vrot.slane %v940_v5, %v12346_v35  ;;  %v969_v54 = vrot.slane %v8993_v61, %v12346_v35  ;;  %v976_v4 = vrot.slane %v942_v3, %v12346_v35  ;;  %v983_v13 = vrot.slane %v8994_v7, %v12346_v35  ;;  %v11595_v61 = vld [vmem:[#allocation6 + $0x150] sm:$0xff]  }
 0x19e   :  { %v997_v23 = vrot.slane %v8995_v14, %v12346_v35  ;;  %v1004_v28 = vrot.slane %v946_v24, %v12346_v35  ;;  %v990_v3 = vrot.slane %v944_v18, %v12346_v35  ;;  %v11605_v14 = vld [vmem:[#allocation6 + $0x1d0] sm:$0xff]  }
 0x19f   :  { %v12360_v11 = vrot.slane %v962_v9, 7  ;;  %v12362_v12 = vrot.slane %v969_v54, 7  ;;  %v12398_v41 = vrot.slane %v976_v4, 7  ;;  %v12406_v22 = vrot.slane %v983_v13, 7  ;;  %v11604_v9 = vld [vmem:[#allocation6 + $0x188] sm:$0xff]   ;;  %v11596_v24 = vld [vmem:[#allocation6 + $0x110] sm:$0xff]  }
 0x1a0   :  { %v12456_v7 = vrot.slane %v997_v23, 7 }
 0x1a1   :  { %v9113_v19 = vpack.c.bf16 %v12360_v11, %v12360_v11  ;;  %v1186_v40 = vsel %vm17857_vm1, 0.0, %v12360_v11  ;;  %v1195_v39 = vsel %vm17857_vm1, %v12360_v11, 0.0  ;;  %v1187_v56 = vsel %vm17857_vm1, 0.0, %v12362_v12 }
 0x1a2   :  { %v1225_v38 = vrot.slane %v1186_v40, 1  ;;  %v1226_v42 = vrot.slane %v1195_v39, 1  ;;  %v1262_v43 = vrot.slane %v1186_v40, 2  ;;  %v1263_v20 = vrot.slane %v1195_v39, 2 }
 0x1a3   :  { %9114 = vmatprep.mubr.msk.bf16.mxu1 %vm12370_vm5, %v9113_v19  ;;  %v1196_v21 = vsel %vm17857_vm1, %v12362_v12, 0.0  ;;  %v1228_v27 = vrot.slane %v1187_v56, 1  ;;  %v9073_v31 = vpack.c.bf16 %v12360_v11, %v12224_v34  ;;  %v1265_v6 = vrot.slane %v1187_v56, 2  ;;  %v11607_v56 = vld [vmem:[#allocation6 + $0x190] sm:$0xff]  }
 0x1a4   :  { %v12410_v25 = vsel %vm17851_vm2, %v1225_v38, %v1226_v42  ;;  %v12413_v26 = vsel %vm17854_vm3, %v1262_v43, %v1263_v20  ;;  %v1229_v29 = vrot.slane %v1196_v21, 1  ;;  %v9118_v36 = vpack.c.bf16 %v12362_v12, %v12362_v12  ;;  %v11597_v20 = vld [vmem:[#allocation6 + $0x158] sm:$0xff]  }
 0x1a5   :  { %v1296_v1 = vpack.c.bf16 %v12410_v25, %v12379_v16  ;;  %v1297_v30 = vpack.c.bf16 %v12413_v26, %v12386_v17  ;;  %v1266_v44 = vrot.slane %v1196_v21, 2  ;;  %v1188_v46 = vsel %vm17857_vm1, 0.0, %v12398_v41 }
 0x1a6   :  { %v12424_v37 = vsel %vm17851_vm2, %v1228_v27, %v1229_v29  ;;  %v1197_v49 = vsel %vm17857_vm1, %v12398_v41, 0.0  ;;  %v1231_v50 = vrot.slane %v1188_v46, 1  ;;  %v1268_v51 = vrot.slane %v1188_v46, 2  ;;  %v11600_v46 = vld [vmem:[#allocation6 + $0x160] sm:$0xff]  }
 0x1a7   :  { %1819 = vmatprep.mubr.bf16.mxu0 %v1296_v1  ;;  %1917 = vmatmul.mubr.bf16.vlgmr.msra.gmra.mrb[24].mxu1 %v1297_v30  ;;  %v12430_v48 = vpack.c.bf16 %v12424_v37, %v12410_v25  ;;  %v12439_v58 = vsel %vm17854_vm3, %v1265_v6, %v1266_v44  ;;  %v1232_v59 = vrot.slane %v1197_v49, 1  ;;  %v1269_v62 = vrot.slane %v1197_v49, 2  ;;  %v11598_v30 = vld [vmem:[#allocation6 + $0x118] sm:$0xff]  }
 0x1a8   :  { %9074 = vmatmul.mubr.msk.bf16.vlgmr.msra.gmra.mrb[8].mxu0 %vm12370_vm5, %v9073_v31  ;;  %9119 = vmatprep.mubr.msk.bf16.mxu1 %vm12370_vm5, %v9118_v36  ;;  %v12443_v33 = vpack.c.bf16 %v12398_v41, %v12362_v12  ;;  %v12468_v4 = vsel %vm17857_vm1, 0.0, %v12406_v22  ;;  %v12472_v13 = vsel %vm17857_vm1, %v12406_v22, 0.0  ;;  %v12476_v18 = vpack.c.bf16 %v12439_v58, %v12413_v26  ;;  %v11610_v49 = vld [vmem:[#allocation6 + $0x198] sm:$0xff]  }
 0x1a9   :  { %1827 = vmatprep.mubr.bf16.mxu0 %v12430_v48  ;;  %10235 = vmatpush3.bf16.msra.mxu0 %v11592_v32  ;;  %v12450_v60 = vsel %vm17851_vm2, %v1231_v50, %v1232_v59  ;;  %v12453_v5 = vsel %vm17854_vm3, %v1268_v51, %v1269_v62  ;;  %v12478_v19 = vrot.slane %v1004_v28, 7  ;;  %v1011_v40 = vrot.slane %v8996_v2, %v12346_v35  ;;  %v11611_v62 = vld [vmem:[#allocation6 + $0x1e0] sm:$0xff]  }
 0x1aa   :  { %10236 = vmatprep.subr.bf16.mxu0 %v11593_v45  ;;  %10299 = vmatpush3.bf16.msra.mxu1 %v11601_v47  ;;  %v12460_v54 = vpack.c.bf16 %v12450_v60, %v12424_v37  ;;  %v12464_v8 = vpack.c.bf16 %v12453_v5, %v12439_v58  ;;  %v12483_v39 = vpack.c.bf16 %v12362_v12, %v12360_v11  ;;  %v1234_v42 = vrot.slane %v12468_v4, 1  ;;  %v11609_v12 = vld [vmem:[#allocation6 + $0x1d8] sm:$0xff]  }
 0x1ab   :  { %10300 = vmatprep.subr.bf16.mxu1 %v11603_v57  ;;  %v9123_v38 = vpack.c.bf16 %v12398_v41, %v12398_v41  ;;  %v1235_v43 = vrot.slane %v12472_v13, 1  ;;  %v12490_v21 = vrot.slane %v990_v3, 7  ;;  %v1191_v23 = vsel %vm17857_vm1, 0.0, %v12456_v7 }
 0x1ac   :  { %v1200_v11 = vsel %vm17857_vm1, %v12456_v7, 0.0  ;;  %v1240_v27 = vrot.slane %v1191_v23, 1  ;;  %v9128_v1 = vpack.c.bf16 %v12406_v22, %v12406_v22  ;;  %v1277_v31 = vrot.slane %v1191_v23, 2 }
 0x1ad   :  { %10237 = vmatpush3.bf16.msra.mxu0 %v11594_v63  ;;  %v1241_v29 = vrot.slane %v1200_v11, 1  ;;  %v1278_v32 = vrot.slane %v1200_v11, 2  ;;  %v12504_v6 = vrot.slane %v1011_v40, 7  ;;  %v12507_v36 = vsel %vm17851_vm2, %v1234_v42, %v1235_v43  ;;  %v11613_v42 = vld [vmem:[#allocation6 + $0x1a0] sm:$0xff]  }
 0x1ae   :  { %10238 = vmatprep.subr.bf16.mxu0 %v11595_v61  ;;  %10301 = vmatpush3.bf16.msra.mxu1 %v11604_v9  ;;  %v1271_v44 = vrot.slane %v12468_v4, 2  ;;  %v1272_v45 = vrot.slane %v12472_v13, 2  ;;  %v1192_v47 = vsel %vm17857_vm1, 0.0, %v12478_v19  ;;  %v12515_v50 = vsel %vm17857_vm1, 0.0, %v12490_v21  ;;  %v11602_v9 = vld [vmem:[#allocation6 + $0x120] sm:$0xff]  }
 0x1af   :  { %1925 = vmatmul.mubr.bf16.gmra.mrb[28].mxu1 %v12476_v18  ;;  %10302 = vmatprep.subr.bf16.mxu1 %v11605_v14  ;;  %v12518_v51 = vsel %vm17851_vm2, %v1240_v27, %v1241_v29  ;;  %v1201_v57 = vsel %vm17857_vm1, %v12478_v19, 0.0  ;;  %v1243_v59 = vrot.slane %v1192_v47, 1  ;;  %v12523_v63 = vsel %vm17854_vm3, %v1277_v31, %v1278_v32  ;;  %v11608_v32 = vld [vmem:[#allocation6 + $0x128] sm:$0xff]  }
 0x1b0   :  { %9079 = vmatmul.mubr.msk.bf16.gmra.mrb[12].mxu0 %vm12370_vm5, %v12483_v39  ;;  %9124 = vmatprep.mubr.msk.bf16.mxu1 %vm12370_vm5, %v9123_v38  ;;  %v1244_v28 = vrot.slane %v1201_v57, 1  ;;  %v1280_v2 = vrot.slane %v1192_v47, 2  ;;  %v1281_v61 = vrot.slane %v1201_v57, 2  ;;  %v12527_v3 = vsel %vm17857_vm1, %v12490_v21, 0.0  ;;  %v11612_v47 = vld [vmem:[#allocation6 + $0x170] sm:$0xff]  }
 0x1b1   :  { %1835 = vmatprep.mubr.bf16.mxu0 %v12460_v54  ;;  %10239 = vmatpush3.bf16.msra.mxu0 %v11596_v24  ;;  %v12531_v4 = vpack.c.bf16 %v12478_v19, %v12456_v7  ;;  %v1193_v13 = vsel %vm17857_vm1, 0.0, %v12504_v6  ;;  %v1202_v14 = vsel %vm17857_vm1, %v12504_v6, 0.0  ;;  %v11606_v24 = vld [vmem:[#allocation6 + $0x168] sm:$0xff]   ;;  %v1237_v27 = vrot.slane %v12515_v50, 1  ;;  %v11617_v57 = vld [vmem:[#allocation6 + $0x1f0] sm:$0xff]  }
 0x1b2   :  { %10240 = vmatprep.subr.bf16.mxu0 %v11597_v20  ;;  %10303 = vmatpush3.bf16.msra.mxu1 %v11607_v56  ;;  %v12538_v40 = vsel %vm17851_vm2, %v1243_v59, %v1244_v28  ;;  %v12541_v38 = vsel %vm17854_vm3, %v1280_v2, %v1281_v61  ;;  %v1246_v43 = vrot.slane %v1193_v13, 1  ;;  %v1247_v20 = vrot.slane %v1202_v14, 1 }
 0x1b3   :  { %10304 = vmatprep.subr.bf16.mxu1 %v11609_v12  ;;  %v12546_v56 = vpack.c.bf16 %v12507_v36, %v12450_v60  ;;  %v12550_v23 = vpack.c.bf16 %v12538_v40, %v12518_v51  ;;  %v12554_v11 = vpack.c.bf16 %v12541_v38, %v12523_v63  ;;  %v11615_v12 = vld [vmem:[#allocation6 + $0x1e8] sm:$0xff]   ;;  %v1238_v29 = vrot.slane %v12527_v3, 1 }
 0x1b4   :  { %v1284_v31 = vrot.slane %v1202_v14, 2  ;;  %v1320_v59 = vpack.c.bf16 %v12379_v16, %v12507_v36  ;;  %v12586_v61 = vpack.c.bf16 %v12406_v22, %v12398_v41  ;;  %v1275_v14 = vrot.slane %v12527_v3, 2 }
 0x1b5   :  { %10241 = vmatpush3.bf16.msra.mxu0 %v11598_v30  ;;  %v1283_v30 = vrot.slane %v1193_v13, 2  ;;  %v1274_v13 = vrot.slane %v12515_v50, 2  ;;  %v11620_v50 = vld [vmem:[#allocation6 + $0x138] sm:$0xff]  }
 0x1b6   :  { %10242 = vmatprep.subr.bf16.mxu0 %v11600_v46  ;;  %10305 = vmatpush3.bf16.msra.mxu1 %v11610_v49  ;;  %v12565_v46 = vsel %vm17854_vm3, %v1271_v44, %v1272_v45  ;;  %v12568_v49 = vsel %vm17851_vm2, %v1246_v43, %v1247_v20  ;;  %v11614_v45 = vld [vmem:[#allocation6 + $0x130] sm:$0xff]   ;;  %v11621_v20 = vld [vmem:[#allocation6 + $0x1f8] sm:$0xff]  }
 0x1b7   :  { %1933 = vmatmul.mubr.bf16.gmra.mrb[32].mxu1 %v12464_v8  ;;  %10306 = vmatprep.subr.bf16.mxu1 %v11611_v62  ;;  %v12573_v62 = vsel %vm17851_vm2, %v1237_v27, %v1238_v29  ;;  %v12576_v28 = vsel %vm17854_vm3, %v1283_v30, %v1284_v31  ;;  %v12580_v44 = vpack.c.bf16 %v12565_v46, %v12453_v5  ;;  %v11622_v27 = vld [vmem:[#allocation6 + $0x1b8] sm:$0xff]   ;;  %v11623_v29 = vld [vmem:[#allocation6 + $0x200] sm:$0xff]  }
 0x1b8   :  { %9084 = vmatmul.mubr.msk.bf16.gmra.mrb[16].mxu0 %vm12370_vm5, %v12443_v33  ;;  %9129 = vmatprep.mubr.msk.bf16.mxu1 %vm12370_vm5, %v9128_v1  ;;  %v11616_v1 = vld [vmem:[#allocation6 + $0x1a8] sm:$0xff]   ;;  %v1347_v2 = vpack.c.bf16 %v12379_v16, %v12568_v49  ;;  %v1323_v43 = vpack.c.bf16 %v12573_v62, %v12379_v16  ;;  %v1321_v41 = vpack.c.bf16 %v12386_v17, %v12565_v46 }
 0x1b9   :  { %1843 = vmatprep.mubr.bf16.mxu0 %v12546_v56  ;;  %10243 = vmatpush3.bf16.msra.mxu0 %v11602_v9  ;;  %v9133_v9 = vpack.c.bf16 %v12490_v21, %v12490_v21  ;;  %v12605_v3 = vsel %vm17854_vm3, %v1274_v13, %v1275_v14  ;;  %v9093_v31 = vpack.c.bf16 %v12490_v21, %v12224_v34 }
 0x1ba   :  { %10244 = vmatprep.subr.bf16.mxu0 %v11606_v24  ;;  %10307 = vmatpush3.bf16.msra.mxu1 %v11613_v42  ;;  %v11618_v24 = vld [vmem:[#allocation6 + $0x178] sm:$0xff]   ;;  %v11619_v42 = vld [vmem:[#allocation6 + $0x1b0] sm:$0xff]   ;;  %v1324_v30 = vpack.c.bf16 %v12605_v3, %v12386_v17  ;;  %v12659_v13 = vpack.c.bf16 %v12504_v6, %v12478_v19  ;;  %v1300_v14 = vpack.c.bf16 %v12413_v26, %v12413_v26 }
 0x1bb   :  { %10308 = vmatprep.subr.bf16.mxu1 %v11615_v12  ;;  %v1348_v12 = vpack.c.bf16 %v12386_v17, %v12576_v28  ;;  %v11625_v26 = vld [vmem:[#allocation6 + $0x210] sm:$0xff]  }
 0x1bd   :  { %10245 = vmatpush3.bf16.msra.mxu0 %v11608_v32  ;;  %v9138_v32 = vpack.c.bf16 %v12456_v7, %v12456_v7 }
 0x1be   :  { %10246 = vmatprep.subr.bf16.mxu0 %v11612_v47  ;;  %10309 = vmatpush3.bf16.msra.mxu1 %v11616_v1  ;;  %v12615_v47 = vpack.c.bf16 %v12518_v51, %v12573_v62  ;;  %v12625_v1 = vpack.c.bf16 %v12523_v63, %v12605_v3 }
 0x1bf   :  { %1941 = vmatmul.mubr.bf16.gmra.mrb[36].mxu1 %v12580_v44  ;;  %10310 = vmatprep.subr.bf16.mxu1 %v11617_v57  ;;  %v12629_v57 = vpack.c.bf16 %v12456_v7, %v12490_v21  ;;  %v12645_v7 = vpack.c.bf16 %v12568_v49, %v12538_v40  ;;  %v12655_v21 = vpack.c.bf16 %v12576_v28, %v12541_v38 }
 0x1c0   :  { %9089 = vmatmul.mubr.msk.bf16.gmra.mrb[20].mxu0 %vm12370_vm5, %v12586_v61  ;;  %9134 = vmatprep.mubr.msk.bf16.mxu1 %vm12370_vm5, %v9133_v9  ;;  %v9148_v9 = vpack.c.bf16 %v12504_v6, %v12504_v6 }
 0x1c1   :  { %1851 = vmatprep.mubr.bf16.mxu0 %v1323_v43  ;;  %10247 = vmatpush3.bf16.msra.mxu0 %v11614_v45  ;;  %v9143_v45 = vpack.c.bf16 %v12478_v19, %v12478_v19  ;;  %v1306_v19 = vpack.c.bf16 %v12439_v58, %v12439_v58  ;;  %v1312_v58 = vpack.c.bf16 %v12453_v5, %v12453_v5  ;;  %v11629_v5 = vld [vmem:[#allocation6 + $0x230] sm:$0xff]  }
 0x1c2   :  { %10248 = vmatprep.subr.bf16.mxu0 %v11618_v24  ;;  %10311 = vmatpush3.bf16.msra.mxu1 %v11619_v42  ;;  %v1299_v24 = vpack.c.bf16 %v12410_v25, %v12410_v25  ;;  %v11624_v42 = vld [vmem:[#allocation6 + $0x208] sm:$0xff]   ;;  %v11626_v25 = vld [vmem:[#allocation6 + $0x218] sm:$0xff]   ;;  %v1327_v43 = vpack.c.bf16 %v12605_v3, %v12605_v3 }
 0x1c3   :  { %10312 = vmatprep.subr.bf16.mxu1 %v11621_v20 }
 0x1c5   :  { %10249 = vmatpush3.bf16.msra.mxu0 %v11620_v50 }
 0x1c6   :  { %10313 = vmatpush3.bf16.msra.mxu1 %v11622_v27  ;;  %10458 = vmatprep.subr.bf16.mxu0 %v11623_v29 }
 0x1c7   :  { %1949 = vmatmul.mubr.bf16.gmra.mrb[40].mxu1 %v1324_v30  ;;  %3811 = vmatprep.subr.bf16.mxu1 %v17753_v0 }
 0x1c8   :  { %9094 = vmatmul.mubr.msk.bf16.gmra.mrb[24].mxu0 %vm12370_vm5, %v9093_v31  ;;  %9139 = vmatprep.mubr.msk.bf16.mxu1 %vm12370_vm5, %v9138_v32 }
 0x1c9   :  { %1859 = vmatprep.mubr.bf16.mxu0 %v12615_v47 }
 0x1cf   :  { %1957 = vmatmul.mubr.bf16.gmra.mrb[44].mxu1 %v12625_v1 }
 0x1d0   :  { %9099 = vmatmul.mubr.msk.bf16.gmra.mrb[28].mxu0 %vm12370_vm5, %v12629_v57  ;;  %9144 = vmatprep.mubr.msk.bf16.mxu1 %vm12370_vm5, %v9143_v45 }
 0x1d1   :  { %1867 = vmatprep.mubr.bf16.mxu0 %v12550_v23 }
 0x1d7   :  { %1965 = vmatmul.mubr.bf16.gmra.mrb[48].mxu1 %v12554_v11 }
 0x1d8   :  { %9104 = vmatmul.mubr.msk.bf16.gmra.mrb[32].mxu0 %vm12370_vm5, %v12531_v4  ;;  %9149 = vmatprep.mubr.msk.bf16.mxu1 %vm12370_vm5, %v9148_v9 }
 0x1d9   :  { %1875 = vmatprep.mubr.bf16.mxu0 %v12645_v7 }
 0x1df   :  { %1973 = vmatmul.mubr.bf16.gmra.mrb[52].mxu1 %v12655_v21 }
 0x1e0   :  { %9109 = vmatmul.mubr.msk.bf16.gmra.mrb[36].mxu0 %vm12370_vm5, %v12659_v13  ;;  %2110 = vmatprep.mubr.bf16.mxu1 %v12430_v48  ;;  %v1305_v48 = vpack.c.bf16 %v12424_v37, %v12424_v37  ;;  %v1311_v37 = vpack.c.bf16 %v12450_v60, %v12450_v60  ;;  %v9168_v60 = vpack.c.bf16 %v12224_v34, %v12406_v22 }
 0x1e1   :  { %2013 = vmatprep.mubr.bf16.mxu0 %v1300_v14  ;;  %v1326_v22 = vpack.c.bf16 %v12573_v62, %v12573_v62  ;;  %v1339_v62 = vpack.c.bf16 %v12541_v38, %v12541_v38  ;;  %v1344_v38 = vpack.c.bf16 %v12568_v49, %v12568_v49 }
 0x1e7   :  { %9154 = vmatmul.mubr.msk.bf16.vlgmr.msra.gmra.mrb[56].mxu1 %vm12370_vm5, %v12483_v39  ;;  %v11628_v39 = vld [vmem:[#allocation6 + $0x228] sm:$0xff]  }
 0x1e8   :  { %2014 = vmatmul.mubr.bf16.vlgmr.msra.gmra.mrb[40].mxu0 %v1299_v24  ;;  %2118 = vmatprep.mubr.bf16.mxu1 %v12460_v54  ;;  %v11627_v54 = vld [vmem:[#allocation6 + $0x220] sm:$0xff]  }
 0x1e9   :  { %2021 = vmatprep.mubr.bf16.mxu0 %v1306_v19  ;;  %10459 = vmatpush3.bf16.msra.mxu0 %v11623_v29 }
 0x1ea   :  { %10460 = vmatprep.subr.bf16.mxu0 %v11624_v42 }
 0x1ed   :  { %10461 = vmatpush3.bf16.msra.mxu0 %v11624_v42 }
 0x1ee   :  { %10462 = vmatprep.subr.bf16.mxu0 %v11625_v26 }
 0x1ef   :  { %9159 = vmatmul.mubr.msk.bf16.gmra.mrb[60].mxu1 %vm12370_vm5, %v12443_v33  ;;  %v1318_v33 = vpack.c.bf16 %v12565_v46, %v12565_v46 }
 0x1f0   :  { %2022 = vmatmul.mubr.bf16.gmra.mrb[44].mxu0 %v1305_v48  ;;  %2126 = vmatprep.mubr.bf16.mxu1 %v12546_v56  ;;  %v1317_v56 = vpack.c.bf16 %v12507_v36, %v12507_v36  ;;  %v1333_v36 = vpack.c.bf16 %v12523_v63, %v12523_v63  ;;  %v1338_v63 = vpack.c.bf16 %v12538_v40, %v12538_v40 }
 0x1f1   :  { %2029 = vmatprep.mubr.bf16.mxu0 %v1312_v58  ;;  %10463 = vmatpush3.bf16.msra.mxu0 %v11625_v26 }
 0x1f2   :  { %10464 = vmatprep.subr.bf16.mxu0 %v11626_v25 }
 0x1f5   :  { %10465 = vmatpush3.bf16.msra.mxu0 %v11626_v25 }
 0x1f6   :  { %10466 = vmatprep.subr.bf16.mxu0 %v11627_v54 }
 0x1f7   :  { %9164 = vmatmul.mubr.msk.bf16.gmra.mrb[64].mxu1 %vm12370_vm5, %v12586_v61  ;;  %v11630_v61 = vld [vmem:[#allocation6 + $0x238] sm:$0xff]  }
 0x1f8   :  { %2030 = vmatmul.mubr.bf16.gmra.mrb[48].mxu0 %v1311_v37  ;;  %2134 = vmatprep.mubr.bf16.mxu1 %v1320_v59  ;;  %v1332_v59 = vpack.c.bf16 %v12518_v51, %v12518_v51  ;;  %v1345_v51 = vpack.c.bf16 %v12576_v28, %v12576_v28 }
 0x1f9   :  { %2037 = vmatprep.mubr.bf16.mxu0 %v1318_v33  ;;  %10467 = vmatpush3.bf16.msra.mxu0 %v11627_v54 }
 0x1fa   :  { %10468 = vmatprep.subr.bf16.mxu0 %v11628_v39 }
 0x1fd   :  { %10469 = vmatpush3.bf16.msra.mxu0 %v11628_v39 }
 0x1fe   :  { %10470 = vmatprep.subr.bf16.mxu0 %v11629_v5 }
 0x1ff   :  { %9169 = vmatmul.mubr.msk.bf16.gmra.mrb[68].mxu1 %vm12370_vm5, %v9168_v60 }
 0x200   :  { %2038 = vmatmul.mubr.bf16.gmra.mrb[52].mxu0 %v1317_v56  ;;  %2142 = vmatprep.mubr.bf16.mxu1 %v12615_v47 }
 0x201   :  { %2045 = vmatprep.mubr.bf16.mxu0 %v1327_v43  ;;  %10471 = vmatpush3.bf16.msra.mxu0 %v11629_v5 }
 0x202   :  { %10472 = vmatprep.subr.bf16.mxu0 %v11630_v61 }
 0x205   :  { %10473 = vmatpush3.bf16.msra.mxu0 %v11630_v61 }
 0x207   :  { %9174 = vmatmul.mubr.msk.bf16.gmra.mrb[72].mxu1 %vm12370_vm5, %v12629_v57 }
 0x208   :  { %2046 = vmatmul.mubr.bf16.gmra.mrb[56].mxu0 %v1326_v22  ;;  %2150 = vmatprep.mubr.bf16.mxu1 %v12550_v23  ;;  %v12751_v23 = vld [vmem:[%s17743_s6] ss:$0 sm:$0xff] }
 0x209   :  { %2053 = vmatprep.mubr.bf16.mxu0 %v1333_v36 }
 0x20f   :  { %9179 = vmatmul.mubr.msk.bf16.gmra.mrb[76].mxu1 %vm12370_vm5, %v12531_v4  ;;  %v9188_v4 = vpack.c.bf16 %v12224_v34, %v12504_v6 }
 0x210   :  { %2054 = vmatmul.mubr.bf16.gmra.mrb[60].mxu0 %v1332_v59  ;;  %2158 = vmatprep.mubr.bf16.mxu1 %v12645_v7 }
 0x211   :  { %2061 = vmatprep.mubr.bf16.mxu0 %v1339_v62 }
 0x217   :  { %9184 = vmatmul.mubr.msk.bf16.gmra.mrb[80].mxu1 %vm12370_vm5, %v12659_v13 }
 0x218   :  { %2062 = vmatmul.mubr.bf16.gmra.mrb[64].mxu0 %v1338_v63  ;;  %2166 = vmatprep.mubr.bf16.mxu1 %v1347_v2 }
 0x219   :  { %2069 = vmatprep.mubr.bf16.mxu0 %v1345_v51 }
 0x21f   :  { %9189 = vmatmul.mubr.msk.bf16.gmra.mrb[84].mxu1 %vm12370_vm5, %v9188_v4 }
 0x220   :  { %2070 = vmatmul.mubr.bf16.gmra.mrb[68].mxu0 %v1344_v38  ;;  %3843 = vmatprep.mubr.bf16.mxu1 %v12252_v52 }
 0x221   :  { %10474 = vmatprep.mubr.bf16.mxu0 %v12476_v18 }
 0x228   :  { %10475 = vmatmul.mubr.bf16.vlgmr.msra.gmra.mrb[72].mxu0 %v12464_v8 }
 0x229   :  { %10478 = vmatprep.mubr.bf16.mxu0 %v12580_v44 }
 0x230   :  { %10479 = vmatmul.mubr.bf16.gmra.mrb[76].mxu0 %v1321_v41 }
 0x231   :  { %10482 = vmatprep.mubr.bf16.mxu0 %v12625_v1 }
 0x238   :  { %10483 = vmatmul.mubr.bf16.gmra.mrb[80].mxu0 %v12554_v11 }
 0x239   :  { %10486 = vmatprep.mubr.bf16.mxu0 %v12655_v21 }
 0x240   :  { %10487 = vmatmul.mubr.bf16.gmra.mrb[84].mxu0 %v1348_v12 }
 0x27a   :  { %v10186_v15 = vpop.f32.mrb[24].mxu1 }
 0x27b   :  { %v10122_v16 = vpop.f32.mrb[8].mxu0  ;;  %v10187_v18 = vpop.f32.mrb[25].mxu1 }
 0x27c   :  { %v10188_v8 = vadd.f32 %v10187_v18, %v10186_v15  ;;  %v10123_v6 = vpop.f32.mrb[9].mxu0  ;;  %v10189_v40 = vpop.f32.mrb[26].mxu1 }
 0x27d   :  { %v10125_v46 = vpop.f32.mrb[10].mxu0  ;;  %v10190_v49 = vpop.f32.mrb[27].mxu1  ;;  %v10124_v11 = vadd.f32 %v10123_v6, %v10122_v16  ;;  %v11631_v16 = vld [vmem:[#allocation7] sm:$0xff]  }
 0x27e   :  { %v10191_v44 = vadd.f32 %v10190_v49, %v10189_v40  ;;  %v10126_v2 = vpop.f32.mrb[11].mxu0  ;;  %3812 = vmatpush1.bf16.msra.mxu1 %v11631_v16 }
 0x27f   :  { %v1822_v20 = vadd.f32 %v10124_v11, %v12751_v23  ;;  %v10127_v17 = vadd.f32 %v10126_v2, %v10125_v46  ;;  %v11632_v46 = vld [vmem:[#allocation7 + $0x8] sm:$0xff]   ;;  %3813 = vmatprep.subr.bf16.mxu1 %v17753_v0 }
 0x281   :  { %v12754_v28 = vadd.f32 %v10188_v8, %v1822_v20  ;;  %v1825_v41 = vadd.f32 %v10127_v17, %v12751_v23 }
 0x282   :  { %v10192_v12 = vpop.f32.mrb[28].mxu1  ;;  %3814 = vmatpush1.bf16.msra.mxu1 %v11632_v46 }
 0x283   :  { %v10128_v50 = vpop.f32.mrb[12].mxu0  ;;  %v10193_v3 = vpop.f32.mrb[29].mxu1  ;;  %v12757_v27 = vadd.f32 %v10191_v44, %v1825_v41  ;;  %3815 = vmatprep.subr.bf16.mxu1 %v17753_v0 }
 0x284   :  { %v10194_v29 = vadd.f32 %v10193_v3, %v10192_v12  ;;  %v10129_v30 = vpop.f32.mrb[13].mxu0  ;;  %v10195_v31 = vpop.f32.mrb[30].mxu1 }
 0x285   :  { %v10131_v32 = vpop.f32.mrb[14].mxu0  ;;  %v10196_v47 = vpop.f32.mrb[31].mxu1  ;;  %v10130_v1 = vadd.f32 %v10129_v30, %v10128_v50 }
 0x286   :  { %v10197_v57 = vadd.f32 %v10196_v47, %v10195_v31  ;;  %v10132_v45 = vpop.f32.mrb[15].mxu0 }
 0x287   :  { %v1830_v9 = vadd.f32 %v10130_v1, %v12751_v23  ;;  %v10133_v7 = vadd.f32 %v10132_v45, %v10131_v32 }
 0x289   :  { %v12760_v21 = vadd.f32 %v10194_v29, %v1830_v9  ;;  %v1833_v13 = vadd.f32 %v10133_v7, %v12751_v23 }
 0x28a   :  { %v10198_v14 = vpop.f32.mrb[32].mxu1 }
 0x28b   :  { %v10134_v24 = vpop.f32.mrb[16].mxu0  ;;  %v10199_v42 = vpop.f32.mrb[33].mxu1  ;;  %v12763_v19 = vadd.f32 %v10197_v57, %v1833_v13 }
 0x28c   :  { %v10200_v26 = vadd.f32 %v10199_v42, %v10198_v14  ;;  %v10135_v48 = vpop.f32.mrb[17].mxu0  ;;  %v10201_v25 = vpop.f32.mrb[34].mxu1 }
 0x28d   :  { %v10137_v58 = vpop.f32.mrb[18].mxu0  ;;  %v10202_v54 = vpop.f32.mrb[35].mxu1  ;;  %v10136_v37 = vadd.f32 %v10135_v48, %v10134_v24 }
 0x28e   :  { %v10203_v39 = vadd.f32 %v10202_v54, %v10201_v25  ;;  %v10138_v33 = vpop.f32.mrb[19].mxu0 }
 0x28f   :  { %v1838_v5 = vadd.f32 %v10136_v37, %v12751_v23  ;;  %v10139_v60 = vadd.f32 %v10138_v33, %v10137_v58 }
 0x291   :  { %v12766_v56 = vadd.f32 %v10200_v26, %v1838_v5  ;;  %v1841_v61 = vadd.f32 %v10139_v60, %v12751_v23 }
 0x292   :  { %v10204_v43 = vpop.f32.mrb[36].mxu1 }
 0x293   :  { %v10140_v22 = vpop.f32.mrb[20].mxu0  ;;  %v10205_v36 = vpop.f32.mrb[37].mxu1  ;;  %v12769_v59 = vadd.f32 %v10203_v39, %v1841_v61 }
 0x294   :  { %v10206_v62 = vadd.f32 %v10205_v36, %v10204_v43  ;;  %v10141_v63 = vpop.f32.mrb[21].mxu0  ;;  %v10207_v51 = vpop.f32.mrb[38].mxu1 }
 0x295   :  { %v10143_v4 = vpop.f32.mrb[22].mxu0  ;;  %v10208_v38 = vpop.f32.mrb[39].mxu1  ;;  %v10142_v15 = vadd.f32 %v10141_v63, %v10140_v22 }
 0x296   :  { %v10209_v18 = vadd.f32 %v10208_v38, %v10207_v51  ;;  %v10144_v8 = vpop.f32.mrb[23].mxu0 }
 0x297   :  { %v1846_v6 = vadd.f32 %v10142_v15, %v12751_v23  ;;  %v10145_v40 = vadd.f32 %v10144_v8, %v10143_v4 }
 0x299   :  { %v12773_v49 = vadd.f32 %v10206_v62, %v1846_v6  ;;  %v1849_v11 = vadd.f32 %v10145_v40, %v12751_v23 }
 0x29a   :  { %v10210_v44 = vpop.f32.mrb[40].mxu1 }
 0x29b   :  { %v10146_v2 = vpop.f32.mrb[24].mxu0  ;;  %v10211_v20 = vpop.f32.mrb[41].mxu1  ;;  %v12776_v17 = vadd.f32 %v10209_v18, %v1849_v11 }
 0x29c   :  { %v10212_v41 = vadd.f32 %v10211_v20, %v10210_v44  ;;  %v10147_v12 = vpop.f32.mrb[25].mxu0  ;;  %v10213_v50 = vpop.f32.mrb[42].mxu1  ;;  %v11633_v44 = vld [vmem:[#allocation7 + $0x10] sm:$0xff]  }
 0x29d   :  { %v10148_v3 = vadd.f32 %v10147_v12, %v10146_v2  ;;  %v10149_v29 = vpop.f32.mrb[26].mxu0  ;;  %v10214_v30 = vpop.f32.mrb[43].mxu1  ;;  %3816 = vmatpush1.bf16.msra.mxu1 %v11633_v44 }
 0x29e   :  { %v10215_v31 = vadd.f32 %v10214_v30, %v10213_v50  ;;  %v10150_v32 = vpop.f32.mrb[27].mxu0  ;;  %3817 = vmatprep.subr.bf16.mxu1 %v17753_v0 }
 0x29f   :  { %v1854_v47 = vadd.f32 %v10148_v3, %v12751_v23  ;;  %v10151_v1 = vadd.f32 %v10150_v32, %v10149_v29 }
 0x2a1   :  { %v1857_v57 = vadd.f32 %v10151_v1, %v12751_v23  ;;  %v12781_v45 = vadd.f32 %v10212_v41, %v1854_v47  ;;  %v11634_v1 = vld [vmem:[#allocation7 + $0x18] sm:$0xff]  }
 0x2a2   :  { %v10216_v9 = vpop.f32.mrb[44].mxu1  ;;  %3818 = vmatpush1.bf16.msra.mxu1 %v11634_v1 }
 0x2a3   :  { %v10152_v7 = vpop.f32.mrb[28].mxu0  ;;  %v10217_v13 = vpop.f32.mrb[45].mxu1  ;;  %v12783_v14 = vadd.f32 %v10215_v31, %v1857_v57  ;;  %3819 = vmatprep.subr.bf16.mxu1 %v17753_v0 }
 0x2a4   :  { %v10218_v24 = vadd.f32 %v10217_v13, %v10216_v9  ;;  %v10153_v42 = vpop.f32.mrb[29].mxu0  ;;  %v10219_v26 = vpop.f32.mrb[46].mxu1 }
 0x2a5   :  { %v10154_v48 = vadd.f32 %v10153_v42, %v10152_v7  ;;  %v10155_v25 = vpop.f32.mrb[30].mxu0  ;;  %v10220_v58 = vpop.f32.mrb[47].mxu1  ;;  %v11635_v42 = vld [vmem:[#allocation7 + $0x20] sm:$0xff]  }
 0x2a6   :  { %v10221_v54 = vadd.f32 %v10220_v58, %v10219_v26  ;;  %v10156_v37 = vpop.f32.mrb[31].mxu0  ;;  %3820 = vmatpush1.bf16.msra.mxu1 %v11635_v42 }
 0x2a7   :  { %v1862_v39 = vadd.f32 %v10154_v48, %v12751_v23  ;;  %v10157_v33 = vadd.f32 %v10156_v37, %v10155_v25  ;;  %3821 = vmatprep.subr.bf16.mxu1 %v17753_v0 }
 0x2a9   :  { %v1865_v5 = vadd.f32 %v10157_v33, %v12751_v23  ;;  %v12787_v60 = vadd.f32 %v10218_v24, %v1862_v39 }
 0x2aa   :  { %v10222_v61 = vpop.f32.mrb[48].mxu1 }
 0x2ab   :  { %v10158_v43 = vpop.f32.mrb[32].mxu0  ;;  %v10223_v22 = vpop.f32.mrb[49].mxu1  ;;  %v12789_v36 = vadd.f32 %v10221_v54, %v1865_v5 }
 0x2ac   :  { %v10224_v62 = vadd.f32 %v10223_v22, %v10222_v61  ;;  %v10159_v63 = vpop.f32.mrb[33].mxu0  ;;  %v10225_v51 = vpop.f32.mrb[50].mxu1 }
 0x2ad   :  { %v10160_v4 = vadd.f32 %v10159_v63, %v10158_v43  ;;  %v10161_v38 = vpop.f32.mrb[34].mxu0  ;;  %v10226_v15 = vpop.f32.mrb[51].mxu1  ;;  %v11636_v43 = vld [vmem:[#allocation7 + $0x28] sm:$0xff]  }
 0x2ae   :  { %v10227_v16 = vadd.f32 %v10226_v15, %v10225_v51  ;;  %v10162_v18 = vpop.f32.mrb[35].mxu0  ;;  %3822 = vmatpush1.bf16.msra.mxu1 %v11636_v43 }
 0x2af   :  { %v1870_v8 = vadd.f32 %v10160_v4, %v12751_v23  ;;  %v10163_v6 = vadd.f32 %v10162_v18, %v10161_v38  ;;  %3823 = vmatprep.subr.bf16.mxu1 %v17753_v0  ;;  %v11637_v38 = vld [vmem:[#allocation7 + $0x30] sm:$0xff]  }
 0x2b1   :  { %v1873_v40 = vadd.f32 %v10163_v6, %v12751_v23  ;;  %v12793_v46 = vadd.f32 %v10224_v62, %v1870_v8 }
 0x2b2   :  { %v10228_v11 = vpop.f32.mrb[52].mxu1  ;;  %3824 = vmatpush1.bf16.msra.mxu1 %v11637_v38  ;;  %v11644_v38 = vld [vmem:[#allocation7 + $0x58] sm:$0xff]  }
 0x2b3   :  { %v10164_v2 = vpop.f32.mrb[36].mxu0  ;;  %v10229_v20 = vpop.f32.mrb[53].mxu1  ;;  %v12795_v41 = vadd.f32 %v10227_v16, %v1873_v40  ;;  %3825 = vmatprep.subr.bf16.mxu1 %v17753_v0 }
 0x2b4   :  { %v10230_v12 = vadd.f32 %v10229_v20, %v10228_v11  ;;  %v10165_v50 = vpop.f32.mrb[37].mxu0  ;;  %v10231_v3 = vpop.f32.mrb[54].mxu1  ;;  %v11638_v20 = vld [vmem:[#allocation7 + $0x38] sm:$0xff]  }
 0x2b5   :  { %v10166_v29 = vadd.f32 %v10165_v50, %v10164_v2  ;;  %v10167_v30 = vpop.f32.mrb[38].mxu0  ;;  %v10232_v31 = vpop.f32.mrb[55].mxu1 }
 0x2b6   :  { %v10233_v32 = vadd.f32 %v10232_v31, %v10231_v3  ;;  %v10168_v47 = vpop.f32.mrb[39].mxu0  ;;  %3826 = vmatpush1.bf16.msra.mxu1 %v11638_v20  ;;  %v11639_v31 = vld [vmem:[#allocation7 + $0x40] sm:$0xff]  }
 0x2b7   :  { %v1878_v57 = vadd.f32 %v10166_v29, %v12751_v23  ;;  %v10169_v9 = vadd.f32 %v10168_v47, %v10167_v30  ;;  %3827 = vmatprep.subr.bf16.mxu1 %v17753_v0 }
 0x2b9   :  { %v1881_v7 = vadd.f32 %v10169_v9, %v12751_v23  ;;  %v12800_v13 = vadd.f32 %v10230_v12, %v1878_v57 }
 0x2ba   :  { %v10314_v24 = vpop.f32.mrb[56].mxu1  ;;  %3828 = vmatpush1.bf16.msra.mxu1 %v11639_v31 }
 0x2bb   :  { %v10250_v26 = vpop.f32.mrb[40].mxu0  ;;  %v10315_v48 = vpop.f32.mrb[57].mxu1  ;;  %v12803_v25 = vadd.f32 %v10233_v32, %v1881_v7  ;;  %3829 = vmatprep.subr.bf16.mxu1 %v17753_v0 }
 0x2bc   :  { %v10316_v58 = vadd.f32 %v10315_v48, %v10314_v24  ;;  %v10251_v54 = vpop.f32.mrb[41].mxu0  ;;  %v10317_v37 = vpop.f32.mrb[58].mxu1  ;;  %v11640_v48 = vld [vmem:[#allocation7 + $0x48] sm:$0xff]  }
 0x2bd   :  { %v10252_v39 = vadd.f32 %v10251_v54, %v10250_v26  ;;  %v10253_v33 = vpop.f32.mrb[42].mxu0  ;;  %v10318_v5 = vpop.f32.mrb[59].mxu1 }
 0x2be   :  { %v10319_v23 = vadd.f32 %v10318_v5, %v10317_v37  ;;  %v10254_v61 = vpop.f32.mrb[43].mxu0  ;;  %3830 = vmatpush1.bf16.msra.mxu1 %v11640_v48  ;;  %v11641_v37 = vld [vmem:[#allocation7 + $0x200] sm:$0xff]   ;;  %v11651_v48 = vld [vmem:[#allocation7 + $0x228] sm:$0xff]  }
 0x2bf   :  { %v2016_v22 = vadd.f32 %v10252_v39, %v12754_v28  ;;  %v10255_v62 = vadd.f32 %v10254_v61, %v10253_v33  ;;  %v11642_v39 = vld [vmem:[#allocation7 + $0x50] sm:$0xff]   ;;  %v11643_v33 = vld [vmem:[#allocation7 + $0x208] sm:$0xff]   ;;  %3831 = vmatprep.subr.bf16.mxu1 %v17753_v0  ;;  %10490 = vmatprep.subr.bf16.mxu0 %v11641_v37 }
 0x2c0   :  { %10491 = vmatpush3.bf16.msra.mxu0 %v11641_v37 }
 0x2c1   :  { %v2019_v63 = vadd.f32 %v10255_v62, %v12757_v27  ;;  %v12808_v51 = vadd.f32 %v10316_v58, %v2016_v22  ;;  %10492 = vmatprep.subr.bf16.mxu0 %v11643_v33 }
 0x2c2   :  { %v10320_v4 = vpop.f32.mrb[60].mxu1  ;;  %3832 = vmatpush1.bf16.msra.mxu1 %v11642_v39 }
 0x2c3   :  { %v10256_v15 = vpop.f32.mrb[44].mxu0  ;;  %v10321_v16 = vpop.f32.mrb[61].mxu1  ;;  %v12811_v18 = vadd.f32 %v10319_v23, %v2019_v63  ;;  %3833 = vmatprep.subr.bf16.mxu1 %v17753_v0 }
 0x2c4   :  { %v10322_v8 = vadd.f32 %v10321_v16, %v10320_v4  ;;  %v10257_v6 = vpop.f32.mrb[45].mxu0  ;;  %v10323_v40 = vpop.f32.mrb[62].mxu1  ;;  %10493 = vmatpush3.bf16.msra.mxu0 %v11643_v33 }
 0x2c5   :  { %v10258_v11 = vadd.f32 %v10257_v6, %v10256_v15  ;;  %v10259_v28 = vpop.f32.mrb[46].mxu0  ;;  %v10324_v44 = vpop.f32.mrb[63].mxu1  ;;  %v11645_v15 = vld [vmem:[#allocation7 + $0x210] sm:$0xff]  }
 0x2c6   :  { %v10325_v27 = vadd.f32 %v10324_v44, %v10323_v40  ;;  %v10260_v2 = vpop.f32.mrb[47].mxu0  ;;  %3834 = vmatpush1.bf16.msra.mxu1 %v11644_v38  ;;  %10494 = vmatprep.subr.bf16.mxu0 %v11645_v15  ;;  %v11646_v44 = vld [vmem:[#allocation7 + $0x60] sm:$0xff]  }
 0x2c7   :  { %v2024_v12 = vadd.f32 %v10258_v11, %v12760_v21  ;;  %v10261_v50 = vadd.f32 %v10260_v2, %v10259_v28  ;;  %3835 = vmatprep.subr.bf16.mxu1 %v17753_v0 }
 0x2c8   :  { %10495 = vmatpush3.bf16.msra.mxu0 %v11645_v15 }
 0x2c9   :  { %v2027_v3 = vadd.f32 %v10261_v50, %v12763_v19  ;;  %v12816_v29 = vadd.f32 %v10322_v8, %v2024_v12 }
 0x2ca   :  { %v10326_v30 = vpop.f32.mrb[64].mxu1  ;;  %3836 = vmatpush1.bf16.msra.mxu1 %v11646_v44 }
 0x2cb   :  { %v10262_v32 = vpop.f32.mrb[48].mxu0  ;;  %v10327_v47 = vpop.f32.mrb[65].mxu1  ;;  %v12819_v1 = vadd.f32 %v10325_v27, %v2027_v3  ;;  %v11647_v27 = vld [vmem:[#allocation7 + $0x218] sm:$0xff]   ;;  %3837 = vmatprep.subr.bf16.mxu1 %v17753_v0 }
 0x2cc   :  { %v10328_v57 = vadd.f32 %v10327_v47, %v10326_v30  ;;  %v10263_v9 = vpop.f32.mrb[49].mxu0  ;;  %v10329_v7 = vpop.f32.mrb[66].mxu1  ;;  %10496 = vmatprep.subr.bf16.mxu0 %v11647_v27  ;;  %v11648_v47 = vld [vmem:[#allocation7 + $0x68] sm:$0xff]  }
 0x2cd   :  { %v10264_v24 = vadd.f32 %v10263_v9, %v10262_v32  ;;  %v10265_v21 = vpop.f32.mrb[50].mxu0  ;;  %v10330_v42 = vpop.f32.mrb[67].mxu1  ;;  %10497 = vmatpush3.bf16.msra.mxu0 %v11647_v27 }
 0x2ce   :  { %v10331_v19 = vadd.f32 %v10330_v42, %v10329_v7  ;;  %v10266_v26 = vpop.f32.mrb[51].mxu0  ;;  %3838 = vmatpush1.bf16.msra.mxu1 %v11648_v47 }
 0x2cf   :  { %v2032_v58 = vadd.f32 %v10264_v24, %v12766_v56  ;;  %v10267_v54 = vadd.f32 %v10266_v26, %v10265_v21  ;;  %v11650_v26 = vld [vmem:[#allocation7 + $0x70] sm:$0xff]   ;;  %3839 = vmatprep.subr.bf16.mxu1 %v17753_v0 }
 0x2d1   :  { %v2035_v5 = vadd.f32 %v10267_v54, %v12769_v59  ;;  %v12824_v23 = vadd.f32 %v10328_v57, %v2032_v58  ;;  %v11649_v57 = vld [vmem:[#allocation7 + $0x220] sm:$0xff]  }
 0x2d2   :  { %v10332_v61 = vpop.f32.mrb[68].mxu1  ;;  %10498 = vmatprep.subr.bf16.mxu0 %v11649_v57  ;;  %3840 = vmatpush1.bf16.msra.mxu1 %v11650_v26 }
 0x2d3   :  { %v10268_v43 = vpop.f32.mrb[52].mxu0  ;;  %v10333_v22 = vpop.f32.mrb[69].mxu1  ;;  %v12827_v62 = vadd.f32 %v10331_v19, %v2035_v5  ;;  %10499 = vmatpush3.bf16.msra.mxu0 %v11649_v57  ;;  %3841 = vmatprep.subr.bf16.mxu1 %v17753_v0 }
 0x2d4   :  { %v10334_v63 = vadd.f32 %v10333_v22, %v10332_v61  ;;  %v10269_v56 = vpop.f32.mrb[53].mxu0  ;;  %v10335_v4 = vpop.f32.mrb[70].mxu1  ;;  %10500 = vmatprep.subr.bf16.mxu0 %v11651_v48  ;;  %v11652_v22 = vld [vmem:[#allocation7 + $0x78] sm:$0xff]  }
 0x2d5   :  { %v10270_v16 = vadd.f32 %v10269_v56, %v10268_v43  ;;  %v10271_v59 = vpop.f32.mrb[54].mxu0  ;;  %v10336_v8 = vpop.f32.mrb[71].mxu1 }
 0x2d6   :  { %v10337_v6 = vadd.f32 %v10336_v8, %v10335_v4  ;;  %v10272_v40 = vpop.f32.mrb[55].mxu0  ;;  %v12849_v8 = vpack.c.bf16 %v12224_v34, %v12224_v34  ;;  %3842 = vmatpush1.bf16.msra.mxu1 %v11652_v22 }
 0x2d7   :  { %v2040_v11 = vadd.f32 %v10270_v16, %v12773_v49  ;;  %v10273_v28 = vadd.f32 %v10272_v40, %v10271_v59  ;;  %10501 = vmatpush3.bf16.msra.mxu0 %v11651_v48  ;;  %v11654_v40 = vld [vmem:[#allocation7 + $0x80] sm:$0xff]   ;;  %4100 = vmatprep.subr.bf16.mxu1 %v17753_v0 }
 0x2d8   :  { %18039 = vst [vmem:[#allocation16_spill] sm:$0xff] %v12849_v8 }
 0x2d9   :  { %v2043_v2 = vadd.f32 %v10273_v28, %v12776_v17  ;;  %v12832_v20 = vadd.f32 %v10334_v63, %v2040_v11  ;;  %v11653_v63 = vld [vmem:[#allocation7 + $0x230] sm:$0xff]   ;;  %v11655_v11 = vld [vmem:[#allocation7 + $0x238] sm:$0xff]   ;;  %9267 = vmatmul.mubr.msk.bf16.vlgmr.msra.gmra.mrb[88].mxu1 %vm12853_vm7, %v12849_v8 }
 0x2da   :  { %v10338_v12 = vpop.f32.mrb[72].mxu1  ;;  %10502 = vmatprep.subr.bf16.mxu0 %v11653_v63  ;;  %4101 = vmatpush1.bf16.msra.mxu1 %v11654_v40 }
 0x2db   :  { %v10274_v50 = vpop.f32.mrb[56].mxu0  ;;  %v10339_v3 = vpop.f32.mrb[73].mxu1  ;;  %v12835_v30 = vadd.f32 %v10337_v6, %v2043_v2  ;;  %v18040_v6 = vmov 0  ;;  %10503 = vmatpush3.bf16.msra.mxu0 %v11653_v63  ;;  %4102 = vmatprep.subr.bf16.mxu1 %v17753_v0 }
 0x2dc   :  { %v10340_v31 = vadd.f32 %v10339_v3, %v10338_v12  ;;  %v10275_v49 = vpop.f32.mrb[57].mxu0  ;;  %v10341_v32 = vpop.f32.mrb[74].mxu1  ;;  %v18041_v6 = vsel %vm12853_vm7, 4294967295, %v18040_v6  ;;  %10504 = vmatprep.subr.bf16.mxu0 %v11655_v11 }
 0x2dd   :  { %v10276_v9 = vadd.f32 %v10275_v49, %v10274_v50  ;;  %v10277_v7 = vpop.f32.mrb[58].mxu0  ;;  %v10342_v17 = vpop.f32.mrb[75].mxu1  ;;  %18042 = vst [vmem:[#allocation17_spill] sm:$0xff] %v18041_v6 }
 0x2de   :  { %v10343_v24 = vadd.f32 %v10342_v17, %v10341_v32  ;;  %v10278_v21 = vpop.f32.mrb[59].mxu0 }
 0x2df   :  { %v2048_v42 = vadd.f32 %v10276_v9, %v12781_v45  ;;  %v10279_v19 = vadd.f32 %v10278_v21, %v10277_v7  ;;  %10505 = vmatpush3.bf16.msra.mxu0 %v11655_v11 }
 0x2e0   :  { %7372 = vmatprep.subr.bf16.mxu0 %v17753_v0 }
 0x2e1   :  { %v2051_v58 = vadd.f32 %v10279_v19, %v12783_v14  ;;  %v12840_v54 = vadd.f32 %v10340_v31, %v2048_v42 }
 0x2e2   :  { %v10344_v37 = vpop.f32.mrb[76].mxu1 }
 0x2e3   :  { %v10280_v39 = vpop.f32.mrb[60].mxu0  ;;  %v10345_v33 = vpop.f32.mrb[77].mxu1  ;;  %v12843_v5 = vadd.f32 %v10343_v24, %v2051_v58 }
 0x2e4   :  { %v10346_v61 = vadd.f32 %v10345_v33, %v10344_v37  ;;  %v10281_v45 = vpop.f32.mrb[61].mxu0  ;;  %v10347_v43 = vpop.f32.mrb[78].mxu1 }
 0x2e5   :  { %v10282_v56 = vadd.f32 %v10281_v45, %v10280_v39  ;;  %v10283_v4 = vpop.f32.mrb[62].mxu0  ;;  %v10348_v14 = vpop.f32.mrb[79].mxu1 }
 0x2e6   :  { %v10349_v38 = vadd.f32 %v10348_v14, %v10347_v43  ;;  %v10284_v15 = vpop.f32.mrb[63].mxu0 }
 0x2e7   :  { %v2056_v16 = vadd.f32 %v10282_v56, %v12787_v60  ;;  %v10285_v59 = vadd.f32 %v10284_v15, %v10283_v4 }
 0x2e9   :  { %v2059_v28 = vadd.f32 %v10285_v59, %v12789_v36  ;;  %v12858_v60 = vadd.f32 %v10346_v61, %v2056_v16  ;;  %v11656_v36 = vld [vmem:[#allocation7 + $0x88] sm:$0xff]  }
 0x2ea   :  { %v10350_v44 = vpop.f32.mrb[80].mxu1  ;;  %4103 = vmatpush1.bf16.msra.mxu1 %v11656_v36 }
 0x2eb   :  { %v10286_v34 = vpop.f32.mrb[64].mxu0  ;;  %v10351_v27 = vpop.f32.mrb[81].mxu1  ;;  %v12861_v2 = vadd.f32 %v10349_v38, %v2059_v28  ;;  %4104 = vmatprep.subr.bf16.mxu1 %v17753_v0 }
 0x2ec   :  { %v10352_v10 = vadd.f32 %v10351_v27, %v10350_v44  ;;  %v10287_v12 = vpop.f32.mrb[65].mxu0  ;;  %v10353_v50 = vpop.f32.mrb[82].mxu1  ;;  %v11658_v27 = vld [vmem:[#allocation7 + $0x98] sm:$0xff]  }
 0x2ed   :  { %v10288_v3 = vadd.f32 %v10287_v12, %v10286_v34  ;;  %v10289_v31 = vpop.f32.mrb[66].mxu0  ;;  %v10354_v49 = vpop.f32.mrb[83].mxu1 }
 0x2ee   :  { %v10355_v32 = vadd.f32 %v10354_v49, %v10353_v50  ;;  %v10290_v47 = vpop.f32.mrb[67].mxu0 }
 0x2ef   :  { %v2064_v57 = vadd.f32 %v10288_v3, %v12793_v46  ;;  %v10291_v9 = vadd.f32 %v10290_v47, %v10289_v31  ;;  %v11657_v46 = vld [vmem:[#allocation7 + $0x90] sm:$0xff]  }
 0x2f0   :  { %4105 = vmatpush1.bf16.msra.mxu1 %v11657_v46 }
 0x2f1   :  { %v2067_v7 = vadd.f32 %v10291_v9, %v12795_v41  ;;  %v12870_v17 = vadd.f32 %v10352_v10, %v2064_v57  ;;  %4106 = vmatprep.subr.bf16.mxu1 %v17753_v0 }
 0x2f2   :  { %v10356_v24 = vpop.f32.mrb[84].mxu1 }
 0x2f3   :  { %v10292_v21 = vpop.f32.mrb[68].mxu0  ;;  %v10357_v42 = vpop.f32.mrb[85].mxu1  ;;  %v12873_v19 = vadd.f32 %v10355_v32, %v2067_v7 }
 0x2f4   :  { %v10358_v26 = vadd.f32 %v10357_v42, %v10356_v24  ;;  %v10293_v48 = vpop.f32.mrb[69].mxu0  ;;  %v10359_v58 = vpop.f32.mrb[86].mxu1  ;;  %4107 = vmatpush1.bf16.msra.mxu1 %v11658_v27 }
 0x2f5   :  { %v10294_v37 = vadd.f32 %v10293_v48, %v10292_v21  ;;  %v10295_v39 = vpop.f32.mrb[70].mxu0  ;;  %v10360_v33 = vpop.f32.mrb[87].mxu1  ;;  %4108 = vmatprep.subr.bf16.mxu1 %v17753_v0 }
 0x2f6   :  { %v10361_v61 = vadd.f32 %v10360_v33, %v10359_v58  ;;  %v10296_v45 = vpop.f32.mrb[71].mxu0 }
 0x2f7   :  { %v2072_v41 = vadd.f32 %v10294_v37, %v12800_v13  ;;  %v10297_v43 = vadd.f32 %v10296_v45, %v10295_v39 }
 0x2f9   :  { %v2075_v22 = vadd.f32 %v10297_v43, %v12803_v25  ;;  %v2169_v63 = vadd.f32 %v10358_v26, %v2072_v41 }
 0x2fb   :  { %v10476_v56 = vpop.f32.mrb[72].mxu0  ;;  %v12878_v4 = vadd.f32 %v10361_v61, %v2075_v22 }
 0x2fc   :  { %v12881_v14 = vadd.f32 %v10476_v56, %v12816_v29  ;;  %v2209_v38 = vpop.f32.mrb[73].mxu0 }
 0x2fd   :  { %v12884_v15 = vadd.f32 %v2209_v38, %v12808_v51  ;;  %v10477_v16 = vpop.f32.mrb[74].mxu0 }
 0x2fe   :  { %v12887_v59 = vadd.f32 %v10477_v16, %v12819_v1  ;;  %v2212_v13 = vpop.f32.mrb[75].mxu0  ;;  %v2297_v51 = vmul.f32 %v12881_v14, %v12881_v14 }
 0x2ff   :  { %v12890_v40 = vadd.f32 %v2212_v13, %v12811_v18  ;;  %v2295_v25 = vmul.f32 %v12884_v15, %v12884_v15 }
 0x300   :  { %v2298_v10 = vmul.f32 %v12887_v59, %v12887_v59 }
 0x301   :  { %v2274_v11 = vadd.f32 %v12890_v40, %v12884_v15  ;;  %v2296_v29 = vmul.f32 %v12890_v40, %v12890_v40 }
 0x303   :  { %v2275_v28 = vadd.f32 %v2274_v11, %v12881_v14  ;;  %v2311_v1 = vadd.f32 %v2296_v29, %v2295_v25  ;;  %v10480_v44 = vpop.f32.mrb[76].mxu0  ;;  %v11659_v29 = vld [vmem:[#allocation7 + $0xa0] sm:$0xff]  }
 0x304   :  { %v12902_v34 = vadd.f32 %v10480_v44, %v12832_v20  ;;  %v2225_v18 = vpop.f32.mrb[77].mxu0  ;;  %4109 = vmatpush1.bf16.msra.mxu1 %v11659_v29 }
 0x305   :  { %v2312_v12 = vadd.f32 %v2311_v1, %v2297_v51  ;;  %v12907_v50 = vadd.f32 %v2225_v18, %v12824_v23  ;;  %v2276_v36 = vadd.f32 %v2275_v28, %v12887_v59  ;;  %v10481_v3 = vpop.f32.mrb[78].mxu0  ;;  %4110 = vmatprep.subr.bf16.mxu1 %v17753_v0 }
 0x306   :  { %v12911_v31 = vadd.f32 %v10481_v3, %v12835_v30  ;;  %v2228_v49 = vpop.f32.mrb[79].mxu0  ;;  %v2301_v7 = vmul.f32 %v12902_v34, %v12902_v34 }
 0x307   :  { %v2277_v20 = vadd.f32 %v2276_v36, %v12907_v50  ;;  %v2299_v32 = vmul.f32 %v12907_v50, %v12907_v50  ;;  %v2313_v47 = vadd.f32 %v2312_v12, %v2298_v10  ;;  %v12917_v57 = vadd.f32 %v2228_v49, %v12827_v62 }
 0x308   :  { %v2302_v48 = vmul.f32 %v12911_v31, %v12911_v31 }
 0x309   :  { %v2314_v23 = vadd.f32 %v2313_v47, %v2299_v32  ;;  %v2278_v9 = vadd.f32 %v2277_v20, %v12917_v57  ;;  %v2300_v30 = vmul.f32 %v12917_v57, %v12917_v57 }
 0x30b   :  { %v2279_v24 = vadd.f32 %v2278_v9, %v12902_v34  ;;  %v2315_v21 = vadd.f32 %v2314_v23, %v2300_v30  ;;  %v10484_v42 = vpop.f32.mrb[80].mxu0 }
 0x30c   :  { %v12927_v26 = vadd.f32 %v10484_v42, %v12858_v60  ;;  %v2241_v62 = vpop.f32.mrb[81].mxu0 }
 0x30d   :  { %v2316_v58 = vadd.f32 %v2315_v21, %v2301_v7  ;;  %v12932_v46 = vadd.f32 %v2241_v62, %v12840_v54  ;;  %v2280_v37 = vadd.f32 %v2279_v24, %v12911_v31  ;;  %v10485_v39 = vpop.f32.mrb[82].mxu0  ;;  %v11660_v62 = vld [vmem:[#allocation7 + $0xa8] sm:$0xff]  }
 0x30e   :  { %v12936_v33 = vadd.f32 %v10485_v39, %v12861_v2  ;;  %v2244_v61 = vpop.f32.mrb[83].mxu0  ;;  %v2305_v2 = vmul.f32 %v12927_v26, %v12927_v26  ;;  %4111 = vmatpush1.bf16.msra.mxu1 %v11660_v62 }
 0x30f   :  { %v2281_v45 = vadd.f32 %v2280_v37, %v12932_v46  ;;  %v2303_v60 = vmul.f32 %v12932_v46, %v12932_v46  ;;  %v2317_v41 = vadd.f32 %v2316_v58, %v2302_v48  ;;  %v12942_v43 = vadd.f32 %v2244_v61, %v12843_v5  ;;  %4112 = vmatprep.subr.bf16.mxu1 %v17753_v0 }
 0x310   :  { %v2306_v5 = vmul.f32 %v12936_v33, %v12936_v33 }
 0x311   :  { %v2318_v22 = vadd.f32 %v2317_v41, %v2303_v60  ;;  %v2282_v54 = vadd.f32 %v2281_v45, %v12942_v43  ;;  %v2304_v56 = vmul.f32 %v12942_v43, %v12942_v43 }
 0x313   :  { %v2283_v38 = vadd.f32 %v2282_v54, %v12927_v26  ;;  %v2319_v16 = vadd.f32 %v2318_v22, %v2304_v56  ;;  %v10488_v13 = vpop.f32.mrb[84].mxu0 }
 0x314   :  { %v12950_v25 = vadd.f32 %v10488_v13, %v2169_v63  ;;  %v2257_v11 = vpop.f32.mrb[85].mxu0 }
 0x315   :  { %v2320_v51 = vadd.f32 %v2319_v16, %v2305_v2  ;;  %v12955_v28 = vadd.f32 %v2257_v11, %v12870_v17  ;;  %v2284_v1 = vadd.f32 %v2283_v38, %v12936_v33  ;;  %v10489_v44 = vpop.f32.mrb[86].mxu0 }
 0x316   :  { %v12959_v18 = vadd.f32 %v10489_v44, %v12878_v4  ;;  %v2260_v27 = vpop.f32.mrb[87].mxu0  ;;  %v2309_v49 = vmul.f32 %v12950_v25, %v12950_v25 }
 0x317   :  { %v2285_v63 = vadd.f32 %v2284_v1, %v12955_v28  ;;  %v2307_v10 = vmul.f32 %v12955_v28, %v12955_v28  ;;  %v2321_v12 = vadd.f32 %v2320_v51, %v2306_v5  ;;  %v12965_v36 = vadd.f32 %v2260_v27, %v12873_v19 }
 0x318   :  { %v2310_v47 = vmul.f32 %v12959_v18, %v12959_v18 }
 0x319   :  { %v2322_v17 = vadd.f32 %v2321_v12, %v2307_v10  ;;  %v2286_v3 = vadd.f32 %v2285_v63, %v12965_v36  ;;  %v2308_v4 = vmul.f32 %v12965_v36, %v12965_v36  ;;  %v11661_v10 = vld [vmem:[#allocation7 + $0xb0] sm:$0xff]   ;;  %v2272_v12 = vld [vmem:[%s17744_s7] sm:$0x1] }
 0x31a   :  { %4113 = vmatpush1.bf16.msra.mxu1 %v11661_v10 }
 0x31b   :  { %v2287_v20 = vadd.f32 %v2286_v3, %v12950_v25  ;;  %v2323_v32 = vadd.f32 %v2322_v17, %v2308_v4  ;;  %4114 = vmatprep.subr.bf16.mxu1 %v17753_v0  ;;  %v13024_v4 = vld [vmem:[%s17745_s8] ss:$0 sm:$0xff] }
 0x31d   :  { %v2288_v19 = vadd.f32 %v2287_v20, %v12959_v18  ;;  %v2324_v23 = vadd.f32 %v2323_v32, %v2309_v49 }
 0x31f   :  { %v2289_v9 = vrot.slane %v2288_v19, 4  ;;  %v2325_v30 = vadd.f32 %v2324_v23, %v2310_v47 }
 0x321   :  { %v2290_v7 = vadd.f32 %v2289_v9, %v2288_v19  ;;  %v2326_v24 = vrot.slane %v2325_v30, 4  ;;  %v11662_v9 = vld [vmem:[#allocation7 + $0xb8] sm:$0xff]  }
 0x322   :  { %4115 = vmatpush1.bf16.msra.mxu1 %v11662_v9 }
 0x323   :  { %v2291_v21 = vrot.slane %v2290_v7, 2  ;;  %v2327_v42 = vadd.f32 %v2326_v24, %v2325_v30  ;;  %4116 = vmatprep.subr.bf16.mxu1 %v17753_v0 }
 0x325   :  { %v2292_v48 = vadd.f32 %v2291_v21, %v2290_v7  ;;  %v2328_v58 = vrot.slane %v2327_v42, 2 }
 0x327   :  { %v2293_v37 = vrot.slane %v2292_v48, 1  ;;  %v2329_v39 = vadd.f32 %v2328_v58, %v2327_v42 }
 0x329   :  { %v2294_v61 = vadd.f32 %v2293_v37, %v2292_v48  ;;  %v2330_v45 = vrot.slane %v2329_v39, 1 }
 0x32b   :  { %v2331_v60 = vadd.f32 %v2330_v45, %v2329_v39  ;;  %v12978_v41 = vmul.f32 0.0078125, %v2294_v61 }
 0x32d   :  { %v2333_v22 = vmul.f32 0.0078125, %v2331_v60  ;;  %v2334_v54 = vmul.f32 %v12978_v41, %v12978_v41  ;;  %v2351_v56 = vsub.f32 %v12965_v36, %v12978_v41  ;;  %v2338_v2 = vsub.f32 %v12884_v15, %v12978_v41 }
 0x32e   :  { %v2339_v38 = vsub.f32 %v12890_v40, %v12978_v41  ;;  %v2340_v16 = vsub.f32 %v12881_v14, %v12978_v41  ;;  %v2341_v13 = vsub.f32 %v12887_v59, %v12978_v41  ;;  %v2342_v11 = vsub.f32 %v12907_v50, %v12978_v41 }
 0x32f   :  { %v2335_v29 = vsub.f32 %v2333_v22, %v2334_v54  ;;  %v2343_v5 = vsub.f32 %v12917_v57, %v12978_v41  ;;  %v2344_v51 = vsub.f32 %v12902_v34, %v12978_v41  ;;  %v2345_v15 = vsub.f32 %v12911_v31, %v12978_v41 }
 0x330   :  { %v2346_v40 = vsub.f32 %v12932_v46, %v12978_v41  ;;  %v2347_v14 = vsub.f32 %v12942_v43, %v12978_v41  ;;  %v2348_v59 = vsub.f32 %v12927_v26, %v12978_v41 }
 0x331   :  { %v2336_v1 = vadd.f32 0.8, %v2335_v29 }
 0x333   :  { %11777 = vrsqrt.f32 %v2336_v1 }
 0x33d   :  { %v11778_v36 = vpop.eup %11777 }
 0x33e   :  { %v2354_v17 = vmul.f32 %v11778_v36, %v2272_v12 }
 0x340   :  { %v13019_v3 = vrot.slane %v2354_v17, %v12259_v55 }
 0x342   :  { %v2359_v49 = vmul.f32 %v13019_v3, %v2338_v2  ;;  %v2360_v20 = vmul.f32 %v13019_v3, %v2339_v38  ;;  %v2361_v32 = vmul.f32 %v13019_v3, %v2340_v16  ;;  %v2362_v7 = vmul.f32 %v13019_v3, %v2341_v13 }
 0x343   :  { %v2363_v60 = vmul.f32 %v13019_v3, %v2342_v11  ;;  %v13039_v29 = vmul.f32 %v13019_v3, %v2351_v56  ;;  %v2368_v46 = vmul.f32 %v13019_v3, %v2347_v14 }
 0x344   :  { %v2381_v47 = vadd.f32 %v13024_v4, %v2359_v49  ;;  %v2382_v19 = vadd.f32 %v13024_v4, %v2360_v20  ;;  %v2383_v23 = vadd.f32 %v13024_v4, %v2361_v32  ;;  %v2384_v45 = vadd.f32 %v13024_v4, %v2362_v7 }
 0x345   :  { %v2385_v49 = vadd.f32 %v13024_v4, %v2363_v60 }
 0x346   :  { %vm2397_vm8 = vcmp.ge.f32.partialorder %v2381_v47, 0.0  ;;  %v2413_v30 = vmul.f32 0.2, %v2381_v47  ;;  %vm2398_vm9 = vcmp.ge.f32.partialorder %v2382_v19, 0.0  ;;  %v2414_v24 = vmul.f32 0.2, %v2382_v19 }
 0x347   :  { %vm2399_vm10 = vcmp.ge.f32.partialorder %v2383_v23, 0.0  ;;  %v2415_v21 = vmul.f32 0.2, %v2383_v23  ;;  %vm2400_vm11 = vcmp.ge.f32.partialorder %v2384_v45, 0.0  ;;  %v2416_v11 = vmul.f32 0.2, %v2384_v45 }
 0x348   :  { %v2429_v42 = vsel %vm2397_vm8, %v2381_v47, %v2413_v30  ;;  %v2430_v58 = vsel %vm2398_vm9, %v2382_v19, %v2414_v24  ;;  %v11663_v19 = vld [vmem:[#allocation7 + $0xc0] sm:$0xff]   ;;  %vm2401_vm12 = vcmp.ge.f32.partialorder %v2385_v49, 0.0 }
 0x349   :  { %v2461_v62 = vcombine.low %v2429_v42, %v2429_v42  ;;  %v2462_v48 = vcombine.high %v2429_v42, %v2429_v42  ;;  %v2431_v37 = vsel %vm2399_vm10, %v2383_v23, %v2415_v21  ;;  %v2463_v22 = vcombine.low %v2430_v58, %v2430_v58  ;;  %4117 = vmatpush1.bf16.msra.mxu1 %v11663_v19 }
 0x34a   :  { %v2464_v54 = vcombine.high %v2430_v58, %v2430_v58  ;;  %v2465_v2 = vcombine.low %v2431_v37, %v2431_v37  ;;  %v2466_v38 = vcombine.high %v2431_v37, %v2431_v37  ;;  %4118 = vmatprep.subr.bf16.mxu1 %v17753_v0 }
 0x34b   :  { %v2531_v39 = vrot.slane %v2461_v62, %v12346_v35  ;;  %v2538_v61 = vrot.slane %v2462_v48, %v12346_v35  ;;  %v2545_v10 = vrot.slane %v2463_v22, %v12346_v35 }
 0x34c   :  { %v2552_v12 = vrot.slane %v2464_v54, %v12346_v35  ;;  %v2559_v36 = vrot.slane %v2465_v2, %v12346_v35  ;;  %v2566_v17 = vrot.slane %v2466_v38, %v12346_v35 }
 0x34d   :  { %v2927_v16 = vrot.slane %v2531_v39, 7  ;;  %v2928_v13 = vrot.slane %v2538_v61, 7  ;;  %v13051_v21 = vrot.slane %v2545_v10, 7 }
 0x34e   :  { %v2931_v42 = vrot.slane %v2552_v12, 7  ;;  %v13053_v62 = vrot.slane %v2559_v36, 7  ;;  %v2432_v36 = vsel %vm2400_vm11, %v2384_v45, %v2416_v11  ;;  %v2364_v45 = vmul.f32 %v13019_v3, %v2343_v5 }
 0x34f   :  { %v2929_v1 = vsel %vm17857_vm1, %v2927_v16, %v2928_v13  ;;  %v3024_v20 = vsel %vm17857_vm1, 0.0, %v2927_v16  ;;  %v3040_v32 = vsel %vm17857_vm1, %v2928_v13, 0.0  ;;  %v3025_v54 = vsel %vm17857_vm1, 0.0, %v13051_v21 }
 0x350   :  { %v3092_v56 = vrot.slane %v2929_v1, 1  ;;  %v3209_v47 = vrot.slane %v2929_v1, 2  ;;  %v3091_v23 = vrot.slane %v3024_v20, 1  ;;  %v3094_v9 = vrot.slane %v3040_v32, 1 }
 0x351   :  { %v3208_v30 = vrot.slane %v3024_v20, 2  ;;  %v3211_v7 = vrot.slane %v3040_v32, 2  ;;  %v13049_v24 = vpack.c.bf16 %v2929_v1, %v2927_v16  ;;  %v13066_v22 = vsel %vm17857_vm1, %v13051_v21, %v2931_v42 }
 0x352   :  { %v3093_v48 = vsel %vm17851_vm2, %v3091_v23, %v3092_v56  ;;  %v3095_v58 = vsel %vm17851_vm2, %v3092_v56, %v3094_v9  ;;  %v3041_v2 = vsel %vm17857_vm1, %v2931_v42, 0.0  ;;  %v3213_v38 = vrot.slane %v3025_v54, 2 }
 0x353   :  { %18043 = vst [vmem:[#allocation18_spill] sm:$0xff] %v13049_v24  ;;  %v3210_v37 = vsel %vm17854_vm3, %v3208_v30, %v3209_v47  ;;  %v3212_v39 = vsel %vm17854_vm3, %v3209_v47, %v3211_v7  ;;  %v13060_v61 = vpack.c.bf16 %v3095_v58, %v3093_v48  ;;  %v3214_v16 = vrot.slane %v13066_v22, 2 }
 0x354   :  { %v13062_v60 = vpack.c.bf16 %v3212_v39, %v3210_v37  ;;  %v2934_v13 = vrot.slane %v2566_v17, 7  ;;  %v3216_v1 = vrot.slane %v3041_v2, 2  ;;  %v13076_v10 = vsel %vm17857_vm1, 0.0, %v13053_v62 }
 0x355   :  { %18044 = vst [vmem:[#allocation19_spill] sm:$0xff] %v13060_v61  ;;  %3851 = vmatprep.mubr.bf16.mxu1 %v13060_v61  ;;  %v3096_v12 = vrot.slane %v3025_v54, 1  ;;  %v3215_v20 = vsel %vm17854_vm3, %v3213_v38, %v3214_v16  ;;  %v3097_v56 = vrot.slane %v13066_v22, 1  ;;  %v2365_v11 = vmul.f32 %v13019_v3, %v2344_v51 }
 0x356   :  { %18045 = vst [vmem:[#allocation20_spill] sm:$0xff] %v13062_v60  ;;  %10506 = vmatprep.mubr.bf16.mxu0 %v13062_v60  ;;  %9271 = vmatmul.mubr.msk.bf16.gmra.mrb[92].mxu1 %vm12853_vm7, %v13049_v24  ;;  %v13085_v17 = vsel %vm17857_vm1, %v13053_v62, %v2934_v13  ;;  %v13088_v32 = vsel %vm17857_vm1, %v2934_v13, 0.0  ;;  %v3217_v47 = vsel %vm17854_vm3, %v3214_v16, %v3216_v1  ;;  %v3218_v23 = vrot.slane %v13076_v10, 2 }
 0x357   :  { %3859 = vmatprep.mubr.bf16.mxu1 %v13060_v61  ;;  %v13101_v19 = vpack.c.bf16 %v3217_v47, %v3215_v20  ;;  %v3099_v9 = vrot.slane %v3041_v2, 1  ;;  %v2467_v30 = vcombine.low %v2432_v36, %v2432_v36  ;;  %v3219_v7 = vrot.slane %v13085_v17, 2 }
 0x358   :  { %v3221_v42 = vrot.slane %v13088_v32, 2  ;;  %v2468_v48 = vcombine.high %v2432_v36, %v2432_v36  ;;  %v2417_v58 = vmul.f32 0.2, %v2385_v49  ;;  %v3098_v57 = vsel %vm17851_vm2, %v3096_v12, %v3097_v56 }
 0x359   :  { %18046 = vst [vmem:[#allocation21_spill] sm:$0xff] %v13101_v19  ;;  %10507 = vmatmul.mubr.bf16.vlgmr.msra.gmra.mrb[88].mxu0 %v13101_v19  ;;  %v3100_v34 = vsel %vm17851_vm2, %v3097_v56, %v3099_v9  ;;  %v2573_v5 = vrot.slane %v2467_v30, %v12346_v35  ;;  %v2394_v51 = vadd.f32 %v13024_v4, %v13039_v29 }
 0x35a   :  { %10510 = vmatprep.mubr.bf16.mxu0 %v13101_v19  ;;  %v2580_v37 = vrot.slane %v2468_v48, %v12346_v35  ;;  %v2433_v39 = vsel %vm2401_vm12, %v2385_v49, %v2417_v58  ;;  %v2386_v54 = vadd.f32 %v13024_v4, %v2364_v45  ;;  %v2387_v13 = vadd.f32 %v13024_v4, %v2365_v11 }
 0x35b   :  { %v13116_v2 = vrot.slane %v2573_v5, 7  ;;  %v2469_v38 = vcombine.low %v2433_v39, %v2433_v39  ;;  %v2470_v16 = vcombine.high %v2433_v39, %v2433_v39  ;;  %v3220_v1 = vsel %vm17854_vm3, %v3218_v23, %v3219_v7  ;;  %v11664_v23 = vld [vmem:[#allocation7 + $0xc8] sm:$0xff]  }
 0x35c   :  { %v3222_v12 = vsel %vm17854_vm3, %v3219_v7, %v3221_v42  ;;  %v13121_v36 = vpack.c.bf16 %v3100_v34, %v3098_v57  ;;  %v2937_v29 = vrot.slane %v2580_v37, 7  ;;  %vm2410_vm13 = vcmp.ge.f32.partialorder %v2394_v51, 0.0  ;;  %4119 = vmatpush1.bf16.msra.mxu1 %v11664_v23 }
 0x35d   :  { %v13128_v49 = vsel %vm17857_vm1, 0.0, %v13116_v2  ;;  %v2587_v20 = vrot.slane %v2469_v38, %v12346_v35  ;;  %v2594_v56 = vrot.slane %v2470_v16, %v12346_v35  ;;  %v2426_v47 = vmul.f32 0.2, %v2394_v51  ;;  %4120 = vmatprep.subr.bf16.mxu1 %v17753_v0 }
 0x35e   :  { %18047 = vst [vmem:[#allocation22_spill] sm:$0xff] %v13121_v36  ;;  %9275 = vmatmul.mubr.msk.bf16.gmra.mrb[96].mxu1 %vm12853_vm7, %v13049_v24  ;;  %v13135_v45 = vsel %vm17857_vm1, %v13116_v2, %v2937_v29  ;;  %v13138_v11 = vsel %vm17857_vm1, %v2937_v29, 0.0  ;;  %v13140_v9 = vpack.c.bf16 %v3222_v12, %v3220_v1  ;;  %v3223_v30 = vrot.slane %v13128_v49, 2 }
 0x35f   :  { %3867 = vmatprep.mubr.bf16.mxu1 %v13121_v36  ;;  %v3224_v7 = vrot.slane %v13135_v45, 2  ;;  %vm2402_vm14 = vcmp.ge.f32.partialorder %v2386_v54, 0.0  ;;  %v3226_v42 = vrot.slane %v13138_v11, 2  ;;  %v2418_v48 = vmul.f32 0.2, %v2386_v54 }
 0x360   :  { %18048 = vst [vmem:[#allocation23_spill] sm:$0xff] %v13140_v9  ;;  %vm2403_vm15 = vcmp.ge.f32.partialorder %v2387_v13, 0.0  ;;  %v2419_v58 = vmul.f32 0.2, %v2387_v13  ;;  %v13146_v57 = vrot.slane %v2587_v20, 7  ;;  %v2940_v34 = vrot.slane %v2594_v56, 7 }
 0x361   :  { %10511 = vmatmul.mubr.bf16.gmra.mrb[92].mxu0 %v13140_v9  ;;  %v2442_v5 = vsel %vm2410_vm13, %v2394_v51, %v2426_v47  ;;  %v13153_v37 = vpack.c.bf16 %v13066_v22, %v13051_v21  ;;  %v3101_v39 = vrot.slane %v13076_v10, 1  ;;  %v3102_v38 = vrot.slane %v13085_v17, 1 }
 0x362   :  { %10514 = vmatprep.mubr.bf16.mxu0 %v13140_v9  ;;  %v3104_v16 = vrot.slane %v13088_v32, 1  ;;  %v2434_v1 = vsel %vm2402_vm14, %v2386_v54, %v2418_v48  ;;  %v2435_v12 = vsel %vm2403_vm15, %v2387_v13, %v2419_v58  ;;  %v3225_v29 = vsel %vm17854_vm3, %v3223_v30, %v3224_v7 }
 0x363   :  { %18049 = vst [vmem:[#allocation24_spill] sm:$0xff] %v13153_v37  ;;  %v3227_v20 = vsel %vm17854_vm3, %v3224_v7, %v3226_v42  ;;  %v2471_v51 = vcombine.low %v2434_v1, %v2434_v1  ;;  %v2472_v56 = vcombine.high %v2434_v1, %v2434_v1  ;;  %v2487_v47 = vcombine.low %v2442_v5, %v2442_v5 }
 0x364   :  { %v13166_v21 = vsel %vm17857_vm1, %v13146_v57, %v2940_v34  ;;  %v13170_v22 = vsel %vm17857_vm1, 0.0, %v13146_v57  ;;  %v13173_v10 = vsel %vm17857_vm1, %v2940_v34, 0.0  ;;  %v2473_v13 = vcombine.low %v2435_v12, %v2435_v12 }
 0x365   :  { %v2601_v32 = vrot.slane %v2471_v51, %v12346_v35  ;;  %v2608_v54 = vrot.slane %v2472_v56, %v12346_v35  ;;  %v2474_v23 = vcombine.high %v2435_v12, %v2435_v12  ;;  %v13178_v30 = vpack.c.bf16 %v3227_v20, %v3225_v29 }
 0x366   :  { %9279 = vmatmul.mubr.msk.bf16.gmra.mrb[100].mxu1 %vm12853_vm7, %v13153_v37  ;;  %v3103_v7 = vsel %vm17851_vm2, %v3101_v39, %v3102_v38  ;;  %v3105_v42 = vsel %vm17851_vm2, %v3102_v38, %v3104_v16  ;;  %v2366_v48 = vmul.f32 %v13019_v3, %v2345_v15  ;;  %v3228_v58 = vrot.slane %v13170_v22, 2 }
 0x367   :  { %3875 = vmatprep.mubr.bf16.mxu1 %v13121_v36  ;;  %18050 = vst [vmem:[#allocation25_spill] sm:$0xff] %v13178_v30  ;;  %v3229_v34 = vrot.slane %v13166_v21, 2  ;;  %v3231_v1 = vrot.slane %v13173_v10, 2  ;;  %v13189_v51 = vrot.slane %v2601_v32, 7  ;;  %v2943_v12 = vrot.slane %v2608_v54, 7 }
 0x368   :  { %v2388_v39 = vadd.f32 %v13024_v4, %v2366_v48  ;;  %v2488_v29 = vcombine.high %v2442_v5, %v2442_v5  ;;  %v2713_v38 = vrot.slane %v2487_v47, %v12346_v35  ;;  %v2615_v31 = vrot.slane %v2473_v13, %v12346_v35  ;;  %v11665_v48 = vld [vmem:[#allocation7 + $0xd0] sm:$0xff]  }
 0x369   :  { %10515 = vmatmul.mubr.bf16.gmra.mrb[96].mxu0 %v13178_v30  ;;  %v2622_v15 = vrot.slane %v2474_v23, %v12346_v35  ;;  %v13197_v16 = vpack.c.bf16 %v3105_v42, %v3103_v7  ;;  %v3230_v20 = vsel %vm17854_vm3, %v3228_v58, %v3229_v34  ;;  %v3232_v56 = vsel %vm17854_vm3, %v3229_v34, %v3231_v1 }
 0x36a   :  { %10518 = vmatprep.mubr.bf16.mxu0 %v13178_v30  ;;  %v13203_v32 = vsel %vm17857_vm1, 0.0, %v13189_v51  ;;  %vm2404_vm0 = vcmp.ge.f32.partialorder %v2388_v39, 0.0  ;;  %v13210_v5 = vsel %vm17857_vm1, %v13189_v51, %v2943_v12  ;;  %v13213_v47 = vsel %vm17857_vm1, %v2943_v12, 0.0  ;;  %4121 = vmatpush1.bf16.msra.mxu1 %v11665_v48 }
 0x36b   :  { %18051 = vst [vmem:[#allocation26_spill] sm:$0xff] %v13197_v16  ;;  %v2420_v54 = vmul.f32 0.2, %v2388_v39  ;;  %v13216_v13 = vrot.slane %v2488_v29, %v12346_v35  ;;  %v13218_v23 = vrot.slane %v2713_v38, 7  ;;  %v13221_v7 = vrot.slane %v2615_v31, 7  ;;  %4122 = vmatprep.subr.bf16.mxu1 %v17753_v0 }
 0x36c   :  { %v2946_v42 = vrot.slane %v2622_v15, 7  ;;  %v13223_v58 = vpack.c.bf16 %v3232_v56, %v3230_v20  ;;  %v3233_v34 = vrot.slane %v13203_v32, 2  ;;  %v2367_v12 = vmul.f32 %v13019_v3, %v2346_v40 }
 0x36d   :  { %18052 = vst [vmem:[#allocation27_spill] sm:$0xff] %v13218_v23  ;;  %v2436_v1 = vsel %vm2404_vm0, %v2388_v39, %v2420_v54  ;;  %v3234_v29 = vrot.slane %v13210_v5, 2  ;;  %v3236_v38 = vrot.slane %v13213_v47, 2  ;;  %v13235_v31 = vpack.c.bf16 %v13085_v17, %v13053_v62 }
 0x36e   :  { %9283 = vmatmul.mubr.msk.bf16.gmra.mrb[104].mxu1 %vm12853_vm7, %v13153_v37  ;;  %18053 = vst [vmem:[#allocation28_spill] sm:$0xff] %v13223_v58  ;;  %v2475_v63 = vcombine.low %v2436_v1, %v2436_v1  ;;  %v2476_v27 = vcombine.high %v2436_v1, %v2436_v1  ;;  %v2389_v39 = vadd.f32 %v13024_v4, %v2367_v12  ;;  %v13253_v62 = vsel %vm17857_vm1, 0.0, %v13221_v7 }
 0x36f   :  { %3883 = vmatprep.mubr.bf16.mxu1 %v13197_v16  ;;  %18054 = vst [vmem:[#allocation29_spill] sm:$0xff] %v13235_v31  ;;  %v2369_v40 = vmul.f32 %v13019_v3, %v2348_v59  ;;  %v13249_v15 = vsel %vm17857_vm1, %v13221_v7, %v2946_v42  ;;  %v13256_v17 = vsel %vm17857_vm1, %v2946_v42, 0.0  ;;  %v2390_v59 = vadd.f32 %v13024_v4, %v2368_v46 }
 0x370   :  { %v2629_v43 = vrot.slane %v2475_v63, %v12346_v35  ;;  %v2636_v26 = vrot.slane %v2476_v27, %v12346_v35  ;;  %vm2405_vm4 = vcmp.ge.f32.partialorder %v2389_v39, 0.0  ;;  %v2421_v14 = vmul.f32 0.2, %v2389_v39 }
 0x371   :  { %10519 = vmatmul.mubr.bf16.gmra.mrb[100].mxu0 %v13223_v58  ;;  %v2967_v20 = vrot.slane %v13216_v13, 7  ;;  %v3235_v56 = vsel %vm17854_vm3, %v3233_v34, %v3234_v29  ;;  %v3237_v54 = vsel %vm17854_vm3, %v3234_v29, %v3236_v38  ;;  %v2391_v48 = vadd.f32 %v13024_v4, %v2369_v40 }
 0x372   :  { %10522 = vmatprep.mubr.bf16.mxu0 %v13223_v58  ;;  %v3106_v63 = vrot.slane %v13128_v49, 1  ;;  %v3107_v27 = vrot.slane %v13135_v45, 1  ;;  %v3109_v42 = vrot.slane %v13138_v11, 1  ;;  %v2437_v1 = vsel %vm2405_vm4, %v2389_v39, %v2421_v14 }
 0x373   :  { %v3238_v13 = vrot.slane %v13253_v62, 2  ;;  %v3239_v34 = vrot.slane %v13249_v15, 2  ;;  %v3241_v12 = vrot.slane %v13256_v17, 2  ;;  %v2422_v29 = vmul.f32 0.2, %v2390_v59 }
 0x374   :  { %v13276_v38 = vpack.c.bf16 %v3237_v54, %v3235_v56  ;;  %v13278_v46 = vrot.slane %v2629_v43, 7  ;;  %v2949_v40 = vrot.slane %v2636_v26, 7  ;;  %vm2406_vm5 = vcmp.ge.f32.partialorder %v2390_v59, 0.0 }
 0x375   :  { %v2477_v49 = vcombine.low %v2437_v1, %v2437_v1  ;;  %v2478_v0 = vcombine.high %v2437_v1, %v2437_v1  ;;  %v2423_v44 = vmul.f32 0.2, %v2391_v48  ;;  %v3108_v11 = vsel %vm17851_vm2, %v3106_v63, %v3107_v27 }
 0x376   :  { %9287 = vmatmul.mubr.msk.bf16.gmra.mrb[108].mxu1 %vm12853_vm7, %v13235_v31  ;;  %18055 = vst [vmem:[#allocation30_spill] sm:$0xff] %v13276_v38  ;;  %v3110_v39 = vsel %vm17851_vm2, %v3107_v27, %v3109_v42  ;;  %vm2407_vm6 = vcmp.ge.f32.partialorder %v2391_v48, 0.0  ;;  %v13285_v14 = vsel %vm17857_vm1, 0.0, %v13218_v23  ;;  %v13288_v56 = vsel %vm17857_vm1, %v2967_v20, 0.0 }
 0x377   :  { %3891 = vmatprep.mubr.bf16.mxu1 %v13197_v16  ;;  %v3240_v43 = vsel %vm17854_vm3, %v3238_v13, %v3239_v34  ;;  %v2438_v26 = vsel %vm2406_vm5, %v2390_v59, %v2422_v29  ;;  %v3242_v54 = vsel %vm17854_vm3, %v3239_v34, %v3241_v12  ;;  %v13295_v63 = vsel %vm17857_vm1, %v13278_v46, %v2949_v40 }
 0x378   :  { %v13299_v27 = vsel %vm17857_vm1, 0.0, %v13278_v46  ;;  %v13302_v42 = vsel %vm17857_vm1, %v2949_v40, 0.0  ;;  %v13304_v1 = vpack.c.bf16 %v3110_v39, %v3108_v11  ;;  %v2643_v50 = vrot.slane %v2477_v49, %v12346_v35 }
 0x379   :  { %10523 = vmatmul.mubr.bf16.gmra.mrb[104].mxu0 %v13276_v38  ;;  %v2650_v13 = vrot.slane %v2478_v0, %v12346_v35  ;;  %v2439_v59 = vsel %vm2407_vm6, %v2391_v48, %v2423_v44  ;;  %v3111_v34 = vrot.slane %v13170_v22, 1  ;;  %v3112_v12 = vrot.slane %v13166_v21, 1  ;;  %v11666_v44 = vld [vmem:[#allocation7 + $0xd8] sm:$0xff]  }
 0x37a   :  { %10526 = vmatprep.mubr.bf16.mxu0 %v13276_v38  ;;  %18056 = vst [vmem:[#allocation31_spill] sm:$0xff] %v13304_v1  ;;  %v2479_v29 = vcombine.low %v2438_v26, %v2438_v26  ;;  %v2480_v55 = vcombine.high %v2438_v26, %v2438_v26  ;;  %v13313_v16 = vpack.c.bf16 %v3242_v54, %v3240_v43  ;;  %v3243_v40 = vrot.slane %v13299_v27, 2 }
 0x37b   :  { %v3244_v49 = vrot.slane %v13295_v63, 2  ;;  %v3246_v0 = vrot.slane %v13302_v42, 2  ;;  %v2481_v48 = vcombine.low %v2439_v59, %v2439_v59  ;;  %v2482_v11 = vcombine.high %v2439_v59, %v2439_v59  ;;  %4123 = vmatpush1.bf16.msra.mxu1 %v11666_v44 }
 0x37c   :  { %18057 = vst [vmem:[#allocation32_spill] sm:$0xff] %v13313_v16  ;;  %v18058_v22 = vsub.f32 %v12936_v33, %v12978_v41  ;;  %v18059_v43 = vsub.f32 %v12955_v28, %v12978_v41  ;;  %v13329_v54 = vsel %vm17857_vm1, %v13218_v23, %v2967_v20  ;;  %v3114_v36 = vrot.slane %v13173_v10, 1 }
 0x37d   :  { %v13332_v61 = vrot.slane %v2643_v50, 7  ;;  %v2952_v38 = vrot.slane %v2650_v13, 7  ;;  %v2657_v28 = vrot.slane %v2479_v29, %v12346_v35  ;;  %v3245_v10 = vsel %vm17854_vm3, %v3243_v40, %v3244_v49 }
 0x37e   :  { %9291 = vmatmul.mubr.msk.bf16.gmra.mrb[112].mxu1 %vm12853_vm7, %v13235_v31  ;;  %v2370_v39 = vmul.f32 %v13019_v3, %v18058_v22  ;;  %v2371_v26 = vmul.f32 %v13019_v3, %v18059_v43  ;;  %v2664_v22 = vrot.slane %v2480_v55, %v12346_v35  ;;  %v18060_v43 = vmov 0  }
 0x37f   :  { %3899 = vmatprep.mubr.bf16.mxu1 %v13304_v1  ;;  %4124 = vmatprep.subr.bf16.mxu1 %v18060_v43  ;;  %v3247_v50 = vsel %vm17854_vm3, %v3244_v49, %v3246_v0  ;;  %v13347_v44 = vpack.c.bf16 %v13135_v45, %v13116_v2  ;;  %v3113_v29 = vsel %vm17851_vm2, %v3111_v34, %v3112_v12  ;;  %v13359_v49 = vsel %vm17857_vm1, 0.0, %v13332_v61 }
 0x380   :  { %v2392_v20 = vadd.f32 %v13024_v4, %v2370_v39  ;;  %v2393_v13 = vadd.f32 %v13024_v4, %v2371_v26  ;;  %v2671_v55 = vrot.slane %v2481_v48, %v12346_v35  ;;  %v2678_v33 = vrot.slane %v2482_v11, %v12346_v35 }
 0x381   :  { %10527 = vmatmul.mubr.bf16.gmra.mrb[108].mxu0 %v13313_v16  ;;  %18061 = vst [vmem:[#allocation33_spill] sm:$0xff] %v13347_v44  ;;  %v3115_v59 = vsel %vm17851_vm2, %v3112_v12, %v3114_v36  ;;  %v13355_v40 = vsel %vm17857_vm1, %v13332_v61, %v2952_v38  ;;  %v13363_v2 = vpack.c.bf16 %v13166_v21, %v13146_v57  ;;  %v13370_v34 = vrot.slane %v2657_v28, 7 }
 0x382   :  { %10530 = vmatprep.mubr.bf16.mxu0 %v13313_v16  ;;  %v13368_v45 = vpack.c.bf16 %v3247_v50, %v3245_v10  ;;  %v2955_v36 = vrot.slane %v2664_v22, 7  ;;  %vm2408_vm8 = vcmp.ge.f32.partialorder %v2392_v20, 0.0  ;;  %v13374_v12 = vsel %vm17857_vm1, %v2952_v38, 0.0 }
 0x383   :  { %v2424_v0 = vmul.f32 0.2, %v2392_v20  ;;  %vm2409_vm9 = vcmp.ge.f32.partialorder %v2393_v13, 0.0  ;;  %v2425_v48 = vmul.f32 0.2, %v2393_v13  ;;  %v3248_v57 = vrot.slane %v13359_v49, 2 }
 0x384   :  { %18062 = vst [vmem:[#allocation34_spill] sm:$0xff] %v13368_v45  ;;  %v3249_v21 = vrot.slane %v13355_v40, 2  ;;  %v13378_v11 = vrot.slane %v2671_v55, 7  ;;  %v2958_v39 = vrot.slane %v2678_v33, 7  ;;  %v13380_v26 = vpack.c.bf16 %v3115_v59, %v3113_v29 }
 0x385   :  { %v3116_v28 = vrot.slane %v13203_v32, 1  ;;  %v3117_v22 = vrot.slane %v13210_v5, 1  ;;  %v2440_v10 = vsel %vm2408_vm8, %v2392_v20, %v2424_v0  ;;  %v3251_v38 = vrot.slane %v13374_v12, 2 }
 0x386   :  { %9295 = vmatmul.mubr.msk.bf16.gmra.mrb[116].mxu1 %vm12853_vm7, %v13347_v44  ;;  %v13388_v50 = vsel %vm17857_vm1, %v13370_v34, %v2955_v36  ;;  %v13392_v55 = vsel %vm17857_vm1, 0.0, %v13370_v34  ;;  %v2441_v33 = vsel %vm2409_vm9, %v2393_v13, %v2425_v48  ;;  %v13396_v32 = vsel %vm17857_vm1, %v2955_v36, 0.0 }
 0x387   :  { %3907 = vmatprep.mubr.bf16.mxu1 %v13304_v1  ;;  %v2483_v59 = vcombine.low %v2440_v10, %v2440_v10  ;;  %v2484_v20 = vcombine.high %v2440_v10, %v2440_v10  ;;  %v18063_v29 = vsub.f32 %v12950_v25, %v12978_v41  ;;  %v3250_v1 = vsel %vm17854_vm3, %v3248_v57, %v3249_v21 }
 0x388   :  { %v13405_v16 = vsel %vm17857_vm1, %v13378_v11, %v2958_v39  ;;  %v13409_v13 = vsel %vm17857_vm1, 0.0, %v13378_v11  ;;  %v3119_v36 = vrot.slane %v13213_v47, 1  ;;  %v13413_v48 = vsel %vm17857_vm1, %v2958_v39, 0.0 }
 0x389   :  { %10531 = vmatmul.mubr.bf16.gmra.mrb[112].mxu0 %v13368_v45  ;;  %v2373_v0 = vmul.f32 %v13019_v3, %v18063_v29  ;;  %v2485_v10 = vcombine.low %v2441_v33, %v2441_v33  ;;  %v3252_v57 = vsel %vm17854_vm3, %v3249_v21, %v3251_v38  ;;  %v3253_v29 = vrot.slane %v13392_v55, 2 }
 0x38a   :  { %10534 = vmatprep.mubr.bf16.mxu0 %v13368_v45  ;;  %v2486_v45 = vcombine.high %v2441_v33, %v2441_v33  ;;  %v3254_v58 = vrot.slane %v13388_v50, 2  ;;  %v3256_v30 = vrot.slane %v13396_v32, 2  ;;  %v2685_v47 = vrot.slane %v2483_v59, %v12346_v35 }
 0x38b   :  { %v2395_v25 = vadd.f32 %v13024_v4, %v2373_v0  ;;  %v2692_v39 = vrot.slane %v2484_v20, %v12346_v35  ;;  %v11667_v0 = vld [vmem:[#allocation7 + $0xe0] sm:$0xff]   ;;  %v3258_v9 = vrot.slane %v13409_v13, 2  ;;  %v3261_v21 = vrot.slane %v13413_v48, 2 }
 0x38c   :  { %v3118_v38 = vsel %vm17851_vm2, %v3116_v28, %v3117_v22  ;;  %v13430_v31 = vpack.c.bf16 %v3252_v57, %v3250_v1  ;;  %v3120_v19 = vsel %vm17851_vm2, %v3117_v22, %v3119_v36  ;;  %v2699_v37 = vrot.slane %v2485_v10, %v12346_v35  ;;  %4125 = vmatpush1.bf16.msra.mxu1 %v11667_v0 }
 0x38d   :  { %vm2411_vm10 = vcmp.ge.f32.partialorder %v2395_v25, 0.0  ;;  %v2427_v33 = vmul.f32 0.2, %v2395_v25  ;;  %v2706_v59 = vrot.slane %v2486_v45, %v12346_v35  ;;  %v3255_v20 = vsel %vm17854_vm3, %v3253_v29, %v3254_v58  ;;  %4126 = vmatprep.subr.bf16.mxu1 %v18060_v43 }
 0x38e   :  { %9299 = vmatmul.mubr.msk.bf16.gmra.mrb[120].mxu1 %vm12853_vm7, %v13347_v44  ;;  %v3259_v44 = vrot.slane %v13405_v16, 2  ;;  %v3257_v60 = vsel %vm17854_vm3, %v3254_v58, %v3256_v30  ;;  %v3121_v24 = vrot.slane %v13253_v62, 1  ;;  %v13442_v1 = vrot.slane %v2685_v47, 7 }
 0x38f   :  { %3915 = vmatprep.mubr.bf16.mxu1 %v13380_v26  ;;  %v2443_v23 = vsel %vm2411_vm10, %v2395_v25, %v2427_v33  ;;  %v2961_v28 = vrot.slane %v2692_v39, 7  ;;  %v3122_v45 = vrot.slane %v13249_v15, 1  ;;  %v13447_v57 = vpack.c.bf16 %v3120_v19, %v3118_v38 }
 0x390   :  { %v2489_v22 = vcombine.low %v2443_v23, %v2443_v23  ;;  %v3260_v36 = vsel %vm17854_vm3, %v3258_v9, %v3259_v44  ;;  %v3262_v10 = vsel %vm17854_vm3, %v3259_v44, %v3261_v21  ;;  %v3124_v30 = vrot.slane %v13256_v17, 1 }
 0x391   :  { %10535 = vmatmul.mubr.bf16.gmra.mrb[116].mxu0 %v12254_v53  ;;  %v13450_v58 = vrot.slane %v2699_v37, 7  ;;  %v2964_v62 = vrot.slane %v2706_v59, 7  ;;  %v2490_v25 = vcombine.high %v2443_v23, %v2443_v23  ;;  %v13454_v29 = vpack.c.bf16 %v13295_v63, %v13278_v46 }
 0x392   :  { %10538 = vmatprep.mubr.bf16.mxu0 %v13430_v31  ;;  %v13459_v47 = vpack.c.bf16 %v3257_v60, %v3255_v20  ;;  %v13463_v19 = vpack.c.bf16 %v13210_v5, %v13189_v51  ;;  %v2727_v9 = vrot.slane %v2489_v22, %v12346_v35  ;;  %v18064_v37 = vsub.f32 %v12959_v18, %v12978_v41 }
 0x393   :  { %v13471_v17 = vpack.c.bf16 %v3262_v10, %v3260_v36  ;;  %v13475_v46 = vsel %vm17857_vm1, %v13442_v1, %v2961_v28  ;;  %v3035_v60 = vsel %vm17857_vm1, 0.0, %v13442_v1  ;;  %v13480_v51 = vsel %vm17851_vm2, %v3121_v24, %v3122_v45 }
 0x394   :  { %v2374_v23 = vmul.f32 %v13019_v3, %v18064_v37  ;;  %v13483_v5 = vsel %vm17857_vm1, %v2961_v28, 0.0  ;;  %v13488_v41 = vpack.c.bf16 %v13355_v40, %v13332_v61  ;;  %v3136_v3 = vrot.slane %v13392_v55, 1 }
 0x395   :  { %v13493_v44 = vsel %vm17857_vm1, %v13450_v58, %v2964_v62  ;;  %v13496_v39 = vsel %vm17851_vm2, %v3122_v45, %v3124_v30  ;;  %v2734_v24 = vrot.slane %v2490_v25, %v12346_v35  ;;  %v3137_v33 = vrot.slane %v13388_v50, 1 }
 0x396   :  { %9303 = vmatmul.mubr.msk.bf16.gmra.mrb[124].mxu1 %vm12853_vm7, %v13363_v2  ;;  %v2396_v18 = vadd.f32 %v13024_v4, %v2374_v23  ;;  %v3263_v4 = vrot.slane %v3035_v60, 2  ;;  %v13503_v61 = vsel %vm17857_vm1, 0.0, %v13450_v58  ;;  %v13505_v0 = vrot.slane %v2727_v9, 7 }
 0x397   :  { %3923 = vmatprep.mubr.bf16.mxu1 %v13380_v26  ;;  %v3264_v55 = vrot.slane %v13475_v46, 2  ;;  %v3266_v21 = vrot.slane %v13483_v5, 2  ;;  %v13511_v38 = vsel %vm17857_vm1, %v2964_v62, 0.0  ;;  %v3138_v20 = vsel %vm17851_vm2, %v3136_v3, %v3137_v33 }
 0x398   :  { %vm2412_vm11 = vcmp.ge.f32.partialorder %v2396_v18, 0.0  ;;  %v2428_v59 = vmul.f32 0.2, %v2396_v18  ;;  %v3139_v28 = vrot.slane %v13396_v32, 1  ;;  %v13517_v45 = vpack.c.bf16 %v13388_v50, %v13370_v34 }
 0x399   :  { %10539 = vmatmul.mubr.bf16.gmra.mrb[120].mxu0 %v13459_v47  ;;  %v3141_v22 = vrot.slane %v13409_v13, 1  ;;  %v3268_v36 = vrot.slane %v13503_v61, 2  ;;  %v2970_v10 = vrot.slane %v2734_v24, 7  ;;  %v3142_v25 = vrot.slane %v13405_v16, 1 }
 0x39a   :  { %10542 = vmatprep.mubr.bf16.mxu0 %v13459_v47  ;;  %v2444_v30 = vsel %vm2412_vm11, %v2396_v18, %v2428_v59  ;;  %v13527_v62 = vsel %vm17857_vm1, 0.0, %v13505_v0  ;;  %v3140_v34 = vsel %vm17851_vm2, %v3137_v33, %v3139_v28  ;;  %v3144_v37 = vrot.slane %v13413_v48, 1  ;;  %v11668_v18 = vld [vmem:[#allocation7 + $0xe8] sm:$0xff]  }
 0x39b   :  { %v2491_v32 = vcombine.low %v2444_v30, %v2444_v30  ;;  %v2492_v9 = vcombine.high %v2444_v30, %v2444_v30  ;;  %v13531_v50 = vpack.c.bf16 %v3140_v34, %v3138_v20  ;;  %v3143_v13 = vsel %vm17851_vm2, %v3141_v22, %v3142_v25  ;;  %4127 = vmatpush1.bf16.msra.mxu1 %v11668_v18 }
 0x39c   :  { %v13537_v23 = vpack.c.bf16 %v13405_v16, %v13378_v11  ;;  %v3146_v59 = vrot.slane %v3035_v60, 1  ;;  %v3147_v33 = vrot.slane %v13475_v46, 1  ;;  %v3145_v28 = vsel %vm17851_vm2, %v3142_v25, %v3144_v37  ;;  %4128 = vmatprep.subr.bf16.mxu1 %v18060_v43 }
 0x39d   :  { %v2741_v3 = vrot.slane %v2491_v32, %v12346_v35  ;;  %v2748_v24 = vrot.slane %v2492_v9, %v12346_v35  ;;  %v3149_v20 = vrot.slane %v13483_v5, 1  ;;  %v13546_v22 = vpack.c.bf16 %v13475_v46, %v13442_v1 }
 0x39e   :  { %9307 = vmatmul.mubr.msk.bf16.gmra.mrb[128].mxu1 %vm12853_vm7, %v13363_v2  ;;  %v3151_v48 = vrot.slane %v13503_v61, 1  ;;  %v13550_v30 = vpack.c.bf16 %v3145_v28, %v3143_v13  ;;  %v3148_v35 = vsel %vm17851_vm2, %v3146_v59, %v3147_v33  ;;  %v3152_v1 = vrot.slane %v13493_v44, 1 }
 0x39f   :  { %3931 = vmatprep.mubr.bf16.mxu1 %v13447_v57  ;;  %v2972_v16 = vrot.slane %v2741_v3, 7  ;;  %v2973_v11 = vrot.slane %v2748_v24, 7  ;;  %v3150_v60 = vsel %vm17851_vm2, %v3147_v33, %v3149_v20  ;;  %v3154_v46 = vrot.slane %v13511_v38, 1 }
 0x3a0   :  { %v13560_v5 = vpack.c.bf16 %v13493_v44, %v13450_v58  ;;  %v3265_v25 = vsel %vm17854_vm3, %v3263_v4, %v3264_v55  ;;  %v3269_v32 = vrot.slane %v13493_v44, 2  ;;  %v13566_v9 = vsel %vm17857_vm1, %v13505_v0, %v2970_v10 }
 0x3a1   :  { %10543 = vmatmul.mubr.bf16.gmra.mrb[124].mxu0 %v13471_v17  ;;  %v13568_v34 = vpack.c.bf16 %v3150_v60, %v3148_v35  ;;  %v3267_v13 = vsel %vm17854_vm3, %v3264_v55, %v3266_v21  ;;  %v3271_v37 = vrot.slane %v13511_v38, 2  ;;  %v13573_v18 = vsel %vm17857_vm1, %v2970_v10, 0.0 }
 0x3a2   :  { %10546 = vmatprep.mubr.bf16.mxu0 %v13471_v17  ;;  %v3153_v58 = vsel %vm17851_vm2, %v3151_v48, %v3152_v1  ;;  %v13580_v44 = vsel %vm17857_vm1, 0.0, %v2972_v16  ;;  %v3155_v4 = vsel %vm17851_vm2, %v3152_v1, %v3154_v46  ;;  %v3157_v3 = vrot.slane %v13329_v54, 1 }
 0x3a3   :  { %v3161_v55 = vrot.slane %v13527_v62, 1  ;;  %v13587_v21 = vsel %vm17857_vm1, %v2972_v16, %v2973_v11  ;;  %v13590_v38 = vsel %vm17857_vm1, %v2973_v11, 0.0  ;;  %v13592_v10 = vpack.c.bf16 %v3155_v4, %v3153_v58 }
 0x3a4   :  { %v3162_v24 = vrot.slane %v13566_v9, 1  ;;  %v13595_v59 = vpack.c.bf16 %v3267_v13, %v3265_v25  ;;  %v18065_v33 = vrot.slane %v13285_v14, 1  ;;  %v18066_v20 = vrot.slane %v13288_v56, 1 }
 0x3a5   :  { %v3164_v35 = vrot.slane %v13573_v18, 1  ;;  %v13609_v1 = vpack.c.bf16 %v13566_v9, %v13505_v0  ;;  %v3166_v46 = vrot.slane %v13580_v44, 1  ;;  %v3167_v13 = vrot.slane %v13587_v21, 1 }
 0x3a6   :  { %9311 = vmatmul.mubr.msk.bf16.gmra.mrb[132].mxu1 %vm12853_vm7, %v13463_v19  ;;  %v3158_v28 = vsel %vm17851_vm2, %v18065_v33, %v3157_v3  ;;  %v3160_v48 = vsel %vm17851_vm2, %v3157_v3, %v18066_v20  ;;  %v3163_v11 = vsel %vm17851_vm2, %v3161_v55, %v3162_v24  ;;  %v3169_v58 = vrot.slane %v13590_v38, 1 }
 0x3a7   :  { %3939 = vmatprep.mubr.bf16.mxu1 %v13447_v57  ;;  %v13604_v60 = vpack.c.bf16 %v3160_v48, %v3158_v28  ;;  %v3165_v25 = vsel %vm17851_vm2, %v3162_v24, %v3164_v35  ;;  %v13617_v4 = vpack.c.bf16 %v13587_v21, %v2972_v16  ;;  %v3168_v0 = vsel %vm17851_vm2, %v3166_v46, %v3167_v13  ;;  %v11669_v48 = vld [vmem:[#allocation7 + $0xf0] sm:$0xff]  }
 0x3a8   :  { %v13620_v3 = vpack.c.bf16 %v3165_v25, %v3163_v11  ;;  %v3170_v55 = vsel %vm17851_vm2, %v3167_v13, %v3169_v58  ;;  %v3270_v33 = vsel %vm17854_vm3, %v3268_v36, %v3269_v32  ;;  %v3272_v24 = vsel %vm17854_vm3, %v3269_v32, %v3271_v37  ;;  %4129 = vmatpush1.bf16.msra.mxu1 %v11669_v48 }
 0x3a9   :  { %10547 = vmatmul.mubr.bf16.gmra.mrb[128].mxu0 %v13595_v59  ;;  %v13630_v28 = vpack.c.bf16 %v13496_v39, %v13480_v51  ;;  %v13632_v16 = vpack.c.bf16 %v3170_v55, %v3168_v0  ;;  %v13638_v20 = vpack.c.bf16 %v3272_v24, %v3270_v33  ;;  %v3273_v61 = vrot.slane %v13285_v14, 2  ;;  %4130 = vmatprep.subr.bf16.mxu1 %v18060_v43 }
 0x3aa   :  { %10550 = vmatprep.mubr.bf16.mxu0 %v13595_v59  ;;  %v3276_v36 = vrot.slane %v13288_v56, 2  ;;  %v3274_v32 = vrot.slane %v13329_v54, 2  ;;  %v13648_v51 = vpack.c.bf16 %v13249_v15, %v13221_v7  ;;  %v3126_v14 = vrot.slane %v13299_v27, 1 }
 0x3ab   :  { %v3127_v56 = vrot.slane %v13295_v63, 1  ;;  %v3129_v35 = vrot.slane %v13302_v42, 1  ;;  %v3278_v7 = vrot.slane %v13527_v62, 2  ;;  %v3279_v15 = vrot.slane %v13566_v9, 2  ;;  %v11670_v9 = vld [vmem:[#allocation7 + $0xf8] sm:$0xff]  }
 0x3ac   :  { %v3275_v39 = vsel %vm17854_vm3, %v3273_v61, %v3274_v32  ;;  %v3277_v37 = vsel %vm17854_vm3, %v3274_v32, %v3276_v36  ;;  %v3281_v46 = vrot.slane %v13573_v18, 2  ;;  %v3283_v18 = vrot.slane %v13580_v44, 2  ;;  %4131 = vmatpush1.bf16.msra.mxu1 %v11670_v9  ;;  %v18073_v9 = vld [vmem:[#allocation18_spill] sm:$0xff] }
 0x3ad   :  { %v13659_v11 = vpack.c.bf16 %v3277_v37, %v3275_v39  ;;  %v3128_v25 = vsel %vm17851_vm2, %v3126_v14, %v3127_v56  ;;  %v3130_v27 = vsel %vm17851_vm2, %v3127_v56, %v3129_v35  ;;  %v3280_v63 = vsel %vm17854_vm3, %v3278_v7, %v3279_v15  ;;  %4389 = vmatprep.subr.bf16.mxu1 %v18060_v43 }
 0x3ae   :  { %9315 = vmatmul.mubr.msk.bf16.gmra.mrb[136].mxu1 %vm12853_vm7, %v13463_v19  ;;  %v3282_v42 = vsel %vm17854_vm3, %v3279_v15, %v3281_v46  ;;  %v13670_v13 = vpack.c.bf16 %v3130_v27, %v3128_v25  ;;  %v3284_v58 = vrot.slane %v13587_v21, 2  ;;  %v3286_v0 = vrot.slane %v13590_v38, 2 }
 0x3af   :  { %3947 = vmatprep.mubr.bf16.mxu1 %v13630_v28  ;;  %v13676_v62 = vpack.c.bf16 %v3282_v42, %v3280_v63  ;;  %v3131_v44 = vrot.slane %v13359_v49, 1  ;;  %v3132_v21 = vrot.slane %v13355_v40, 1  ;;  %v3134_v38 = vrot.slane %v13374_v12, 1  ;;  %v18067_v40 = vld [vmem:[#allocation27_spill] sm:$0xff] }
 0x3b0   :  { %v3285_v55 = vsel %vm17854_vm3, %v3283_v18, %v3284_v58  ;;  %v3287_v33 = vsel %vm17854_vm3, %v3284_v58, %v3286_v0  ;;  %v13749_v49 = vpack.c.bf16 %v13329_v54, %v18067_v40  ;;  %v11671_v58 = vld [vmem:[#allocation7 + $0x100] sm:$0xff]   ;;  %v18081_v40 = vld [vmem:[#allocation20_spill] sm:$0xff] }
 0x3b1   :  { %10551 = vmatmul.mubr.bf16.gmra.mrb[132].mxu0 %v13638_v20  ;;  %v13693_v24 = vpack.c.bf16 %v3287_v33, %v3285_v55  ;;  %v3133_v48 = vsel %vm17851_vm2, %v3131_v44, %v3132_v21  ;;  %v3135_v61 = vsel %vm17851_vm2, %v3132_v21, %v3134_v38  ;;  %v11672_v44 = vld [vmem:[#allocation7 + $0x108] sm:$0xff]   ;;  %v11673_v38 = vld [vmem:[#allocation7 + $0x110] sm:$0xff]  }
 0x3b2   :  { %10554 = vmatprep.mubr.bf16.mxu0 %v13638_v20  ;;  %v13699_v36 = vpack.c.bf16 %v3135_v61, %v3133_v48 }
 0x3b6   :  { %9319 = vmatmul.mubr.msk.bf16.gmra.mrb[140].mxu1 %vm12853_vm7, %v13648_v51 }
 0x3b7   :  { %3955 = vmatprep.mubr.bf16.mxu1 %v13630_v28 }
 0x3b9   :  { %10555 = vmatmul.mubr.bf16.gmra.mrb[136].mxu0 %v13659_v11 }
 0x3ba   :  { %10558 = vmatprep.mubr.bf16.mxu0 %v13659_v11 }
 0x3be   :  { %9323 = vmatmul.mubr.msk.bf16.gmra.mrb[144].mxu1 %vm12853_vm7, %v13648_v51 }
 0x3bf   :  { %3963 = vmatprep.mubr.bf16.mxu1 %v13670_v13 }
 0x3c1   :  { %10559 = vmatmul.mubr.bf16.gmra.mrb[140].mxu0 %v13676_v62 }
 0x3c2   :  { %10562 = vmatprep.mubr.bf16.mxu0 %v13676_v62 }
 0x3c6   :  { %9327 = vmatmul.mubr.msk.bf16.gmra.mrb[148].mxu1 %vm12853_vm7, %v13454_v29 }
 0x3c7   :  { %3971 = vmatprep.mubr.bf16.mxu1 %v12252_v52 }
 0x3c9   :  { %10563 = vmatmul.mubr.bf16.gmra.mrb[144].mxu0 %v13693_v24 }
 0x3ca   :  { %10566 = vmatprep.mubr.bf16.mxu0 %v13693_v24 }
 0x3ce   :  { %9331 = vmatmul.mubr.msk.bf16.gmra.mrb[152].mxu1 %vm12853_vm7, %v12849_v8 }
 0x3cf   :  { %3979 = vmatprep.mubr.bf16.mxu1 %v13699_v36 }
 0x3d1   :  { %10567 = vmatmul.mubr.bf16.gmra.mrb[148].mxu0 %v12254_v53 }
 0x3d2   :  { %7404 = vmatprep.mubr.bf16.mxu0 %v12252_v52 }
 0x3d6   :  { %9335 = vmatmul.mubr.msk.bf16.gmra.mrb[156].mxu1 %vm12853_vm7, %v13488_v41 }
 0x3d7   :  { %3987 = vmatprep.mubr.bf16.mxu1 %v13699_v36 }
 0x3de   :  { %9339 = vmatmul.mubr.msk.bf16.gmra.mrb[160].mxu1 %vm12853_vm7, %v13488_v41 }
 0x3df   :  { %3995 = vmatprep.mubr.bf16.mxu1 %v13531_v50 }
 0x3e6   :  { %9343 = vmatmul.mubr.msk.bf16.gmra.mrb[164].mxu1 %vm12853_vm7, %v13517_v45 }
 0x3e7   :  { %4003 = vmatprep.mubr.bf16.mxu1 %v13531_v50 }
 0x3ee   :  { %9347 = vmatmul.mubr.msk.bf16.gmra.mrb[168].mxu1 %vm12853_vm7, %v13517_v45 }
 0x3ef   :  { %4011 = vmatprep.mubr.bf16.mxu1 %v13550_v30 }
 0x3f6   :  { %9351 = vmatmul.mubr.msk.bf16.gmra.mrb[172].mxu1 %vm12853_vm7, %v13537_v23 }
 0x3f7   :  { %4019 = vmatprep.mubr.bf16.mxu1 %v13550_v30 }
 0x3fe   :  { %9355 = vmatmul.mubr.msk.bf16.gmra.mrb[176].mxu1 %vm12853_vm7, %v13537_v23 }
 0x3ff   :  { %4027 = vmatprep.mubr.bf16.mxu1 %v13568_v34 }
 0x406   :  { %9359 = vmatmul.mubr.msk.bf16.gmra.mrb[180].mxu1 %vm12853_vm7, %v13546_v22 }
 0x407   :  { %4035 = vmatprep.mubr.bf16.mxu1 %v13568_v34 }
 0x40e   :  { %9363 = vmatmul.mubr.msk.bf16.gmra.mrb[184].mxu1 %vm12853_vm7, %v13546_v22 }
 0x40f   :  { %4043 = vmatprep.mubr.bf16.mxu1 %v13592_v10 }
 0x416   :  { %9367 = vmatmul.mubr.msk.bf16.gmra.mrb[188].mxu1 %vm12853_vm7, %v13560_v5 }
 0x417   :  { %4051 = vmatprep.mubr.bf16.mxu1 %v13592_v10 }
 0x41e   :  { %9371 = vmatmul.mubr.msk.bf16.gmra.mrb[192].mxu1 %vm12853_vm7, %v13560_v5 }
 0x41f   :  { %4059 = vmatprep.mubr.bf16.mxu1 %v13604_v60 }
 0x426   :  { %9375 = vmatmul.mubr.msk.bf16.gmra.mrb[196].mxu1 %vm12853_vm7, %v13749_v49 }
 0x427   :  { %4067 = vmatprep.mubr.bf16.mxu1 %v13604_v60 }
 0x42c   :  { %v13755_v12 = vpop.f32.mrb[88].mxu0 }
 0x42d   :  { %v13757_v32 = vpop.f32.mrb[89].mxu0 }
 0x42e   :  { %9379 = vmatmul.mubr.msk.bf16.gmra.mrb[200].mxu1 %vm12853_vm7, %v13749_v49  ;;  %v13762_v39 = vpop.f32.mrb[90].mxu0 }
 0x42f   :  { %4075 = vmatprep.mubr.bf16.mxu1 %v13620_v3  ;;  %v13765_v54 = vpop.f32.mrb[91].mxu0 }
 0x434   :  { %v13767_v37 = vpop.f32.mrb[92].mxu0 }
 0x435   :  { %v13769_v14 = vpop.f32.mrb[93].mxu0 }
 0x436   :  { %9383 = vmatmul.mubr.msk.bf16.gmra.mrb[204].mxu1 %vm12853_vm7, %v13609_v1  ;;  %v13774_v56 = vpop.f32.mrb[94].mxu0 }
 0x437   :  { %4083 = vmatprep.mubr.bf16.mxu1 %v13620_v3  ;;  %v13777_v35 = vpop.f32.mrb[95].mxu0 }
 0x43c   :  { %v13779_v7 = vpop.f32.mrb[96].mxu0 }
 0x43d   :  { %18068 = vst [vmem:[#allocation27_spill] sm:$0xff] %v13779_v7  ;;  %v13781_v15 = vpop.f32.mrb[97].mxu0  ;;  %v11691_v7 = vld [vmem:[#allocation7 + $0x1a0] sm:$0xff]  }
 0x43e   :  { %9387 = vmatmul.mubr.msk.bf16.gmra.mrb[208].mxu1 %vm12853_vm7, %v13609_v1  ;;  %v13786_v46 = vpop.f32.mrb[98].mxu0 }
 0x43f   :  { %18069 = vst [vmem:[#allocation35_spill] sm:$0xff] %v13786_v46  ;;  %4091 = vmatprep.mubr.bf16.mxu1 %v13632_v16  ;;  %v13789_v25 = vpop.f32.mrb[99].mxu0 }
 0x444   :  { %v13791_v27 = vpop.f32.mrb[100].mxu0 }
 0x445   :  { %18070 = vst [vmem:[#allocation36_spill] sm:$0xff] %v13791_v27  ;;  %v13793_v63 = vpop.f32.mrb[101].mxu0 }
 0x446   :  { %18071 = vst [vmem:[#allocation37_spill] sm:$0xff] %v13793_v63  ;;  %9391 = vmatmul.mubr.msk.bf16.gmra.mrb[212].mxu1 %vm12853_vm7, %v13617_v4  ;;  %v13798_v42 = vpop.f32.mrb[102].mxu0 }
 0x447   :  { %18072 = vst [vmem:[#allocation38_spill] sm:$0xff] %v13798_v42  ;;  %9395 = vmatprep.mubr.msk.bf16.mxu1 %vm12853_vm7, %v18073_v9  ;;  %v13803_v18 = vpop.f32.mrb[103].mxu0 }
 0x448   :  { %18074 = vst [vmem:[#allocation18_spill] sm:$0xff] %v13803_v18  ;;  %v18103_v18 = vld [vmem:[#allocation33_spill] sm:$0xff] }
 0x44c   :  { %v13805_v0 = vpop.f32.mrb[104].mxu0 }
 0x44d   :  { %18075 = vst [vmem:[#allocation39_spill] sm:$0xff] %v13805_v0  ;;  %v13807_v55 = vpop.f32.mrb[105].mxu0  ;;  %v18083_v0 = vld [vmem:[#allocation24_spill] sm:$0xff] }
 0x44e   :  { %18076 = vst [vmem:[#allocation40_spill] sm:$0xff] %v13807_v55  ;;  %4133 = vmatmul.mubr.bf16.vlgmr.msra.gmra.mrb[88].mxu1 %v12254_v53  ;;  %v13810_v33 = vpop.f32.mrb[106].mxu0 }
 0x44f   :  { %18077 = vst [vmem:[#allocation41_spill] sm:$0xff] %v13810_v33  ;;  %9399 = vmatprep.mubr.msk.bf16.mxu1 %vm12853_vm7, %v18073_v9  ;;  %4390 = vmatpush1.bf16.msra.mxu1 %v11671_v58  ;;  %v13815_v21 = vpop.f32.mrb[107].mxu0  ;;  %v11674_v58 = vld [vmem:[#allocation7 + $0x118] sm:$0xff]  }
 0x450   :  { %18078 = vst [vmem:[#allocation42_spill] sm:$0xff] %v13815_v21  ;;  %4391 = vmatprep.subr.bf16.mxu1 %v18060_v43 }
 0x453   :  { %4392 = vmatpush1.bf16.msra.mxu1 %v11672_v44  ;;  %v11675_v44 = vld [vmem:[#allocation7 + $0x120] sm:$0xff]  }
 0x454   :  { %4393 = vmatprep.subr.bf16.mxu1 %v18060_v43  ;;  %v13819_v48 = vpop.f32.mrb[108].mxu0 }
 0x455   :  { %18079 = vst [vmem:[#allocation43_spill] sm:$0xff] %v13819_v48  ;;  %v13821_v61 = vpop.f32.mrb[109].mxu0 }
 0x456   :  { %18080 = vst [vmem:[#allocation44_spill] sm:$0xff] %v13821_v61  ;;  %4141 = vmatmul.mubr.bf16.gmra.mrb[92].mxu1 %v18081_v40  ;;  %v13824_v33 = vpop.f32.mrb[110].mxu0 }
 0x457   :  { %18082 = vst [vmem:[#allocation20_spill] sm:$0xff] %v13824_v33  ;;  %9403 = vmatprep.mubr.msk.bf16.mxu1 %vm12853_vm7, %v18083_v0  ;;  %4394 = vmatpush1.bf16.msra.mxu1 %v11673_v38  ;;  %v13829_v21 = vpop.f32.mrb[111].mxu0  ;;  %v11676_v38 = vld [vmem:[#allocation7 + $0x128] sm:$0xff]  }
 0x458   :  { %18084 = vst [vmem:[#allocation24_spill] sm:$0xff] %v13829_v21  ;;  %4395 = vmatprep.subr.bf16.mxu1 %v18060_v43 }
 0x45b   :  { %4396 = vmatpush1.bf16.msra.mxu1 %v11674_v58  ;;  %v11677_v58 = vld [vmem:[#allocation7 + $0x130] sm:$0xff]  }
 0x45c   :  { %4397 = vmatprep.subr.bf16.mxu1 %v18060_v43  ;;  %v13833_v48 = vpop.f32.mrb[112].mxu0 }
 0x45d   :  { %18085 = vst [vmem:[#allocation45_spill] sm:$0xff] %v13833_v48  ;;  %v13835_v61 = vpop.f32.mrb[113].mxu0 }
 0x45e   :  { %18086 = vst [vmem:[#allocation46_spill] sm:$0xff] %v13835_v61  ;;  %4149 = vmatmul.mubr.bf16.gmra.mrb[96].mxu1 %v18081_v40  ;;  %v13838_v33 = vpop.f32.mrb[114].mxu0  ;;  %v18090_v61 = vld [vmem:[#allocation21_spill] sm:$0xff] }
 0x45f   :  { %18087 = vst [vmem:[#allocation47_spill] sm:$0xff] %v13838_v33  ;;  %9407 = vmatprep.mubr.msk.bf16.mxu1 %vm12853_vm7, %v18083_v0  ;;  %4398 = vmatpush1.bf16.msra.mxu1 %v11675_v44  ;;  %v13843_v21 = vpop.f32.mrb[115].mxu0  ;;  %v18092_v33 = vld [vmem:[#allocation29_spill] sm:$0xff] }
 0x460   :  { %18088 = vst [vmem:[#allocation48_spill] sm:$0xff] %v13843_v21  ;;  %4399 = vmatprep.subr.bf16.mxu1 %v18060_v43  ;;  %v11678_v21 = vld [vmem:[#allocation7 + $0x138] sm:$0xff]  }
 0x463   :  { %4400 = vmatpush1.bf16.msra.mxu1 %v11676_v38  ;;  %v11679_v38 = vld [vmem:[#allocation7 + $0x140] sm:$0xff]  }
 0x464   :  { %4401 = vmatprep.subr.bf16.mxu1 %v18060_v43  ;;  %v13847_v48 = vpop.f32.mrb[116].mxu0 }
 0x465   :  { %18089 = vst [vmem:[#allocation49_spill] sm:$0xff] %v13847_v48  ;;  %v13850_v55 = vpop.f32.mrb[117].mxu0 }
 0x466   :  { %4157 = vmatmul.mubr.bf16.gmra.mrb[100].mxu1 %v18090_v61  ;;  %18091 = vst [vmem:[#allocation21_spill] sm:$0xff] %v13850_v55  ;;  %v13855_v44 = vpop.f32.mrb[118].mxu0 }
 0x467   :  { %9411 = vmatprep.mubr.msk.bf16.mxu1 %vm12853_vm7, %v18092_v33  ;;  %18093 = vst [vmem:[#allocation29_spill] sm:$0xff] %v13855_v44  ;;  %4402 = vmatpush1.bf16.msra.mxu1 %v11677_v58  ;;  %v13857_v42 = vpop.f32.mrb[119].mxu0  ;;  %v11680_v58 = vld [vmem:[#allocation7 + $0x148] sm:$0xff]  }
 0x468   :  { %18094 = vst [vmem:[#allocation50_spill] sm:$0xff] %v13857_v42  ;;  %4403 = vmatprep.subr.bf16.mxu1 %v18060_v43  ;;  %v18101_v42 = vld [vmem:[#allocation23_spill] sm:$0xff] }
 0x46b   :  { %4404 = vmatpush1.bf16.msra.mxu1 %v11678_v21  ;;  %v11681_v21 = vld [vmem:[#allocation7 + $0x150] sm:$0xff]  }
 0x46c   :  { %4405 = vmatprep.subr.bf16.mxu1 %v18060_v43  ;;  %v13861_v48 = vpop.f32.mrb[120].mxu0 }
 0x46d   :  { %18095 = vst [vmem:[#allocation51_spill] sm:$0xff] %v13861_v48  ;;  %v13863_v27 = vpop.f32.mrb[121].mxu0 }
 0x46e   :  { %18096 = vst [vmem:[#allocation52_spill] sm:$0xff] %v13863_v27  ;;  %4165 = vmatmul.mubr.bf16.gmra.mrb[104].mxu1 %v18090_v61  ;;  %v13866_v55 = vpop.f32.mrb[122].mxu0 }
 0x46f   :  { %18097 = vst [vmem:[#allocation53_spill] sm:$0xff] %v13866_v55  ;;  %9415 = vmatprep.mubr.msk.bf16.mxu1 %vm12853_vm7, %v18092_v33  ;;  %4406 = vmatpush1.bf16.msra.mxu1 %v11679_v38  ;;  %v13871_v44 = vpop.f32.mrb[123].mxu0 }
 0x470   :  { %18098 = vst [vmem:[#allocation54_spill] sm:$0xff] %v13871_v44  ;;  %4407 = vmatprep.subr.bf16.mxu1 %v18060_v43 }
 0x473   :  { %4408 = vmatpush1.bf16.msra.mxu1 %v11680_v58 }
 0x474   :  { %4409 = vmatprep.subr.bf16.mxu1 %v18060_v43  ;;  %v13875_v48 = vpop.f32.mrb[124].mxu0 }
 0x475   :  { %18099 = vst [vmem:[#allocation55_spill] sm:$0xff] %v13875_v48  ;;  %v13877_v27 = vpop.f32.mrb[125].mxu0 }
 0x476   :  { %18100 = vst [vmem:[#allocation56_spill] sm:$0xff] %v13877_v27  ;;  %4173 = vmatmul.mubr.bf16.gmra.mrb[108].mxu1 %v18101_v42  ;;  %v13880_v55 = vpop.f32.mrb[126].mxu0 }
 0x477   :  { %18102 = vst [vmem:[#allocation23_spill] sm:$0xff] %v13880_v55  ;;  %9419 = vmatprep.mubr.msk.bf16.mxu1 %vm12853_vm7, %v18103_v18  ;;  %4410 = vmatpush1.bf16.msra.mxu1 %v11681_v21  ;;  %v13885_v38 = vpop.f32.mrb[127].mxu0  ;;  %v11682_v55 = vld [vmem:[#allocation7 + $0x158] sm:$0xff]  }
 0x478   :  { %18104 = vst [vmem:[#allocation33_spill] sm:$0xff] %v13885_v38  ;;  %4411 = vmatprep.subr.bf16.mxu1 %v18060_v43 }
 0x47b   :  { %4412 = vmatpush1.bf16.msra.mxu1 %v11682_v55 }
 0x47c   :  { %v13888_v58 = vpop.f32.mrb[128].mxu0  ;;  %4413 = vmatprep.subr.bf16.mxu1 %v18060_v43 }
 0x47d   :  { %18105 = vst [vmem:[#allocation57_spill] sm:$0xff] %v13888_v58  ;;  %v13890_v44 = vpop.f32.mrb[129].mxu0  ;;  %v18111_v58 = vld [vmem:[#allocation25_spill] sm:$0xff] }
 0x47e   :  { %18106 = vst [vmem:[#allocation58_spill] sm:$0xff] %v13890_v44  ;;  %4181 = vmatmul.mubr.bf16.gmra.mrb[112].mxu1 %v18101_v42  ;;  %v13893_v48 = vpop.f32.mrb[130].mxu0 }
 0x47f   :  { %18107 = vst [vmem:[#allocation59_spill] sm:$0xff] %v13893_v48  ;;  %9423 = vmatprep.mubr.msk.bf16.mxu1 %vm12853_vm7, %v18103_v18  ;;  %v13898_v27 = vpop.f32.mrb[131].mxu0 }
 0x480   :  { %18108 = vst [vmem:[#allocation60_spill] sm:$0xff] %v13898_v27 }
 0x484   :  { %v13901_v21 = vpop.f32.mrb[132].mxu0 }
 0x485   :  { %18109 = vst [vmem:[#allocation61_spill] sm:$0xff] %v13901_v21  ;;  %v13903_v38 = vpop.f32.mrb[133].mxu0  ;;  %v11683_v21 = vld [vmem:[#allocation7 + $0x160] sm:$0xff]  }
 0x486   :  { %18110 = vst [vmem:[#allocation62_spill] sm:$0xff] %v13903_v38  ;;  %4189 = vmatmul.mubr.bf16.gmra.mrb[116].mxu1 %v18111_v58  ;;  %v13906_v44 = vpop.f32.mrb[134].mxu0 }
 0x487   :  { %18112 = vst [vmem:[#allocation25_spill] sm:$0xff] %v13906_v44  ;;  %9427 = vmatprep.mubr.msk.bf16.mxu1 %vm12853_vm7, %v13363_v2  ;;  %v13911_v48 = vpop.f32.mrb[135].mxu0  ;;  %4414 = vmatpush1.bf16.msra.mxu1 %v11683_v21 }
 0x488   :  { %18113 = vst [vmem:[#allocation63_spill] sm:$0xff] %v13911_v48  ;;  %4415 = vmatprep.subr.bf16.mxu1 %v18060_v43 }
 0x48c   :  { %v13913_v63 = vpop.f32.mrb[136].mxu0 }
 0x48d   :  { %18114 = vst [vmem:[#allocation64_spill] sm:$0xff] %v13913_v63  ;;  %v13915_v27 = vpop.f32.mrb[137].mxu0  ;;  %v18120_v63 = vld [vmem:[#allocation28_spill] sm:$0xff] }
 0x48e   :  { %18115 = vst [vmem:[#allocation65_spill] sm:$0xff] %v13915_v27  ;;  %4197 = vmatmul.mubr.bf16.gmra.mrb[120].mxu1 %v18111_v58  ;;  %v13918_v55 = vpop.f32.mrb[138].mxu0 }
 0x48f   :  { %18116 = vst [vmem:[#allocation66_spill] sm:$0xff] %v13918_v55  ;;  %9431 = vmatprep.mubr.msk.bf16.mxu1 %vm12853_vm7, %v13363_v2  ;;  %v13923_v44 = vpop.f32.mrb[139].mxu0 }
 0x490   :  { %18117 = vst [vmem:[#allocation67_spill] sm:$0xff] %v13923_v44 }
 0x494   :  { %v13926_v38 = vpop.f32.mrb[140].mxu0 }
 0x495   :  { %18118 = vst [vmem:[#allocation68_spill] sm:$0xff] %v13926_v38  ;;  %v13928_v48 = vpop.f32.mrb[141].mxu0  ;;  %v11684_v38 = vld [vmem:[#allocation7 + $0x168] sm:$0xff]  }
 0x496   :  { %18119 = vst [vmem:[#allocation69_spill] sm:$0xff] %v13928_v48  ;;  %4205 = vmatmul.mubr.bf16.gmra.mrb[124].mxu1 %v18120_v63  ;;  %v13931_v27 = vpop.f32.mrb[142].mxu0  ;;  %v18127_v48 = vld [vmem:[#allocation30_spill] sm:$0xff] }
 0x497   :  { %18121 = vst [vmem:[#allocation28_spill] sm:$0xff] %v13931_v27  ;;  %9435 = vmatprep.mubr.msk.bf16.mxu1 %vm12853_vm7, %v13463_v19  ;;  %v13936_v55 = vpop.f32.mrb[143].mxu0  ;;  %4416 = vmatpush1.bf16.msra.mxu1 %v11684_v38  ;;  %v11686_v38 = vld [vmem:[#allocation7 + $0x178] sm:$0xff]  }
 0x498   :  { %18122 = vst [vmem:[#allocation70_spill] sm:$0xff] %v13936_v55  ;;  %4417 = vmatprep.subr.bf16.mxu1 %v18060_v43  ;;  %v11690_v55 = vld [vmem:[#allocation7 + $0x198] sm:$0xff]  }
 0x49c   :  { %v13938_v46 = vpop.f32.mrb[144].mxu0 }
 0x49d   :  { %18123 = vst [vmem:[#allocation71_spill] sm:$0xff] %v13938_v46  ;;  %v13940_v44 = vpop.f32.mrb[145].mxu0  ;;  %v18128_v46 = vld [vmem:[#allocation32_spill] sm:$0xff] }
 0x49e   :  { %18124 = vst [vmem:[#allocation72_spill] sm:$0xff] %v13940_v44  ;;  %4213 = vmatmul.mubr.bf16.gmra.mrb[128].mxu1 %v18120_v63  ;;  %v13943_v21 = vpop.f32.mrb[146].mxu0  ;;  %v11689_v44 = vld [vmem:[#allocation7 + $0x190] sm:$0xff]  }
 0x49f   :  { %18125 = vst [vmem:[#allocation73_spill] sm:$0xff] %v13943_v21  ;;  %9439 = vmatprep.mubr.msk.bf16.mxu1 %vm12853_vm7, %v13463_v19  ;;  %v13948_v27 = vpop.f32.mrb[147].mxu0  ;;  %v11685_v21 = vld [vmem:[#allocation7 + $0x170] sm:$0xff]  }
 0x4a0   :  { %18126 = vst [vmem:[#allocation74_spill] sm:$0xff] %v13948_v27  ;;  %4418 = vmatpush1.bf16.msra.mxu1 %v11685_v21  ;;  %v18129_v27 = vld [vmem:[#allocation34_spill] sm:$0xff]  ;;  %v11687_v21 = vld [vmem:[#allocation7 + $0x180] sm:$0xff]  }
 0x4a1   :  { %4419 = vmatprep.subr.bf16.mxu1 %v18060_v43 }
 0x4a4   :  { %4420 = vmatpush1.bf16.msra.mxu1 %v11686_v38  ;;  %v18130_v38 = vld [vmem:[#allocation19_spill] sm:$0xff] }
 0x4a5   :  { %4678 = vmatprep.subr.bf16.mxu1 %v18060_v43 }
 0x4a6   :  { %4221 = vmatmul.mubr.bf16.gmra.mrb[132].mxu1 %v18127_v48 }
 0x4a7   :  { %9443 = vmatprep.mubr.msk.bf16.mxu1 %vm12853_vm7, %v13648_v51 }
 0x4ae   :  { %4229 = vmatmul.mubr.bf16.gmra.mrb[136].mxu1 %v18127_v48 }
 0x4af   :  { %9447 = vmatprep.mubr.msk.bf16.mxu1 %vm12853_vm7, %v13648_v51 }
 0x4b6   :  { %4237 = vmatmul.mubr.bf16.gmra.mrb[140].mxu1 %v18128_v46 }
 0x4b7   :  { %9451 = vmatprep.mubr.msk.bf16.mxu1 %vm12853_vm7, %v13454_v29 }
 0x4be   :  { %4245 = vmatmul.mubr.bf16.gmra.mrb[144].mxu1 %v18128_v46 }
 0x4bf   :  { %9455 = vmatprep.mubr.msk.bf16.mxu1 %vm12853_vm7, %v13454_v29 }
 0x4c6   :  { %4253 = vmatmul.mubr.bf16.gmra.mrb[148].mxu1 %v18129_v27 }
 0x4c7   :  { %9459 = vmatprep.mubr.msk.bf16.mxu1 %vm12853_vm7, %v13488_v41 }
 0x4ce   :  { %4261 = vmatmul.mubr.bf16.gmra.mrb[152].mxu1 %v12254_v53  ;;  %v11688_v53 = vld [vmem:[#allocation7 + $0x188] sm:$0xff]  }
 0x4cf   :  { %9463 = vmatprep.mubr.msk.bf16.mxu1 %vm12853_vm7, %v13488_v41 }
 0x4d6   :  { %4269 = vmatmul.mubr.bf16.gmra.mrb[156].mxu1 %v13430_v31 }
 0x4d7   :  { %9467 = vmatprep.mubr.msk.bf16.mxu1 %vm12853_vm7, %v13517_v45 }
 0x4de   :  { %4277 = vmatmul.mubr.bf16.gmra.mrb[160].mxu1 %v13430_v31 }
 0x4df   :  { %9471 = vmatprep.mubr.msk.bf16.mxu1 %vm12853_vm7, %v13517_v45 }
 0x4e6   :  { %4285 = vmatmul.mubr.bf16.gmra.mrb[164].mxu1 %v13459_v47 }
 0x4e7   :  { %9475 = vmatprep.mubr.msk.bf16.mxu1 %vm12853_vm7, %v13537_v23 }
 0x4ee   :  { %4293 = vmatmul.mubr.bf16.gmra.mrb[168].mxu1 %v13459_v47 }
 0x4ef   :  { %9479 = vmatprep.mubr.msk.bf16.mxu1 %vm12853_vm7, %v13537_v23 }
 0x4f6   :  { %4301 = vmatmul.mubr.bf16.gmra.mrb[172].mxu1 %v13471_v17 }
 0x4f7   :  { %9483 = vmatprep.mubr.msk.bf16.mxu1 %vm12853_vm7, %v13546_v22 }
 0x4fe   :  { %4309 = vmatmul.mubr.bf16.gmra.mrb[176].mxu1 %v13471_v17 }
 0x4ff   :  { %9487 = vmatprep.mubr.msk.bf16.mxu1 %vm12853_vm7, %v13546_v22 }
 0x506   :  { %4317 = vmatmul.mubr.bf16.gmra.mrb[180].mxu1 %v13595_v59 }
 0x507   :  { %9491 = vmatprep.mubr.msk.bf16.mxu1 %vm12853_vm7, %v13560_v5 }
 0x50e   :  { %4325 = vmatmul.mubr.bf16.gmra.mrb[184].mxu1 %v13595_v59 }
 0x50f   :  { %9495 = vmatprep.mubr.msk.bf16.mxu1 %vm12853_vm7, %v13560_v5 }
 0x516   :  { %4333 = vmatmul.mubr.bf16.gmra.mrb[188].mxu1 %v13638_v20 }
 0x517   :  { %9499 = vmatprep.mubr.msk.bf16.mxu1 %vm12853_vm7, %v13749_v49 }
 0x51e   :  { %4341 = vmatmul.mubr.bf16.gmra.mrb[192].mxu1 %v13638_v20 }
 0x51f   :  { %9503 = vmatprep.mubr.msk.bf16.mxu1 %vm12853_vm7, %v13749_v49 }
 0x526   :  { %4349 = vmatmul.mubr.bf16.gmra.mrb[196].mxu1 %v13659_v11 }
 0x527   :  { %9507 = vmatprep.mubr.msk.bf16.mxu1 %vm12853_vm7, %v13609_v1 }
 0x52e   :  { %4357 = vmatmul.mubr.bf16.gmra.mrb[200].mxu1 %v13659_v11 }
 0x52f   :  { %9511 = vmatprep.mubr.msk.bf16.mxu1 %vm12853_vm7, %v13609_v1 }
 0x536   :  { %4365 = vmatmul.mubr.bf16.gmra.mrb[204].mxu1 %v13676_v62 }
 0x537   :  { %9515 = vmatprep.mubr.msk.bf16.mxu1 %vm12853_vm7, %v13617_v4 }
 0x53e   :  { %4373 = vmatmul.mubr.bf16.gmra.mrb[208].mxu1 %v13676_v62 }
 0x53f   :  { %9519 = vmatprep.mubr.msk.bf16.mxu1 %vm12853_vm7, %v13617_v4 }
 0x546   :  { %4381 = vmatmul.mubr.bf16.gmra.mrb[212].mxu1 %v13693_v24 }
 0x547   :  { %4421 = vmatprep.mubr.bf16.mxu1 %v18081_v40 }
 0x54e   :  { %4422 = vmatmul.mubr.bf16.vlgmr.msra.gmra.mrb[88].mxu1 %v18130_v38 }
 0x54f   :  { %4429 = vmatprep.mubr.bf16.mxu1 %v18081_v40  ;;  %4679 = vmatpush1.bf16.msra.mxu1 %v11687_v21  ;;  %v18131_v40 = vld [vmem:[#allocation22_spill] sm:$0xff]  ;;  %v11693_v21 = vld [vmem:[#allocation7 + $0x1b0] sm:$0xff]  }
 0x550   :  { %4680 = vmatprep.subr.bf16.mxu1 %v18060_v43 }
 0x553   :  { %4681 = vmatpush1.bf16.msra.mxu1 %v11688_v53  ;;  %v11692_v53 = vld [vmem:[#allocation7 + $0x1a8] sm:$0xff]  }
 0x554   :  { %4682 = vmatprep.subr.bf16.mxu1 %v18060_v43 }
 0x556   :  { %4430 = vmatmul.mubr.bf16.gmra.mrb[92].mxu1 %v18130_v38 }
 0x557   :  { %4437 = vmatprep.mubr.bf16.mxu1 %v18090_v61  ;;  %4683 = vmatpush1.bf16.msra.mxu1 %v11689_v44  ;;  %v11694_v44 = vld [vmem:[#allocation7 + $0x1b8] sm:$0xff]  }
 0x558   :  { %4684 = vmatprep.subr.bf16.mxu1 %v18060_v43 }
 0x55b   :  { %4685 = vmatpush1.bf16.msra.mxu1 %v11690_v55  ;;  %v11695_v55 = vld [vmem:[#allocation7 + $0x1c0] sm:$0xff]  }
 0x55c   :  { %4686 = vmatprep.subr.bf16.mxu1 %v18060_v43 }
 0x55e   :  { %4438 = vmatmul.mubr.bf16.gmra.mrb[96].mxu1 %v18131_v40 }
 0x55f   :  { %4445 = vmatprep.mubr.bf16.mxu1 %v18090_v61  ;;  %4687 = vmatpush1.bf16.msra.mxu1 %v11691_v7  ;;  %v18132_v7 = vld [vmem:[#allocation26_spill] sm:$0xff] }
 0x560   :  { %4688 = vmatprep.subr.bf16.mxu1 %v18060_v43  ;;  %v11696_v61 = vld [vmem:[#allocation7 + $0x1c8] sm:$0xff]  }
 0x563   :  { %4689 = vmatpush1.bf16.msra.mxu1 %v11692_v53  ;;  %v11697_v53 = vld [vmem:[#allocation7 + $0x1d0] sm:$0xff]  }
 0x564   :  { %4690 = vmatprep.subr.bf16.mxu1 %v18060_v43 }
 0x566   :  { %4446 = vmatmul.mubr.bf16.gmra.mrb[100].mxu1 %v18131_v40 }
 0x567   :  { %4453 = vmatprep.mubr.bf16.mxu1 %v18101_v42  ;;  %4691 = vmatpush1.bf16.msra.mxu1 %v11693_v21  ;;  %v18133_v21 = vld [vmem:[#allocation31_spill] sm:$0xff] }
 0x568   :  { %4692 = vmatprep.subr.bf16.mxu1 %v18060_v43 }
 0x56b   :  { %4693 = vmatpush1.bf16.msra.mxu1 %v11694_v44  ;;  %v11699_v44 = vld [vmem:[#allocation7 + $0x1e0] sm:$0xff]  }
 0x56c   :  { %4694 = vmatprep.subr.bf16.mxu1 %v18060_v43 }
 0x56e   :  { %4454 = vmatmul.mubr.bf16.gmra.mrb[104].mxu1 %v18132_v7 }
 0x56f   :  { %4461 = vmatprep.mubr.bf16.mxu1 %v18101_v42  ;;  %4695 = vmatpush1.bf16.msra.mxu1 %v11695_v55  ;;  %v11698_v42 = vld [vmem:[#allocation7 + $0x1d8] sm:$0xff]   ;;  %v18135_v55 = vld [vmem:[#allocation35_spill] sm:$0xff] }
 0x570   :  { %4696 = vmatprep.subr.bf16.mxu1 %v18060_v43 }
 0x573   :  { %4697 = vmatpush1.bf16.msra.mxu1 %v11696_v61 }
 0x574   :  { %4698 = vmatprep.subr.bf16.mxu1 %v18060_v43 }
 0x576   :  { %4462 = vmatmul.mubr.bf16.gmra.mrb[108].mxu1 %v18132_v7 }
 0x577   :  { %4469 = vmatprep.mubr.bf16.mxu1 %v18111_v58  ;;  %4699 = vmatpush1.bf16.msra.mxu1 %v11697_v53 }
 0x578   :  { %4700 = vmatprep.subr.bf16.mxu1 %v18060_v43 }
 0x57b   :  { %4701 = vmatpush1.bf16.msra.mxu1 %v11698_v42 }
 0x57c   :  { %4702 = vmatprep.subr.bf16.mxu1 %v18060_v43 }
 0x57e   :  { %4470 = vmatmul.mubr.bf16.gmra.mrb[112].mxu1 %v18133_v21 }
 0x57f   :  { %4477 = vmatprep.mubr.bf16.mxu1 %v18111_v58  ;;  %4703 = vmatpush1.bf16.msra.mxu1 %v11699_v44  ;;  %v11700_v58 = vld [vmem:[#allocation7 + $0x1e8] sm:$0xff]   ;;  %v18136_v44 = vld [vmem:[#allocation37_spill] sm:$0xff] }
 0x580   :  { %4704 = vmatprep.subr.bf16.mxu1 %v18060_v43 }
 0x583   :  { %4705 = vmatpush1.bf16.msra.mxu1 %v11700_v58 }
 0x584   :  { %4706 = vmatprep.subr.bf16.mxu1 %v18060_v43 }
 0x586   :  { %4478 = vmatmul.mubr.bf16.gmra.mrb[116].mxu1 %v18133_v21 }
 0x587   :  { %4485 = vmatprep.mubr.bf16.mxu1 %v18120_v63 }
 0x58e   :  { %4486 = vmatmul.mubr.bf16.gmra.mrb[120].mxu1 %v13380_v26 }
 0x58f   :  { %4493 = vmatprep.mubr.bf16.mxu1 %v18120_v63  ;;  %v11701_v63 = vld [vmem:[#allocation7 + $0x1f0] sm:$0xff]  }
 0x590   :  { %4707 = vmatpush1.bf16.msra.mxu1 %v11701_v63 }
 0x591   :  { %4708 = vmatprep.subr.bf16.mxu1 %v18060_v43 }
 0x596   :  { %4494 = vmatmul.mubr.bf16.gmra.mrb[124].mxu1 %v13380_v26 }
 0x597   :  { %4501 = vmatprep.mubr.bf16.mxu1 %v18127_v48 }
 0x59e   :  { %4502 = vmatmul.mubr.bf16.gmra.mrb[128].mxu1 %v13447_v57 }
 0x59f   :  { %4509 = vmatprep.mubr.bf16.mxu1 %v18127_v48  ;;  %v11702_v48 = vld [vmem:[#allocation7 + $0x1f8] sm:$0xff]  }
 0x5a0   :  { %4709 = vmatpush1.bf16.msra.mxu1 %v11702_v48 }
 0x5a6   :  { %4510 = vmatmul.mubr.bf16.gmra.mrb[132].mxu1 %v13447_v57 }
 0x5a7   :  { %4517 = vmatprep.mubr.bf16.mxu1 %v18128_v46 }
 0x5ae   :  { %4518 = vmatmul.mubr.bf16.gmra.mrb[136].mxu1 %v13630_v28 }
 0x5af   :  { %4525 = vmatprep.mubr.bf16.mxu1 %v18128_v46 }
 0x5b6   :  { %4526 = vmatmul.mubr.bf16.gmra.mrb[140].mxu1 %v13630_v28 }
 0x5b7   :  { %4533 = vmatprep.mubr.bf16.mxu1 %v18129_v27 }
 0x5be   :  { %4534 = vmatmul.mubr.bf16.gmra.mrb[144].mxu1 %v13670_v13 }
 0x5bf   :  { %4541 = vmatprep.mubr.bf16.mxu1 %v18129_v27 }
 0x5c6   :  { %4542 = vmatmul.mubr.bf16.gmra.mrb[148].mxu1 %v13670_v13 }
 0x5c7   :  { %4549 = vmatprep.mubr.bf16.mxu1 %v13430_v31 }
 0x5ce   :  { %4550 = vmatmul.mubr.bf16.gmra.mrb[152].mxu1 %v13699_v36 }
 0x5cf   :  { %4557 = vmatprep.mubr.bf16.mxu1 %v13430_v31  ;;  %v14225_v31 = vld [vmem:[%s17747_s10] ss:$0 sm:$0xff] }
 0x5d6   :  { %4558 = vmatmul.mubr.bf16.gmra.mrb[156].mxu1 %v13699_v36 }
 0x5d7   :  { %4565 = vmatprep.mubr.bf16.mxu1 %v13459_v47 }
 0x5de   :  { %4566 = vmatmul.mubr.bf16.gmra.mrb[160].mxu1 %v13531_v50 }
 0x5df   :  { %4573 = vmatprep.mubr.bf16.mxu1 %v13459_v47 }
 0x5e6   :  { %4574 = vmatmul.mubr.bf16.gmra.mrb[164].mxu1 %v13531_v50 }
 0x5e7   :  { %4581 = vmatprep.mubr.bf16.mxu1 %v13471_v17 }
 0x5ee   :  { %4582 = vmatmul.mubr.bf16.gmra.mrb[168].mxu1 %v13550_v30 }
 0x5ef   :  { %4589 = vmatprep.mubr.bf16.mxu1 %v13471_v17 }
 0x5f6   :  { %4590 = vmatmul.mubr.bf16.gmra.mrb[172].mxu1 %v13550_v30 }
 0x5f7   :  { %4597 = vmatprep.mubr.bf16.mxu1 %v13595_v59 }
 0x5fe   :  { %4598 = vmatmul.mubr.bf16.gmra.mrb[176].mxu1 %v13568_v34 }
 0x5ff   :  { %4605 = vmatprep.mubr.bf16.mxu1 %v13595_v59 }
 0x606   :  { %4606 = vmatmul.mubr.bf16.gmra.mrb[180].mxu1 %v13568_v34 }
 0x607   :  { %4613 = vmatprep.mubr.bf16.mxu1 %v13638_v20 }
 0x60e   :  { %4614 = vmatmul.mubr.bf16.gmra.mrb[184].mxu1 %v13592_v10 }
 0x60f   :  { %4621 = vmatprep.mubr.bf16.mxu1 %v13638_v20 }
 0x616   :  { %4622 = vmatmul.mubr.bf16.gmra.mrb[188].mxu1 %v13592_v10 }
 0x617   :  { %4629 = vmatprep.mubr.bf16.mxu1 %v13659_v11 }
 0x61e   :  { %4630 = vmatmul.mubr.bf16.gmra.mrb[192].mxu1 %v13604_v60 }
 0x61f   :  { %4637 = vmatprep.mubr.bf16.mxu1 %v13659_v11 }
 0x626   :  { %4638 = vmatmul.mubr.bf16.gmra.mrb[196].mxu1 %v13604_v60 }
 0x627   :  { %4645 = vmatprep.mubr.bf16.mxu1 %v13676_v62 }
 0x62e   :  { %4646 = vmatmul.mubr.bf16.gmra.mrb[200].mxu1 %v13620_v3 }
 0x62f   :  { %4653 = vmatprep.mubr.bf16.mxu1 %v13676_v62 }
 0x636   :  { %4654 = vmatmul.mubr.bf16.gmra.mrb[204].mxu1 %v13620_v3 }
 0x637   :  { %4661 = vmatprep.mubr.bf16.mxu1 %v13693_v24 }
 0x63e   :  { %4662 = vmatmul.mubr.bf16.gmra.mrb[208].mxu1 %v13632_v16 }
 0x63f   :  { %4669 = vmatprep.mubr.bf16.mxu1 %v13693_v24 }
 0x646   :  { %4670 = vmatmul.mubr.bf16.gmra.mrb[212].mxu1 %v13632_v16 }
 0x647   :  { %4710 = vmatprep.mubr.bf16.mxu1 %v18130_v38 }
 0x64e   :  { %9523 = vmatmul.mubr.msk.bf16.vlgmr.msra.gmra.mrb[88].mxu1 %vm12853_vm7, %v18073_v9 }
 0x64f   :  { %4718 = vmatprep.mubr.bf16.mxu1 %v18131_v40 }
 0x656   :  { %9527 = vmatmul.mubr.msk.bf16.gmra.mrb[92].mxu1 %vm12853_vm7, %v18083_v0 }
 0x657   :  { %4726 = vmatprep.mubr.bf16.mxu1 %v18131_v40 }
 0x65e   :  { %9531 = vmatmul.mubr.msk.bf16.gmra.mrb[96].mxu1 %vm12853_vm7, %v18083_v0 }
 0x65f   :  { %4734 = vmatprep.mubr.bf16.mxu1 %v18132_v7 }
 0x666   :  { %9535 = vmatmul.mubr.msk.bf16.gmra.mrb[100].mxu1 %vm12853_vm7, %v18092_v33 }
 0x667   :  { %4742 = vmatprep.mubr.bf16.mxu1 %v18132_v7 }
 0x66e   :  { %9539 = vmatmul.mubr.msk.bf16.gmra.mrb[104].mxu1 %vm12853_vm7, %v18092_v33  ;;  %v18134_v33 = vld [vmem:[#allocation27_spill] sm:$0xff] }
 0x66f   :  { %4750 = vmatprep.mubr.bf16.mxu1 %v18133_v21 }
 0x676   :  { %9543 = vmatmul.mubr.msk.bf16.gmra.mrb[108].mxu1 %vm12853_vm7, %v18103_v18 }
 0x677   :  { %4758 = vmatprep.mubr.bf16.mxu1 %v18133_v21  ;;  %v11703_v21 = vld [vmem:[#allocation9] sm:$0xff]  }
 0x678   :  { %7373 = vmatpush1.bf16.msra.mxu0 %v11703_v21 }
 0x679   :  { %7374 = vmatprep.subr.bf16.mxu0 %v18060_v43 }
 0x67e   :  { %9547 = vmatmul.mubr.msk.bf16.gmra.mrb[112].mxu1 %vm12853_vm7, %v18103_v18 }
 0x67f   :  { %4766 = vmatprep.mubr.bf16.mxu1 %v13380_v26 }
 0x686   :  { %9551 = vmatmul.mubr.msk.bf16.gmra.mrb[116].mxu1 %vm12853_vm7, %v13363_v2 }
 0x687   :  { %4774 = vmatprep.mubr.bf16.mxu1 %v13380_v26 }
 0x68e   :  { %9555 = vmatmul.mubr.msk.bf16.gmra.mrb[120].mxu1 %vm12853_vm7, %v13363_v2 }
 0x68f   :  { %4782 = vmatprep.mubr.bf16.mxu1 %v13447_v57 }
 0x696   :  { %9559 = vmatmul.mubr.msk.bf16.gmra.mrb[124].mxu1 %vm12853_vm7, %v13463_v19 }
 0x697   :  { %4790 = vmatprep.mubr.bf16.mxu1 %v13447_v57 }
 0x69e   :  { %9563 = vmatmul.mubr.msk.bf16.gmra.mrb[128].mxu1 %vm12853_vm7, %v13463_v19 }
 0x69f   :  { %4798 = vmatprep.mubr.bf16.mxu1 %v13630_v28 }
 0x6a6   :  { %9567 = vmatmul.mubr.msk.bf16.gmra.mrb[132].mxu1 %vm12853_vm7, %v13648_v51 }
 0x6a7   :  { %4806 = vmatprep.mubr.bf16.mxu1 %v13630_v28 }
 0x6ae   :  { %9571 = vmatmul.mubr.msk.bf16.gmra.mrb[136].mxu1 %vm12853_vm7, %v13648_v51 }
 0x6af   :  { %4814 = vmatprep.mubr.bf16.mxu1 %v13670_v13 }
 0x6b6   :  { %9575 = vmatmul.mubr.msk.bf16.gmra.mrb[140].mxu1 %vm12853_vm7, %v13454_v29 }
 0x6b7   :  { %4822 = vmatprep.mubr.bf16.mxu1 %v13670_v13 }
 0x6be   :  { %9579 = vmatmul.mubr.msk.bf16.gmra.mrb[144].mxu1 %vm12853_vm7, %v13454_v29 }
 0x6bf   :  { %4830 = vmatprep.mubr.bf16.mxu1 %v12252_v52 }
 0x6c6   :  { %9583 = vmatmul.mubr.msk.bf16.gmra.mrb[148].mxu1 %vm12853_vm7, %v12849_v8 }
 0x6c7   :  { %4838 = vmatprep.mubr.bf16.mxu1 %v13699_v36 }
 0x6ce   :  { %9587 = vmatmul.mubr.msk.bf16.gmra.mrb[152].mxu1 %vm12853_vm7, %v13488_v41 }
 0x6cf   :  { %4846 = vmatprep.mubr.bf16.mxu1 %v13531_v50 }
 0x6d6   :  { %9591 = vmatmul.mubr.msk.bf16.gmra.mrb[156].mxu1 %vm12853_vm7, %v13517_v45 }
 0x6d7   :  { %4854 = vmatprep.mubr.bf16.mxu1 %v13531_v50 }
 0x6de   :  { %9595 = vmatmul.mubr.msk.bf16.gmra.mrb[160].mxu1 %vm12853_vm7, %v13517_v45 }
 0x6df   :  { %4862 = vmatprep.mubr.bf16.mxu1 %v13550_v30 }
 0x6e6   :  { %9599 = vmatmul.mubr.msk.bf16.gmra.mrb[164].mxu1 %vm12853_vm7, %v13537_v23 }
 0x6e7   :  { %4870 = vmatprep.mubr.bf16.mxu1 %v13550_v30 }
 0x6ee   :  { %9603 = vmatmul.mubr.msk.bf16.gmra.mrb[168].mxu1 %vm12853_vm7, %v13537_v23 }
 0x6ef   :  { %4878 = vmatprep.mubr.bf16.mxu1 %v13568_v34 }
 0x6f6   :  { %9607 = vmatmul.mubr.msk.bf16.gmra.mrb[172].mxu1 %vm12853_vm7, %v13546_v22 }
 0x6f7   :  { %4886 = vmatprep.mubr.bf16.mxu1 %v13568_v34 }
 0x6fe   :  { %9611 = vmatmul.mubr.msk.bf16.gmra.mrb[176].mxu1 %vm12853_vm7, %v13546_v22 }
 0x6ff   :  { %4894 = vmatprep.mubr.bf16.mxu1 %v13592_v10 }
 0x706   :  { %9615 = vmatmul.mubr.msk.bf16.gmra.mrb[180].mxu1 %vm12853_vm7, %v13560_v5 }
 0x707   :  { %4902 = vmatprep.mubr.bf16.mxu1 %v13592_v10 }
 0x70e   :  { %9619 = vmatmul.mubr.msk.bf16.gmra.mrb[184].mxu1 %vm12853_vm7, %v13560_v5 }
 0x70f   :  { %4910 = vmatprep.mubr.bf16.mxu1 %v13604_v60 }
 0x716   :  { %9623 = vmatmul.mubr.msk.bf16.gmra.mrb[188].mxu1 %vm12853_vm7, %v13749_v49 }
 0x717   :  { %4918 = vmatprep.mubr.bf16.mxu1 %v13604_v60 }
 0x71e   :  { %9627 = vmatmul.mubr.msk.bf16.gmra.mrb[192].mxu1 %vm12853_vm7, %v13749_v49 }
 0x71f   :  { %4926 = vmatprep.mubr.bf16.mxu1 %v13620_v3 }
 0x721   :  { %v4712_v2 = vpop.f32.mrb[88].mxu1 }
 0x722   :  { %v10650_v26 = vadd.f32 %v14225_v31, %v4712_v2  ;;  %v4714_v57 = vpop.f32.mrb[89].mxu1  ;;  %v18137_v2 = vld [vmem:[#allocation18_spill] sm:$0xff] }
 0x723   :  { %v4715_v29 = vpop.f32.mrb[90].mxu1 }
 0x724   :  { %v14229_v47 = vadd.f32 %v10650_v26, %v13757_v32  ;;  %v10651_v19 = vadd.f32 %v14225_v31, %v4715_v29  ;;  %v4717_v17 = vpop.f32.mrb[91].mxu1 }
 0x725   :  { %v11704_v17 = vld [vmem:[#allocation9 + $0x8] sm:$0xff]  }
 0x726   :  { %v14233_v41 = vadd.f32 %v10651_v19, %v13765_v54  ;;  %9631 = vmatmul.mubr.msk.bf16.gmra.mrb[196].mxu1 %vm12853_vm7, %v13609_v1  ;;  %7375 = vmatpush1.bf16.msra.mxu0 %v11704_v17 }
 0x727   :  { %4934 = vmatprep.mubr.bf16.mxu1 %v13620_v3  ;;  %7376 = vmatprep.subr.bf16.mxu0 %v18060_v43 }
 0x729   :  { %v4720_v45 = vpop.f32.mrb[92].mxu1 }
 0x72a   :  { %v10652_v50 = vadd.f32 %v14225_v31, %v4720_v45  ;;  %v4722_v23 = vpop.f32.mrb[93].mxu1 }
 0x72b   :  { %v4723_v22 = vpop.f32.mrb[94].mxu1 }
 0x72c   :  { %v14241_v30 = vadd.f32 %v10652_v50, %v13755_v12  ;;  %v10653_v5 = vadd.f32 %v14225_v31, %v4723_v22  ;;  %v4725_v34 = vpop.f32.mrb[95].mxu1  ;;  %v18138_v50 = vld [vmem:[#allocation36_spill] sm:$0xff] }
 0x72d   :  { %v18139_v34 = vld [vmem:[#allocation38_spill] sm:$0xff] }
 0x72e   :  { %v14245_v10 = vadd.f32 %v10653_v5, %v13762_v39  ;;  %9635 = vmatmul.mubr.msk.bf16.gmra.mrb[200].mxu1 %vm12853_vm7, %v13609_v1 }
 0x72f   :  { %4942 = vmatprep.mubr.bf16.mxu1 %v13632_v16 }
 0x731   :  { %v4728_v59 = vpop.f32.mrb[96].mxu1 }
 0x732   :  { %v10654_v60 = vadd.f32 %v14225_v31, %v4728_v59  ;;  %v4730_v3 = vpop.f32.mrb[97].mxu1 }
 0x733   :  { %v4731_v28 = vpop.f32.mrb[98].mxu1 }
 0x734   :  { %v14253_v20 = vadd.f32 %v10654_v60, %v13769_v14  ;;  %v10655_v51 = vadd.f32 %v14225_v31, %v4731_v28  ;;  %v4733_v11 = vpop.f32.mrb[99].mxu1  ;;  %v5328_v60 = vmul.f32 %v14233_v41, %v14233_v41  ;;  %v5327_v28 = vmul.f32 %v14229_v47, %v14229_v47 }
 0x735   :  { %v5329_v11 = vmul.f32 %v14241_v30, %v14241_v30 }
 0x736   :  { %v14257_v13 = vadd.f32 %v10655_v51, %v13777_v35  ;;  %9639 = vmatmul.mubr.msk.bf16.gmra.mrb[204].mxu1 %vm12853_vm7, %v13617_v4  ;;  %v5258_v51 = vadd.f32 %v14233_v41, %v14229_v47 }
 0x737   :  { %4950 = vmatprep.mubr.bf16.mxu1 %v13632_v16 }
 0x739   :  { %v4736_v1 = vpop.f32.mrb[100].mxu1 }
 0x73a   :  { %v10656_v62 = vadd.f32 %v14225_v31, %v4736_v1  ;;  %v4738_v24 = vpop.f32.mrb[101].mxu1 }
 0x73b   :  { %v4739_v36 = vpop.f32.mrb[102].mxu1  ;;  %v11705_v24 = vld [vmem:[#allocation9 + $0x10] sm:$0xff]  }
 0x73c   :  { %v14265_v49 = vadd.f32 %v10656_v62, %v13767_v37  ;;  %v10657_v12 = vadd.f32 %v14225_v31, %v4739_v36  ;;  %v4741_v32 = vpop.f32.mrb[103].mxu1  ;;  %7377 = vmatpush1.bf16.msra.mxu0 %v11705_v24 }
 0x73d   :  { %v5259_v32 = vadd.f32 %v5258_v51, %v14241_v30  ;;  %7378 = vmatprep.subr.bf16.mxu0 %v18060_v43 }
 0x73e   :  { %v14269_v39 = vadd.f32 %v10657_v12, %v13774_v56  ;;  %9643 = vmatmul.mubr.msk.bf16.gmra.mrb[208].mxu1 %vm12853_vm7, %v13617_v4  ;;  %v5391_v12 = vadd.f32 %v5328_v60, %v5327_v28  ;;  %v11707_v28 = vld [vmem:[#allocation9 + $0x20] sm:$0xff]  }
 0x73f   :  { %4958 = vmatprep.mubr.bf16.mxu1 %v12252_v52 }
 0x741   :  { %v4744_v16 = vpop.f32.mrb[104].mxu1 }
 0x742   :  { %v10658_v54 = vadd.f32 %v14225_v31, %v4744_v16  ;;  %v4746_v14 = vpop.f32.mrb[105].mxu1  ;;  %v18140_v16 = vld [vmem:[#allocation40_spill] sm:$0xff] }
 0x743   :  { %v4747_v35 = vpop.f32.mrb[106].mxu1 }
 0x744   :  { %v14277_v37 = vadd.f32 %v10658_v54, %v13781_v15  ;;  %v10659_v46 = vadd.f32 %v14225_v31, %v4747_v35  ;;  %v4749_v27 = vpop.f32.mrb[107].mxu1 }
 0x745   :  { %v5330_v27 = vmul.f32 %v14245_v10, %v14245_v10 }
 0x746   :  { %v14281_v56 = vadd.f32 %v10659_v46, %v13789_v25  ;;  %9647 = vmatmul.mubr.msk.bf16.gmra.mrb[212].mxu1 %vm12853_vm7, %v12849_v8  ;;  %v5392_v46 = vadd.f32 %v5391_v12, %v5329_v11 }
 0x749   :  { %v4752_v4 = vpop.f32.mrb[108].mxu1 }
 0x74a   :  { %v10660_v9 = vadd.f32 %v14225_v31, %v4752_v4  ;;  %v4754_v18 = vpop.f32.mrb[109].mxu1  ;;  %v18141_v4 = vld [vmem:[#allocation42_spill] sm:$0xff] }
 0x74b   :  { %v4755_v0 = vpop.f32.mrb[110].mxu1  ;;  %v5260_v18 = vadd.f32 %v5259_v32, %v14245_v10 }
 0x74c   :  { %v14288_v38 = vadd.f32 %v10660_v9, %v18134_v33  ;;  %v10661_v15 = vadd.f32 %v14225_v31, %v4755_v0  ;;  %v4757_v40 = vpop.f32.mrb[111].mxu1  ;;  %v5331_v0 = vmul.f32 %v14253_v20, %v14253_v20 }
 0x74d   :  { %v5261_v40 = vadd.f32 %v5260_v18, %v14253_v20 }
 0x74e   :  { %v14292_v7 = vadd.f32 %v10661_v15, %v18135_v55  ;;  %v5393_v15 = vadd.f32 %v5392_v46, %v5330_v27  ;;  %v5336_v27 = vmul.f32 %v14281_v56, %v14281_v56 }
 0x750   :  { %v5394_v21 = vadd.f32 %v5393_v15, %v5331_v0  ;;  %v5337_v0 = vmul.f32 %v14288_v38, %v14288_v38 }
 0x751   :  { %v4760_v25 = vpop.f32.mrb[112].mxu1 }
 0x752   :  { %v10662_v61 = vadd.f32 %v14225_v31, %v4760_v25  ;;  %v4762_v53 = vpop.f32.mrb[113].mxu1 }
 0x753   :  { %v4763_v42 = vpop.f32.mrb[114].mxu1 }
 0x754   :  { %v14296_v58 = vadd.f32 %v10662_v61, %v18136_v44  ;;  %v10663_v63 = vadd.f32 %v14225_v31, %v4763_v42  ;;  %v4765_v48 = vpop.f32.mrb[115].mxu1  ;;  %v11706_v61 = vld [vmem:[#allocation9 + $0x18] sm:$0xff]   ;;  %v5332_v42 = vmul.f32 %v14257_v13, %v14257_v13  ;;  %v18142_v44 = vld [vmem:[#allocation39_spill] sm:$0xff] }
 0x755   :  { %7379 = vmatpush1.bf16.msra.mxu0 %v11706_v61 }
 0x756   :  { %v14301_v26 = vadd.f32 %v10663_v63, %v18137_v2  ;;  %7380 = vmatprep.subr.bf16.mxu0 %v18060_v43 }
 0x759   :  { %v4768_v57 = vpop.f32.mrb[116].mxu1  ;;  %7381 = vmatpush1.bf16.msra.mxu0 %v11707_v28 }
 0x75a   :  { %v10664_v29 = vadd.f32 %v14225_v31, %v4768_v57  ;;  %v4770_v19 = vpop.f32.mrb[117].mxu1  ;;  %v5262_v57 = vadd.f32 %v5261_v40, %v14257_v13  ;;  %7382 = vmatprep.subr.bf16.mxu0 %v18060_v43  ;;  %v11708_v40 = vld [vmem:[#allocation9 + $0x28] sm:$0xff]  }
 0x75b   :  { %v4771_v45 = vpop.f32.mrb[118].mxu1  ;;  %v18143_v19 = vld [vmem:[#allocation41_spill] sm:$0xff] }
 0x75c   :  { %v14305_v23 = vadd.f32 %v10664_v29, %v18138_v50  ;;  %v10665_v22 = vadd.f32 %v14225_v31, %v4771_v45  ;;  %v4773_v5 = vpop.f32.mrb[119].mxu1  ;;  %v5333_v29 = vmul.f32 %v14265_v49, %v14265_v49  ;;  %v5395_v45 = vadd.f32 %v5394_v21, %v5332_v42 }
 0x75d   :  { %v5263_v50 = vadd.f32 %v5262_v57, %v14265_v49  ;;  %7383 = vmatpush1.bf16.msra.mxu0 %v11708_v40  ;;  %v18147_v57 = vld [vmem:[#allocation20_spill] sm:$0xff] }
 0x75e   :  { %v14310_v59 = vadd.f32 %v10665_v22, %v18139_v34  ;;  %v5396_v5 = vadd.f32 %v5395_v45, %v5333_v29  ;;  %v5334_v34 = vmul.f32 %v14269_v39, %v14269_v39  ;;  %7384 = vmatprep.subr.bf16.mxu0 %v18060_v43  ;;  %v5339_v45 = vmul.f32 %v14296_v58, %v14296_v58 }
 0x75f   :  { %v5264_v11 = vadd.f32 %v5263_v50, %v14269_v39 }
 0x760   :  { %v5397_v32 = vadd.f32 %v5396_v5, %v5334_v34 }
 0x761   :  { %v4776_v3 = vpop.f32.mrb[120].mxu1 }
 0x762   :  { %v10666_v1 = vadd.f32 %v14225_v31, %v4776_v3  ;;  %v4778_v62 = vpop.f32.mrb[121].mxu1 }
 0x763   :  { %v4779_v36 = vpop.f32.mrb[122].mxu1  ;;  %v18144_v62 = vld [vmem:[#allocation44_spill] sm:$0xff] }
 0x764   :  { %v14323_v54 = vadd.f32 %v10666_v1, %v18140_v16  ;;  %v10667_v14 = vadd.f32 %v14225_v31, %v4779_v36  ;;  %v4781_v35 = vpop.f32.mrb[123].mxu1  ;;  %v5335_v1 = vmul.f32 %v14277_v37, %v14277_v37  ;;  %v5265_v16 = vadd.f32 %v5264_v11, %v14277_v37 }
 0x765   :  { %v5340_v11 = vmul.f32 %v14301_v26, %v14301_v26 }
 0x766   :  { %v14330_v9 = vadd.f32 %v10667_v14, %v18141_v4  ;;  %v18145_v14 = vld [vmem:[#allocation24_spill] sm:$0xff]  ;;  %v5398_v46 = vadd.f32 %v5397_v32, %v5335_v1  ;;  %v5266_v18 = vadd.f32 %v5265_v16, %v14281_v56  ;;  %v18148_v1 = vld [vmem:[#allocation46_spill] sm:$0xff]  ;;  %v5341_v16 = vmul.f32 %v14305_v23, %v14305_v23 }
 0x768   :  { %v5267_v61 = vadd.f32 %v5266_v18, %v14288_v38 }
 0x769   :  { %v4784_v33 = vpop.f32.mrb[124].mxu1 }
 0x76a   :  { %v10668_v55 = vadd.f32 %v14225_v31, %v4784_v33  ;;  %v4786_v25 = vpop.f32.mrb[125].mxu1 }
 0x76b   :  { %v4787_v53 = vpop.f32.mrb[126].mxu1  ;;  %v5399_v25 = vadd.f32 %v5398_v46, %v5336_v27 }
 0x76c   :  { %v14340_v63 = vadd.f32 %v10668_v55, %v18142_v44  ;;  %v10669_v48 = vadd.f32 %v14225_v31, %v4787_v53  ;;  %v4789_v2 = vpop.f32.mrb[127].mxu1  ;;  %v18146_v53 = vld [vmem:[#allocation43_spill] sm:$0xff] }
 0x76d   :  { %v5338_v2 = vmul.f32 %v14292_v7, %v14292_v7 }
 0x76e   :  { %v14348_v17 = vadd.f32 %v10669_v48, %v18143_v19  ;;  %v5400_v48 = vadd.f32 %v5399_v25, %v5337_v0  ;;  %v5268_v19 = vadd.f32 %v5267_v61, %v14292_v7 }
 0x770   :  { %v5269_v5 = vadd.f32 %v5268_v19, %v14296_v58 }
 0x771   :  { %v4792_v22 = vpop.f32.mrb[128].mxu1 }
 0x772   :  { %v10670_v60 = vadd.f32 %v14225_v31, %v4792_v22  ;;  %v4794_v3 = vpop.f32.mrb[129].mxu1  ;;  %v5401_v22 = vadd.f32 %v5400_v48, %v5338_v2  ;;  %v5270_v32 = vadd.f32 %v5269_v5, %v14301_v26  ;;  %v5344_v5 = vmul.f32 %v14330_v9, %v14330_v9 }
 0x773   :  { %v4795_v51 = vpop.f32.mrb[130].mxu1  ;;  %v11709_v3 = vld [vmem:[#allocation9 + $0x30] sm:$0xff]  }
 0x774   :  { %v14358_v24 = vadd.f32 %v10670_v60, %v18144_v62  ;;  %v10671_v36 = vadd.f32 %v14225_v31, %v4795_v51  ;;  %v4797_v12 = vpop.f32.mrb[131].mxu1  ;;  %v5402_v51 = vadd.f32 %v5401_v22, %v5339_v45  ;;  %7385 = vmatpush1.bf16.msra.mxu0 %v11709_v3  ;;  %v18151_v45 = vld [vmem:[#allocation47_spill] sm:$0xff] }
 0x775   :  { %7386 = vmatprep.subr.bf16.mxu0 %v18060_v43 }
 0x776   :  { %v14364_v35 = vadd.f32 %v10671_v36, %v18145_v14  ;;  %v18149_v14 = vld [vmem:[#allocation48_spill] sm:$0xff]  ;;  %v5403_v27 = vadd.f32 %v5402_v51, %v5340_v11 }
 0x778   :  { %v5404_v0 = vadd.f32 %v5403_v27, %v5341_v16  ;;  %v18152_v16 = vld [vmem:[#allocation21_spill] sm:$0xff] }
 0x779   :  { %v4800_v4 = vpop.f32.mrb[132].mxu1 }
 0x77a   :  { %v10672_v33 = vadd.f32 %v14225_v31, %v4800_v4  ;;  %v4802_v15 = vpop.f32.mrb[133].mxu1  ;;  %v5271_v4 = vadd.f32 %v5270_v32, %v14305_v23 }
 0x77b   :  { %v4803_v55 = vpop.f32.mrb[134].mxu1 }
 0x77c   :  { %v14374_v21 = vadd.f32 %v10672_v33, %v18146_v53  ;;  %v10673_v42 = vadd.f32 %v14225_v31, %v4803_v55  ;;  %v4805_v44 = vpop.f32.mrb[135].mxu1  ;;  %v5342_v33 = vmul.f32 %v14310_v59, %v14310_v59  ;;  %v11710_v55 = vld [vmem:[#allocation9 + $0x38] sm:$0xff]   ;;  %v5272_v61 = vadd.f32 %v5271_v4, %v14310_v59 }
 0x77d   :  { %v5343_v53 = vmul.f32 %v14323_v54, %v14323_v54  ;;  %7387 = vmatpush1.bf16.msra.mxu0 %v11710_v55 }
 0x77e   :  { %v14381_v29 = vadd.f32 %v10673_v42, %v18147_v57  ;;  %v18150_v42 = vld [vmem:[#allocation45_spill] sm:$0xff]  ;;  %7388 = vmatprep.subr.bf16.mxu0 %v18060_v43  ;;  %v5405_v57 = vadd.f32 %v5404_v0, %v5342_v33  ;;  %v5273_v19 = vadd.f32 %v5272_v61, %v14323_v54  ;;  %v5346_v33 = vmul.f32 %v14348_v17, %v14348_v17 }
 0x780   :  { %v5406_v22 = vadd.f32 %v5405_v57, %v5343_v53  ;;  %v5274_v3 = vadd.f32 %v5273_v19, %v14330_v9 }
 0x781   :  { %v4808_v50 = vpop.f32.mrb[136].mxu1 }
 0x782   :  { %v10674_v34 = vadd.f32 %v14225_v31, %v4808_v50  ;;  %v4810_v60 = vpop.f32.mrb[137].mxu1  ;;  %v5275_v32 = vadd.f32 %v5274_v3, %v14340_v63 }
 0x783   :  { %v4811_v28 = vpop.f32.mrb[138].mxu1 }
 0x784   :  { %v14391_v62 = vadd.f32 %v10674_v34, %v18148_v1  ;;  %v10675_v36 = vadd.f32 %v14225_v31, %v4811_v28  ;;  %v4813_v12 = vpop.f32.mrb[139].mxu1  ;;  %v11711_v34 = vld [vmem:[#allocation9 + $0x40] sm:$0xff]   ;;  %v5345_v28 = vmul.f32 %v14340_v63, %v14340_v63  ;;  %v14423_v1 = vpop.f32.mrb[148].mxu0  ;;  %v5276_v55 = vadd.f32 %v5275_v32, %v14348_v17 }
 0x785   :  { %7389 = vmatpush1.bf16.msra.mxu0 %v11711_v34  ;;  %v5407_v12 = vadd.f32 %v5406_v22, %v5344_v5  ;;  %v5348_v34 = vmul.f32 %v14364_v35, %v14364_v35 }
 0x786   :  { %v14399_v46 = vadd.f32 %v10675_v36, %v18149_v14  ;;  %7390 = vmatprep.subr.bf16.mxu0 %v18060_v43 }
 0x787   :  { %v5408_v0 = vadd.f32 %v5407_v12, %v5345_v28  ;;  %v18155_v12 = vld [vmem:[#allocation29_spill] sm:$0xff] }
 0x789   :  { %v4816_v18 = vpop.f32.mrb[140].mxu1 }
 0x78a   :  { %v10676_v15 = vadd.f32 %v14225_v31, %v4816_v18  ;;  %v4818_v40 = vpop.f32.mrb[141].mxu1  ;;  %v14431_v18 = vpop.f32.mrb[149].mxu0 }
 0x78b   :  { %v4819_v25 = vpop.f32.mrb[142].mxu1  ;;  %v14441_v61 = vpop.f32.mrb[150].mxu0 }
 0x78c   :  { %v14409_v44 = vadd.f32 %v10676_v15, %v18150_v42  ;;  %v10677_v48 = vadd.f32 %v14225_v31, %v4819_v25  ;;  %v4821_v2 = vpop.f32.mrb[143].mxu1  ;;  %v18153_v15 = vld [vmem:[#allocation50_spill] sm:$0xff]  ;;  %v5347_v25 = vmul.f32 %v14358_v24, %v14358_v24  ;;  %v14443_v42 = vpop.f32.mrb[151].mxu0 }
 0x78d   :  { %v5277_v2 = vadd.f32 %v5276_v55, %v14358_v24 }
 0x78e   :  { %v14415_v50 = vadd.f32 %v10677_v48, %v18151_v45  ;;  %v5409_v48 = vadd.f32 %v5408_v0, %v5346_v33  ;;  %v11712_v45 = vld [vmem:[#allocation9 + $0x48] sm:$0xff]   ;;  %v5350_v33 = vmul.f32 %v14381_v29, %v14381_v29 }
 0x78f   :  { %7391 = vmatpush1.bf16.msra.mxu0 %v11712_v45 }
 0x790   :  { %v5410_v5 = vadd.f32 %v5409_v48, %v5347_v25  ;;  %7392 = vmatprep.subr.bf16.mxu0 %v18060_v43  ;;  %v5351_v48 = vmul.f32 %v14391_v62, %v14391_v62 }
 0x791   :  { %v4824_v60 = vpop.f32.mrb[144].mxu1 }
 0x792   :  { %v10678_v51 = vadd.f32 %v14225_v31, %v4824_v60  ;;  %v4826_v11 = vpop.f32.mrb[145].mxu1  ;;  %v18154_v60 = vld [vmem:[#allocation49_spill] sm:$0xff] }
 0x793   :  { %v4827_v36 = vpop.f32.mrb[146].mxu1  ;;  %v5278_v11 = vadd.f32 %v5277_v2, %v14364_v35  ;;  %v18156_v2 = vld [vmem:[#allocation52_spill] sm:$0xff] }
 0x794   :  { %v14428_v14 = vadd.f32 %v10678_v51, %v18152_v16  ;;  %v10679_v27 = vadd.f32 %v14225_v31, %v4827_v36  ;;  %v4829_v4 = vpop.f32.mrb[147].mxu1  ;;  %v5349_v36 = vmul.f32 %v14374_v21, %v14374_v21  ;;  %v5411_v16 = vadd.f32 %v5410_v5, %v5348_v34  ;;  %v18158_v34 = vld [vmem:[#allocation54_spill] sm:$0xff] }
 0x796   :  { %v14436_v40 = vadd.f32 %v10679_v27, %v18153_v15  ;;  %v5279_v27 = vadd.f32 %v5278_v11, %v14374_v21  ;;  %v5412_v0 = vadd.f32 %v5411_v16, %v5349_v36 }
 0x799   :  { %v4832_v53 = vpop.f32.mrb[148].mxu1 }
 0x79a   :  { %v10680_v57 = vadd.f32 %v14225_v31, %v4832_v53  ;;  %v4834_v19 = vpop.f32.mrb[149].mxu1  ;;  %v5280_v53 = vadd.f32 %v5279_v27, %v14381_v29 }
 0x79b   :  { %v4835_v22 = vpop.f32.mrb[150].mxu1 }
 0x79c   :  { %v14450_v3 = vadd.f32 %v10680_v57, %v18154_v60  ;;  %v10681_v28 = vadd.f32 %v14225_v31, %v4835_v22  ;;  %v4837_v51 = vpop.f32.mrb[151].mxu1  ;;  %v5413_v22 = vadd.f32 %v5412_v0, %v5350_v33  ;;  %v5281_v5 = vadd.f32 %v5280_v53, %v14391_v62 }
 0x79d   :  { %v5352_v51 = vmul.f32 %v14399_v46, %v14399_v46 }
 0x79e   :  { %v14458_v32 = vadd.f32 %v10681_v28, %v18155_v12  ;;  %v5414_v28 = vadd.f32 %v5413_v22, %v5351_v48  ;;  %v5282_v36 = vadd.f32 %v5281_v5, %v14399_v46  ;;  %v5353_v12 = vmul.f32 %v14409_v44, %v14409_v44 }
 0x79f   :  { %v5355_v5 = vmul.f32 %v14428_v14, %v14428_v14 }
 0x7a0   :  { %v5415_v0 = vadd.f32 %v5414_v28, %v5352_v51  ;;  %v5283_v33 = vadd.f32 %v5282_v36, %v14409_v44 }
 0x7a1   :  { %v4840_v4 = vpop.f32.mrb[152].mxu1 }
 0x7a2   :  { %v10682_v15 = vadd.f32 %v14225_v31, %v4840_v4  ;;  %v4842_v55 = vpop.f32.mrb[153].mxu1  ;;  %v5416_v48 = vadd.f32 %v5415_v0, %v5353_v12  ;;  %v5284_v22 = vadd.f32 %v5283_v33, %v14415_v50 }
 0x7a3   :  { %v4843_v25 = vpop.f32.mrb[154].mxu1 }
 0x7a4   :  { %v14468_v57 = vadd.f32 %v10682_v15, %v18156_v2  ;;  %v10683_v19 = vadd.f32 %v14225_v31, %v4843_v25  ;;  %v4845_v45 = vpop.f32.mrb[155].mxu1  ;;  %v18160_v15 = vld [vmem:[#allocation51_spill] sm:$0xff]  ;;  %v5354_v2 = vmul.f32 %v14415_v50, %v14415_v50  ;;  %v5285_v51 = vadd.f32 %v5284_v22, %v14428_v14 }
 0x7a6   :  { %18157 = vst [vmem:[#allocation30_spill] sm:$0xff] %v14468_v57  ;;  %v14473_v60 = vadd.f32 %v10683_v19, %v18158_v34  ;;  %v18161_v19 = vld [vmem:[#allocation53_spill] sm:$0xff]  ;;  %v5417_v28 = vadd.f32 %v5416_v48, %v5354_v2 }
 0x7a7   :  { %v18165_v48 = vld [vmem:[#allocation33_spill] sm:$0xff] }
 0x7a8   :  { %18159 = vst [vmem:[#allocation32_spill] sm:$0xff] %v14473_v60  ;;  %v5418_v12 = vadd.f32 %v5417_v28, %v5355_v5  ;;  %v5358_v28 = vmul.f32 %v14458_v32, %v14458_v32 }
 0x7a9   :  { %v4848_v11 = vpop.f32.mrb[156].mxu1 }
 0x7aa   :  { %v10684_v16 = vadd.f32 %v14225_v31, %v4848_v11  ;;  %v4850_v27 = vpop.f32.mrb[157].mxu1 }
 0x7ab   :  { %v4851_v4 = vpop.f32.mrb[158].mxu1  ;;  %v5356_v27 = vmul.f32 %v14436_v40, %v14436_v40 }
 0x7ac   :  { %v14483_v55 = vadd.f32 %v10684_v16, %v18160_v15  ;;  %v10685_v25 = vadd.f32 %v14225_v31, %v4851_v4  ;;  %v4853_v53 = vpop.f32.mrb[159].mxu1  ;;  %v18163_v4 = vld [vmem:[#allocation56_spill] sm:$0xff] }
 0x7ad   :  { %v5357_v53 = vmul.f32 %v14450_v3, %v14450_v3 }
 0x7ae   :  { %v14489_v45 = vadd.f32 %v10685_v25, %v18161_v19  ;;  %v5286_v25 = vadd.f32 %v5285_v51, %v14436_v40  ;;  %v5419_v19 = vadd.f32 %v5418_v12, %v5356_v27 }
 0x7b0   :  { %18162 = vst [vmem:[#allocation34_spill] sm:$0xff] %v14489_v45  ;;  %v5287_v22 = vadd.f32 %v5286_v25, %v14450_v3 }
 0x7b1   :  { %v4856_v34 = vpop.f32.mrb[160].mxu1 }
 0x7b2   :  { %v10686_v11 = vadd.f32 %v14225_v31, %v4856_v34  ;;  %v4858_v36 = vpop.f32.mrb[161].mxu1  ;;  %v5420_v34 = vadd.f32 %v5419_v19, %v5357_v53  ;;  %v5288_v51 = vadd.f32 %v5287_v22, %v14458_v32 }
 0x7b3   :  { %v4859_v16 = vpop.f32.mrb[162].mxu1 }
 0x7b4   :  { %v14499_v0 = vadd.f32 %v10686_v11, %v18163_v4  ;;  %v10687_v33 = vadd.f32 %v14225_v31, %v4859_v16  ;;  %v4861_v15 = vpop.f32.mrb[163].mxu1  ;;  %v5359_v4 = vmul.f32 %v14468_v57, %v14468_v57  ;;  %v5421_v25 = vadd.f32 %v5420_v34, %v5358_v28 }
 0x7b5   :  { %v18167_v15 = vld [vmem:[#allocation55_spill] sm:$0xff]  ;;  %v5289_v53 = vadd.f32 %v5288_v51, %v14468_v57  ;;  %v18170_v51 = vld [vmem:[#allocation58_spill] sm:$0xff] }
 0x7b6   :  { %18164 = vst [vmem:[#allocation19_spill] sm:$0xff] %v14499_v0  ;;  %v14506_v2 = vadd.f32 %v10687_v33, %v18165_v48  ;;  %v18168_v48 = vld [vmem:[#allocation23_spill] sm:$0xff] }
 0x7b7   :  { %v5290_v52 = vadd.f32 %v5289_v53, %v14473_v60  ;;  %v5362_v53 = vmul.f32 %v14489_v45, %v14489_v45 }
 0x7b8   :  { %18166 = vst [vmem:[#allocation22_spill] sm:$0xff] %v14506_v2 }
 0x7b9   :  { %v4864_v5 = vpop.f32.mrb[164].mxu1  ;;  %v5291_v28 = vadd.f32 %v5290_v52, %v14483_v55 }
 0x7ba   :  { %v10688_v11 = vadd.f32 %v14225_v31, %v4864_v5  ;;  %v4866_v36 = vpop.f32.mrb[165].mxu1  ;;  %v5422_v5 = vadd.f32 %v5421_v25, %v5359_v4 }
 0x7bb   :  { %v4867_v16 = vpop.f32.mrb[166].mxu1  ;;  %v5360_v36 = vmul.f32 %v14473_v60, %v14473_v60  ;;  %v18172_v60 = vld [vmem:[#allocation60_spill] sm:$0xff] }
 0x7bc   :  { %v14516_v33 = vadd.f32 %v10688_v11, %v18167_v15  ;;  %v10689_v12 = vadd.f32 %v14225_v31, %v4867_v16  ;;  %v4869_v27 = vpop.f32.mrb[167].mxu1  ;;  %v5361_v11 = vmul.f32 %v14483_v55, %v14483_v55 }
 0x7bd   :  { %v5423_v34 = vadd.f32 %v5422_v5, %v5360_v36  ;;  %v5363_v5 = vmul.f32 %v14499_v0, %v14499_v0 }
 0x7be   :  { %v14521_v19 = vadd.f32 %v10689_v12, %v18168_v48 }
 0x7bf   :  { %v5424_v48 = vadd.f32 %v5423_v34, %v5361_v11  ;;  %v5364_v34 = vmul.f32 %v14506_v2, %v14506_v2 }
 0x7c0   :  { %18169 = vst [vmem:[#allocation26_spill] sm:$0xff] %v14521_v19 }
 0x7c1   :  { %v4872_v22 = vpop.f32.mrb[168].mxu1  ;;  %v5425_v52 = vadd.f32 %v5424_v48, %v5362_v53  ;;  %v5365_v48 = vmul.f32 %v14516_v33, %v14516_v33  ;;  %v18176_v53 = vld [vmem:[#allocation59_spill] sm:$0xff] }
 0x7c2   :  { %v10690_v15 = vadd.f32 %v14225_v31, %v4872_v22  ;;  %v4874_v16 = vpop.f32.mrb[169].mxu1  ;;  %v5292_v22 = vadd.f32 %v5291_v28, %v14489_v45 }
 0x7c3   :  { %v4875_v27 = vpop.f32.mrb[170].mxu1  ;;  %v5426_v11 = vadd.f32 %v5425_v52, %v5363_v5 }
 0x7c4   :  { %v14531_v12 = vadd.f32 %v10690_v15, %v18170_v51  ;;  %v10691_v4 = vadd.f32 %v14225_v31, %v4875_v27  ;;  %v4877_v25 = vpop.f32.mrb[171].mxu1  ;;  %v5293_v15 = vadd.f32 %v5292_v22, %v14499_v0  ;;  %v18178_v0 = vld [vmem:[#allocation62_spill] sm:$0xff] }
 0x7c5   :  { %v18174_v25 = vld [vmem:[#allocation57_spill] sm:$0xff] }
 0x7c6   :  { %18171 = vst [vmem:[#allocation31_spill] sm:$0xff] %v14531_v12  ;;  %v14537_v57 = vadd.f32 %v10691_v4, %v18172_v60  ;;  %v5294_v45 = vadd.f32 %v5293_v15, %v14506_v2  ;;  %v5367_v2 = vmul.f32 %v14531_v12, %v14531_v12 }
 0x7c8   :  { %18173 = vst [vmem:[#allocation27_spill] sm:$0xff] %v14537_v57  ;;  %v5295_v5 = vadd.f32 %v5294_v45, %v14516_v33 }
 0x7c9   :  { %v4880_v36 = vpop.f32.mrb[172].mxu1 }
 0x7ca   :  { %v10692_v16 = vadd.f32 %v14225_v31, %v4880_v36  ;;  %v4882_v27 = vpop.f32.mrb[173].mxu1  ;;  %v5427_v36 = vadd.f32 %v5426_v11, %v5364_v34  ;;  %v5296_v15 = vadd.f32 %v5295_v5, %v14521_v19 }
 0x7cb   :  { %v4883_v51 = vpop.f32.mrb[174].mxu1 }
 0x7cc   :  { %v14547_v60 = vadd.f32 %v10692_v16, %v18174_v25  ;;  %v10693_v28 = vadd.f32 %v14225_v31, %v4883_v51  ;;  %v4885_v4 = vpop.f32.mrb[175].mxu1  ;;  %v5428_v27 = vadd.f32 %v5427_v36, %v5365_v48  ;;  %v5366_v16 = vmul.f32 %v14521_v19, %v14521_v19 }
 0x7cd   :  { %v5297_v48 = vadd.f32 %v5296_v15, %v14531_v12  ;;  %v18182_v15 = vld [vmem:[#allocation61_spill] sm:$0xff] }
 0x7ce   :  { %18175 = vst [vmem:[#allocation35_spill] sm:$0xff] %v14547_v60  ;;  %v14554_v22 = vadd.f32 %v10693_v28, %v18176_v53  ;;  %v5429_v34 = vadd.f32 %v5428_v27, %v5366_v16  ;;  %v18180_v53 = vld [vmem:[#allocation63_spill] sm:$0xff] }
 0x7cf   :  { %v5298_v19 = vadd.f32 %v5297_v48, %v14537_v57 }
 0x7d0   :  { %18177 = vst [vmem:[#allocation37_spill] sm:$0xff] %v14554_v22  ;;  %v5370_v48 = vmul.f32 %v14554_v22, %v14554_v22 }
 0x7d1   :  { %v4888_v52 = vpop.f32.mrb[176].mxu1  ;;  %v5299_v16 = vadd.f32 %v5298_v19, %v14547_v60 }
 0x7d2   :  { %v10694_v25 = vadd.f32 %v14225_v31, %v4888_v52  ;;  %v4890_v51 = vpop.f32.mrb[177].mxu1  ;;  %v5430_v52 = vadd.f32 %v5429_v34, %v5367_v2 }
 0x7d3   :  { %v4891_v4 = vpop.f32.mrb[178].mxu1  ;;  %v5368_v51 = vmul.f32 %v14537_v57, %v14537_v57  ;;  %v18184_v57 = vld [vmem:[#allocation25_spill] sm:$0xff] }
 0x7d4   :  { %v14564_v28 = vadd.f32 %v10694_v25, %v18178_v0  ;;  %v10695_v11 = vadd.f32 %v14225_v31, %v4891_v4  ;;  %v4893_v45 = vpop.f32.mrb[179].mxu1  ;;  %v5369_v0 = vmul.f32 %v14547_v60, %v14547_v60 }
 0x7d5   :  { %v5431_v27 = vadd.f32 %v5430_v52, %v5368_v51 }
 0x7d6   :  { %18179 = vst [vmem:[#allocation18_spill] sm:$0xff] %v14564_v28  ;;  %v14569_v36 = vadd.f32 %v10695_v11, %v18180_v53  ;;  %v5371_v52 = vmul.f32 %v14564_v28, %v14564_v28 }
 0x7d7   :  { %v5432_v53 = vadd.f32 %v5431_v27, %v5369_v0 }
 0x7d8   :  { %18181 = vst [vmem:[#allocation36_spill] sm:$0xff] %v14569_v36  ;;  %v5372_v27 = vmul.f32 %v14569_v36, %v14569_v36 }
 0x7d9   :  { %v4896_v5 = vpop.f32.mrb[180].mxu1  ;;  %v5433_v19 = vadd.f32 %v5432_v53, %v5370_v48  ;;  %v18188_v48 = vld [vmem:[#allocation67_spill] sm:$0xff] }
 0x7da   :  { %v10696_v25 = vadd.f32 %v14225_v31, %v4896_v5  ;;  %v4898_v4 = vpop.f32.mrb[181].mxu1  ;;  %v5300_v5 = vadd.f32 %v5299_v16, %v14554_v22 }
 0x7db   :  { %v4899_v45 = vpop.f32.mrb[182].mxu1  ;;  %v5434_v0 = vadd.f32 %v5433_v19, %v5371_v52 }
 0x7dc   :  { %v14579_v11 = vadd.f32 %v10696_v25, %v18182_v15  ;;  %v10697_v2 = vadd.f32 %v14225_v31, %v4899_v45  ;;  %v4901_v34 = vpop.f32.mrb[183].mxu1  ;;  %v5301_v25 = vadd.f32 %v5300_v5, %v14564_v28  ;;  %v18190_v28 = vld [vmem:[#allocation64_spill] sm:$0xff] }
 0x7dd   :  { %v18186_v34 = vld [vmem:[#allocation65_spill] sm:$0xff] }
 0x7de   :  { %18183 = vst [vmem:[#allocation38_spill] sm:$0xff] %v14579_v11  ;;  %v14585_v12 = vadd.f32 %v10697_v2, %v18184_v57  ;;  %v5302_v22 = vadd.f32 %v5301_v25, %v14569_v36  ;;  %v5373_v53 = vmul.f32 %v14579_v11, %v14579_v11 }
 0x7e0   :  { %18185 = vst [vmem:[#allocation40_spill] sm:$0xff] %v14585_v12  ;;  %v5303_v52 = vadd.f32 %v5302_v22, %v14579_v11  ;;  %v11719_v11 = vld [vmem:[#allocation9 + $0x210] sm:$0xff]  }
 0x7e1   :  { %v4904_v51 = vpop.f32.mrb[184].mxu1 }
 0x7e2   :  { %v10698_v4 = vadd.f32 %v14225_v31, %v4904_v51  ;;  %v4906_v45 = vpop.f32.mrb[185].mxu1  ;;  %v5435_v51 = vadd.f32 %v5434_v0, %v5372_v27  ;;  %v5304_v25 = vadd.f32 %v5303_v52, %v14585_v12 }
 0x7e3   :  { %v4907_v15 = vpop.f32.mrb[186].mxu1 }
 0x7e4   :  { %v14595_v57 = vadd.f32 %v10698_v4, %v18186_v34  ;;  %v10699_v16 = vadd.f32 %v14225_v31, %v4907_v15  ;;  %v4909_v2 = vpop.f32.mrb[187].mxu1  ;;  %v5436_v45 = vadd.f32 %v5435_v51, %v5373_v53  ;;  %v5374_v4 = vmul.f32 %v14585_v12, %v14585_v12 }
 0x7e6   :  { %18187 = vst [vmem:[#allocation42_spill] sm:$0xff] %v14595_v57  ;;  %v14602_v5 = vadd.f32 %v10699_v16, %v18188_v48  ;;  %v5375_v36 = vmul.f32 %v14595_v57, %v14595_v57  ;;  %v5437_v27 = vadd.f32 %v5436_v45, %v5374_v4  ;;  %v5305_v53 = vadd.f32 %v5304_v25, %v14595_v57  ;;  %v18192_v48 = vld [vmem:[#allocation66_spill] sm:$0xff]  ;;  %v18194_v25 = vld [vmem:[#allocation69_spill] sm:$0xff] }
 0x7e8   :  { %18189 = vst [vmem:[#allocation39_spill] sm:$0xff] %v14602_v5  ;;  %v5306_v12 = vadd.f32 %v5305_v53, %v14602_v5 }
 0x7e9   :  { %v4912_v19 = vpop.f32.mrb[188].mxu1 }
 0x7ea   :  { %v10700_v34 = vadd.f32 %v14225_v31, %v4912_v19  ;;  %v4914_v15 = vpop.f32.mrb[189].mxu1  ;;  %v5438_v19 = vadd.f32 %v5437_v27, %v5375_v36 }
 0x7eb   :  { %v4915_v2 = vpop.f32.mrb[190].mxu1  ;;  %v5376_v15 = vmul.f32 %v14602_v5, %v14602_v5  ;;  %v18196_v5 = vld [vmem:[#allocation70_spill] sm:$0xff] }
 0x7ec   :  { %v14612_v16 = vadd.f32 %v10700_v34, %v18190_v28  ;;  %v10701_v0 = vadd.f32 %v14225_v31, %v4915_v2  ;;  %v4917_v22 = vpop.f32.mrb[191].mxu1 }
 0x7ed   :  { %v5439_v45 = vadd.f32 %v5438_v19, %v5376_v15  ;;  %v18228_v6 = vld [vmem:[#allocation42_spill] sm:$0xff] }
 0x7ee   :  { %18191 = vst [vmem:[#allocation41_spill] sm:$0xff] %v14612_v16  ;;  %v14617_v51 = vadd.f32 %v10701_v0, %v18192_v48  ;;  %v5377_v28 = vmul.f32 %v14612_v16, %v14612_v16  ;;  %v5307_v4 = vadd.f32 %v5306_v12, %v14612_v16 }
 0x7f0   :  { %18193 = vst [vmem:[#allocation44_spill] sm:$0xff] %v14617_v51  ;;  %v5440_v48 = vadd.f32 %v5439_v45, %v5377_v28  ;;  %v5378_v53 = vmul.f32 %v14617_v51, %v14617_v51 }
 0x7f1   :  { %v4920_v52 = vpop.f32.mrb[192].mxu1 }
 0x7f2   :  { %v10702_v34 = vadd.f32 %v14225_v31, %v4920_v52  ;;  %v4922_v2 = vpop.f32.mrb[193].mxu1  ;;  %v5308_v52 = vadd.f32 %v5307_v4, %v14617_v51  ;;  %v5441_v12 = vadd.f32 %v5440_v48, %v5378_v53  ;;  %v18200_v53 = vld [vmem:[#allocation28_spill] sm:$0xff] }
 0x7f3   :  { %v4923_v22 = vpop.f32.mrb[194].mxu1 }
 0x7f4   :  { %v14627_v0 = vadd.f32 %v10702_v34, %v18194_v25  ;;  %v10703_v36 = vadd.f32 %v14225_v31, %v4923_v22  ;;  %v4925_v27 = vpop.f32.mrb[195].mxu1 }
 0x7f5   :  { %v18198_v27 = vld [vmem:[#allocation68_spill] sm:$0xff] }
 0x7f6   :  { %18195 = vst [vmem:[#allocation24_spill] sm:$0xff] %v14627_v0  ;;  %v14633_v57 = vadd.f32 %v10703_v36, %v18196_v5  ;;  %v5379_v19 = vmul.f32 %v14627_v0, %v14627_v0  ;;  %v5309_v34 = vadd.f32 %v5308_v52, %v14627_v0 }
 0x7f8   :  { %18197 = vst [vmem:[#allocation43_spill] sm:$0xff] %v14633_v57  ;;  %v5442_v28 = vadd.f32 %v5441_v12, %v5379_v19  ;;  %v5380_v45 = vmul.f32 %v14633_v57, %v14633_v57  ;;  %v5310_v51 = vadd.f32 %v5309_v34, %v14633_v57  ;;  %v18202_v57 = vld [vmem:[#allocation72_spill] sm:$0xff] }
 0x7f9   :  { %v4928_v15 = vpop.f32.mrb[196].mxu1 }
 0x7fa   :  { %v10704_v2 = vadd.f32 %v14225_v31, %v4928_v15  ;;  %v4930_v22 = vpop.f32.mrb[197].mxu1  ;;  %v5443_v15 = vadd.f32 %v5442_v28, %v5380_v45 }
 0x7fb   :  { %v4931_v25 = vpop.f32.mrb[198].mxu1 }
 0x7fc   :  { %v14643_v5 = vadd.f32 %v10704_v2, %v18198_v27  ;;  %v10705_v4 = vadd.f32 %v14225_v31, %v4931_v25  ;;  %v4933_v36 = vpop.f32.mrb[199].mxu1 }
 0x7fe   :  { %18199 = vst [vmem:[#allocation20_spill] sm:$0xff] %v14643_v5  ;;  %v5381_v48 = vmul.f32 %v14643_v5, %v14643_v5  ;;  %v14650_v52 = vadd.f32 %v10705_v4, %v18200_v53  ;;  %v5311_v19 = vadd.f32 %v5310_v51, %v14643_v5 }
 0x800   :  { %18201 = vst [vmem:[#allocation46_spill] sm:$0xff] %v14650_v52  ;;  %v5444_v22 = vadd.f32 %v5443_v15, %v5381_v48  ;;  %v5382_v2 = vmul.f32 %v14650_v52, %v14650_v52  ;;  %v5312_v34 = vadd.f32 %v5311_v19, %v14650_v52  ;;  %v18204_v48 = vld [vmem:[#allocation74_spill] sm:$0xff]  ;;  %v18233_v52 = vld [vmem:[#allocation43_spill] sm:$0xff] }
 0x801   :  { %v4936_v12 = vpop.f32.mrb[200].mxu1 }
 0x802   :  { %v10706_v27 = vadd.f32 %v14225_v31, %v4936_v12  ;;  %v4938_v25 = vpop.f32.mrb[201].mxu1  ;;  %v5445_v28 = vadd.f32 %v5444_v22, %v5382_v2  ;;  %v18206_v2 = vld [vmem:[#allocation71_spill] sm:$0xff] }
 0x803   :  { %v4939_v36 = vpop.f32.mrb[202].mxu1 }
 0x804   :  { %v14658_v0 = vadd.f32 %v10706_v27, %v18202_v57  ;;  %v10707_v4 = vadd.f32 %v14225_v31, %v4939_v36  ;;  %v4941_v53 = vpop.f32.mrb[203].mxu1 }
 0x806   :  { %18203 = vst [vmem:[#allocation48_spill] sm:$0xff] %v14658_v0  ;;  %v5313_v51 = vadd.f32 %v5312_v34, %v14658_v0  ;;  %v5383_v45 = vmul.f32 %v14658_v0, %v14658_v0  ;;  %v14665_v15 = vadd.f32 %v10707_v4, %v18204_v48  ;;  %v11716_v4 = vld [vmem:[#allocation9 + $0x200] sm:$0xff]   ;;  %v18232_v0 = vld [vmem:[#allocation24_spill] sm:$0xff] }
 0x807   :  { %10570 = vmatprep.subr.bf16.mxu1 %v11716_v4 }
 0x808   :  { %18205 = vst [vmem:[#allocation45_spill] sm:$0xff] %v14665_v15  ;;  %v5446_v12 = vadd.f32 %v5445_v28, %v5383_v45  ;;  %v5314_v25 = vadd.f32 %v5313_v51, %v14665_v15  ;;  %v5384_v19 = vmul.f32 %v14665_v15, %v14665_v15  ;;  %v18208_v45 = vld [vmem:[#allocation73_spill] sm:$0xff]  ;;  %10571 = vmatpush3.bf16.msra.mxu1 %v11716_v4 }
 0x809   :  { %v4944_v57 = vpop.f32.mrb[204].mxu1  ;;  %v11715_v4 = vld [vmem:[#allocation9 + $0x60] sm:$0xff]  }
 0x80a   :  { %v5447_v27 = vadd.f32 %v5446_v12, %v5384_v19  ;;  %v10708_v36 = vadd.f32 %v14225_v31, %v4944_v57  ;;  %v4946_v53 = vpop.f32.mrb[205].mxu1  ;;  %v11713_v12 = vld [vmem:[#allocation9 + $0x50] sm:$0xff]  }
 0x80b   :  { %v4947_v22 = vpop.f32.mrb[206].mxu1  ;;  %7393 = vmatpush1.bf16.msra.mxu0 %v11713_v12  ;;  %v11721_v12 = vld [vmem:[#allocation9 + $0x218] sm:$0xff]  }
 0x80c   :  { %v14672_v34 = vadd.f32 %v10708_v36, %v18206_v2  ;;  %v10709_v5 = vadd.f32 %v14225_v31, %v4947_v22  ;;  %v4949_v16 = vpop.f32.mrb[207].mxu1  ;;  %7394 = vmatprep.subr.bf16.mxu0 %v18060_v43 }
 0x80e   :  { %18207 = vst [vmem:[#allocation47_spill] sm:$0xff] %v14672_v34  ;;  %v5315_v28 = vadd.f32 %v5314_v25, %v14672_v34  ;;  %v5385_v51 = vmul.f32 %v14672_v34, %v14672_v34  ;;  %v14679_v48 = vadd.f32 %v10709_v5, %v18208_v45  ;;  %v11718_v25 = vld [vmem:[#allocation9 + $0x208] sm:$0xff]   ;;  %v11714_v5 = vld [vmem:[#allocation9 + $0x58] sm:$0xff]  }
 0x80f   :  { %10572 = vmatprep.subr.bf16.mxu1 %v11718_v25  ;;  %7395 = vmatpush1.bf16.msra.mxu0 %v11714_v5 }
 0x810   :  { %18209 = vst [vmem:[#allocation21_spill] sm:$0xff] %v14679_v48  ;;  %v5448_v19 = vadd.f32 %v5447_v27, %v5385_v51  ;;  %v5386_v57 = vmul.f32 %v14679_v48, %v14679_v48  ;;  %v5316_v36 = vadd.f32 %v5315_v28, %v14679_v48  ;;  %10573 = vmatpush3.bf16.msra.mxu1 %v11718_v25  ;;  %v11717_v25 = vld [vmem:[#allocation9 + $0x68] sm:$0xff]  }
 0x811   :  { %v4952_v16 = vpop.f32.mrb[208].mxu1  ;;  %7396 = vmatprep.subr.bf16.mxu0 %v18060_v43  ;;  %10574 = vmatprep.subr.bf16.mxu1 %v11719_v11 }
 0x812   :  { %v10710_v53 = vadd.f32 %v14225_v31, %v4952_v16  ;;  %v4954_v22 = vpop.f32.mrb[209].mxu1  ;;  %v5449_v2 = vadd.f32 %v5448_v19, %v5386_v57 }
 0x813   :  { %v4955_v45 = vpop.f32.mrb[210].mxu1  ;;  %7397 = vmatpush1.bf16.msra.mxu0 %v11715_v4  ;;  %v11720_v4 = vld [vmem:[#allocation9 + $0x70] sm:$0xff]  }
 0x814   :  { %v10711_v27 = vadd.f32 %v14225_v31, %v4955_v45  ;;  %v14688_v51 = vadd.f32 %v10710_v53, %v14431_v18  ;;  %v4957_v28 = vpop.f32.mrb[211].mxu1  ;;  %10575 = vmatpush3.bf16.msra.mxu1 %v11719_v11  ;;  %7398 = vmatprep.subr.bf16.mxu0 %v18060_v43  ;;  %v11724_v11 = vld [vmem:[#allocation9 + $0x228] sm:$0xff]  }
 0x815   :  { %10576 = vmatprep.subr.bf16.mxu1 %v11721_v12 }
 0x816   :  { %18210 = vst [vmem:[#allocation50_spill] sm:$0xff] %v14688_v51  ;;  %v5317_v16 = vadd.f32 %v5316_v36, %v14688_v51  ;;  %v5387_v19 = vmul.f32 %v14688_v51, %v14688_v51  ;;  %v14695_v57 = vadd.f32 %v10711_v27, %v14443_v42  ;;  %v11722_v36 = vld [vmem:[#allocation9 + $0x220] sm:$0xff]  }
 0x817   :  { %7399 = vmatpush1.bf16.msra.mxu0 %v11717_v25  ;;  %v11725_v25 = vld [vmem:[#allocation9 + $0x230] sm:$0xff]  }
 0x818   :  { %18211 = vst [vmem:[#allocation49_spill] sm:$0xff] %v14695_v57  ;;  %v5450_v22 = vadd.f32 %v5449_v2, %v5387_v19  ;;  %v5318_v18 = vadd.f32 %v5317_v16, %v14695_v57  ;;  %v5388_v53 = vmul.f32 %v14695_v57, %v14695_v57  ;;  %10577 = vmatpush3.bf16.msra.mxu1 %v11721_v12  ;;  %v11723_v12 = vld [vmem:[#allocation9 + $0x78] sm:$0xff]  }
 0x819   :  { %v4960_v5 = vpop.f32.mrb[212].mxu1  ;;  %7400 = vmatprep.subr.bf16.mxu0 %v18060_v43  ;;  %10578 = vmatprep.subr.bf16.mxu1 %v11722_v36 }
 0x81a   :  { %v5451_v45 = vadd.f32 %v5450_v22, %v5388_v53  ;;  %v10712_v28 = vadd.f32 %v14225_v31, %v4960_v5  ;;  %v4962_v60 = vpop.f32.mrb[213].mxu1 }
 0x81b   :  { %v4963_v42 = vpop.f32.mrb[214].mxu1  ;;  %7401 = vmatpush1.bf16.msra.mxu0 %v11720_v4 }
 0x81c   :  { %v14703_v2 = vadd.f32 %v10712_v28, %v14423_v1  ;;  %v10713_v27 = vadd.f32 %v14225_v31, %v4963_v42  ;;  %v4965_v16 = vpop.f32.mrb[215].mxu1  ;;  %10579 = vmatpush3.bf16.msra.mxu1 %v11722_v36  ;;  %7402 = vmatprep.subr.bf16.mxu0 %v18060_v43 }
 0x81d   :  { %10580 = vmatprep.subr.bf16.mxu1 %v11724_v11 }
 0x81e   :  { %18212 = vst [vmem:[#allocation29_spill] sm:$0xff] %v14703_v2  ;;  %v5319_v19 = vadd.f32 %v5318_v18, %v14703_v2  ;;  %v5389_v22 = vmul.f32 %v14703_v2, %v14703_v2  ;;  %v14711_v60 = vadd.f32 %v10713_v27, %v14441_v61  ;;  %v11726_v61 = vld [vmem:[#allocation9 + $0x80] sm:$0xff]  }
 0x81f   :  { %7403 = vmatpush1.bf16.msra.mxu0 %v11723_v12 }
 0x820   :  { %v5452_v1 = vadd.f32 %v5451_v45, %v5389_v22  ;;  %v5320_v53 = vadd.f32 %v5319_v19, %v14711_v60  ;;  %v5390_v31 = vmul.f32 %v14711_v60, %v14711_v60  ;;  %10581 = vmatpush3.bf16.msra.mxu1 %v11724_v11  ;;  %7661 = vmatprep.subr.bf16.mxu0 %v18060_v43  ;;  %v11727_v45 = vld [vmem:[#allocation9 + $0x238] sm:$0xff]   ;;  %v11728_v19 = vld [vmem:[#allocation9 + $0x88] sm:$0xff]  }
 0x821   :  { %10582 = vmatprep.subr.bf16.mxu1 %v11725_v25 }
 0x822   :  { %v5321_v18 = vrot.slane %v5320_v53, 4  ;;  %v5453_v5 = vadd.f32 %v5452_v1, %v5390_v31  ;;  %9725 = vmatmul.mubr.msk.bf16.vlgmr.msra.gmra.mrb[152].mxu0 %vm12853_vm7, %v12849_v8 }
 0x823   :  { %7662 = vmatpush1.bf16.msra.mxu0 %v11726_v61 }
 0x824   :  { %v5322_v28 = vadd.f32 %v5321_v18, %v5320_v53  ;;  %v5454_v42 = vrot.slane %v5453_v5, 4  ;;  %10583 = vmatpush3.bf16.msra.mxu1 %v11725_v25  ;;  %7663 = vmatprep.subr.bf16.mxu0 %v18060_v43 }
 0x825   :  { %10584 = vmatprep.subr.bf16.mxu1 %v11727_v45 }
 0x826   :  { %v5323_v27 = vrot.slane %v5322_v28, 2  ;;  %v5455_v16 = vadd.f32 %v5454_v42, %v5453_v5 }
 0x827   :  { %7664 = vmatpush1.bf16.msra.mxu0 %v11728_v19 }
 0x828   :  { %v5324_v36 = vadd.f32 %v5323_v27, %v5322_v28  ;;  %v5456_v4 = vrot.slane %v5455_v16, 2  ;;  %10585 = vmatpush3.bf16.msra.mxu1 %v11727_v45  ;;  %7665 = vmatprep.subr.bf16.mxu0 %v18060_v43  ;;  %v18226_v27 = vld [vmem:[#allocation15_spill] sm:$0xff] }
 0x82a   :  { %v5325_v11 = vrot.slane %v5324_v36, 1  ;;  %v5457_v22 = vadd.f32 %v5456_v4, %v5455_v16  ;;  %v18224_v16 = vld [vmem:[#allocation36_spill] sm:$0xff] }
 0x82b   :  { %v18227_v4 = vld [vmem:[#allocation40_spill] sm:$0xff] }
 0x82c   :  { %v5326_v1 = vadd.f32 %v5325_v11, %v5324_v36  ;;  %v5458_v53 = vrot.slane %v5457_v22, 1  ;;  %v18222_v36 = vld [vmem:[#allocation37_spill] sm:$0xff] }
 0x82e   :  { %v5459_v31 = vadd.f32 %v5458_v53, %v5457_v22  ;;  %v14723_v12 = vmul.f32 0.001953125, %v5326_v1  ;;  %v11729_v22 = vld [vmem:[#allocation9 + $0x90] sm:$0xff]   ;;  %v18213_v1 = vld [vmem:[#allocation30_spill] sm:$0xff] }
 0x82f   :  { %7666 = vmatpush1.bf16.msra.mxu0 %v11729_v22  ;;  %v5256_v22 = vld [vmem:[%s17748_s11] sm:$0x1]  ;;  %v18216_v53 = vld [vmem:[#allocation19_spill] sm:$0xff] }
 0x830   :  { %v5461_v18 = vmul.f32 0.001953125, %v5459_v31  ;;  %v5462_v5 = vmul.f32 %v14723_v12, %v14723_v12  ;;  %7667 = vmatprep.subr.bf16.mxu0 %v18060_v43  ;;  %v18217_v31 = vld [vmem:[#allocation22_spill] sm:$0xff]  ;;  %v5509_v34 = vsub.f32 %v18222_v36, %v14723_v12  ;;  %v5511_v51 = vsub.f32 %v18224_v16, %v14723_v12  ;;  %v18229_v36 = vld [vmem:[#allocation39_spill] sm:$0xff]  ;;  %v18230_v16 = vld [vmem:[#allocation41_spill] sm:$0xff] }
 0x831   :  { %v5513_v57 = vsub.f32 %v18227_v4, %v14723_v12  ;;  %v5514_v2 = vsub.f32 %v18228_v6, %v14723_v12  ;;  %v5515_v15 = vsub.f32 %v18229_v36, %v14723_v12  ;;  %v5518_v4 = vsub.f32 %v18232_v0, %v14723_v12 }
 0x832   :  { %v5463_v28 = vsub.f32 %v5461_v18, %v5462_v5  ;;  %v18218_v5 = vld [vmem:[#allocation26_spill] sm:$0xff]  ;;  %v5519_v6 = vsub.f32 %v18233_v52, %v14723_v12  ;;  %v18234_v36 = vsub.f32 %v14711_v60, %v14723_v12  ;;  %v18235_v25 = vsub.f32 %v14229_v47, %v14723_v12 }
 0x833   :  { %v18223_v18 = vld [vmem:[#allocation18_spill] sm:$0xff]  ;;  %v18237_v0 = vsub.f32 %v14241_v30, %v14723_v12  ;;  %v18238_v60 = vsub.f32 %v14245_v10, %v14723_v12 }
 0x834   :  { %v5464_v42 = vadd.f32 0.8, %v5463_v28  ;;  %v18214_v28 = vld [vmem:[#allocation32_spill] sm:$0xff]  ;;  %v5510_v48 = vsub.f32 %v18223_v18, %v14723_v12 }
 0x835   :  { %v14855_v18 = vld [vmem:[%s17749_s12] ss:$0 sm:$0xff] }
 0x836   :  { %11779 = vrsqrt.f32 %v5464_v42  ;;  %v18215_v42 = vld [vmem:[#allocation34_spill] sm:$0xff] }
 0x840   :  { %v11780_v61 = vpop.eup %11779 }
 0x841   :  { %v5530_v19 = vmul.f32 %v11780_v61, %v5256_v22  ;;  %v18225_v61 = vld [vmem:[#allocation38_spill] sm:$0xff] }
 0x842   :  { %v5512_v22 = vsub.f32 %v18225_v61, %v14723_v12  ;;  %v5516_v61 = vsub.f32 %v18230_v16, %v14723_v12  ;;  %v18236_v16 = vsub.f32 %v14233_v41, %v14723_v12 }
 0x843   :  { %v14844_v45 = vrot.slane %v5530_v19, %v18226_v27  ;;  %v18231_v27 = vld [vmem:[#allocation44_spill] sm:$0xff] }
 0x844   :  { %v5517_v19 = vsub.f32 %v18231_v27, %v14723_v12 }
 0x845   :  { %v5598_v8 = vmul.f32 %v14844_v45, %v18234_v36  ;;  %v14873_v11 = vmul.f32 %v14844_v45, %v18235_v25  ;;  %v14879_v27 = vmul.f32 %v14844_v45, %v18236_v16  ;;  %v14885_v52 = vmul.f32 %v14844_v45, %v18237_v0 }
 0x846   :  { %v14891_v47 = vmul.f32 %v14844_v45, %v18238_v60  ;;  %v18239_v25 = vsub.f32 %v14253_v20, %v14723_v12  ;;  %v18240_v36 = vsub.f32 %v14257_v13, %v14723_v12  ;;  %v18241_v16 = vsub.f32 %v14265_v49, %v14723_v12 }
 0x847   :  { %v14912_v0 = vadd.f32 %v14855_v18, %v5598_v8  ;;  %v18243_v20 = vsub.f32 %v14269_v39, %v14723_v12  ;;  %v18244_v13 = vsub.f32 %v14277_v37, %v14723_v12  ;;  %v18245_v49 = vsub.f32 %v14281_v56, %v14723_v12 }
 0x848   :  { %v14897_v41 = vmul.f32 %v14844_v45, %v18239_v25  ;;  %v14903_v30 = vmul.f32 %v14844_v45, %v18240_v36  ;;  %v14909_v10 = vmul.f32 %v14844_v45, %v18241_v16  ;;  %v18246_v8 = vsub.f32 %v14288_v38, %v14723_v12 }
 0x849   :  { %18242 = vst [vmem:[#allocation52_spill] sm:$0xff] %v14912_v0  ;;  %v14918_v60 = vmul.f32 %v14844_v45, %v18243_v20  ;;  %v14924_v25 = vmul.f32 %v14844_v45, %v18244_v13  ;;  %v14930_v36 = vmul.f32 %v14844_v45, %v18245_v49  ;;  %v18247_v16 = vsub.f32 %v14292_v7, %v14723_v12  ;;  %v18251_v49 = vld [vmem:[#allocation20_spill] sm:$0xff] }
 0x84a   :  { %v14936_v39 = vmul.f32 %v14844_v45, %v18246_v8  ;;  %v18248_v20 = vsub.f32 %v14296_v58, %v14723_v12  ;;  %v18249_v13 = vsub.f32 %v14301_v26, %v14723_v12  ;;  %v5520_v8 = vsub.f32 %v18251_v49, %v14723_v12 }
 0x84b   :  { %v14942_v37 = vmul.f32 %v14844_v45, %v18247_v16  ;;  %v18252_v7 = vsub.f32 %v14305_v23, %v14723_v12  ;;  %v18253_v58 = vsub.f32 %v14310_v59, %v14723_v12  ;;  %v18254_v26 = vsub.f32 %v14323_v54, %v14723_v12 }
 0x84c   :  { %v14948_v56 = vmul.f32 %v14844_v45, %v18248_v20  ;;  %v14954_v38 = vmul.f32 %v14844_v45, %v18249_v13  ;;  %v18255_v49 = vsub.f32 %v14330_v9, %v14723_v12 }
 0x84d   :  { %v14962_v16 = vmul.f32 %v14844_v45, %v18252_v7  ;;  %v14968_v20 = vmul.f32 %v14844_v45, %v18253_v58  ;;  %v14974_v13 = vmul.f32 %v14844_v45, %v18254_v26  ;;  %v18256_v7 = vsub.f32 %v14340_v63, %v14723_v12 }
 0x84e   :  { %18250 = vst [vmem:[#allocation54_spill] sm:$0xff] %v14954_v38  ;;  %v11730_v38 = vld [vmem:[#allocation9 + $0x98] sm:$0xff]   ;;  %v14980_v23 = vmul.f32 %v14844_v45, %v18255_v49  ;;  %v18257_v58 = vsub.f32 %v14348_v17, %v14723_v12  ;;  %v18258_v26 = vsub.f32 %v14358_v24, %v14723_v12  ;;  %v18260_v49 = vsub.f32 %v14364_v35, %v14723_v12 }
 0x84f   :  { %v14986_v59 = vmul.f32 %v14844_v45, %v18256_v7  ;;  %v18262_v7 = vsub.f32 %v14374_v21, %v14723_v12  ;;  %7668 = vmatpush1.bf16.msra.mxu0 %v11730_v38  ;;  %v18274_v38 = vsub.f32 %v14428_v14, %v14723_v12  ;;  %v18280_v14 = vsub.f32 %v14458_v32, %v14723_v12 }
 0x850   :  { %v14992_v54 = vmul.f32 %v14844_v45, %v18257_v58  ;;  %v14998_v9 = vmul.f32 %v14844_v45, %v18258_v26  ;;  %v15004_v63 = vmul.f32 %v14844_v45, %v18260_v49  ;;  %v18264_v58 = vsub.f32 %v14381_v29, %v14723_v12  ;;  %7669 = vmatprep.subr.bf16.mxu0 %v18060_v43 }
 0x851   :  { %v15010_v17 = vmul.f32 %v14844_v45, %v18262_v7  ;;  %v18266_v26 = vsub.f32 %v14391_v62, %v14723_v12  ;;  %v18268_v49 = vsub.f32 %v14399_v46, %v14723_v12  ;;  %v18270_v7 = vsub.f32 %v14409_v44, %v14723_v12 }
 0x852   :  { %18259 = vst [vmem:[#allocation51_spill] sm:$0xff] %v14998_v9  ;;  %18261 = vst [vmem:[#allocation53_spill] sm:$0xff] %v15004_v63  ;;  %v15016_v24 = vmul.f32 %v14844_v45, %v18264_v58  ;;  %v18272_v58 = vsub.f32 %v14415_v50, %v14723_v12  ;;  %v15046_v46 = vmul.f32 %v14844_v45, %v18274_v38  ;;  %v18310_v63 = vld [vmem:[#allocation29_spill] sm:$0xff] }
 0x853   :  { %18263 = vst [vmem:[#allocation56_spill] sm:$0xff] %v15010_v17  ;;  %v15022_v35 = vmul.f32 %v14844_v45, %v18266_v26  ;;  %v15028_v21 = vmul.f32 %v14844_v45, %v18268_v49  ;;  %v15034_v29 = vmul.f32 %v14844_v45, %v18270_v7  ;;  %v18276_v44 = vsub.f32 %v14436_v40, %v14723_v12  ;;  %v18308_v17 = vld [vmem:[#allocation49_spill] sm:$0xff] }
 0x854   :  { %18265 = vst [vmem:[#allocation33_spill] sm:$0xff] %v15016_v24  ;;  %v15040_v62 = vmul.f32 %v14844_v45, %v18272_v58  ;;  %18275 = vst [vmem:[#allocation57_spill] sm:$0xff] %v15046_v46  ;;  %v18278_v50 = vsub.f32 %v14450_v3, %v14723_v12  ;;  %v15065_v7 = vmul.f32 %v14844_v45, %v18280_v14  ;;  %v18306_v24 = vld [vmem:[#allocation50_spill] sm:$0xff]  ;;  %v11731_v9 = vld [vmem:[#allocation9 + $0xa0] sm:$0xff]  }
 0x855   :  { %18267 = vst [vmem:[#allocation55_spill] sm:$0xff] %v15022_v35  ;;  %18269 = vst [vmem:[#allocation23_spill] sm:$0xff] %v15028_v21  ;;  %v15053_v26 = vmul.f32 %v14844_v45, %v18276_v44  ;;  %v18282_v58 = vsub.f32 %v18213_v1, %v14723_v12  ;;  %v18283_v38 = vsub.f32 %v18214_v28, %v14723_v12  ;;  %v18300_v21 = vld [vmem:[#allocation45_spill] sm:$0xff]  ;;  %7670 = vmatpush1.bf16.msra.mxu0 %v11731_v9 }
 0x856   :  { %18271 = vst [vmem:[#allocation58_spill] sm:$0xff] %v15034_v29  ;;  %18273 = vst [vmem:[#allocation60_spill] sm:$0xff] %v15040_v62  ;;  %v15059_v49 = vmul.f32 %v14844_v45, %v18278_v50  ;;  %v18284_v3 = vsub.f32 %v14483_v55, %v14723_v12  ;;  %v18285_v32 = vsub.f32 %v18215_v42, %v14723_v12  ;;  %v18296_v29 = vld [vmem:[#allocation46_spill] sm:$0xff]  ;;  %v18304_v35 = vld [vmem:[#allocation21_spill] sm:$0xff]  ;;  %7671 = vmatprep.subr.bf16.mxu0 %v18060_v43 }
 0x857   :  { %18277 = vst [vmem:[#allocation59_spill] sm:$0xff] %v15053_v26  ;;  %18281 = vst [vmem:[#allocation63_spill] sm:$0xff] %v15065_v7  ;;  %v5567_v40 = vmul.f32 %v14844_v45, %v18282_v58  ;;  %v5568_v44 = vmul.f32 %v14844_v45, %v18283_v38  ;;  %v18286_v1 = vsub.f32 %v18216_v53, %v14723_v12  ;;  %v18290_v7 = vld [vmem:[#allocation31_spill] sm:$0xff] }
 0x858   :  { %18279 = vst [vmem:[#allocation62_spill] sm:$0xff] %v15059_v49  ;;  %v5569_v50 = vmul.f32 %v14844_v45, %v18284_v3  ;;  %v5570_v14 = vmul.f32 %v14844_v45, %v18285_v32  ;;  %v18287_v28 = vsub.f32 %v18217_v31, %v14723_v12  ;;  %v18288_v55 = vsub.f32 %v14516_v33, %v14723_v12  ;;  %v18292_v49 = vld [vmem:[#allocation27_spill] sm:$0xff] }
 0x859   :  { %v5571_v58 = vmul.f32 %v14844_v45, %v18286_v1  ;;  %v18289_v42 = vsub.f32 %v18218_v5, %v14723_v12  ;;  %v18291_v53 = vsub.f32 %v18290_v7, %v14723_v12  ;;  %v18293_v31 = vsub.f32 %v18292_v49, %v14723_v12  ;;  %v18294_v26 = vld [vmem:[#allocation35_spill] sm:$0xff] }
 0x85a   :  { %v5572_v38 = vmul.f32 %v14844_v45, %v18287_v28  ;;  %v5573_v3 = vmul.f32 %v14844_v45, %v18288_v55  ;;  %v18295_v33 = vsub.f32 %v18294_v26, %v14723_v12  ;;  %v5578_v46 = vmul.f32 %v14844_v45, %v5509_v34 }
 0x85b   :  { %v5574_v32 = vmul.f32 %v14844_v45, %v18289_v42  ;;  %v5575_v1 = vmul.f32 %v14844_v45, %v18291_v53  ;;  %v5576_v28 = vmul.f32 %v14844_v45, %v18293_v31  ;;  %v5579_v5 = vmul.f32 %v14844_v45, %v5510_v48 }
 0x85c   :  { %v5577_v55 = vmul.f32 %v14844_v45, %v18295_v33  ;;  %v5580_v42 = vmul.f32 %v14844_v45, %v5511_v51  ;;  %v5581_v7 = vmul.f32 %v14844_v45, %v5512_v22  ;;  %v5582_v53 = vmul.f32 %v14844_v45, %v5513_v57  ;;  %v18298_v57 = vld [vmem:[#allocation48_spill] sm:$0xff] }
 0x85d   :  { %v5583_v62 = vmul.f32 %v14844_v45, %v5514_v2  ;;  %v5584_v49 = vmul.f32 %v14844_v45, %v5515_v15  ;;  %v5585_v31 = vmul.f32 %v14844_v45, %v5516_v61  ;;  %v5586_v26 = vmul.f32 %v14844_v45, %v5517_v19 }
 0x85e   :  { %v5587_v33 = vmul.f32 %v14844_v45, %v5518_v4  ;;  %v5588_v34 = vmul.f32 %v14844_v45, %v5519_v6  ;;  %v5589_v48 = vmul.f32 %v14844_v45, %v5520_v8  ;;  %v18297_v51 = vsub.f32 %v18296_v29, %v14723_v12  ;;  %v18302_v4 = vld [vmem:[#allocation47_spill] sm:$0xff] }
 0x85f   :  { %v18299_v2 = vsub.f32 %v18298_v57, %v14723_v12  ;;  %v18301_v61 = vsub.f32 %v18300_v21, %v14723_v12  ;;  %v18303_v6 = vsub.f32 %v18302_v4, %v14723_v12  ;;  %v18305_v29 = vsub.f32 %v18304_v35, %v14723_v12 }
 0x860   :  { %v5590_v22 = vmul.f32 %v14844_v45, %v18297_v51  ;;  %v18307_v57 = vsub.f32 %v18306_v24, %v14723_v12  ;;  %v18309_v21 = vsub.f32 %v18308_v17, %v14723_v12  ;;  %v18311_v4 = vsub.f32 %v18310_v63, %v14723_v12 }
 0x861   :  { %v5591_v15 = vmul.f32 %v14844_v45, %v18299_v2  ;;  %v5592_v19 = vmul.f32 %v14844_v45, %v18301_v61  ;;  %v5593_v8 = vmul.f32 %v14844_v45, %v18303_v6  ;;  %v5594_v51 = vmul.f32 %v14844_v45, %v18305_v29 }
 0x862   :  { %v5595_v2 = vmul.f32 %v14844_v45, %v18307_v57  ;;  %v5596_v61 = vmul.f32 %v14844_v45, %v18309_v21  ;;  %v5597_v6 = vmul.f32 %v14844_v45, %v18311_v4  ;;  %v15157_v35 = vadd.f32 %v14855_v18, %v5567_v40  ;;  %v11732_v21 = vld [vmem:[#allocation9 + $0xa8] sm:$0xff]   ;;  %v18333_v4 = vld [vmem:[#allocation51_spill] sm:$0xff] }
 0x863   :  { %v15160_v24 = vadd.f32 %v14855_v18, %v5568_v44  ;;  %v15163_v29 = vadd.f32 %v14855_v18, %v5569_v50  ;;  %v15166_v17 = vadd.f32 %v14855_v18, %v5570_v14  ;;  %v15169_v12 = vadd.f32 %v14855_v18, %v5571_v58  ;;  %7672 = vmatpush1.bf16.msra.mxu0 %v11732_v21 }
 0x864   :  { %18312 = vst [vmem:[#allocation61_spill] sm:$0xff] %v15157_v35  ;;  %v15172_v45 = vadd.f32 %v14855_v18, %v5572_v38  ;;  %v15175_v9 = vadd.f32 %v14855_v18, %v5573_v3  ;;  %v15178_v63 = vadd.f32 %v14855_v18, %v5574_v32  ;;  %v15181_v40 = vadd.f32 %v14855_v18, %v5575_v1 }
 0x865   :  { %18313 = vst [vmem:[#allocation25_spill] sm:$0xff] %v15160_v24  ;;  %v15184_v44 = vadd.f32 %v14855_v18, %v5576_v28  ;;  %v15187_v50 = vadd.f32 %v14855_v18, %v5577_v55  ;;  %v15190_v14 = vadd.f32 %v14855_v18, %v5578_v46  ;;  %v15193_v58 = vadd.f32 %v14855_v18, %v5579_v5 }
 0x866   :  { %18314 = vst [vmem:[#allocation65_spill] sm:$0xff] %v15178_v63  ;;  %v15196_v38 = vadd.f32 %v14855_v18, %v5580_v42  ;;  %v15199_v3 = vadd.f32 %v14855_v18, %v5581_v7  ;;  %v15202_v32 = vadd.f32 %v14855_v18, %v5582_v53  ;;  %v15205_v1 = vadd.f32 %v14855_v18, %v5583_v62 }
 0x867   :  { %18315 = vst [vmem:[#allocation67_spill] sm:$0xff] %v15184_v44  ;;  %18316 = vst [vmem:[#allocation64_spill] sm:$0xff] %v15187_v50  ;;  %v15208_v28 = vadd.f32 %v14855_v18, %v5584_v49  ;;  %v15211_v46 = vadd.f32 %v14855_v18, %v5585_v31  ;;  %v15214_v55 = vadd.f32 %v14855_v18, %v5586_v26  ;;  %7673 = vmatprep.subr.bf16.mxu0 %v18060_v43 }
 0x868   :  { %18317 = vst [vmem:[#allocation66_spill] sm:$0xff] %v15190_v14  ;;  %18318 = vst [vmem:[#allocation69_spill] sm:$0xff] %v15199_v3  ;;  %v15217_v5 = vadd.f32 %v14855_v18, %v5587_v33  ;;  %v15220_v42 = vadd.f32 %v14855_v18, %v5588_v34  ;;  %v15223_v7 = vadd.f32 %v14855_v18, %v5589_v48  ;;  %v15247_v48 = vmul.f32 0.2, %v14912_v0  ;;  %v18337_v0 = vld [vmem:[#allocation55_spill] sm:$0xff] }
 0x869   :  { %18319 = vst [vmem:[#allocation70_spill] sm:$0xff] %v15202_v32  ;;  %18320 = vst [vmem:[#allocation68_spill] sm:$0xff] %v15211_v46  ;;  %v15226_v62 = vadd.f32 %v14855_v18, %v5590_v22  ;;  %v15229_v53 = vadd.f32 %v14855_v18, %v5591_v15  ;;  %v15232_v49 = vadd.f32 %v14855_v18, %v5592_v19  ;;  %v18346_v46 = vld [vmem:[#allocation63_spill] sm:$0xff]  ;;  %vm5718_vm1 = vcmp.ge.f32.partialorder %v15208_v28, 0.0 }
 0x86a   :  { %18321 = vst [vmem:[#allocation28_spill] sm:$0xff] %v15214_v55  ;;  %18322 = vst [vmem:[#allocation72_spill] sm:$0xff] %v15223_v7  ;;  %v15235_v31 = vadd.f32 %v14855_v18, %v5593_v8  ;;  %v15238_v26 = vadd.f32 %v14855_v18, %v5594_v51  ;;  %v15241_v33 = vadd.f32 %v14855_v18, %v5595_v2  ;;  %v18331_v2 = vld [vmem:[#allocation54_spill] sm:$0xff]  ;;  %v18342_v7 = vld [vmem:[#allocation59_spill] sm:$0xff] }
 0x86b   :  { %18323 = vst [vmem:[#allocation74_spill] sm:$0xff] %v15226_v62  ;;  %v15244_v34 = vadd.f32 %v14855_v18, %v5596_v61  ;;  %18326 = vst [vmem:[#allocation30_spill] sm:$0xff] %v15247_v48  ;;  %v5605_v22 = vadd.f32 %v14855_v18, %v14873_v11  ;;  %v15253_v15 = vadd.f32 %v14855_v18, %v14879_v27  ;;  %v18336_v48 = vld [vmem:[#allocation33_spill] sm:$0xff] }
 0x86c   :  { %18324 = vst [vmem:[#allocation71_spill] sm:$0xff] %v15235_v31  ;;  %18325 = vst [vmem:[#allocation73_spill] sm:$0xff] %v15238_v26  ;;  %v15256_v19 = vadd.f32 %v14855_v18, %v5597_v6  ;;  %v15260_v8 = vadd.f32 %v14855_v18, %v14885_v52  ;;  %v15264_v51 = vadd.f32 %v14855_v18, %v14891_v47  ;;  %v18334_v6 = vld [vmem:[#allocation53_spill] sm:$0xff]  ;;  %v18339_v26 = vld [vmem:[#allocation58_spill] sm:$0xff] }
 0x86d   :  { %18327 = vst [vmem:[#allocation32_spill] sm:$0xff] %v15253_v15  ;;  %v15268_v57 = vadd.f32 %v14855_v18, %v14897_v41  ;;  %v15272_v11 = vadd.f32 %v14855_v18, %v14903_v30  ;;  %v15276_v27 = vadd.f32 %v14855_v18, %v14909_v10  ;;  %v15280_v52 = vadd.f32 %v14855_v18, %v14918_v60  ;;  %v18340_v31 = vld [vmem:[#allocation60_spill] sm:$0xff]  ;;  %v18341_v62 = vld [vmem:[#allocation57_spill] sm:$0xff] }
 0x86e   :  { %18328 = vst [vmem:[#allocation34_spill] sm:$0xff] %v15256_v19  ;;  %18329 = vst [vmem:[#allocation19_spill] sm:$0xff] %v15264_v51  ;;  %v15284_v47 = vadd.f32 %v14855_v18, %v14924_v25  ;;  %v15288_v41 = vadd.f32 %v14855_v18, %v14930_v36  ;;  %v15292_v30 = vadd.f32 %v14855_v18, %v14936_v39  ;;  %v18338_v19 = vld [vmem:[#allocation23_spill] sm:$0xff]  ;;  %vm5669_vm12 = vcmp.ge.f32.partialorder %v5605_v22, 0.0 }
 0x86f   :  { %18330 = vst [vmem:[#allocation22_spill] sm:$0xff] %v15280_v52  ;;  %v15296_v10 = vadd.f32 %v14855_v18, %v14942_v37  ;;  %v15300_v60 = vadd.f32 %v14855_v18, %v14948_v56  ;;  %v15304_v25 = vadd.f32 %v14855_v18, %v18331_v2  ;;  %v15308_v36 = vadd.f32 %v14855_v18, %v14962_v16  ;;  %v18335_v2 = vld [vmem:[#allocation56_spill] sm:$0xff] }
 0x870   :  { %v15312_v39 = vadd.f32 %v14855_v18, %v14968_v20  ;;  %v15316_v37 = vadd.f32 %v14855_v18, %v14974_v13  ;;  %v15320_v56 = vadd.f32 %v14855_v18, %v14980_v23  ;;  %v15324_v61 = vadd.f32 %v14855_v18, %v14986_v59 }
 0x871   :  { %v15328_v16 = vadd.f32 %v14855_v18, %v14992_v54  ;;  %v15332_v20 = vadd.f32 %v14855_v18, %v18333_v4  ;;  %v15336_v13 = vadd.f32 %v14855_v18, %v18334_v6  ;;  %v15340_v23 = vadd.f32 %v14855_v18, %v18335_v2 }
 0x872   :  { %18332 = vst [vmem:[#allocation26_spill] sm:$0xff] %v15312_v39  ;;  %v15344_v59 = vadd.f32 %v14855_v18, %v18336_v48  ;;  %v15348_v54 = vadd.f32 %v14855_v18, %v18337_v0  ;;  %v15352_v4 = vadd.f32 %v14855_v18, %v18338_v19  ;;  %v15356_v6 = vadd.f32 %v14855_v18, %v18339_v26  ;;  %v18344_v26 = vld [vmem:[#allocation62_spill] sm:$0xff] }
 0x873   :  { %v15360_v2 = vadd.f32 %v14855_v18, %v18340_v31  ;;  %v15364_v48 = vadd.f32 %v14855_v18, %v18341_v62  ;;  %v15368_v0 = vadd.f32 %v14855_v18, %v18342_v7  ;;  %vm5671_vm13 = vcmp.ge.f32.partialorder %v15260_v8, 0.0 }
 0x874   :  { %vm5673_vm14 = vcmp.ge.f32.partialorder %v15268_v57, 0.0  ;;  %vm5674_vm15 = vcmp.ge.f32.partialorder %v15272_v11, 0.0  ;;  %vm5675_vm0 = vcmp.ge.f32.partialorder %v15276_v27, 0.0  ;;  %vm5677_vm4 = vcmp.ge.f32.partialorder %v15284_v47, 0.0 }
 0x875   :  { %vm5679_vm5 = vcmp.ge.f32.partialorder %v15292_v30, 0.0  ;;  %v5733_v62 = vmul.f32 0.2, %v5605_v22  ;;  %vm5681_vm6 = vcmp.ge.f32.partialorder %v15300_v60, 0.0  ;;  %vm5683_vm8 = vcmp.ge.f32.partialorder %v15308_v36, 0.0 }
 0x876   :  { %v15380_v7 = vmul.f32 0.2, %v15253_v15  ;;  %v5735_v31 = vmul.f32 0.2, %v15260_v8  ;;  %v15385_v19 = vadd.f32 %v14855_v18, %v18344_v26  ;;  %vm5685_vm9 = vcmp.ge.f32.partialorder %v15316_v37, 0.0 }
 0x877   :  { %v15389_v21 = vmul.f32 0.2, %v15264_v51  ;;  %v5737_v43 = vmul.f32 0.2, %v15268_v57  ;;  %v5738_v55 = vmul.f32 0.2, %v15272_v11  ;;  %v15395_v32 = vadd.f32 %v14855_v18, %v18346_v46 }
 0x878   :  { %18343 = vst [vmem:[#allocation37_spill] sm:$0xff] %v15380_v7  ;;  %vm5687_vm10 = vcmp.ge.f32.partialorder %v15324_v61, 0.0  ;;  %v5739_v7 = vmul.f32 0.2, %v15276_v27  ;;  %v15400_v26 = vmul.f32 0.2, %v15280_v52  ;;  %v15412_v18 = vsel %vm5669_vm12, %v5605_v22, %v5733_v62 }
 0x879   :  { %18345 = vst [vmem:[#allocation18_spill] sm:$0xff] %v15389_v21  ;;  %v5741_v15 = vmul.f32 0.2, %v15284_v47  ;;  %vm5689_vm11 = vcmp.ge.f32.partialorder %v15332_v20, 0.0  ;;  %v15405_v21 = vmul.f32 0.2, %v15288_v41 }
 0x87a   :  { %18347 = vst [vmem:[#allocation36_spill] sm:$0xff] %v15400_v26  ;;  %v5743_v51 = vmul.f32 0.2, %v15292_v30  ;;  %v15409_v3 = vmul.f32 0.2, %v15296_v10  ;;  %vm5691_vm2 = vcmp.ge.f32.partialorder %v15340_v23, 0.0 }
 0x87b   :  { %18348 = vst [vmem:[#allocation38_spill] sm:$0xff] %v15405_v21  ;;  %v5745_v46 = vmul.f32 0.2, %v15300_v60  ;;  %v15417_v26 = vmul.f32 0.2, %v15304_v25  ;;  %v15423_v21 = vsel %vm5671_vm13, %v15260_v8, %v5735_v31  ;;  %vm5693_vm3 = vcmp.ge.f32.partialorder %v15348_v54, 0.0 }
 0x87c   :  { %18349 = vst [vmem:[#allocation15_spill] sm:$0xff] %v15409_v3  ;;  %v5747_v52 = vmul.f32 0.2, %v15308_v36  ;;  %v15427_v3 = vmul.f32 0.2, %v15312_v39  ;;  %vm5695_vm12 = vcmp.ge.f32.partialorder %v15356_v6, 0.0 }
 0x87d   :  { %18350 = vst [vmem:[#allocation40_spill] sm:$0xff] %v15417_v26  ;;  %v5749_v22 = vmul.f32 0.2, %v15316_v37  ;;  %v15431_v62 = vmul.f32 0.2, %v15320_v56  ;;  %v15436_v26 = vsel %vm5673_vm14, %v15268_v57, %v5737_v43  ;;  %vm5713_vm13 = vcmp.ge.f32.partialorder %v15193_v58, 0.0 }
 0x87e   :  { %18351 = vst [vmem:[#allocation42_spill] sm:$0xff] %v15427_v3  ;;  %v5751_v8 = vmul.f32 0.2, %v15324_v61  ;;  %v15441_v31 = vmul.f32 0.2, %v15328_v16  ;;  %v15447_v3 = vsel %vm5674_vm15, %v15272_v11, %v5738_v55  ;;  %vm5717_vm15 = vcmp.ge.f32.partialorder %v15205_v1, 0.0 }
 0x87f   :  { %18352 = vst [vmem:[#allocation39_spill] sm:$0xff] %v15431_v62  ;;  %v5753_v39 = vmul.f32 0.2, %v15332_v20  ;;  %v15451_v62 = vmul.f32 0.2, %v15336_v13  ;;  %vm5729_vm14 = vcmp.ge.f32.partialorder %v15241_v33, 0.0 }
 0x880   :  { %18353 = vst [vmem:[#allocation41_spill] sm:$0xff] %v15441_v31  ;;  %v5755_v43 = vmul.f32 0.2, %v15340_v23  ;;  %v15455_v57 = vmul.f32 0.2, %v15344_v59  ;;  %v15460_v31 = vsel %vm5675_vm0, %v15276_v27, %v5739_v7  ;;  %vm5726_vm0 = vcmp.ge.f32.partialorder %v15232_v49, 0.0 }
 0x881   :  { %18354 = vst [vmem:[#allocation44_spill] sm:$0xff] %v15451_v62  ;;  %v5757_v55 = vmul.f32 0.2, %v15348_v54  ;;  %v15466_v11 = vmul.f32 0.2, %v15352_v4 }
 0x882   :  { %18355 = vst [vmem:[#allocation24_spill] sm:$0xff] %v15455_v57  ;;  %v5759_v62 = vmul.f32 0.2, %v15356_v6  ;;  %v15472_v57 = vsel %vm5677_vm4, %v15284_v47, %v5741_v15  ;;  %v15478_v27 = vmul.f32 0.2, %v15360_v2  ;;  %v15489_v15 = vsel %vm5679_vm5, %v15292_v30, %v5743_v51 }
 0x883   :  { %18356 = vst [vmem:[#allocation43_spill] sm:$0xff] %v15466_v11  ;;  %v15481_v7 = vmul.f32 0.2, %v15364_v48  ;;  %v15484_v11 = vmul.f32 0.2, %v15368_v0  ;;  %vm5725_vm4 = vcmp.ge.f32.partialorder %v15229_v53, 0.0  ;;  %v15506_v51 = vsel %vm5681_vm6, %v15300_v60, %v5745_v46 }
 0x884   :  { %18357 = vst [vmem:[#allocation20_spill] sm:$0xff] %v15478_v27  ;;  %v15495_v47 = vmul.f32 0.2, %v15385_v19  ;;  %v15498_v27 = vmul.f32 0.2, %v15395_v32  ;;  %vm5730_vm5 = vcmp.ge.f32.partialorder %v15244_v34, 0.0 }
 0x885   :  { %18358 = vst [vmem:[#allocation31_spill] sm:$0xff] %v15481_v7  ;;  %18359 = vst [vmem:[#allocation27_spill] sm:$0xff] %v15484_v11  ;;  %v15501_v7 = vmul.f32 0.2, %v15157_v35  ;;  %v15510_v30 = vmul.f32 0.2, %v15160_v24 }
 0x886   :  { %18360 = vst [vmem:[#allocation35_spill] sm:$0xff] %v15495_v47  ;;  %v15513_v11 = vmul.f32 0.2, %v15163_v29  ;;  %v15516_v47 = vmul.f32 0.2, %v15166_v17  ;;  %vm18385_vm6 = vcmp.ge.f32.partialorder %v15220_v42, 0.0 }
 0x887   :  { %18361 = vst [vmem:[#allocation46_spill] sm:$0xff] %v15501_v7  ;;  %18362 = vst [vmem:[#allocation48_spill] sm:$0xff] %v15510_v30  ;;  %v15521_v7 = vsel %vm5683_vm8, %v15308_v36, %v5747_v52  ;;  %v15524_v35 = vmul.f32 0.2, %v15169_v12  ;;  %v15527_v60 = vmul.f32 0.2, %v15172_v45  ;;  %v15535_v30 = vsel %vm5685_vm9, %v15316_v37, %v5749_v22 }
 0x888   :  { %v15530_v46 = vmul.f32 0.2, %v15175_v9  ;;  %v15538_v24 = vmul.f32 0.2, %v15178_v63  ;;  %v15541_v52 = vmul.f32 0.2, %v15181_v40 }
 0x889   :  { %18363 = vst [vmem:[#allocation45_spill] sm:$0xff] %v15524_v35  ;;  %18364 = vst [vmem:[#allocation47_spill] sm:$0xff] %v15527_v60  ;;  %v15544_v36 = vmul.f32 0.2, %v15184_v44  ;;  %v15549_v60 = vsel %vm5687_vm10, %v15324_v61, %v5751_v8  ;;  %v15555_v37 = vmul.f32 0.2, %v15190_v14  ;;  %v15571_v8 = vsel %vm5691_vm2, %v15340_v23, %v5755_v43 }
 0x88a   :  { %18365 = vst [vmem:[#allocation21_spill] sm:$0xff] %v15530_v46  ;;  %18366 = vst [vmem:[#allocation50_spill] sm:$0xff] %v15538_v24  ;;  %v15552_v46 = vmul.f32 0.2, %v15187_v50  ;;  %v5777_v22 = vmul.f32 0.2, %v15193_v58  ;;  %v15593_v43 = vsel %vm5695_vm12, %v15356_v6, %v5759_v62 }
 0x88b   :  { %18367 = vst [vmem:[#allocation49_spill] sm:$0xff] %v15541_v52  ;;  %18368 = vst [vmem:[#allocation29_spill] sm:$0xff] %v15544_v36  ;;  %v15561_v52 = vsel %vm5689_vm11, %v15332_v20, %v5753_v39  ;;  %v5778_v36 = vmul.f32 0.2, %v15196_v38  ;;  %v18371_v44 = vld [vmem:[#allocation69_spill] sm:$0xff]  ;;  %v18375_v63 = vld [vmem:[#allocation68_spill] sm:$0xff]  ;;  %v15583_v20 = vsel %vm5693_vm3, %v15348_v54, %v5757_v55 }
 0x88c   :  { %18369 = vst [vmem:[#allocation54_spill] sm:$0xff] %v15552_v46  ;;  %18370 = vst [vmem:[#allocation51_spill] sm:$0xff] %v15555_v37  ;;  %v15565_v24 = vmul.f32 0.2, %v18371_v44  ;;  %v5781_v61 = vmul.f32 0.2, %v15205_v1  ;;  %v5841_v55 = vsel %vm5713_vm13, %v15193_v58, %v5777_v22 }
 0x88d   :  { %v18373_v37 = vld [vmem:[#allocation70_spill] sm:$0xff]  ;;  %v5782_v14 = vmul.f32 0.2, %v15208_v28  ;;  %v15578_v39 = vmul.f32 0.2, %v18375_v63  ;;  %vm18383_vm2 = vcmp.ge.f32.partialorder %v15196_v38, 0.0 }
 0x88e   :  { %18372 = vst [vmem:[#allocation53_spill] sm:$0xff] %v15565_v24  ;;  %v15574_v46 = vmul.f32 0.2, %v18373_v37  ;;  %v18377_v24 = vld [vmem:[#allocation28_spill] sm:$0xff]  ;;  %v5785_v50 = vmul.f32 0.2, %v15217_v5  ;;  %v5842_v6 = vsel %vm18383_vm2, %v15196_v38, %v5778_v36  ;;  %v5845_v62 = vsel %vm5717_vm15, %v15205_v1, %v5781_v61 }
 0x88f   :  { %18376 = vst [vmem:[#allocation33_spill] sm:$0xff] %v15578_v39  ;;  %v15586_v44 = vmul.f32 0.2, %v18377_v24  ;;  %v5786_v23 = vmul.f32 0.2, %v15220_v42  ;;  %vm18384_vm3 = vcmp.ge.f32.partialorder %v15217_v5, 0.0 }
 0x890   :  { %18374 = vst [vmem:[#allocation56_spill] sm:$0xff] %v15574_v46  ;;  %v18379_v46 = vld [vmem:[#allocation72_spill] sm:$0xff]  ;;  %v5789_v39 = vmul.f32 0.2, %v15229_v53  ;;  %v5790_v54 = vmul.f32 0.2, %v15232_v49  ;;  %v5849_v58 = vsel %vm18384_vm3, %v15217_v5, %v5785_v50 }
 0x891   :  { %18378 = vst [vmem:[#allocation55_spill] sm:$0xff] %v15586_v44  ;;  %v15596_v37 = vmul.f32 0.2, %v18379_v46  ;;  %v18381_v44 = vld [vmem:[#allocation74_spill] sm:$0xff]  ;;  %v5793_v63 = vmul.f32 0.2, %v15241_v33  ;;  %v5846_v46 = vsel %vm5718_vm1, %v15208_v28, %v5782_v14  ;;  %v5850_v22 = vsel %vm18385_vm6, %v15220_v42, %v5786_v23 }
 0x892   :  { %v15604_v24 = vmul.f32 0.2, %v18381_v44  ;;  %v18386_v38 = vld [vmem:[#allocation71_spill] sm:$0xff]  ;;  %v5853_v1 = vsel %vm5725_vm4, %v15229_v53, %v5789_v39  ;;  %v5854_v14 = vsel %vm5726_vm0, %v15232_v49, %v5790_v54  ;;  %v18388_v28 = vld [vmem:[#allocation73_spill] sm:$0xff]  ;;  %v15641_v61 = vrot.slane %v5841_v55, 7 }
 0x893   :  { %18380 = vst [vmem:[#allocation23_spill] sm:$0xff] %v15596_v37  ;;  %v5794_v37 = vmul.f32 0.2, %v15244_v34  ;;  %v15624_v36 = vmul.f32 0.2, %v18386_v38  ;;  %v5857_v50 = vsel %vm5729_vm14, %v15241_v33, %v5793_v63  ;;  %v6137_v23 = vrot.slane %v5842_v6, 7 }
 0x894   :  { %18382 = vst [vmem:[#allocation58_spill] sm:$0xff] %v15604_v24  ;;  %v11733_v24 = vld [vmem:[#allocation9 + $0xb0] sm:$0xff]   ;;  %v15636_v5 = vmul.f32 0.2, %v18388_v28  ;;  %18390 = vst [vmem:[#allocation59_spill] sm:$0xff] %v15641_v61  ;;  %v15643_v53 = vrot.slane %v5845_v62, 7 }
 0x895   :  { %18387 = vst [vmem:[#allocation60_spill] sm:$0xff] %v15624_v36  ;;  %v5858_v42 = vsel %vm5730_vm5, %v15244_v34, %v5794_v37  ;;  %7674 = vmatpush1.bf16.msra.mxu0 %v11733_v24  ;;  %v6143_v39 = vrot.slane %v5846_v46, 7  ;;  %v15645_v36 = vrot.slane %v5849_v58, 7  ;;  %v6149_v49 = vrot.slane %v5850_v22, 7  ;;  %v18394_v63 = vld [vmem:[#allocation34_spill] sm:$0xff] }
 0x896   :  { %18389 = vst [vmem:[#allocation57_spill] sm:$0xff] %v15636_v5  ;;  %18391 = vst [vmem:[#allocation62_spill] sm:$0xff] %v15643_v53  ;;  %v18393_v54 = vmov 0   ;;  %v15649_v33 = vmul.f32 0.2, %v18394_v63  ;;  %v15651_v5 = vrot.slane %v5853_v1, 7 }
 0x897   :  { %18392 = vst [vmem:[#allocation63_spill] sm:$0xff] %v15645_v36  ;;  %7675 = vmatprep.subr.bf16.mxu0 %v18393_v54  ;;  %v6155_v28 = vrot.slane %v5854_v14, 7  ;;  %v15653_v44 = vrot.slane %v5857_v50, 7  ;;  %v15656_v34 = vrot.slane %v15436_v26, 7  ;;  %v6077_v24 = vrot.slane %v15447_v3, 7  ;;  %v11734_v26 = vld [vmem:[#allocation9 + $0xb8] sm:$0xff]  }
 0x898   :  { %18395 = vst [vmem:[#allocation75_spill] sm:$0xff] %v15649_v33  ;;  %18396 = vst [vmem:[#allocation76_spill] sm:$0xff] %v15651_v5  ;;  %vm18398_vm1 = vcmask 1040384   ;;  %v6161_v37 = vrot.slane %v5858_v42, 7 }
 0x899   :  { %18397 = vst [vmem:[#allocation77_spill] sm:$0xff] %v15653_v44  ;;  %v15661_v46 = vsel %vm18398_vm1, %v15645_v36, %v6149_v49  ;;  %vm18400_vm8 = vmmov %vm18398_vm1  ;;  %7676 = vmatpush1.bf16.msra.mxu0 %v11734_v26 }
 0x89a   :  { %18399 = vst [vmem:[#allocation78_spill] sm:$0xff] %v15661_v46  ;;  %v15665_v55 = vsel %vm18400_vm8, %v15641_v61, %v6137_v23  ;;  %vm18402_vm9 = vmmov %vm18398_vm1  ;;  %7677 = vmatprep.subr.bf16.mxu0 %v18393_v54  ;;  %vm18429_vm8 = vcmask 1045504  }
 0x89b   :  { %18401 = vst [vmem:[#allocation79_spill] sm:$0xff] %v15665_v55  ;;  %v15669_v6 = vsel %vm18402_vm9, %v15643_v53, %v6143_v39  ;;  %vm18404_vm10 = vmmov %vm18398_vm1 }
 0x89c   :  { %18403 = vst [vmem:[#allocation80_spill] sm:$0xff] %v15669_v6  ;;  %v15673_v62 = vsel %vm18404_vm10, %v15651_v5, %v6155_v28  ;;  %vm18406_vm11 = vmmov %vm18398_vm1  ;;  %v18430_v63 = vrot.slane %v15669_v6, 2  ;;  %v18464_v6 = vld [vmem:[#allocation22_spill] sm:$0xff] }
 0x89d   :  { %18405 = vst [vmem:[#allocation81_spill] sm:$0xff] %v15673_v62  ;;  %v15677_v3 = vsel %vm18406_vm11, 0.0, %v15641_v61  ;;  %vm18407_vm12 = vmmov %vm18398_vm1 }
 0x89e   :  { %v15681_v58 = vsel %vm18407_vm12, %v15653_v44, %v6161_v37  ;;  %vm18409_vm13 = vmmov %vm18398_vm1 }
 0x89f   :  { %18408 = vst [vmem:[#allocation82_spill] sm:$0xff] %v15681_v58  ;;  %v15685_v22 = vsel %vm18409_vm13, 0.0, %v15643_v53  ;;  %vm18411_vm14 = vmmov %vm18398_vm1 }
 0x8a0   :  { %18410 = vst [vmem:[#allocation83_spill] sm:$0xff] %v15685_v22  ;;  %v15689_v1 = vsel %vm18411_vm14, 0.0, %v15645_v36  ;;  %vm18413_vm15 = vmmov %vm18398_vm1 }
 0x8a1   :  { %18412 = vst [vmem:[#allocation84_spill] sm:$0xff] %v15689_v1  ;;  %v15692_v14 = vsel %vm18413_vm15, %v6137_v23, 0.0  ;;  %vm18415_vm0 = vmmov %vm18398_vm1 }
 0x8a2   :  { %18414 = vst [vmem:[#allocation85_spill] sm:$0xff] %v15692_v14  ;;  %v15696_v50 = vsel %vm18415_vm0, 0.0, %v15651_v5  ;;  %vm18417_vm4 = vmmov %vm18415_vm0  ;;  %v6704_v33 = vrot.slane %v15692_v14, 2 }
 0x8a3   :  { %18416 = vst [vmem:[#allocation86_spill] sm:$0xff] %v15696_v50  ;;  %v15700_v42 = vsel %vm18417_vm4, 0.0, %v15653_v44  ;;  %vm18419_vm5 = vmmov %vm18415_vm0  ;;  %v18443_v50 = vld [vmem:[#allocation19_spill] sm:$0xff] }
 0x8a4   :  { %18418 = vst [vmem:[#allocation87_spill] sm:$0xff] %v15700_v42  ;;  %v15703_v61 = vsel %vm18419_vm5, %v6143_v39, 0.0  ;;  %vm18421_vm2 = vmmov %vm18415_vm0  ;;  %v6742_v39 = vrot.slane %v15681_v58, 2  ;;  %v18436_v58 = vrot.slane %v15673_v62, 2  ;;  %vm5672_vm15 = vcmp.ge.f32.partialorder %v18443_v50, 0.0  ;;  %v18445_v62 = vld [vmem:[#allocation18_spill] sm:$0xff] }
 0x8a5   :  { %18420 = vst [vmem:[#allocation88_spill] sm:$0xff] %v15703_v61  ;;  %v15706_v53 = vsel %vm18421_vm2, %v6149_v49, 0.0  ;;  %vm18423_vm3 = vmmov %vm18415_vm0  ;;  %v6714_v49 = vrot.slane %v15703_v61, 2  ;;  %v18428_v61 = vrot.slane %v15665_v55, 2 }
 0x8a6   :  { %18422 = vst [vmem:[#allocation89_spill] sm:$0xff] %v15706_v53  ;;  %v15709_v36 = vsel %vm18423_vm3, %v6077_v24, 0.0  ;;  %vm18424_vm6 = vmmov %vm18415_vm0  ;;  %v6724_v38 = vrot.slane %v15706_v53, 2 }
 0x8a7   :  { %v15712_v23 = vsel %vm18424_vm6, %v6155_v28, 0.0  ;;  %vm18426_vm1 = vmmov %vm18415_vm0  ;;  %v15734_v26 = vsel %vm18429_vm8, %v18428_v61, %v6704_v33  ;;  %v18440_v33 = vld [vmem:[#allocation32_spill] sm:$0xff] }
 0x8a8   :  { %18425 = vst [vmem:[#allocation90_spill] sm:$0xff] %v15712_v23  ;;  %v15718_v44 = vsel %vm18426_vm1, %v6161_v37, 0.0  ;;  %v6734_v35 = vrot.slane %v15712_v23, 2  ;;  %v6741_v37 = vrot.slane %v15700_v42, 2  ;;  %vm18431_vm9 = vmmov %vm18429_vm8  ;;  %v18433_v23 = vrot.slane %v15661_v46, 2 }
 0x8a9   :  { %18427 = vst [vmem:[#allocation91_spill] sm:$0xff] %v15718_v44  ;;  %v15739_v28 = vsel %vm18431_vm9, %v18430_v63, %v6714_v49  ;;  %v6744_v14 = vrot.slane %v15718_v44, 2  ;;  %vm18434_vm10 = vmmov %vm18429_vm8  ;;  %vm5670_vm13 = vcmp.ge.f32.partialorder %v18440_v33, 0.0  ;;  %v18442_v49 = vld [vmem:[#allocation37_spill] sm:$0xff]  ;;  %v6070_v44 = vrot.slane %v15412_v18, 7 }
 0x8aa   :  { %18432 = vst [vmem:[#allocation92_spill] sm:$0xff] %v15739_v28  ;;  %v15746_v42 = vsel %vm18434_vm10, %v18433_v23, %v6724_v38  ;;  %vm18437_vm11 = vmmov %vm18429_vm8  ;;  %v5798_v5 = vsel %vm5670_vm13, %v18440_v33, %v18442_v49  ;;  %vm18457_vm9 = vcmask 1046528  }
 0x8ab   :  { %18435 = vst [vmem:[#allocation93_spill] sm:$0xff] %v15746_v42  ;;  %v15751_v53 = vsel %vm18437_vm11, %v18436_v58, %v6734_v35  ;;  %vm18439_vm12 = vmmov %vm18429_vm8  ;;  %v6071_v23 = vrot.slane %v5798_v5, 7  ;;  %v5800_v35 = vsel %vm5672_vm15, %v18443_v50, %v18445_v62  ;;  %v6073_v58 = vrot.slane %v15423_v21, 7  ;;  %v11735_v50 = vld [vmem:[#allocation9 + $0xc0] sm:$0xff]  }
 0x8ac   :  { %18438 = vst [vmem:[#allocation94_spill] sm:$0xff] %v15751_v53  ;;  %v6743_v61 = vsel %vm18439_vm12, %v6741_v37, %v6742_v39  ;;  %vm18441_vm14 = vmmov %vm18429_vm8  ;;  %v15766_v37 = vsel %vm18415_vm0, 0.0, %v6070_v44  ;;  %v6074_v53 = vrot.slane %v5800_v35, 7  ;;  %7678 = vmatpush1.bf16.msra.mxu0 %v11735_v50  ;;  %vm5676_vm15 = vcmp.ge.f32.partialorder %v18464_v6, 0.0 }
 0x8ad   :  { %v6745_v63 = vsel %vm18441_vm14, %v6742_v39, %v6744_v14  ;;  %18446 = vst [vmem:[#allocation37_spill] sm:$0xff] %v15766_v37  ;;  %vm18447_vm4 = vmmov %vm18415_vm0  ;;  %v6386_v21 = vrot.slane %v15766_v37, 1  ;;  %7679 = vmatprep.subr.bf16.mxu0 %v18393_v54 }
 0x8ae   :  { %v15760_v38 = vpack.c.bf16 %v6745_v63, %v6743_v61  ;;  %v15770_v14 = vsel %vm18447_vm4, %v15656_v34, %v6077_v24  ;;  %vm18448_vm5 = vmmov %vm18415_vm0  ;;  %vm5678_vm4 = vcmp.ge.f32.partialorder %v15288_v41, 0.0 }
 0x8af   :  { %v15774_v18 = vsel %vm18448_vm5, 0.0, %v15656_v34  ;;  %vm18449_vm2 = vmmov %vm18415_vm0  ;;  %v6607_v46 = vrot.slane %v15770_v14, 2 }
 0x8b0   :  { %18444 = vst [vmem:[#allocation32_spill] sm:$0xff] %v15760_v38  ;;  %v15777_v39 = vsel %vm18449_vm2, %v6070_v44, %v6071_v23  ;;  %vm18451_vm3 = vmmov %vm18415_vm0  ;;  %v6606_v1 = vrot.slane %v15774_v18, 2 }
 0x8b1   :  { %18450 = vst [vmem:[#allocation19_spill] sm:$0xff] %v15777_v39  ;;  %v15780_v5 = vsel %vm18451_vm3, %v6071_v23, 0.0  ;;  %vm18453_vm6 = vmmov %vm18415_vm0  ;;  %v6387_v61 = vrot.slane %v15777_v39, 1  ;;  %v15789_v42 = vpack.c.bf16 %v15777_v39, %v6070_v44  ;;  %v6609_v44 = vrot.slane %v15709_v36, 2 }
 0x8b2   :  { %18452 = vst [vmem:[#allocation18_spill] sm:$0xff] %v15780_v5  ;;  %v6263_v62 = vsel %vm18453_vm6, 0.0, %v6073_v58  ;;  %v6389_v24 = vrot.slane %v15780_v5, 1  ;;  %vm18454_vm1 = vmmov %vm18415_vm0 }
 0x8b3   :  { %v6075_v33 = vsel %vm18454_vm1, %v6073_v58, %v6074_v53  ;;  %vm18455_vm8 = vmmov %vm18415_vm0  ;;  %v6601_v49 = vrot.slane %v6263_v62, 2  ;;  %18456 = vst [vmem:[#allocation95_spill] sm:$0xff] %v15789_v42  ;;  %v6388_v23 = vsel %vm18457_vm9, %v6386_v21, %v6387_v61  ;;  %v6391_v50 = vrot.slane %v6263_v62, 1  ;;  %v18468_v62 = vld [vmem:[#allocation36_spill] sm:$0xff] }
 0x8b4   :  { %v6295_v63 = vsel %vm18455_vm8, %v6074_v53, 0.0  ;;  %v6602_v35 = vrot.slane %v6075_v33, 2  ;;  %vm18458_vm10 = vmmov %vm18457_vm9 }
 0x8b5   :  { %v6604_v38 = vrot.slane %v6295_v63, 2  ;;  %v6390_v37 = vsel %vm18458_vm10, %v6387_v61, %v6389_v24  ;;  %vm18460_vm12 = vmmov %vm18437_vm11  ;;  %v6392_v61 = vrot.slane %v6075_v33, 1  ;;  %v6394_v22 = vrot.slane %v6295_v63, 1 }
 0x8b6   :  { %v15796_v5 = vpack.c.bf16 %v6390_v37, %v6388_v23  ;;  %v6603_v53 = vsel %vm18437_vm11, %v6601_v49, %v6602_v35  ;;  %vm18462_vm13 = vmmov %vm18437_vm11  ;;  %v15808_v37 = vrot.slane %v15460_v31, 7  ;;  %v5804_v49 = vsel %vm5676_vm15, %v18464_v6, %v18468_v62 }
 0x8b7   :  { %v6605_v28 = vsel %vm18460_vm12, %v6602_v35, %v6604_v38  ;;  %v6608_v21 = vsel %vm18462_vm13, %v6606_v1, %v6607_v46  ;;  %vm18463_vm14 = vmmov %vm18437_vm11  ;;  %v6080_v63 = vrot.slane %v5804_v49, 7  ;;  %v15823_v35 = vpack.c.bf16 %v6075_v33, %v6073_v58 }
 0x8b8   :  { %18459 = vst [vmem:[#allocation96_spill] sm:$0xff] %v15796_v5  ;;  %v15801_v39 = vpack.c.bf16 %v6605_v28, %v6603_v53  ;;  %7412 = vmatprep.mubr.bf16.mxu0 %v15796_v5  ;;  %v6610_v24 = vsel %vm18463_vm14, %v6607_v46, %v6609_v44  ;;  %vm18467_vm0 = vmmov %vm18457_vm9  ;;  %v18473_v44 = vld [vmem:[#allocation38_spill] sm:$0xff]  ;;  %v15831_v6 = vrot.slane %v15472_v57, 7  ;;  %v6396_v58 = vrot.slane %v15774_v18, 1 }
 0x8b9   :  { %9729 = vmatmul.mubr.msk.bf16.gmra.mrb[156].mxu0 %vm12853_vm7, %v15789_v42  ;;  %v15814_v28 = vpack.c.bf16 %v6610_v24, %v6608_v21  ;;  %v6393_v1 = vsel %vm18467_vm0, %v6391_v50, %v6392_v61  ;;  %vm18469_vm5 = vmmov %vm18467_vm0  ;;  %18471 = vst [vmem:[#allocation17_spill] sm:$0xff] %v15823_v35  ;;  %v5806_v21 = vsel %vm5678_vm4, %v15288_v41, %v18473_v44  ;;  %v6397_v57 = vrot.slane %v15770_v14, 1  ;;  %v18670_v42 = vld [vmem:[#allocation78_spill] sm:$0xff] }
 0x8ba   :  { %18461 = vst [vmem:[#allocation97_spill] sm:$0xff] %v15801_v39  ;;  %10586 = vmatprep.mubr.bf16.mxu1 %v15801_v39  ;;  %v6395_v46 = vsel %vm18469_vm5, %v6392_v61, %v6394_v22  ;;  %vm18470_vm2 = vmmov %vm18454_vm1  ;;  %v6083_v61 = vrot.slane %v5806_v21, 7  ;;  %v15843_v41 = vsel %vm18454_vm1, 0.0, %v15831_v6  ;;  %v6399_v49 = vrot.slane %v15709_v36, 1 }
 0x8bb   :  { %18466 = vst [vmem:[#allocation22_spill] sm:$0xff] %v15814_v28  ;;  %v6265_v31 = vsel %vm18470_vm2, 0.0, %v15808_v37  ;;  %10587 = vmatmul.mubr.bf16.vlgmr.msra.gmra.mrb[216].mxu1 %v15814_v28  ;;  %v15826_v23 = vpack.c.bf16 %v6395_v46, %v6393_v1  ;;  %vm18474_vm3 = vmmov %vm18454_vm1  ;;  %v6616_v18 = vrot.slane %v15843_v41, 2  ;;  %vm5680_vm14 = vcmp.ge.f32.partialorder %v15296_v10, 0.0 }
 0x8bc   :  { %v6611_v53 = vrot.slane %v6265_v31, 2  ;;  %v15835_v22 = vsel %vm18474_vm3, %v15808_v37, %v6080_v63  ;;  %vm18475_vm6 = vmmov %vm18454_vm1  ;;  %vm5682_vm4 = vcmp.ge.f32.partialorder %v15304_v25, 0.0 }
 0x8bd   :  { %18472 = vst [vmem:[#allocation36_spill] sm:$0xff] %v15826_v23  ;;  %v6297_v50 = vsel %vm18475_vm6, %v6080_v63, 0.0  ;;  %7420 = vmatprep.mubr.bf16.mxu0 %v15826_v23  ;;  %v6612_v33 = vrot.slane %v15835_v22, 2  ;;  %vm18476_vm8 = vmmov %vm18454_vm1 }
 0x8be   :  { %v6614_v24 = vrot.slane %v6297_v50, 2  ;;  %v15848_v1 = vsel %vm18476_vm8, %v15831_v6, %v6083_v61  ;;  %vm18477_vm9 = vmmov %vm18454_vm1 }
 0x8bf   :  { %v15851_v62 = vsel %vm18477_vm9, %v6083_v61, 0.0  ;;  %vm18478_vm10 = vmmov %vm18437_vm11  ;;  %v6617_v44 = vrot.slane %v15848_v1, 2 }
 0x8c0   :  { %v6613_v46 = vsel %vm18478_vm10, %v6611_v53, %v6612_v33  ;;  %vm18479_vm11 = vmmov %vm18478_vm10  ;;  %v6619_v21 = vrot.slane %v15851_v62, 2 }
 0x8c1   :  { %v6615_v63 = vsel %vm18479_vm11, %v6612_v33, %v6614_v24  ;;  %vm18481_vm12 = vmmov %vm18467_vm0  ;;  %9733 = vmatmul.mubr.msk.bf16.gmra.mrb[160].mxu0 %vm12853_vm7, %v15823_v35  ;;  %v18486_v33 = vld [vmem:[#allocation15_spill] sm:$0xff] }
 0x8c2   :  { %v15859_v23 = vpack.c.bf16 %v6615_v63, %v6613_v46  ;;  %v6398_v5 = vsel %vm18481_vm12, %v6396_v58, %v6397_v57  ;;  %vm18482_vm13 = vmmov %vm18467_vm0  ;;  %v5808_v24 = vsel %vm5680_vm14, %v15296_v10, %v18486_v33  ;;  %v15881_v46 = vpack.c.bf16 %v15770_v14, %v15656_v34  ;;  %v18492_v63 = vld [vmem:[#allocation40_spill] sm:$0xff] }
 0x8c3   :  { %v6400_v28 = vsel %vm18482_vm13, %v6397_v57, %v6399_v49  ;;  %vm18483_vm15 = vmmov %vm18478_vm10  ;;  %v15877_v57 = vrot.slane %v15489_v15, 7  ;;  %v6086_v49 = vrot.slane %v5808_v24, 7  ;;  %v6401_v10 = vrot.slane %v6265_v31, 1 }
 0x8c4   :  { %18480 = vst [vmem:[#allocation38_spill] sm:$0xff] %v15859_v23  ;;  %v6618_v36 = vsel %vm18483_vm15, %v6616_v18, %v6617_v44  ;;  %vm18484_vm0 = vmmov %vm18478_vm10  ;;  %v15869_v61 = vpack.c.bf16 %v6400_v28, %v6398_v5  ;;  %10590 = vmatprep.mubr.bf16.mxu1 %v15859_v23  ;;  %v11736_v18 = vld [vmem:[#allocation9 + $0xc8] sm:$0xff]   ;;  %v15886_v5 = vrot.slane %v15506_v51, 7  ;;  %v6402_v28 = vrot.slane %v15835_v22, 1 }
 0x8c5   :  { %v6620_v53 = vsel %vm18484_vm0, %v6617_v44, %v6619_v21  ;;  %18488 = vst [vmem:[#allocation99_spill] sm:$0xff] %v15881_v46  ;;  %vm18489_vm5 = vmmov %vm18454_vm1  ;;  %v5810_v51 = vsel %vm5682_vm4, %v15304_v25, %v18492_v63  ;;  %7680 = vmatpush1.bf16.msra.mxu0 %v11736_v18  ;;  %v6404_v24 = vrot.slane %v6297_v50, 1  ;;  %vm5686_vm4 = vcmp.ge.f32.partialorder %v15320_v56, 0.0 }
 0x8c6   :  { %18485 = vst [vmem:[#allocation98_spill] sm:$0xff] %v15869_v61  ;;  %v15874_v58 = vpack.c.bf16 %v6620_v53, %v6618_v36  ;;  %7428 = vmatprep.mubr.bf16.mxu0 %v15869_v61  ;;  %v15892_v15 = vsel %vm18489_vm5, %v15877_v57, %v6086_v49  ;;  %vm18490_vm2 = vmmov %vm18454_vm1  ;;  %v6089_v36 = vrot.slane %v5810_v51, 7  ;;  %7681 = vmatprep.subr.bf16.mxu0 %v18393_v54 }
 0x8c7   :  { %v15896_v34 = vsel %vm18490_vm2, 0.0, %v15877_v57  ;;  %vm18491_vm3 = vmmov %vm18454_vm1  ;;  %v6622_v44 = vrot.slane %v15892_v15, 2 }
 0x8c8   :  { %18487 = vst [vmem:[#allocation15_spill] sm:$0xff] %v15874_v58  ;;  %10591 = vmatmul.mubr.bf16.gmra.mrb[220].mxu1 %v15874_v58  ;;  %v15899_v14 = vsel %vm18491_vm3, %v6086_v49, 0.0  ;;  %v6621_v31 = vrot.slane %v15896_v34, 2  ;;  %vm18493_vm6 = vmmov %vm18454_vm1  ;;  %v18495_v49 = vld [vmem:[#allocation26_spill] sm:$0xff] }
 0x8c9   :  { %v6624_v21 = vrot.slane %v15899_v14, 2  ;;  %v15909_v53 = vsel %vm18493_vm6, 0.0, %v15886_v5  ;;  %vm18494_vm1 = vmmov %vm18481_vm12  ;;  %vm5684_vm8 = vcmp.ge.f32.partialorder %v18495_v49, 0.0  ;;  %9737 = vmatmul.mubr.msk.bf16.gmra.mrb[164].mxu0 %vm12853_vm7, %v15881_v46 }
 0x8ca   :  { %v6403_v33 = vsel %vm18494_vm1, %v6401_v10, %v6402_v28  ;;  %vm18496_vm9 = vmmov %vm18484_vm0  ;;  %v6626_v58 = vrot.slane %v15909_v53, 2 }
 0x8cb   :  { %v6623_v25 = vsel %vm18496_vm9, %v6621_v31, %v6622_v44  ;;  %vm18497_vm10 = vmmov %vm18484_vm0 }
 0x8cc   :  { %v6625_v18 = vsel %vm18497_vm10, %v6622_v44, %v6624_v21  ;;  %vm18498_vm11 = vmmov %vm18490_vm2  ;;  %v18502_v44 = vld [vmem:[#allocation42_spill] sm:$0xff] }
 0x8cd   :  { %v15917_v63 = vsel %vm18498_vm11, %v15886_v5, %v6089_v36  ;;  %vm18499_vm12 = vmmov %vm18490_vm2  ;;  %v15922_v61 = vpack.c.bf16 %v6625_v18, %v6623_v25  ;;  %v5812_v21 = vsel %vm5684_vm8, %v18495_v49, %v18502_v44  ;;  %v15938_v25 = vpack.c.bf16 %v15835_v22, %v15808_v37 }
 0x8ce   :  { %v15920_v51 = vsel %vm18499_vm12, %v6089_v36, 0.0  ;;  %v6627_v10 = vrot.slane %v15917_v63, 2  ;;  %vm18501_vm13 = vmmov %vm18494_vm1  ;;  %v15934_v36 = vrot.slane %v15521_v7, 7  ;;  %v6092_v46 = vrot.slane %v5812_v21, 7 }
 0x8cf   :  { %18500 = vst [vmem:[#allocation40_spill] sm:$0xff] %v15922_v61  ;;  %v6629_v50 = vrot.slane %v15920_v51, 2  ;;  %v6405_v31 = vsel %vm18501_vm13, %v6402_v28, %v6404_v24  ;;  %18503 = vst [vmem:[#allocation26_spill] sm:$0xff] %v15938_v25  ;;  %10594 = vmatprep.mubr.bf16.mxu1 %v15922_v61  ;;  %v15953_v7 = vrot.slane %v15535_v30, 7  ;;  %v6407_v44 = vrot.slane %v15848_v1, 1 }
 0x8d0   :  { %vm18504_vm14 = vmmov %vm18484_vm0  ;;  %v15943_v39 = vpack.c.bf16 %v6405_v31, %v6403_v33  ;;  %v6409_v21 = vrot.slane %v15851_v62, 1  ;;  %vm5688_vm12 = vcmp.ge.f32.partialorder %v15328_v16, 0.0 }
 0x8d1   :  { %v6628_v18 = vsel %vm18504_vm14, %v6626_v58, %v6627_v10  ;;  %vm18505_vm15 = vmmov %vm18484_vm0  ;;  %v18511_v58 = vld [vmem:[#allocation39_spill] sm:$0xff] }
 0x8d2   :  { %v6630_v23 = vsel %vm18505_vm15, %v6627_v10, %v6629_v50  ;;  %18506 = vst [vmem:[#allocation42_spill] sm:$0xff] %v15943_v39  ;;  %vm18508_vm0 = vmmov %vm18490_vm2  ;;  %7436 = vmatprep.mubr.bf16.mxu0 %v15943_v39  ;;  %v5814_v33 = vsel %vm5686_vm4, %v15320_v56, %v18511_v58 }
 0x8d3   :  { %v15945_v28 = vpack.c.bf16 %v6630_v23, %v6628_v18  ;;  %v15949_v24 = vsel %vm18508_vm0, 0.0, %v15934_v36  ;;  %vm18509_vm5 = vmmov %vm18508_vm0  ;;  %v6095_v10 = vrot.slane %v5814_v33, 7  ;;  %9741 = vmatmul.mubr.msk.bf16.gmra.mrb[168].mxu0 %vm12853_vm7, %v15938_v25 }
 0x8d4   :  { %v15958_v37 = vsel %vm18509_vm5, %v15934_v36, %v6092_v46  ;;  %vm18510_vm2 = vmmov %vm18508_vm0  ;;  %v6631_v23 = vrot.slane %v15949_v24, 2 }
 0x8d5   :  { %18507 = vst [vmem:[#allocation100_spill] sm:$0xff] %v15945_v28  ;;  %v15961_v22 = vsel %vm18510_vm2, %v6092_v46, 0.0  ;;  %10595 = vmatmul.mubr.bf16.gmra.mrb[224].mxu1 %v15945_v28  ;;  %v6632_v49 = vrot.slane %v15958_v37, 2  ;;  %vm18512_vm3 = vmmov %vm18508_vm0  ;;  %v6406_v46 = vrot.slane %v15843_v41, 1 }
 0x8d6   :  { %v6634_v30 = vrot.slane %v15961_v22, 2  ;;  %v15971_v50 = vsel %vm18512_vm3, 0.0, %v15953_v7  ;;  %vm18513_vm6 = vmmov %vm18496_vm9 }
 0x8d7   :  { %v6636_v31 = vrot.slane %v15971_v50, 2  ;;  %v6633_v56 = vsel %vm18513_vm6, %v6631_v23, %v6632_v49  ;;  %vm18514_vm1 = vmmov %vm18513_vm6  ;;  %v15997_v23 = vrot.slane %v15549_v60, 7 }
 0x8d8   :  { %v6635_v18 = vsel %vm18514_vm1, %v6632_v49, %v6634_v30  ;;  %vm18515_vm8 = vmmov %vm18508_vm0  ;;  %v16001_v49 = vpack.c.bf16 %v15848_v1, %v15831_v6  ;;  %v18527_v1 = vld [vmem:[#allocation44_spill] sm:$0xff] }
 0x8d9   :  { %v15981_v58 = vsel %vm18515_vm8, %v15953_v7, %v6095_v10  ;;  %vm18516_vm9 = vmmov %vm18508_vm0  ;;  %v15986_v39 = vpack.c.bf16 %v6635_v18, %v6633_v56  ;;  %v18524_v56 = vld [vmem:[#allocation41_spill] sm:$0xff] }
 0x8da   :  { %v15984_v33 = vsel %vm18516_vm9, %v6095_v10, 0.0  ;;  %v6637_v28 = vrot.slane %v15981_v58, 2  ;;  %vm18518_vm10 = vmmov %vm18501_vm13  ;;  %18520 = vst [vmem:[#allocation101_spill] sm:$0xff] %v16001_v49 }
 0x8db   :  { %18517 = vst [vmem:[#allocation39_spill] sm:$0xff] %v15986_v39  ;;  %v6639_v41 = vrot.slane %v15984_v33, 2  ;;  %v6408_v61 = vsel %vm18518_vm10, %v6406_v46, %v6407_v44  ;;  %vm18519_vm11 = vmmov %vm18518_vm10  ;;  %10598 = vmatprep.mubr.bf16.mxu1 %v15986_v39  ;;  %v18540_v39 = vld [vmem:[#allocation24_spill] sm:$0xff] }
 0x8dc   :  { %v6410_v62 = vsel %vm18519_vm11, %v6407_v44, %v6409_v21  ;;  %vm18521_vm13 = vmmov %vm18514_vm1  ;;  %v5816_v44 = vsel %vm5688_vm12, %v15328_v16, %v18524_v56  ;;  %v11737_v21 = vld [vmem:[#allocation9 + $0xd0] sm:$0xff]   ;;  %v6411_v16 = vrot.slane %v15896_v34, 1  ;;  %vm5692_vm12 = vcmp.ge.f32.partialorder %v15344_v59, 0.0 }
 0x8dd   :  { %v6638_v30 = vsel %vm18521_vm13, %v6636_v31, %v6637_v28  ;;  %vm18522_vm14 = vmmov %vm18514_vm1  ;;  %v16006_v46 = vpack.c.bf16 %v6410_v62, %v6408_v61  ;;  %v6098_v60 = vrot.slane %v5816_v44, 7  ;;  %7682 = vmatpush1.bf16.msra.mxu0 %v11737_v21 }
 0x8de   :  { %v6640_v10 = vsel %vm18522_vm14, %v6637_v28, %v6639_v41  ;;  %vm18526_vm15 = vmmov %vm18508_vm0  ;;  %vm5690_vm0 = vcmp.ge.f32.partialorder %v15336_v13, 0.0  ;;  %v16022_v28 = vrot.slane %v15561_v52, 7  ;;  %7683 = vmatprep.subr.bf16.mxu0 %v18393_v54 }
 0x8df   :  { %18523 = vst [vmem:[#allocation102_spill] sm:$0xff] %v16006_v46  ;;  %v16010_v18 = vpack.c.bf16 %v6640_v10, %v6638_v30  ;;  %v16014_v25 = vsel %vm18526_vm15, 0.0, %v15997_v23  ;;  %7444 = vmatprep.mubr.bf16.mxu0 %v16006_v46  ;;  %v5818_v61 = vsel %vm5690_vm0, %v15336_v13, %v18527_v1  ;;  %vm18528_vm4 = vmmov %vm18510_vm2  ;;  %v6412_v30 = vrot.slane %v15892_v15, 1 }
 0x8e0   :  { %v6641_v6 = vrot.slane %v16014_v25, 2  ;;  %v16028_v31 = vsel %vm18528_vm4, %v15997_v23, %v6098_v60  ;;  %vm18529_vm5 = vmmov %vm18510_vm2  ;;  %v6101_v62 = vrot.slane %v5818_v61, 7  ;;  %v16039_v34 = vsel %vm18510_vm2, 0.0, %v16022_v28  ;;  %9745 = vmatmul.mubr.msk.bf16.gmra.mrb[172].mxu0 %vm12853_vm7, %v16001_v49 }
 0x8e1   :  { %18525 = vst [vmem:[#allocation41_spill] sm:$0xff] %v16010_v18  ;;  %10599 = vmatmul.mubr.bf16.gmra.mrb[228].mxu1 %v16010_v18  ;;  %v16031_v41 = vsel %vm18529_vm5, %v6098_v60, 0.0  ;;  %v6642_v13 = vrot.slane %v16028_v31, 2  ;;  %v6414_v10 = vrot.slane %v15899_v14, 1  ;;  %vm18530_vm3 = vmmov %vm18510_vm2  ;;  %v6646_v21 = vrot.slane %v16039_v34, 2 }
 0x8e2   :  { %v6644_v52 = vrot.slane %v16031_v41, 2  ;;  %v16044_v56 = vsel %vm18530_vm3, %v16022_v28, %v6101_v62  ;;  %vm18531_vm6 = vmmov %vm18510_vm2  ;;  %vm5694_vm0 = vcmp.ge.f32.partialorder %v15352_v4, 0.0  ;;  %vm5699_vm3 = vcmp.ge.f32.partialorder %v15385_v19, 0.0 }
 0x8e3   :  { %v16047_v44 = vsel %vm18531_vm6, %v6101_v62, 0.0  ;;  %vm18532_vm1 = vmmov %vm18518_vm10  ;;  %v6647_v46 = vrot.slane %v16044_v56, 2  ;;  %vm5697_vm10 = vcmp.ge.f32.partialorder %v15364_v48, 0.0 }
 0x8e4   :  { %v6413_v60 = vsel %vm18532_vm1, %v6411_v16, %v6412_v30  ;;  %vm18533_vm8 = vmmov %vm18521_vm13  ;;  %v6649_v18 = vrot.slane %v16047_v44, 2 }
 0x8e5   :  { %v6643_v1 = vsel %vm18533_vm8, %v6641_v6, %v6642_v13  ;;  %vm18534_vm9 = vmmov %vm18533_vm8  ;;  %v16064_v6 = vrot.slane %v15571_v8, 7  ;;  %v16081_v8 = vpack.c.bf16 %v15892_v15, %v15877_v57  ;;  %v18546_v15 = vld [vmem:[#allocation43_spill] sm:$0xff] }
 0x8e6   :  { %v6645_v61 = vsel %vm18534_vm9, %v6642_v13, %v6644_v52  ;;  %vm18536_vm11 = vmmov %vm18532_vm1 }
 0x8e7   :  { %v16056_v14 = vpack.c.bf16 %v6645_v61, %v6643_v1  ;;  %v6415_v62 = vsel %vm18536_vm11, %v6412_v30, %v6414_v10  ;;  %vm18537_vm13 = vmmov %vm18533_vm8  ;;  %v5820_v1 = vsel %vm5692_vm12, %v15344_v59, %v18540_v39  ;;  %18543 = vst [vmem:[#allocation104_spill] sm:$0xff] %v16081_v8  ;;  %v16087_v59 = vrot.slane %v15583_v20, 7 }
 0x8e8   :  { %v6648_v16 = vsel %vm18537_vm13, %v6646_v21, %v6647_v46  ;;  %vm18538_vm14 = vmmov %vm18533_vm8  ;;  %v16068_v52 = vpack.c.bf16 %v6415_v62, %v6413_v60  ;;  %v6104_v49 = vrot.slane %v5820_v1, 7  ;;  %v6416_v39 = vrot.slane %v15909_v53, 1 }
 0x8e9   :  { %18535 = vst [vmem:[#allocation44_spill] sm:$0xff] %v16056_v14  ;;  %v6650_v13 = vsel %vm18538_vm14, %v6647_v46, %v6649_v18  ;;  %10602 = vmatprep.mubr.bf16.mxu1 %v16056_v14  ;;  %vm18542_vm15 = vmmov %vm18510_vm2  ;;  %v5822_v10 = vsel %vm5694_vm0, %v15352_v4, %v18546_v15  ;;  %v6417_v21 = vrot.slane %v15917_v63, 1  ;;  %v16105_v53 = vsel %vm18510_vm2, 0.0, %v16087_v59 }
 0x8ea   :  { %18539 = vst [vmem:[#allocation103_spill] sm:$0xff] %v16068_v52  ;;  %v16073_v61 = vpack.c.bf16 %v6650_v13, %v6648_v16  ;;  %v16077_v30 = vsel %vm18542_vm15, 0.0, %v16064_v6  ;;  %7452 = vmatprep.mubr.bf16.mxu0 %v16068_v52  ;;  %vm18544_vm4 = vmmov %vm18510_vm2  ;;  %v6107_v62 = vrot.slane %v5822_v10, 7  ;;  %v6656_v16 = vrot.slane %v16105_v53, 2 }
 0x8eb   :  { %v6651_v46 = vrot.slane %v16077_v30, 2  ;;  %v16093_v18 = vsel %vm18544_vm4, %v16064_v6, %v6104_v49  ;;  %vm18545_vm5 = vmmov %vm18510_vm2  ;;  %v6419_v13 = vrot.slane %v15920_v51, 1  ;;  %9749 = vmatmul.mubr.msk.bf16.gmra.mrb[176].mxu0 %vm12853_vm7, %v16081_v8  ;;  %vm5703_vm14 = vcmp.ge.f32.partialorder %v15163_v29, 0.0 }
 0x8ec   :  { %18541 = vst [vmem:[#allocation24_spill] sm:$0xff] %v16073_v61  ;;  %10603 = vmatmul.mubr.bf16.gmra.mrb[232].mxu1 %v16073_v61  ;;  %v16096_v57 = vsel %vm18545_vm5, %v6104_v49, 0.0  ;;  %v6652_v60 = vrot.slane %v16093_v18, 2  ;;  %vm18547_vm6 = vmmov %vm18532_vm1  ;;  %vm5696_vm1 = vcmp.ge.f32.partialorder %v15360_v2, 0.0  ;;  %vm5698_vm4 = vcmp.ge.f32.partialorder %v15368_v0, 0.0 }
 0x8ed   :  { %v6654_v20 = vrot.slane %v16096_v57, 2  ;;  %v6418_v49 = vsel %vm18547_vm6, %v6416_v39, %v6417_v21  ;;  %vm18548_vm9 = vmmov %vm18533_vm8 }
 0x8ee   :  { %v6653_v4 = vsel %vm18533_vm8, %v6651_v46, %v6652_v60  ;;  %vm18549_vm11 = vmmov %vm18510_vm2 }
 0x8ef   :  { %v6655_v1 = vsel %vm18548_vm9, %v6652_v60, %v6654_v20  ;;  %v16116_v15 = vsel %vm18549_vm11, %v16087_v59, %v6107_v62  ;;  %vm18550_vm12 = vmmov %vm18510_vm2  ;;  %v18554_v20 = vld [vmem:[#allocation20_spill] sm:$0xff] }
 0x8f0   :  { %v16119_v10 = vsel %vm18550_vm12, %v6107_v62, 0.0  ;;  %v16121_v52 = vpack.c.bf16 %v6655_v1, %v6653_v4  ;;  %v6657_v51 = vrot.slane %v16116_v15, 2  ;;  %vm18552_vm13 = vmmov %vm18547_vm6  ;;  %v5824_v61 = vsel %vm5696_vm1, %v15360_v2, %v18554_v20  ;;  %v11738_v1 = vld [vmem:[#allocation9 + $0xd8] sm:$0xff]  }
 0x8f1   :  { %v6659_v39 = vrot.slane %v16119_v10, 2  ;;  %v6420_v46 = vsel %vm18552_vm13, %v6417_v21, %v6419_v13  ;;  %v16134_v62 = vrot.slane %v15593_v43, 7  ;;  %v16138_v4 = vpack.c.bf16 %v15917_v63, %v15886_v5  ;;  %vm18556_vm15 = vmmov %vm18533_vm8  ;;  %v18560_v5 = vld [vmem:[#allocation31_spill] sm:$0xff]  ;;  %7684 = vmatpush1.bf16.msra.mxu0 %v11738_v1 }
 0x8f2   :  { %18551 = vst [vmem:[#allocation43_spill] sm:$0xff] %v16121_v52  ;;  %v16129_v60 = vpack.c.bf16 %v6420_v46, %v6418_v49  ;;  %10606 = vmatprep.mubr.bf16.mxu1 %v16121_v52  ;;  %v6658_v14 = vsel %vm18556_vm15, %v6656_v16, %v6657_v51  ;;  %vm18557_vm0 = vmmov %vm18533_vm8  ;;  %v6110_v49 = vrot.slane %v5824_v61, 7  ;;  %v5825_v63 = vsel %vm5697_vm10, %v15364_v48, %v18560_v5  ;;  %v18561_v13 = vld [vmem:[#allocation27_spill] sm:$0xff] }
 0x8f3   :  { %18555 = vst [vmem:[#allocation20_spill] sm:$0xff] %v16138_v4  ;;  %v6660_v21 = vsel %vm18557_vm0, %v6657_v51, %v6659_v39  ;;  %vm18559_vm5 = vmmov %vm18510_vm2  ;;  %v5826_v16 = vsel %vm5698_vm4, %v15368_v0, %v18561_v13  ;;  %v16166_v39 = vrot.slane %v5825_v63, 7  ;;  %7685 = vmatprep.subr.bf16.mxu0 %v18393_v54  ;;  %v6421_v20 = vrot.slane %v15949_v24, 1 }
 0x8f4   :  { %18553 = vst [vmem:[#allocation105_spill] sm:$0xff] %v16129_v60  ;;  %v16145_v2 = vpack.c.bf16 %v6660_v21, %v6658_v14  ;;  %7460 = vmatprep.mubr.bf16.mxu0 %v16129_v60  ;;  %v16150_v43 = vsel %vm18559_vm5, 0.0, %v16134_v62  ;;  %v16160_v61 = vsel %vm18510_vm2, %v16134_v62, %v6110_v49  ;;  %vm18562_vm6 = vmmov %vm18510_vm2  ;;  %v6113_v46 = vrot.slane %v5826_v16, 7 }
 0x8f5   :  { %v16163_v14 = vsel %vm18562_vm6, %v6110_v49, 0.0  ;;  %v6661_v51 = vrot.slane %v16150_v43, 2  ;;  %v6662_v48 = vrot.slane %v16160_v61, 2  ;;  %vm5705_vm10 = vcmp.ge.f32.partialorder %v15169_v12, 0.0  ;;  %vm18563_vm1 = vmmov %vm18510_vm2  ;;  %9753 = vmatmul.mubr.msk.bf16.gmra.mrb[180].mxu0 %vm12853_vm7, %v16138_v4 }
 0x8f6   :  { %18558 = vst [vmem:[#allocation106_spill] sm:$0xff] %v16145_v2  ;;  %10607 = vmatmul.mubr.bf16.gmra.mrb[236].mxu1 %v16145_v2  ;;  %v6664_v0 = vrot.slane %v16163_v14, 2  ;;  %v16176_v1 = vsel %vm18563_vm1, 0.0, %v16166_v39  ;;  %v6422_v21 = vrot.slane %v15958_v37, 1  ;;  %v6424_v49 = vrot.slane %v15961_v22, 1  ;;  %vm18564_vm9 = vmmov %vm18557_vm0  ;;  %v18571_v2 = vld [vmem:[#allocation35_spill] sm:$0xff] }
 0x8f7   :  { %vm5700_vm8 = vcmp.ge.f32.partialorder %v15395_v32, 0.0  ;;  %v6663_v5 = vsel %vm18564_vm9, %v6661_v51, %v6662_v48  ;;  %vm18565_vm11 = vmmov %vm18557_vm0  ;;  %v6666_v22 = vrot.slane %v16176_v1, 2  ;;  %vm18569_vm15 = vcmask 1046528  }
 0x8f8   :  { %v6665_v63 = vsel %vm18565_vm11, %v6662_v48, %v6664_v0  ;;  %vm18566_vm12 = vmmov %vm18563_vm1  ;;  %v6423_v48 = vsel %vm18569_vm15, %v6421_v20, %v6422_v21  ;;  %vm5704_vm6 = vcmp.ge.f32.partialorder %v15166_v17, 0.0 }
 0x8f9   :  { %v16185_v13 = vsel %vm18566_vm12, %v16166_v39, %v6113_v46  ;;  %vm18567_vm13 = vmmov %vm18563_vm1  ;;  %v16190_v16 = vpack.c.bf16 %v6665_v63, %v6663_v5  ;;  %v5828_v5 = vsel %vm5700_vm8, %v15395_v32, %v15498_v27  ;;  %v6427_v27 = vrot.slane %v15981_v58, 1 }
 0x8fa   :  { %v16188_v24 = vsel %vm18567_vm13, %v6113_v46, 0.0  ;;  %v6667_v60 = vrot.slane %v16185_v13, 2  ;;  %vm18570_vm0 = vmmov %vm18569_vm15  ;;  %v5827_v46 = vsel %vm5699_vm3, %v15385_v19, %v18571_v2  ;;  %v6426_v19 = vrot.slane %v15971_v50, 1 }
 0x8fb   :  { %18568 = vst [vmem:[#allocation31_spill] sm:$0xff] %v16190_v16  ;;  %v6669_v51 = vrot.slane %v16188_v24, 2  ;;  %v6425_v0 = vsel %vm18570_vm0, %v6422_v21, %v6424_v49  ;;  %10610 = vmatprep.mubr.bf16.mxu1 %v16190_v16  ;;  %vm18572_vm4 = vmmov %vm18564_vm9  ;;  %v16211_v8 = vrot.slane %v5827_v46, 7  ;;  %v6116_v21 = vrot.slane %v5828_v5, 7 }
 0x8fc   :  { %v6668_v63 = vsel %vm18572_vm4, %v6666_v22, %v6667_v60  ;;  %vm18573_vm5 = vmmov %vm18572_vm4  ;;  %v16209_v4 = vpack.c.bf16 %v6425_v0, %v6423_v48  ;;  %v16217_v49 = vpack.c.bf16 %v15958_v37, %v15934_v36  ;;  %vm5707_vm3 = vcmp.ge.f32.partialorder %v15175_v9, 0.0 }
 0x8fd   :  { %v6670_v52 = vsel %vm18573_vm5, %v6667_v60, %v6669_v51  ;;  %18575 = vst [vmem:[#allocation35_spill] sm:$0xff] %v16211_v8  ;;  %vm18578_vm2 = vmmov %vm18563_vm1  ;;  %v16232_v36 = vsel %vm18563_vm1, %v16211_v8, %v6116_v21  ;;  %v5831_v60 = vsel %vm5703_vm14, %v15163_v29, %v15513_v11  ;;  %vm5709_vm12 = vcmp.ge.f32.partialorder %v15181_v40, 0.0 }
 0x8fe   :  { %18574 = vst [vmem:[#allocation27_spill] sm:$0xff] %v16209_v4  ;;  %v16213_v20 = vpack.c.bf16 %v6670_v52, %v6668_v63  ;;  %18577 = vst [vmem:[#allocation108_spill] sm:$0xff] %v16217_v49  ;;  %7468 = vmatprep.mubr.bf16.mxu0 %v16209_v4  ;;  %v16224_v32 = vsel %vm18578_vm2, 0.0, %v16211_v8  ;;  %v6429_v52 = vrot.slane %v15984_v33, 1  ;;  %v6825_v33 = vrot.slane %v16232_v36, 2 }
 0x8ff   :  { %18579 = vst [vmem:[#allocation109_spill] sm:$0xff] %v16224_v32  ;;  %18580 = vst [vmem:[#allocation110_spill] sm:$0xff] %v16232_v36  ;;  %v6824_v50 = vrot.slane %v16224_v32, 2  ;;  %v5832_v0 = vsel %vm5704_vm6, %v15166_v17, %v15516_v47  ;;  %v16251_v46 = vrot.slane %v5831_v60, 7  ;;  %v16255_v29 = vpack.c.bf16 %v15981_v58, %v15953_v7  ;;  %9757 = vmatmul.mubr.msk.bf16.gmra.mrb[184].mxu0 %vm12853_vm7, %v16217_v49  ;;  %v18591_v47 = vld [vmem:[#allocation45_spill] sm:$0xff]  ;;  %v18592_v58 = vld [vmem:[#allocation47_spill] sm:$0xff] }
 0x900   :  { %18576 = vst [vmem:[#allocation107_spill] sm:$0xff] %v16213_v20  ;;  %10611 = vmatmul.mubr.bf16.gmra.mrb[240].mxu1 %v16213_v20  ;;  %vm18581_vm8 = vmmov %vm18563_vm1  ;;  %v6122_v63 = vrot.slane %v5832_v0, 7  ;;  %vm5706_vm15 = vcmp.ge.f32.partialorder %v15172_v45, 0.0  ;;  %v5833_v7 = vsel %vm5705_vm10, %v15169_v12, %v18591_v47  ;;  %v18598_v47 = vld [vmem:[#allocation14_spill] sm:$0xff] }
 0x901   :  { %v16235_v37 = vsel %vm18581_vm8, %v6116_v21, 0.0  ;;  %vm18583_vm9 = vmmov %vm18570_vm0  ;;  %18586 = vst [vmem:[#allocation113_spill] sm:$0xff] %v16255_v29  ;;  %v11740_v49 = vld [vmem:[#allocation9 + $0xe8] sm:$0xff]  }
 0x902   :  { %18582 = vst [vmem:[#allocation111_spill] sm:$0xff] %v16235_v37  ;;  %v6827_v2 = vrot.slane %v16235_v37, 2  ;;  %v6428_v22 = vsel %vm18583_vm9, %v6426_v19, %v6427_v27  ;;  %vm18584_vm11 = vmmov %vm18570_vm0  ;;  %v5834_v19 = vsel %vm5706_vm15, %v15172_v45, %v18592_v58 }
 0x903   :  { %v6430_v51 = vsel %vm18584_vm11, %v6427_v27, %v6429_v52  ;;  %vm18587_vm14 = vmmov %vm18572_vm4  ;;  %v11739_v27 = vld [vmem:[#allocation9 + $0xe0] sm:$0xff]   ;;  %v18593_v52 = vld [vmem:[#allocation64_spill] sm:$0xff] }
 0x904   :  { %v16247_v48 = vpack.c.bf16 %v6430_v51, %v6428_v22  ;;  %v6826_v11 = vsel %vm18587_vm14, %v6824_v50, %v6825_v33  ;;  %vm18588_vm13 = vmmov %vm18572_vm4  ;;  %vm5711_vm4 = vcmp.ge.f32.partialorder %v18593_v52, 0.0  ;;  %v6125_v22 = vrot.slane %v5834_v19, 7  ;;  %7686 = vmatpush1.bf16.msra.mxu0 %v11739_v27 }
 0x905   :  { %v6828_v5 = vsel %vm18588_vm13, %v6825_v33, %v6827_v2  ;;  %vm18590_vm0 = vmmov %vm18563_vm1  ;;  %v16285_v2 = vrot.slane %v5833_v7, 7  ;;  %v6431_v51 = vrot.slane %v16014_v25, 1  ;;  %7687 = vmatprep.subr.bf16.mxu0 %v18393_v54  ;;  %vm18604_vm14 = vcmask 1046528  }
 0x906   :  { %18585 = vst [vmem:[#allocation112_spill] sm:$0xff] %v16247_v48  ;;  %v16263_v21 = vpack.c.bf16 %v6828_v5, %v6826_v11  ;;  %7476 = vmatprep.mubr.bf16.mxu0 %v16247_v48  ;;  %v16268_v17 = vsel %vm18590_vm0, 0.0, %v16251_v46  ;;  %vm18594_vm5 = vmmov %vm18590_vm0  ;;  %v6432_v11 = vrot.slane %v16028_v31, 1  ;;  %v6434_v5 = vrot.slane %v16031_v41, 1  ;;  %v18607_v48 = vld [vmem:[#allocation50_spill] sm:$0xff] }
 0x907   :  { %v16279_v50 = vsel %vm18594_vm5, %v16251_v46, %v6122_v63  ;;  %vm18595_vm2 = vmmov %vm18590_vm0  ;;  %v6676_v33 = vrot.slane %v16268_v17, 2  ;;  %9761 = vmatmul.mubr.msk.bf16.gmra.mrb[188].mxu0 %vm12853_vm7, %v16255_v29 }
 0x908   :  { %18589 = vst [vmem:[#allocation114_spill] sm:$0xff] %v16263_v21  ;;  %v16282_v60 = vsel %vm18595_vm2, %v6122_v63, 0.0  ;;  %10614 = vmatprep.mubr.bf16.mxu1 %v16263_v21  ;;  %v6677_v12 = vrot.slane %v16279_v50, 2  ;;  %vm18596_vm10 = vmmov %vm18590_vm0  ;;  %v18597_v63 = vld [vmem:[#allocation65_spill] sm:$0xff]  ;;  %v6433_v32 = vsel %vm18604_vm14, %v6431_v51, %v6432_v11  ;;  %7688 = vmatpush1.bf16.msra.mxu0 %v11740_v49  ;;  %v16446_v49 = vpack.c.bf16 %v16093_v18, %v16064_v6 }
 0x909   :  { %v6679_v45 = vrot.slane %v16282_v60, 2  ;;  %v16293_v0 = vsel %vm18596_vm10, 0.0, %v16285_v2  ;;  %vm5708_vm6 = vcmp.ge.f32.partialorder %v18597_v63, 0.0  ;;  %10615 = vmatmul.mubr.bf16.gmra.mrb[244].mxu1 %v18598_v47  ;;  %vm18599_vm1 = vmmov %vm18588_vm13  ;;  %7689 = vmatprep.subr.bf16.mxu0 %v18393_v54 }
 0x90a   :  { %v6678_v7 = vsel %vm18599_vm1, %v6676_v33, %v6677_v12  ;;  %vm18600_vm8 = vmmov %vm18599_vm1  ;;  %v6681_v41 = vrot.slane %v16293_v0, 2 }
 0x90b   :  { %v6680_v58 = vsel %vm18600_vm8, %v6677_v12, %v6679_v45  ;;  %vm18601_vm9 = vmmov %vm18590_vm0  ;;  %v18606_v12 = vld [vmem:[#allocation21_spill] sm:$0xff] }
 0x90c   :  { %v16304_v25 = vsel %vm18601_vm9, %v16285_v2, %v6125_v22  ;;  %vm18602_vm11 = vmmov %vm18590_vm0  ;;  %v16309_v27 = vpack.c.bf16 %v6680_v58, %v6678_v7  ;;  %v5835_v45 = vsel %vm5707_vm3, %v15175_v9, %v18606_v12  ;;  %v18614_v12 = vld [vmem:[#allocation69_spill] sm:$0xff] }
 0x90d   :  { %v16307_v19 = vsel %vm18602_vm11, %v6125_v22, 0.0  ;;  %v6682_v21 = vrot.slane %v16304_v25, 2  ;;  %vm18605_vm13 = vmmov %vm18604_vm14  ;;  %v5836_v22 = vsel %vm5708_vm6, %v18597_v63, %v18607_v48  ;;  %v16336_v48 = vpack.c.bf16 %v16028_v31, %v15997_v23  ;;  %v18613_v63 = vld [vmem:[#allocation67_spill] sm:$0xff] }
 0x90e   :  { %18603 = vst [vmem:[#allocation45_spill] sm:$0xff] %v16309_v27  ;;  %v6684_v37 = vrot.slane %v16307_v19, 2  ;;  %v6435_v33 = vsel %vm18605_vm13, %v6432_v11, %v6434_v5  ;;  %10618 = vmatprep.mubr.bf16.mxu1 %v16309_v27  ;;  %vm18608_vm15 = vmmov %vm18599_vm1  ;;  %v16330_v11 = vrot.slane %v5835_v45, 7  ;;  %v6128_v9 = vrot.slane %v5836_v22, 7 }
 0x90f   :  { %v6683_v7 = vsel %vm18608_vm15, %v6681_v41, %v6682_v21  ;;  %vm18609_vm0 = vmmov %vm18599_vm1  ;;  %v16328_v58 = vpack.c.bf16 %v6435_v33, %v6433_v32  ;;  %18612 = vst [vmem:[#allocation65_spill] sm:$0xff] %v16336_v48  ;;  %vm5710_vm3 = vcmp.ge.f32.partialorder %v18613_v63, 0.0  ;;  %vm5715_vm5 = vcmp.ge.f32.partialorder %v18614_v12, 0.0  ;;  %v18615_v32 = vld [vmem:[#allocation49_spill] sm:$0xff] }
 0x910   :  { %v6685_v51 = vsel %vm18609_vm0, %v6682_v21, %v6684_v37  ;;  %v16343_v37 = vsel %vm18595_vm2, 0.0, %v16330_v11  ;;  %v5837_v21 = vsel %vm5709_vm12, %v15181_v40, %v18615_v32  ;;  %v18616_v41 = vld [vmem:[#allocation29_spill] sm:$0xff]  ;;  %v6436_v23 = vrot.slane %v16039_v34, 1  ;;  %vm18617_vm10 = vmmov %vm18595_vm2  ;;  %18642 = vst [vmem:[#allocation49_spill] sm:$0xff] %v16446_v49 }
 0x911   :  { %18610 = vst [vmem:[#allocation47_spill] sm:$0xff] %v16328_v58  ;;  %v16332_v5 = vpack.c.bf16 %v6685_v51, %v6683_v7  ;;  %7484 = vmatprep.mubr.bf16.mxu0 %v16328_v58  ;;  %v5838_v33 = vsel %vm5710_vm3, %v18613_v63, %v18616_v41  ;;  %v16354_v31 = vsel %vm18617_vm10, %v16330_v11, %v6128_v9  ;;  %vm18618_vm6 = vmmov %vm18595_vm2  ;;  %v6686_v22 = vrot.slane %v16343_v37, 2  ;;  %v18620_v41 = vld [vmem:[#allocation66_spill] sm:$0xff] }
 0x912   :  { %v16357_v45 = vsel %vm18618_vm6, %v6128_v9, 0.0  ;;  %v16360_v7 = vrot.slane %v5837_v21, 7  ;;  %v6687_v51 = vrot.slane %v16354_v31, 2  ;;  %v6131_v32 = vrot.slane %v5838_v33, 7  ;;  %vm18619_vm12 = vmmov %vm18595_vm2  ;;  %v18621_v58 = vld [vmem:[#allocation54_spill] sm:$0xff]  ;;  %9765 = vmatmul.mubr.msk.bf16.gmra.mrb[192].mxu0 %vm12853_vm7, %v16336_v48 }
 0x913   :  { %18611 = vst [vmem:[#allocation64_spill] sm:$0xff] %v16332_v5  ;;  %v6689_v40 = vrot.slane %v16357_v45, 2  ;;  %v6437_v63 = vrot.slane %v16044_v56, 1  ;;  %10619 = vmatmul.mubr.bf16.gmra.mrb[248].mxu1 %v16332_v5  ;;  %v6439_v9 = vrot.slane %v16047_v44, 1  ;;  %vm5712_vm1 = vcmp.ge.f32.partialorder %v18620_v41, 0.0  ;;  %vm18622_vm8 = vmmov %vm18609_vm0 }
 0x914   :  { %v16368_v34 = vsel %vm18619_vm12, 0.0, %v16360_v7  ;;  %v5839_v21 = vsel %vm5711_vm4, %v18593_v52, %v18621_v58  ;;  %v6688_v4 = vsel %vm18622_vm8, %v6686_v22, %v6687_v51  ;;  %vm18623_vm9 = vmmov %vm18609_vm0  ;;  %v18627_v52 = vld [vmem:[#allocation68_spill] sm:$0xff] }
 0x915   :  { %v6690_v33 = vsel %vm18623_vm9, %v6687_v51, %v6689_v40  ;;  %vm18624_vm11 = vmmov %vm18595_vm2  ;;  %v6691_v44 = vrot.slane %v16368_v34, 2  ;;  %vm5719_vm4 = vcmp.ge.f32.partialorder %v18627_v52, 0.0  ;;  %v6438_v58 = vsel %vm18605_vm13, %v6436_v23, %v6437_v63  ;;  %v18629_v51 = vld [vmem:[#allocation51_spill] sm:$0xff] }
 0x916   :  { %v16380_v5 = vsel %vm18624_vm11, %v16360_v7, %v6131_v32  ;;  %vm18625_vm14 = vmmov %vm18595_vm2  ;;  %v16385_v20 = vpack.c.bf16 %v6690_v33, %v6688_v4  ;;  %v5840_v4 = vsel %vm5712_vm1, %v18620_v41, %v18629_v51  ;;  %v16398_v40 = vrot.slane %v5839_v21, 7 }
 0x917   :  { %v16383_v27 = vsel %vm18625_vm14, %v6131_v32, 0.0  ;;  %v6692_v16 = vrot.slane %v16380_v5, 2  ;;  %vm18628_vm15 = vmmov %vm18605_vm13  ;;  %v6134_v29 = vrot.slane %v5840_v4, 7  ;;  %v18635_v41 = vrot.slane %v15677_v3, 2  ;;  %v18640_v4 = vld [vmem:[#allocation70_spill] sm:$0xff] }
 0x918   :  { %18626 = vst [vmem:[#allocation14_spill] sm:$0xff] %v16385_v20  ;;  %v6694_v36 = vrot.slane %v16383_v27, 2  ;;  %v6440_v22 = vsel %vm18628_vm15, %v6437_v63, %v6439_v9  ;;  %10622 = vmatprep.mubr.bf16.mxu1 %v16385_v20  ;;  %vm18630_vm3 = vmmov %vm18609_vm0  ;;  %v16409_v23 = vsel %vm18595_vm2, 0.0, %v16398_v40  ;;  %v16413_v63 = vpack.c.bf16 %v16044_v56, %v16022_v28 }
 0x919   :  { %v6693_v32 = vsel %vm18609_vm0, %v6691_v44, %v6692_v16  ;;  %v16403_v8 = vpack.c.bf16 %v6440_v22, %v6438_v58  ;;  %v18634_v9 = vrot.slane %v15665_v55, 2  ;;  %vm18636_vm10 = vmmov %vm18609_vm0  ;;  %v6696_v44 = vrot.slane %v16409_v23, 2 }
 0x91a   :  { %v6695_v33 = vsel %vm18630_vm3, %v6692_v16, %v6694_v36  ;;  %18633 = vst [vmem:[#allocation67_spill] sm:$0xff] %v16413_v63  ;;  %vm18637_vm6 = vmmov %vm18595_vm2  ;;  %v6441_v22 = vrot.slane %v16077_v30, 1  ;;  %v6442_v51 = vrot.slane %v16093_v18, 1  ;;  %vm5716_vm1 = vcmp.ge.f32.partialorder %v18640_v4, 0.0  ;;  %v18643_v30 = vld [vmem:[#allocation72_spill] sm:$0xff] }
 0x91b   :  { %18631 = vst [vmem:[#allocation21_spill] sm:$0xff] %v16403_v8  ;;  %v16405_v48 = vpack.c.bf16 %v6695_v33, %v6693_v32  ;;  %v6703_v16 = vsel %vm18636_vm10, %v18635_v41, %v18634_v9  ;;  %7492 = vmatprep.mubr.bf16.mxu0 %v16403_v8  ;;  %v16423_v36 = vsel %vm18637_vm6, %v16398_v40, %v6134_v29  ;;  %vm18638_vm12 = vmmov %vm18595_vm2  ;;  %v18641_v32 = vld [vmem:[#allocation53_spill] sm:$0xff]  ;;  %vm5723_vm8 = vcmp.ge.f32.partialorder %v18643_v30, 0.0  ;;  %v18650_v18 = vld [vmem:[#allocation80_spill] sm:$0xff] }
 0x91c   :  { %v16426_v21 = vsel %vm18638_vm12, %v6134_v29, 0.0  ;;  %v16430_v28 = vpack.c.bf16 %v15734_v26, %v6703_v16  ;;  %v6697_v56 = vrot.slane %v16423_v36, 2  ;;  %v6444_v29 = vrot.slane %v16096_v57, 1  ;;  %vm18644_vm9 = vmmov %vm18609_vm0  ;;  %v18647_v57 = vld [vmem:[#allocation56_spill] sm:$0xff]  ;;  %9769 = vmatmul.mubr.msk.bf16.gmra.mrb[196].mxu0 %vm12853_vm7, %v16413_v63 }
 0x91d   :  { %18632 = vst [vmem:[#allocation50_spill] sm:$0xff] %v16405_v48  ;;  %v6699_v58 = vrot.slane %v16426_v21, 2  ;;  %10623 = vmatmul.mubr.bf16.gmra.mrb[252].mxu1 %v16405_v48  ;;  %v5843_v26 = vsel %vm5715_vm5, %v18614_v12, %v18641_v32  ;;  %vm18645_vm11 = vmmov %vm18609_vm0  ;;  %v5844_v16 = vsel %vm5716_vm1, %v18640_v4, %v18647_v57  ;;  %v6446_v4 = vrot.slane %v16105_v53, 1 }
 0x91e   :  { %18639 = vst [vmem:[#allocation69_spill] sm:$0xff] %v16430_v28  ;;  %v6698_v33 = vsel %vm18644_vm9, %v6696_v44, %v6697_v56  ;;  %vm18646_vm14 = vmmov %vm18605_vm13  ;;  %v6445_v48 = vsel %vm18605_vm13, %v6442_v51, %v6444_v29  ;;  %v16457_v12 = vrot.slane %v5843_v26, 7  ;;  %v6140_v32 = vrot.slane %v5844_v16, 7  ;;  %v18658_v26 = vld [vmem:[#allocation92_spill] sm:$0xff] }
 0x91f   :  { %v6700_v9 = vsel %vm18645_vm11, %v6697_v56, %v6699_v58  ;;  %v6443_v41 = vsel %vm18646_vm14, %v6441_v22, %v6442_v51  ;;  %v18651_v44 = vrot.slane %v18650_v18, 2  ;;  %v18652_v56 = vld [vmem:[#allocation83_spill] sm:$0xff]  ;;  %vm18654_vm5 = vmmov %vm18609_vm0 }
 0x920   :  { %v16454_v8 = vpack.c.bf16 %v6700_v9, %v6698_v33  ;;  %v16462_v6 = vpack.c.bf16 %v6445_v48, %v6443_v41  ;;  %v18653_v58 = vrot.slane %v18652_v56, 2  ;;  %v6447_v33 = vrot.slane %v16116_v15, 1  ;;  %vm18655_vm15 = vmmov %vm18595_vm2 }
 0x921   :  { %v16474_v51 = vsel %vm18655_vm15, %v16457_v12, %v6140_v32  ;;  %vm18656_vm0 = vmmov %vm18595_vm2 }
 0x922   :  { %18648 = vst [vmem:[#allocation29_spill] sm:$0xff] %v16454_v8  ;;  %18649 = vst [vmem:[#allocation66_spill] sm:$0xff] %v16462_v6  ;;  %v6713_v22 = vsel %vm18654_vm5, %v18653_v58, %v18651_v44  ;;  %10626 = vmatprep.mubr.bf16.mxu1 %v16454_v8  ;;  %v16478_v48 = vsel %vm18656_vm0, 0.0, %v16457_v12  ;;  %7500 = vmatprep.mubr.bf16.mxu0 %v16462_v6  ;;  %v6707_v41 = vrot.slane %v16474_v51, 2  ;;  %v6449_v44 = vrot.slane %v16119_v10, 1  ;;  %v18661_v58 = vld [vmem:[#allocation28_spill] sm:$0xff] }
 0x923   :  { %vm18657_vm3 = vmmov %vm18656_vm0  ;;  %v16484_v9 = vpack.c.bf16 %v18658_v26, %v6713_v22  ;;  %v6706_v53 = vrot.slane %v16478_v48, 2  ;;  %vm5720_vm10 = vcmp.ge.f32.partialorder %v18661_v58, 0.0  ;;  %v18662_v8 = vld [vmem:[#allocation33_spill] sm:$0xff]  ;;  %v16499_v22 = vpack.c.bf16 %v16116_v15, %v16087_v59  ;;  %v18664_v26 = vld [vmem:[#allocation71_spill] sm:$0xff] }
 0x924   :  { %v16481_v29 = vsel %vm18657_vm3, %v6140_v32, 0.0  ;;  %vm18660_vm2 = vmmov %vm18605_vm13  ;;  %v5847_v32 = vsel %vm5719_vm4, %v18627_v52, %v18662_v8  ;;  %vm5727_vm6 = vcmp.ge.f32.partialorder %v18664_v26, 0.0  ;;  %v18671_v59 = vrot.slane %v18670_v42, 2  ;;  %v18672_v15 = vld [vmem:[#allocation84_spill] sm:$0xff]  ;;  %9773 = vmatmul.mubr.msk.bf16.gmra.mrb[200].mxu0 %vm12853_vm7, %v16446_v49  ;;  %v18691_v49 = vld [vmem:[#allocation58_spill] sm:$0xff] }
 0x925   :  { %18659 = vst [vmem:[#allocation54_spill] sm:$0xff] %v16484_v9  ;;  %v6709_v57 = vrot.slane %v16481_v29, 2  ;;  %v6448_v16 = vsel %vm18660_vm2, %v6446_v4, %v6447_v33  ;;  %18663 = vst [vmem:[#allocation68_spill] sm:$0xff] %v16499_v22  ;;  %v18667_v4 = vld [vmem:[#allocation55_spill] sm:$0xff]  ;;  %v6145_v63 = vrot.slane %v5847_v32, 7  ;;  %10627 = vmatmul.mubr.bf16.gmra.mrb[0].mxu1 %v16430_v28  ;;  %v18673_v18 = vrot.slane %v18672_v15, 2 }
 0x926   :  { %vm18665_vm12 = vmmov %vm18654_vm5  ;;  %v5848_v10 = vsel %vm5720_vm10, %v18661_v58, %v18667_v4  ;;  %v6452_v32 = vrot.slane %v16160_v61, 1  ;;  %v11741_v28 = vld [vmem:[#allocation9 + $0xf0] sm:$0xff]  }
 0x927   :  { %v6708_v6 = vsel %vm18665_vm12, %v6706_v53, %v6707_v41  ;;  %vm18666_vm1 = vmmov %vm18654_vm5  ;;  %v6146_v52 = vrot.slane %v5848_v10, 7  ;;  %v6454_v10 = vrot.slane %v16163_v14, 1  ;;  %7690 = vmatpush1.bf16.msra.mxu0 %v11741_v28 }
 0x928   :  { %v6710_v20 = vsel %vm18666_vm1, %v6707_v41, %v6709_v57  ;;  %vm18669_vm9 = vmmov %vm18660_vm2  ;;  %v18677_v57 = vld [vmem:[#allocation93_spill] sm:$0xff]  ;;  %7691 = vmatprep.subr.bf16.mxu0 %v18393_v54 }
 0x929   :  { %v16507_v35 = vpack.c.bf16 %v6710_v20, %v6708_v6  ;;  %v6450_v8 = vsel %vm18669_vm9, %v6447_v33, %v6449_v44  ;;  %vm18674_vm4 = vmmov %vm18666_vm1  ;;  %v6451_v20 = vrot.slane %v16150_v43, 1  ;;  %v18679_v6 = vld [vmem:[#allocation61_spill] sm:$0xff]  ;;  %v18680_v33 = vld [vmem:[#allocation34_spill] sm:$0xff] }
 0x92a   :  { %v6723_v56 = vsel %vm18674_vm4, %v18673_v18, %v18671_v59  ;;  %v16515_v53 = vpack.c.bf16 %v6450_v8, %v6448_v16  ;;  %vm18676_vm11 = vmmov %vm18656_vm0  ;;  %vm5701_vm14 = vcmp.ge.f32.partialorder %v18679_v6, 0.0  ;;  %vm5731_vm13 = vcmp.ge.f32.partialorder %v18680_v33, 0.0  ;;  %v18686_v59 = vld [vmem:[#allocation23_spill] sm:$0xff] }
 0x92b   :  { %18668 = vst [vmem:[#allocation51_spill] sm:$0xff] %v16507_v35  ;;  %v16518_v41 = vsel %vm18676_vm11, 0.0, %v6145_v63  ;;  %v16521_v58 = vpack.c.bf16 %v18677_v57, %v6723_v56  ;;  %10630 = vmatprep.mubr.bf16.mxu1 %v16507_v35  ;;  %vm18681_vm5 = vmmov %vm18656_vm0  ;;  %v5851_v57 = vsel %vm5723_vm8, %v18643_v30, %v18686_v59  ;;  %v16553_v35 = vpack.c.bf16 %v16160_v61, %v16134_v62  ;;  %v18694_v59 = vld [vmem:[#allocation81_spill] sm:$0xff]  ;;  %v18696_v61 = vld [vmem:[#allocation86_spill] sm:$0xff] }
 0x92c   :  { %18675 = vst [vmem:[#allocation70_spill] sm:$0xff] %v16515_v53  ;;  %v16528_v44 = vsel %vm18681_vm5, %v6145_v63, %v6146_v52  ;;  %vm18682_vm15 = vmmov %vm18656_vm0  ;;  %v6716_v16 = vrot.slane %v16518_v41, 2  ;;  %7508 = vmatprep.mubr.bf16.mxu0 %v16515_v53  ;;  %v6151_v15 = vrot.slane %v5851_v57, 7  ;;  %v18695_v62 = vrot.slane %v18694_v59, 2 }
 0x92d   :  { %18678 = vst [vmem:[#allocation53_spill] sm:$0xff] %v16521_v58  ;;  %v16531_v18 = vsel %vm18682_vm15, %v6146_v52, 0.0  ;;  %v6717_v43 = vrot.slane %v16528_v44, 2  ;;  %v16541_v4 = vpack.c.bf16 %v16528_v44, %v6145_v63  ;;  %vm18684_vm0 = vmmov %vm18660_vm2  ;;  %v18685_v52 = vld [vmem:[#allocation74_spill] sm:$0xff]  ;;  %v18697_v55 = vrot.slane %v18696_v61, 2  ;;  %10631 = vmatmul.mubr.bf16.gmra.mrb[4].mxu1 %v16484_v9  ;;  %9777 = vmatmul.mubr.msk.bf16.gmra.mrb[204].mxu0 %vm12853_vm7, %v16499_v22 }
 0x92e   :  { %v6719_v56 = vrot.slane %v16531_v18, 2  ;;  %v6453_v8 = vsel %vm18684_vm0, %v6451_v20, %v6452_v32  ;;  %vm5724_vm3 = vcmp.ge.f32.partialorder %v18685_v52, 0.0  ;;  %18687 = vst [vmem:[#allocation56_spill] sm:$0xff] %v16553_v35  ;;  %vm18688_vm2 = vmmov %vm18666_vm1  ;;  %v6466_v22 = vrot.slane %v16268_v17, 1 }
 0x92f   :  { %18683 = vst [vmem:[#allocation72_spill] sm:$0xff] %v16541_v4  ;;  %v6718_v63 = vsel %vm18688_vm2, %v6716_v16, %v6717_v43  ;;  %vm18689_vm10 = vmmov %vm18666_vm1  ;;  %v5852_v20 = vsel %vm5724_vm3, %v18685_v52, %v18691_v49 }
 0x930   :  { %v6720_v14 = vsel %vm18689_vm10, %v6717_v43, %v6719_v56  ;;  %vm18690_vm12 = vmmov %vm18684_vm0  ;;  %v6152_v30 = vrot.slane %v5852_v20, 7  ;;  %v6456_v43 = vrot.slane %v16176_v1, 1  ;;  %v6459_v56 = vrot.slane %v16188_v24, 1  ;;  %v18707_v20 = vld [vmem:[#allocation60_spill] sm:$0xff] }
 0x931   :  { %v6455_v53 = vsel %vm18690_vm12, %v6452_v32, %v6454_v10  ;;  %v16560_v4 = vpack.c.bf16 %v6720_v14, %v6718_v63  ;;  %vm18698_vm8 = vmmov %vm18666_vm1  ;;  %v6457_v32 = vrot.slane %v16185_v13, 1  ;;  %v18706_v14 = vld [vmem:[#allocation73_spill] sm:$0xff] }
 0x932   :  { %v16562_v42 = vpack.c.bf16 %v6455_v53, %v6453_v8  ;;  %v6733_v16 = vsel %vm18698_vm8, %v18697_v55, %v18695_v62  ;;  %vm18699_vm1 = vmmov %vm18681_vm5  ;;  %v18702_v55 = vld [vmem:[#allocation94_spill] sm:$0xff]  ;;  %vm5728_vm15 = vcmp.ge.f32.partialorder %v18706_v14, 0.0 }
 0x933   :  { %18692 = vst [vmem:[#allocation92_spill] sm:$0xff] %v16560_v4  ;;  %v16575_v49 = vsel %vm18699_vm1, %v6151_v15, %v6152_v30  ;;  %vm18700_vm9 = vmmov %vm18699_vm1  ;;  %v16584_v10 = vpack.c.bf16 %v18702_v55, %v6733_v16  ;;  %10634 = vmatprep.mubr.bf16.mxu1 %v16560_v4 }
 0x934   :  { %18693 = vst [vmem:[#allocation28_spill] sm:$0xff] %v16562_v42  ;;  %v16578_v28 = vsel %vm18700_vm9, 0.0, %v6151_v15  ;;  %vm18701_vm4 = vmmov %vm18699_vm1  ;;  %v6727_v24 = vrot.slane %v16575_v49, 2  ;;  %v16591_v52 = vpack.c.bf16 %v16575_v49, %v6151_v15  ;;  %7516 = vmatprep.mubr.bf16.mxu0 %v16562_v42 }
 0x935   :  { %v16581_v53 = vsel %vm18701_vm4, %v6152_v30, 0.0  ;;  %v6726_v1 = vrot.slane %v16578_v28, 2  ;;  %vm18704_vm11 = vmmov %vm18684_vm0  ;;  %v5855_v30 = vsel %vm5727_vm6, %v18664_v26, %v18707_v20  ;;  %v16614_v26 = vpack.c.bf16 %v16185_v13, %v16166_v39  ;;  %v18713_v20 = vld [vmem:[#allocation52_spill] sm:$0xff]  ;;  %10635 = vmatmul.mubr.bf16.gmra.mrb[8].mxu1 %v16521_v58  ;;  %9781 = vmatmul.mubr.msk.bf16.gmra.mrb[208].mxu0 %vm12853_vm7, %v16553_v35 }
 0x936   :  { %v6729_v8 = vrot.slane %v16581_v53, 2  ;;  %18703 = vst [vmem:[#allocation33_spill] sm:$0xff] %v16591_v52  ;;  %v6458_v57 = vsel %vm18704_vm11, %v6456_v43, %v6457_v32  ;;  %vm18705_vm5 = vmmov %vm18684_vm0  ;;  %v18711_v43 = vld [vmem:[#allocation57_spill] sm:$0xff]  ;;  %v6157_v55 = vrot.slane %v5855_v30, 7  ;;  %vm5732_vm6 = vcmp.ge.f32.partialorder %v18713_v20, 0.0  ;;  %v18720_v30 = vld [vmem:[#allocation30_spill] sm:$0xff] }
 0x937   :  { %v6460_v63 = vsel %vm18705_vm5, %v6457_v32, %v6459_v56  ;;  %vm18708_vm0 = vmmov %vm18688_vm2  ;;  %v5856_v32 = vsel %vm5728_vm15, %v18706_v14, %v18711_v43  ;;  %vm18729_vm15 = vcmask 1046528   ;;  %v11742_v58 = vld [vmem:[#allocation9 + $0xf8] sm:$0xff]  }
 0x938   :  { %v6728_v62 = vsel %vm18708_vm0, %v6726_v1, %v6727_v24  ;;  %vm18709_vm3 = vmmov %vm18708_vm0  ;;  %v16605_v16 = vpack.c.bf16 %v6460_v63, %v6458_v57  ;;  %v6158_v4 = vrot.slane %v5856_v32, 7  ;;  %v18714_v1 = vld [vmem:[#allocation75_spill] sm:$0xff]  ;;  %v18716_v57 = vld [vmem:[#allocation46_spill] sm:$0xff]  ;;  %7692 = vmatpush1.bf16.msra.mxu0 %v11742_v58 }
 0x939   :  { %v6730_v15 = vsel %vm18709_vm3, %v6727_v24, %v6729_v8  ;;  %v5859_v24 = vsel %vm5731_vm13, %v18680_v33, %v18714_v1  ;;  %v18715_v8 = vld [vmem:[#allocation25_spill] sm:$0xff]  ;;  %v5829_v63 = vsel %vm5701_vm14, %v18679_v6, %v18716_v57  ;;  %vm18717_vm10 = vmmov %vm18699_vm1  ;;  %v18722_v57 = vld [vmem:[#allocation48_spill] sm:$0xff]  ;;  %7950 = vmatprep.subr.bf16.mxu0 %v18393_v54 }
 0x93a   :  { %18710 = vst [vmem:[#allocation71_spill] sm:$0xff] %v16605_v16  ;;  %v16610_v56 = vpack.c.bf16 %v6730_v15, %v6728_v62  ;;  %vm5702_vm2 = vcmp.ge.f32.partialorder %v18715_v8, 0.0  ;;  %v16627_v14 = vsel %vm18717_vm10, %v6157_v55, %v6158_v4  ;;  %vm18718_vm12 = vmmov %vm18699_vm1  ;;  %v5860_v62 = vsel %vm5732_vm6, %v18713_v20, %v18720_v30  ;;  %7524 = vmatprep.mubr.bf16.mxu0 %v16605_v16 }
 0x93b   :  { %v16630_v39 = vsel %vm18718_vm12, 0.0, %v6157_v55  ;;  %vm18719_vm8 = vmmov %vm18699_vm1  ;;  %v6737_v15 = vrot.slane %v16627_v14, 2  ;;  %v16641_v6 = vpack.c.bf16 %v16627_v14, %v6157_v55  ;;  %v16644_v32 = vrot.slane %v5859_v24, 7 }
 0x93c   :  { %18712 = vst [vmem:[#allocation55_spill] sm:$0xff] %v16610_v56  ;;  %v16633_v13 = vsel %vm18719_vm8, %v6158_v4, 0.0  ;;  %v6736_v33 = vrot.slane %v16630_v39, 2  ;;  %v6164_v1 = vrot.slane %v5860_v62, 7  ;;  %v5830_v4 = vsel %vm5702_vm2, %v18715_v8, %v18722_v57  ;;  %10638 = vmatprep.mubr.bf16.mxu1 %v16610_v56  ;;  %vm18723_vm14 = vmmov %vm18708_vm0 }
 0x93d   :  { %v6739_v43 = vrot.slane %v16633_v13, 2  ;;  %18721 = vst [vmem:[#allocation93_spill] sm:$0xff] %v16641_v6  ;;  %v6118_v42 = vrot.slane %v5829_v63, 7  ;;  %vm18724_vm13 = vmmov %vm18708_vm0  ;;  %v6119_v9 = vrot.slane %v5830_v4, 7  ;;  %10639 = vmatmul.mubr.bf16.gmra.mrb[12].mxu1 %v16584_v10  ;;  %9785 = vmatmul.mubr.msk.bf16.gmra.mrb[212].mxu0 %vm12853_vm7, %v16614_v26 }
 0x93e   :  { %v6738_v20 = vsel %vm18723_vm14, %v6736_v33, %v6737_v15  ;;  %v16656_v24 = vsel %vm18699_vm1, %v16644_v32, %v6164_v1  ;;  %vm18725_vm9 = vmmov %vm18699_vm1 }
 0x93f   :  { %v6740_v30 = vsel %vm18724_vm13, %v6737_v15, %v6739_v43  ;;  %v6293_v62 = vsel %vm18725_vm9, 0.0, %v16644_v32  ;;  %vm18726_vm4 = vmmov %vm18699_vm1  ;;  %v6816_v33 = vrot.slane %v16656_v24, 1  ;;  %v6830_v43 = vrot.slane %v16656_v24, 2 }
 0x940   :  { %v16652_v55 = vpack.c.bf16 %v6740_v30, %v6738_v20  ;;  %v6325_v8 = vsel %vm18726_vm4, %v6164_v1, 0.0  ;;  %v6815_v63 = vrot.slane %v6293_v62, 1  ;;  %v6829_v17 = vrot.slane %v6293_v62, 2  ;;  %vm18727_vm11 = vmmov %vm18699_vm1 }
 0x941   :  { %v6818_v15 = vrot.slane %v6325_v8, 1  ;;  %v6832_v57 = vrot.slane %v6325_v8, 2  ;;  %v16668_v4 = vsel %vm18727_vm11, %v6118_v42, %v6119_v9  ;;  %vm18728_vm5 = vmmov %vm18699_vm1 }
 0x942   :  { %v16671_v20 = vsel %vm18728_vm5, 0.0, %v6118_v42  ;;  %v6817_v1 = vsel %vm18729_vm15, %v6815_v63, %v6816_v33  ;;  %vm18730_vm0 = vmmov %vm18729_vm15  ;;  %v6462_v6 = vrot.slane %v16668_v4, 1  ;;  %10642 = vmatprep.mubr.bf16.mxu1 %v16652_v55 }
 0x943   :  { %v6819_v30 = vsel %vm18730_vm0, %v6816_v33, %v6818_v15  ;;  %vm18731_vm3 = vmmov %vm18699_vm1  ;;  %v6461_v62 = vrot.slane %v16671_v20, 1  ;;  %v16688_v33 = vpack.c.bf16 %v16668_v4, %v6118_v42 }
 0x944   :  { %v16676_v56 = vsel %vm18731_vm3, %v6119_v9, 0.0  ;;  %vm18732_vm6 = vmmov %vm18724_vm13  ;;  %v16681_v35 = vpack.c.bf16 %v6819_v30, %v6817_v1  ;;  %v6467_v9 = vrot.slane %v16279_v50, 1  ;;  %v6474_v1 = vrot.slane %v16307_v19, 1 }
 0x945   :  { %v6831_v16 = vsel %vm18732_vm6, %v6829_v17, %v6830_v43  ;;  %vm18733_vm2 = vmmov %vm18732_vm6  ;;  %v6464_v63 = vrot.slane %v16676_v56, 1  ;;  %v6469_v17 = vrot.slane %v16282_v60, 1 }
 0x946   :  { %v6833_v8 = vsel %vm18733_vm2, %v6830_v43, %v6832_v57  ;;  %vm18734_vm10 = vmmov %vm18730_vm0  ;;  %v16696_v43 = vpack.c.bf16 %v16279_v50, %v16251_v46  ;;  %v6472_v57 = vrot.slane %v16304_v25, 1  ;;  %v16710_v46 = vpack.c.bf16 %v16304_v25, %v16285_v2 }
 0x947   :  { %v16684_v52 = vpack.c.bf16 %v6833_v8, %v6831_v16  ;;  %v6463_v15 = vsel %vm18734_vm10, %v6461_v62, %v6462_v6  ;;  %v6471_v16 = vrot.slane %v16293_v0, 1  ;;  %vm18736_vm12 = vmmov %vm18730_vm0  ;;  %v6476_v50 = vrot.slane %v16343_v37, 1  ;;  %v18742_v62 = vld [vmem:[#allocation13_spill] sm:$0xff] }
 0x948   :  { %18735 = vst [vmem:[#allocation61_spill] sm:$0xff] %v16696_v43  ;;  %v6465_v42 = vsel %vm18736_vm12, %v6462_v6, %v6464_v63  ;;  %vm18737_vm8 = vmmov %vm18730_vm0  ;;  %v6477_v6 = vrot.slane %v16354_v31, 1  ;;  %7532 = vmatprep.mubr.bf16.mxu0 %v18742_v62  ;;  %v6479_v2 = vrot.slane %v16357_v45, 1  ;;  %v16727_v25 = vpack.c.bf16 %v16354_v31, %v16330_v11  ;;  %v18870_v62 = vld [vmem:[#allocation65_spill] sm:$0xff] }
 0x949   :  { %v6468_v58 = vsel %vm18737_vm8, %v6466_v22, %v6467_v9  ;;  %v16705_v30 = vpack.c.bf16 %v6465_v42, %v6463_v15  ;;  %vm18738_vm14 = vmmov %vm18730_vm0  ;;  %18739 = vst [vmem:[#allocation34_spill] sm:$0xff] %v16710_v46  ;;  %v6481_v37 = vrot.slane %v16368_v34, 1  ;;  %v6484_v15 = vrot.slane %v16383_v27, 1 }
 0x94a   :  { %v6470_v60 = vsel %vm18738_vm14, %v6467_v9, %v6469_v17  ;;  %vm18740_vm13 = vmmov %vm18730_vm0  ;;  %18743 = vst [vmem:[#allocation74_spill] sm:$0xff] %v16727_v25  ;;  %v6482_v9 = vrot.slane %v16380_v5, 1  ;;  %v16735_v17 = vpack.c.bf16 %v16380_v5, %v16360_v7  ;;  %v6486_v45 = vrot.slane %v16409_v23, 1  ;;  %v18750_v5 = vld [vmem:[#allocation32_spill] sm:$0xff] }
 0x94b   :  { %v16716_v0 = vpack.c.bf16 %v6470_v60, %v6468_v58  ;;  %v6473_v22 = vsel %vm18740_vm13, %v6471_v16, %v6472_v57  ;;  %vm18741_vm1 = vmmov %vm18730_vm0  ;;  %v6487_v42 = vrot.slane %v16423_v36, 1  ;;  %v6489_v11 = vrot.slane %v16426_v21, 1  ;;  %10643 = vmatmul.mubr.bf16.gmra.mrb[16].mxu1 %v18750_v5 }
 0x94c   :  { %v6475_v19 = vsel %vm18741_vm1, %v6472_v57, %v6474_v1  ;;  %vm18744_vm9 = vmmov %vm18730_vm0  ;;  %18745 = vst [vmem:[#allocation23_spill] sm:$0xff] %v16735_v17  ;;  %v16747_v27 = vpack.c.bf16 %v16423_v36, %v16398_v40  ;;  %10646 = vmatprep.mubr.bf16.mxu1 %v16684_v52  ;;  %v6496_v1 = vrot.slane %v16478_v48, 1  ;;  %v6497_v60 = vrot.slane %v16474_v51, 1  ;;  %v18753_v36 = vld [vmem:[#allocation16_spill] sm:$0xff] }
 0x94d   :  { %v16722_v8 = vpack.c.bf16 %v6475_v19, %v6473_v22  ;;  %v6478_v63 = vsel %vm18744_vm9, %v6476_v50, %v6477_v6  ;;  %vm18746_vm4 = vmmov %vm18730_vm0  ;;  %v6490_v57 = vsel %vm18730_vm0, %v6487_v42, %v6489_v11  ;;  %v6499_v50 = vrot.slane %v16481_v29, 1  ;;  %9789 = vmatmul.mubr.msk.bf16.gmra.mrb[216].mxu0 %vm12853_vm7, %v18753_v36 }
 0x94e   :  { %v6480_v16 = vsel %vm18746_vm4, %v6477_v6, %v6479_v2  ;;  %vm18747_vm11 = vmmov %vm18730_vm0  ;;  %18749 = vst [vmem:[#allocation58_spill] sm:$0xff] %v16747_v27  ;;  %v16762_v40 = vpack.c.bf16 %v16474_v51, %v16457_v12  ;;  %7540 = vmatprep.mubr.bf16.mxu0 %v16705_v30  ;;  %v6506_v48 = vrot.slane %v16518_v41, 1  ;;  %v6507_v29 = vrot.slane %v16528_v44, 1 }
 0x94f   :  { %v16741_v31 = vpack.c.bf16 %v6480_v16, %v6478_v63  ;;  %v6483_v34 = vsel %vm18747_vm11, %v6481_v37, %v6482_v9  ;;  %vm18748_vm5 = vmmov %vm18730_vm0  ;;  %v6509_v2 = vrot.slane %v16531_v18, 1  ;;  %v6516_v12 = vrot.slane %v16578_v28, 1 }
 0x950   :  { %v6485_v58 = vsel %vm18748_vm5, %v6482_v9, %v6484_v15  ;;  %vm18751_vm15 = vmmov %vm18730_vm0  ;;  %18752 = vst [vmem:[#allocation81_spill] sm:$0xff] %v16762_v40  ;;  %v6517_v63 = vrot.slane %v16575_v49, 1  ;;  %v6519_v9 = vrot.slane %v16581_v53, 1  ;;  %v6526_v28 = vrot.slane %v16630_v39, 1 }
 0x951   :  { %v16750_v7 = vpack.c.bf16 %v6485_v58, %v6483_v34  ;;  %v6488_v23 = vsel %vm18751_vm15, %v6486_v45, %v6487_v42  ;;  %vm18754_vm3 = vmmov %vm18730_vm0  ;;  %v6527_v49 = vrot.slane %v16627_v14, 1  ;;  %v6529_v53 = vrot.slane %v16633_v13, 1 }
 0x952   :  { %v16755_v21 = vpack.c.bf16 %v6490_v57, %v6488_v23  ;;  %v6498_v22 = vsel %vm18754_vm3, %v6496_v1, %v6497_v60  ;;  %vm18755_vm6 = vmmov %vm18730_vm0  ;;  %v6671_v11 = vrot.slane %v16671_v20, 2  ;;  %v6672_v34 = vrot.slane %v16668_v4, 2  ;;  %v18766_v4 = vld [vmem:[#allocation85_spill] sm:$0xff] }
 0x953   :  { %v6500_v19 = vsel %vm18755_vm6, %v6497_v60, %v6499_v50  ;;  %vm18756_vm2 = vmmov %vm18730_vm0  ;;  %10647 = vmatmul.mubr.bf16.gmra.mrb[20].mxu1 %v18598_v47  ;;  %v6674_v58 = vrot.slane %v16676_v56, 2  ;;  %v16803_v39 = vpack.c.bf16 %v16656_v24, %v16644_v32  ;;  %vm18763_vm1 = vcmask 1045504   ;;  %v18765_v32 = vld [vmem:[#allocation79_spill] sm:$0xff] }
 0x954   :  { %v16770_v6 = vpack.c.bf16 %v6500_v19, %v6498_v22  ;;  %v6508_v51 = vsel %vm18756_vm2, %v6506_v48, %v6507_v29  ;;  %vm18757_vm10 = vmmov %vm18730_vm0  ;;  %v6673_v14 = vsel %vm18763_vm1, %v6671_v11, %v6672_v34  ;;  %v6491_v56 = vrot.slane %v15677_v3, 1  ;;  %v18769_v50 = vld [vmem:[#allocation59_spill] sm:$0xff]  ;;  %v18772_v48 = vld [vmem:[#allocation80_spill] sm:$0xff] }
 0x955   :  { %v6510_v37 = vsel %vm18757_vm10, %v6507_v29, %v6509_v2  ;;  %vm18758_vm12 = vmmov %vm18730_vm0  ;;  %9793 = vmatmul.mubr.msk.bf16.gmra.mrb[220].mxu0 %vm12853_vm7, %v16688_v33  ;;  %18762 = vst [vmem:[#allocation86_spill] sm:$0xff] %v16803_v39  ;;  %v6492_v24 = vrot.slane %v18765_v32, 1  ;;  %v6494_v20 = vrot.slane %v18766_v4, 1  ;;  %v16838_v3 = vpack.c.bf16 %v18765_v32, %v18769_v50  ;;  %v18771_v22 = vld [vmem:[#allocation83_spill] sm:$0xff]  ;;  %v18773_v2 = vld [vmem:[#allocation88_spill] sm:$0xff] }
 0x956   :  { %v16781_v15 = vpack.c.bf16 %v6510_v37, %v6508_v51  ;;  %v6518_v41 = vsel %vm18758_vm12, %v6516_v12, %v6517_v63  ;;  %vm18759_vm8 = vmmov %vm18730_vm0  ;;  %7548 = vmatprep.mubr.bf16.mxu0 %v16716_v0  ;;  %v6501_v19 = vrot.slane %v18771_v22, 1  ;;  %v6502_v29 = vrot.slane %v18772_v48, 1  ;;  %v18785_v4 = vld [vmem:[#allocation90_spill] sm:$0xff] }
 0x957   :  { %v6520_v44 = vsel %vm18759_vm8, %v6517_v63, %v6519_v9  ;;  %vm18760_vm14 = vmmov %vm18730_vm0  ;;  %18770 = vst [vmem:[#allocation94_spill] sm:$0xff] %v16838_v3  ;;  %v6504_v12 = vrot.slane %v18773_v2, 1  ;;  %v18776_v9 = vld [vmem:[#allocation62_spill] sm:$0xff]  ;;  %v6521_v32 = vrot.slane %v18696_v61, 1  ;;  %v18792_v61 = vld [vmem:[#allocation33_spill] sm:$0xff] }
 0x958   :  { %v16788_v18 = vpack.c.bf16 %v6520_v44, %v6518_v41  ;;  %v6528_v16 = vsel %vm18760_vm14, %v6526_v28, %v6527_v49  ;;  %vm18761_vm13 = vmmov %vm18730_vm0  ;;  %v16857_v41 = vpack.c.bf16 %v18772_v48, %v18776_v9  ;;  %v18778_v44 = vld [vmem:[#allocation84_spill] sm:$0xff] }
 0x959   :  { %v6530_v45 = vsel %vm18761_vm13, %v6527_v49, %v6529_v53  ;;  %vm18764_vm9 = vmmov %vm18763_vm1  ;;  %v6511_v28 = vrot.slane %v18778_v44, 1  ;;  %v18779_v49 = vld [vmem:[#allocation78_spill] sm:$0xff]  ;;  %v18793_v2 = vld [vmem:[#allocation76_spill] sm:$0xff] }
 0x95a   :  { %v16796_v42 = vpack.c.bf16 %v6530_v45, %v6528_v16  ;;  %v6675_v13 = vsel %vm18764_vm9, %v6672_v34, %v6674_v58  ;;  %vm18767_vm4 = vmmov %vm18730_vm0  ;;  %18777 = vst [vmem:[#allocation73_spill] sm:$0xff] %v16857_v41  ;;  %v6512_v53 = vrot.slane %v18779_v49, 1  ;;  %v18780_v16 = vld [vmem:[#allocation89_spill] sm:$0xff]  ;;  %v18798_v44 = vld [vmem:[#allocation87_spill] sm:$0xff] }
 0x95b   :  { %v16811_v23 = vpack.c.bf16 %v6675_v13, %v6673_v14  ;;  %v6493_v57 = vsel %vm18767_vm4, %v6491_v56, %v6492_v24  ;;  %vm18768_vm11 = vmmov %vm18730_vm0  ;;  %v6514_v45 = vrot.slane %v18780_v16, 1  ;;  %v18782_v14 = vld [vmem:[#allocation72_spill] sm:$0xff]  ;;  %v18783_v13 = vld [vmem:[#allocation63_spill] sm:$0xff] }
 0x95c   :  { %v6495_v1 = vsel %vm18768_vm11, %v6492_v24, %v6494_v20  ;;  %vm18774_vm5 = vmmov %vm18730_vm0  ;;  %v6513_v11 = vsel %vm18730_vm0, %v6511_v28, %v6512_v53  ;;  %v16876_v56 = vpack.c.bf16 %v18779_v49, %v18783_v13  ;;  %v6522_v24 = vrot.slane %v18694_v59, 1  ;;  %v18799_v49 = vld [vmem:[#allocation82_spill] sm:$0xff]  ;;  %v18800_v16 = vld [vmem:[#allocation91_spill] sm:$0xff] }
 0x95d   :  { %9797 = vmatmul.mubr.msk.bf16.gmra.mrb[224].mxu0 %vm12853_vm7, %v16696_v43  ;;  %v16830_v60 = vpack.c.bf16 %v6495_v1, %v6493_v57  ;;  %v6503_v51 = vsel %vm18774_vm5, %v6501_v19, %v6502_v29  ;;  %vm18775_vm15 = vmmov %vm18730_vm0  ;;  %v6524_v20 = vrot.slane %v18785_v4, 1  ;;  %v6531_v28 = vrot.slane %v18798_v44, 1  ;;  %v18806_v4 = vld [vmem:[#allocation93_spill] sm:$0xff] }
 0x95e   :  { %7556 = vmatprep.mubr.bf16.mxu0 %v16722_v8  ;;  %v6505_v37 = vsel %vm18775_vm15, %v6502_v29, %v6504_v12  ;;  %vm18781_vm3 = vmmov %vm18730_vm0  ;;  %18784 = vst [vmem:[#allocation60_spill] sm:$0xff] %v16876_v56  ;;  %v16903_v12 = vpack.c.bf16 %v18694_v59, %v18793_v2 }
 0x95f   :  { %v16849_v63 = vpack.c.bf16 %v6505_v37, %v6503_v51  ;;  %v6515_v34 = vsel %vm18781_vm3, %v6512_v53, %v6514_v45  ;;  %vm18786_vm6 = vmmov %vm18730_vm0  ;;  %v6532_v53 = vrot.slane %v18799_v49, 1  ;;  %v6534_v45 = vrot.slane %v18800_v16, 1  ;;  %v18814_v16 = vld [vmem:[#allocation95_spill] sm:$0xff] }
 0x960   :  { %v16868_v58 = vpack.c.bf16 %v6515_v34, %v6513_v11  ;;  %v6523_v57 = vsel %vm18786_vm6, %v6521_v32, %v6522_v24  ;;  %vm18787_vm2 = vmmov %vm18730_vm0  ;;  %18794 = vst [vmem:[#allocation46_spill] sm:$0xff] %v16903_v12 }
 0x961   :  { %v6525_v1 = vsel %vm18787_vm2, %v6522_v24, %v6524_v20  ;;  %vm18802_vm10 = vmmov %vm18730_vm0 }
 0x962   :  { %v16893_v48 = vpack.c.bf16 %v6525_v1, %v6523_v57  ;;  %v6533_v59 = vsel %vm18802_vm10, %v6531_v28, %v6532_v53  ;;  %vm18803_vm12 = vmmov %vm18730_vm0  ;;  %v18809_v1 = vld [vmem:[#allocation77_spill] sm:$0xff] }
 0x963   :  { %v6535_v34 = vsel %vm18803_vm12, %v6532_v53, %v6534_v45  ;;  %v16938_v2 = vpack.c.bf16 %v18799_v49, %v18809_v1  ;;  %v18817_v49 = vld [vmem:[#allocation37_spill] sm:$0xff]  ;;  %vm18824_vm8 = vmmov %vm18763_vm1 }
 0x964   :  { %v16924_v32 = vpack.c.bf16 %v6535_v34, %v6533_v59  ;;  %v11743_v59 = vld [vmem:[#allocation9 + $0x100] sm:$0xff]   ;;  %v6596_v1 = vrot.slane %v18817_v49, 2  ;;  %vm18825_vm14 = vmmov %vm18763_vm1  ;;  %v11745_v49 = vld [vmem:[#allocation9 + $0x110] sm:$0xff]  }
 0x965   :  { %9801 = vmatmul.mubr.msk.bf16.gmra.mrb[228].mxu0 %vm12853_vm7, %v16710_v46  ;;  %18810 = vst [vmem:[#allocation88_spill] sm:$0xff] %v16938_v2  ;;  %vm18924_vm13 = vmmov %vm18730_vm0 }
 0x966   :  { %7564 = vmatprep.mubr.bf16.mxu0 %v16741_v31  ;;  %vm18925_vm1 = vmmov %vm18730_vm0 }
 0x96d   :  { %9805 = vmatmul.mubr.msk.bf16.gmra.mrb[232].mxu0 %vm12853_vm7, %v16727_v25 }
 0x96e   :  { %7572 = vmatprep.mubr.bf16.mxu0 %v16750_v7 }
 0x975   :  { %9809 = vmatmul.mubr.msk.bf16.gmra.mrb[236].mxu0 %vm12853_vm7, %v16735_v17 }
 0x976   :  { %7580 = vmatprep.mubr.bf16.mxu0 %v16755_v21 }
 0x97d   :  { %9813 = vmatmul.mubr.msk.bf16.gmra.mrb[240].mxu0 %vm12853_vm7, %v16747_v27 }
 0x97e   :  { %7588 = vmatprep.mubr.bf16.mxu0 %v16830_v60 }
 0x985   :  { %9817 = vmatmul.mubr.msk.bf16.gmra.mrb[244].mxu0 %vm12853_vm7, %v16838_v3 }
 0x986   :  { %7596 = vmatprep.mubr.bf16.mxu0 %v16770_v6 }
 0x98d   :  { %9821 = vmatmul.mubr.msk.bf16.gmra.mrb[248].mxu0 %vm12853_vm7, %v16762_v40 }
 0x98e   :  { %7604 = vmatprep.mubr.bf16.mxu0 %v16849_v63  ;;  %v16887_v50 = vpop.f32.mrb[216].mxu1 }
 0x98f   :  { %18788 = vst [vmem:[#allocation57_spill] sm:$0xff] %v16887_v50  ;;  %v16889_v22 = vpop.f32.mrb[217].mxu1  ;;  %v18858_v50 = vld [vmem:[#allocation108_spill] sm:$0xff] }
 0x990   :  { %18789 = vst [vmem:[#allocation52_spill] sm:$0xff] %v16889_v22  ;;  %v16891_v19 = vpop.f32.mrb[218].mxu1  ;;  %v18864_v22 = vld [vmem:[#allocation113_spill] sm:$0xff] }
 0x991   :  { %18790 = vst [vmem:[#allocation75_spill] sm:$0xff] %v16891_v19  ;;  %v16895_v29 = vpop.f32.mrb[219].mxu1  ;;  %v18852_v19 = vld [vmem:[#allocation20_spill] sm:$0xff] }
 0x992   :  { %18791 = vst [vmem:[#allocation25_spill] sm:$0xff] %v16895_v29 }
 0x995   :  { %9825 = vmatmul.mubr.msk.bf16.gmra.mrb[252].mxu0 %vm12853_vm7, %v16857_v41 }
 0x996   :  { %7612 = vmatprep.mubr.bf16.mxu0 %v16781_v15 }
 0x99b   :  { %v16905_v51 = vpop.f32.mrb[220].mxu1 }
 0x99c   :  { %18795 = vst [vmem:[#allocation30_spill] sm:$0xff] %v16905_v51  ;;  %v16907_v37 = vpop.f32.mrb[221].mxu1  ;;  %v18844_v51 = vld [vmem:[#allocation38_spill] sm:$0xff] }
 0x99d   :  { %9829 = vmatmul.mubr.msk.bf16.gmra.mrb[0].mxu0 %vm12853_vm7, %v18782_v14  ;;  %18796 = vst [vmem:[#allocation48_spill] sm:$0xff] %v16907_v37  ;;  %v16909_v9 = vpop.f32.mrb[222].mxu1  ;;  %v18850_v37 = vld [vmem:[#allocation15_spill] sm:$0xff] }
 0x99e   :  { %7620 = vmatprep.mubr.bf16.mxu0 %v16868_v58  ;;  %18797 = vst [vmem:[#allocation32_spill] sm:$0xff] %v16909_v9  ;;  %v16917_v11 = vpop.f32.mrb[223].mxu1  ;;  %v18840_v9 = vld [vmem:[#allocation101_spill] sm:$0xff] }
 0x99f   :  { %18801 = vst [vmem:[#allocation79_spill] sm:$0xff] %v16917_v11  ;;  %v18846_v11 = vld [vmem:[#allocation104_spill] sm:$0xff] }
 0x9a5   :  { %9833 = vmatmul.mubr.msk.bf16.gmra.mrb[4].mxu0 %vm12853_vm7, %v16876_v56 }
 0x9a6   :  { %7628 = vmatprep.mubr.bf16.mxu0 %v16788_v18 }
 0x9a8   :  { %v16922_v13 = vpop.f32.mrb[224].mxu1 }
 0x9a9   :  { %18804 = vst [vmem:[#allocation85_spill] sm:$0xff] %v16922_v13  ;;  %v16926_v24 = vpop.f32.mrb[225].mxu1 }
 0x9aa   :  { %18805 = vst [vmem:[#allocation59_spill] sm:$0xff] %v16926_v24  ;;  %v16931_v20 = vpop.f32.mrb[226].mxu1  ;;  %v18822_v24 = vld [vmem:[#allocation17_spill] sm:$0xff] }
 0x9ab   :  { %18807 = vst [vmem:[#allocation83_spill] sm:$0xff] %v16931_v20  ;;  %v16934_v57 = vpop.f32.mrb[227].mxu1 }
 0x9ac   :  { %18808 = vst [vmem:[#allocation80_spill] sm:$0xff] %v16934_v57 }
 0x9ad   :  { %9837 = vmatmul.mubr.msk.bf16.gmra.mrb[8].mxu0 %vm12853_vm7, %v18792_v61 }
 0x9ae   :  { %7636 = vmatprep.mubr.bf16.mxu0 %v16893_v48 }
 0x9b4   :  { %v16940_v44 = vpop.f32.mrb[228].mxu1 }
 0x9b5   :  { %9841 = vmatmul.mubr.msk.bf16.gmra.mrb[12].mxu0 %vm12853_vm7, %v16903_v12  ;;  %18811 = vst [vmem:[#allocation62_spill] sm:$0xff] %v16940_v44  ;;  %v16942_v28 = vpop.f32.mrb[229].mxu1  ;;  %v18818_v44 = vld [vmem:[#allocation19_spill] sm:$0xff] }
 0x9b6   :  { %7644 = vmatprep.mubr.bf16.mxu0 %v16796_v42  ;;  %18812 = vst [vmem:[#allocation84_spill] sm:$0xff] %v16942_v28  ;;  %v16947_v53 = vpop.f32.mrb[230].mxu1  ;;  %v6597_v20 = vrot.slane %v18818_v44, 2  ;;  %v18819_v28 = vld [vmem:[#allocation18_spill] sm:$0xff] }
 0x9b7   :  { %18813 = vst [vmem:[#allocation78_spill] sm:$0xff] %v16947_v53  ;;  %v16952_v45 = vpop.f32.mrb[231].mxu1  ;;  %v6599_v13 = vrot.slane %v18819_v28, 2 }
 0x9b8   :  { %18815 = vst [vmem:[#allocation89_spill] sm:$0xff] %v16952_v45  ;;  %v6598_v44 = vsel %vm18824_vm8, %v6596_v1, %v6597_v20  ;;  %v11746_v1 = vld [vmem:[#allocation9 + $0x118] sm:$0xff]  }
 0x9b9   :  { %v6600_v28 = vsel %vm18825_vm14, %v6597_v20, %v6599_v13  ;;  %v11747_v20 = vld [vmem:[#allocation9 + $0x120] sm:$0xff]  }
 0x9bd   :  { %9845 = vmatmul.mubr.msk.bf16.gmra.mrb[16].mxu0 %vm12853_vm7, %v18806_v4 }
 0x9be   :  { %7652 = vmatprep.mubr.bf16.mxu0 %v16924_v32 }
 0x9bf   :  { %v16954_v34 = vpop.f32.mrb[232].mxu1 }
 0x9c0   :  { %18816 = vst [vmem:[#allocation63_spill] sm:$0xff] %v16954_v34  ;;  %v16959_v57 = vpop.f32.mrb[233].mxu1  ;;  %v16972_v34 = vpack.c.bf16 %v6600_v28, %v6598_v44  ;;  %v18832_v44 = vld [vmem:[#allocation97_spill] sm:$0xff] }
 0x9c1   :  { %18820 = vst [vmem:[#allocation90_spill] sm:$0xff] %v16959_v57  ;;  %v16962_v53 = vpop.f32.mrb[234].mxu1  ;;  %v18828_v57 = vld [vmem:[#allocation99_spill] sm:$0xff] }
 0x9c2   :  { %18821 = vst [vmem:[#allocation76_spill] sm:$0xff] %v16962_v53  ;;  %v16967_v45 = vpop.f32.mrb[235].mxu1 }
 0x9c3   :  { %18823 = vst [vmem:[#allocation87_spill] sm:$0xff] %v16967_v45 }
 0x9c5   :  { %9849 = vmatmul.mubr.msk.bf16.gmra.mrb[20].mxu0 %vm12853_vm7, %v16938_v2 }
 0x9c6   :  { %9853 = vmatprep.mubr.msk.bf16.mxu0 %vm12853_vm7, %v18814_v16  ;;  %v11744_v16 = vld [vmem:[#allocation9 + $0x108] sm:$0xff]  }
 0x9c9   :  { %v16975_v53 = vpop.f32.mrb[236].mxu1 }
 0x9ca   :  { %18826 = vst [vmem:[#allocation82_spill] sm:$0xff] %v16975_v53  ;;  %v18834_v53 = vld [vmem:[#allocation26_spill] sm:$0xff] }
 0x9cd   :  { %7694 = vmatmul.mubr.bf16.vlgmr.msra.gmra.mrb[152].mxu0 %v18598_v47 }
 0x9ce   :  { %9857 = vmatprep.mubr.msk.bf16.mxu0 %vm12853_vm7, %v18822_v24  ;;  %7951 = vmatpush1.bf16.msra.mxu0 %v11743_v59  ;;  %v16978_v59 = vpop.f32.mrb[237].mxu1 }
 0x9cf   :  { %7952 = vmatprep.subr.bf16.mxu0 %v18393_v54  ;;  %18827 = vst [vmem:[#allocation91_spill] sm:$0xff] %v16978_v59  ;;  %v16983_v45 = vpop.f32.mrb[238].mxu1  ;;  %v18838_v59 = vld [vmem:[#allocation22_spill] sm:$0xff] }
 0x9d0   :  { %18829 = vst [vmem:[#allocation77_spill] sm:$0xff] %v16983_v45  ;;  %v16986_v13 = vpop.f32.mrb[239].mxu1 }
 0x9d1   :  { %18830 = vst [vmem:[#allocation95_spill] sm:$0xff] %v16986_v13  ;;  %v11749_v13 = vld [vmem:[#allocation9 + $0x130] sm:$0xff]  }
 0x9d2   :  { %7953 = vmatpush1.bf16.msra.mxu0 %v11744_v16 }
 0x9d3   :  { %7954 = vmatprep.subr.bf16.mxu0 %v18393_v54  ;;  %v16989_v16 = vpop.f32.mrb[240].mxu1 }
 0x9d4   :  { %18831 = vst [vmem:[#allocation37_spill] sm:$0xff] %v16989_v16  ;;  %v16992_v28 = vpop.f32.mrb[241].mxu1 }
 0x9d5   :  { %7702 = vmatmul.mubr.bf16.gmra.mrb[156].mxu0 %v16972_v34  ;;  %18833 = vst [vmem:[#allocation19_spill] sm:$0xff] %v16992_v28  ;;  %v16997_v45 = vpop.f32.mrb[242].mxu1 }
 0x9d6   :  { %9861 = vmatprep.mubr.msk.bf16.mxu0 %vm12853_vm7, %v18828_v57  ;;  %7955 = vmatpush1.bf16.msra.mxu0 %v11745_v49  ;;  %v11748_v49 = vld [vmem:[#allocation9 + $0x128] sm:$0xff]   ;;  %18835 = vst [vmem:[#allocation18_spill] sm:$0xff] %v16997_v45 }
 0x9d7   :  { %7956 = vmatprep.subr.bf16.mxu0 %v18393_v54 }
 0x9da   :  { %7957 = vmatpush1.bf16.msra.mxu0 %v11746_v1  ;;  %v17000_v1 = vpop.f32.mrb[243].mxu1 }
 0x9db   :  { %7958 = vmatprep.subr.bf16.mxu0 %v18393_v54  ;;  %18836 = vst [vmem:[#allocation17_spill] sm:$0xff] %v17000_v1  ;;  %v11751_v1 = vld [vmem:[#allocation9 + $0x140] sm:$0xff]  }
 0x9dc   :  { %v17003_v16 = vpop.f32.mrb[244].mxu1 }
 0x9dd   :  { %7710 = vmatmul.mubr.bf16.gmra.mrb[160].mxu0 %v18832_v44  ;;  %18837 = vst [vmem:[#allocation99_spill] sm:$0xff] %v17003_v16  ;;  %v17006_v28 = vpop.f32.mrb[245].mxu1 }
 0x9de   :  { %9865 = vmatprep.mubr.msk.bf16.mxu0 %vm12853_vm7, %v18834_v53  ;;  %7959 = vmatpush1.bf16.msra.mxu0 %v11747_v20  ;;  %18839 = vst [vmem:[#allocation97_spill] sm:$0xff] %v17006_v28  ;;  %v11750_v20 = vld [vmem:[#allocation9 + $0x138] sm:$0xff]   ;;  %v17011_v45 = vpop.f32.mrb[246].mxu1 }
 0x9df   :  { %7960 = vmatprep.subr.bf16.mxu0 %v18393_v54  ;;  %18841 = vst [vmem:[#allocation26_spill] sm:$0xff] %v17011_v45 }
 0x9e2   :  { %7961 = vmatpush1.bf16.msra.mxu0 %v11748_v49  ;;  %v17014_v49 = vpop.f32.mrb[247].mxu1 }
 0x9e3   :  { %7962 = vmatprep.subr.bf16.mxu0 %v18393_v54  ;;  %18842 = vst [vmem:[#allocation22_spill] sm:$0xff] %v17014_v49  ;;  %v11753_v49 = vld [vmem:[#allocation9 + $0x150] sm:$0xff]  }
 0x9e5   :  { %7718 = vmatmul.mubr.bf16.gmra.mrb[164].mxu0 %v18838_v59 }
 0x9e6   :  { %9869 = vmatprep.mubr.msk.bf16.mxu0 %vm12853_vm7, %v18840_v9  ;;  %7963 = vmatpush1.bf16.msra.mxu0 %v11749_v13  ;;  %v17017_v16 = vpop.f32.mrb[248].mxu1  ;;  %v11752_v13 = vld [vmem:[#allocation9 + $0x148] sm:$0xff]  }
 0x9e7   :  { %7964 = vmatprep.subr.bf16.mxu0 %v18393_v54  ;;  %18843 = vst [vmem:[#allocation101_spill] sm:$0xff] %v17017_v16  ;;  %v17020_v28 = vpop.f32.mrb[249].mxu1 }
 0x9e8   :  { %18845 = vst [vmem:[#allocation38_spill] sm:$0xff] %v17020_v28  ;;  %v17025_v45 = vpop.f32.mrb[250].mxu1 }
 0x9e9   :  { %18847 = vst [vmem:[#allocation115_spill] sm:$0xff] %v17025_v45 }
 0x9ea   :  { %7965 = vmatpush1.bf16.msra.mxu0 %v11750_v20  ;;  %v17028_v20 = vpop.f32.mrb[251].mxu1 }
 0x9eb   :  { %7966 = vmatprep.subr.bf16.mxu0 %v18393_v54  ;;  %18848 = vst [vmem:[#allocation116_spill] sm:$0xff] %v17028_v20  ;;  %v18856_v20 = vld [vmem:[#allocation40_spill] sm:$0xff] }
 0x9ed   :  { %7726 = vmatmul.mubr.bf16.gmra.mrb[168].mxu0 %v18844_v51 }
 0x9ee   :  { %9873 = vmatprep.mubr.msk.bf16.mxu0 %vm12853_vm7, %v18846_v11  ;;  %7967 = vmatpush1.bf16.msra.mxu0 %v11751_v1 }
 0x9ef   :  { %7968 = vmatprep.subr.bf16.mxu0 %v18393_v54 }
 0x9f0   :  { %v17031_v16 = vpop.f32.mrb[252].mxu1 }
 0x9f1   :  { %18849 = vst [vmem:[#allocation117_spill] sm:$0xff] %v17031_v16  ;;  %v17034_v28 = vpop.f32.mrb[253].mxu1 }
 0x9f2   :  { %7969 = vmatpush1.bf16.msra.mxu0 %v11752_v13  ;;  %18851 = vst [vmem:[#allocation15_spill] sm:$0xff] %v17034_v28  ;;  %v17039_v1 = vpop.f32.mrb[254].mxu1  ;;  %v11754_v28 = vld [vmem:[#allocation9 + $0x158] sm:$0xff]  }
 0x9f3   :  { %7970 = vmatprep.subr.bf16.mxu0 %v18393_v54  ;;  %18853 = vst [vmem:[#allocation118_spill] sm:$0xff] %v17039_v1  ;;  %v17042_v45 = vpop.f32.mrb[255].mxu1 }
 0x9f4   :  { %18854 = vst [vmem:[#allocation119_spill] sm:$0xff] %v17042_v45  ;;  %v18862_v45 = vld [vmem:[#allocation100_spill] sm:$0xff] }
 0x9f5   :  { %7734 = vmatmul.mubr.bf16.gmra.mrb[172].mxu0 %v18850_v37 }
 0x9f6   :  { %9877 = vmatprep.mubr.msk.bf16.mxu0 %vm12853_vm7, %v18852_v19  ;;  %7971 = vmatpush1.bf16.msra.mxu0 %v11753_v49  ;;  %v18882_v19 = vld [vmem:[#allocation49_spill] sm:$0xff] }
 0x9f7   :  { %7972 = vmatprep.subr.bf16.mxu0 %v18393_v54 }
 0x9f8   :  { %v17044_v13 = vpop.f32.mrb[0].mxu1 }
 0x9f9   :  { %18855 = vst [vmem:[#allocation120_spill] sm:$0xff] %v17044_v13  ;;  %v17047_v16 = vpop.f32.mrb[1].mxu1 }
 0x9fa   :  { %18857 = vst [vmem:[#allocation40_spill] sm:$0xff] %v17047_v16  ;;  %v17052_v29 = vpop.f32.mrb[2].mxu1  ;;  %7973 = vmatpush1.bf16.msra.mxu0 %v11754_v28 }
 0x9fb   :  { %18859 = vst [vmem:[#allocation121_spill] sm:$0xff] %v17052_v29  ;;  %v17054_v49 = vpop.f32.mrb[3].mxu1  ;;  %7974 = vmatprep.subr.bf16.mxu0 %v18393_v54 }
 0x9fc   :  { %18860 = vst [vmem:[#allocation122_spill] sm:$0xff] %v17054_v49  ;;  %v18868_v49 = vld [vmem:[#allocation39_spill] sm:$0xff] }
 0x9fd   :  { %7742 = vmatmul.mubr.bf16.gmra.mrb[176].mxu0 %v18856_v20 }
 0x9fe   :  { %9881 = vmatprep.mubr.msk.bf16.mxu0 %vm12853_vm7, %v18858_v50 }
 0xa00   :  { %v17057_v1 = vpop.f32.mrb[4].mxu1 }
 0xa01   :  { %18861 = vst [vmem:[#allocation123_spill] sm:$0xff] %v17057_v1  ;;  %v17060_v13 = vpop.f32.mrb[5].mxu1  ;;  %v11755_v1 = vld [vmem:[#allocation9 + $0x160] sm:$0xff]  }
 0xa02   :  { %18863 = vst [vmem:[#allocation100_spill] sm:$0xff] %v17060_v13  ;;  %v17065_v16 = vpop.f32.mrb[6].mxu1  ;;  %7975 = vmatpush1.bf16.msra.mxu0 %v11755_v1 }
 0xa03   :  { %18865 = vst [vmem:[#allocation124_spill] sm:$0xff] %v17065_v16  ;;  %v17067_v36 = vpop.f32.mrb[7].mxu1  ;;  %7976 = vmatprep.subr.bf16.mxu0 %v18393_v54 }
 0xa04   :  { %18866 = vst [vmem:[#allocation125_spill] sm:$0xff] %v17067_v36  ;;  %v18874_v36 = vld [vmem:[#allocation41_spill] sm:$0xff] }
 0xa05   :  { %7750 = vmatmul.mubr.bf16.gmra.mrb[180].mxu0 %v18862_v45 }
 0xa06   :  { %9885 = vmatprep.mubr.msk.bf16.mxu0 %vm12853_vm7, %v18864_v22  ;;  %v18876_v22 = vld [vmem:[#allocation67_spill] sm:$0xff] }
 0xa08   :  { %v17069_v29 = vpop.f32.mrb[8].mxu1 }
 0xa09   :  { %18867 = vst [vmem:[#allocation126_spill] sm:$0xff] %v17069_v29  ;;  %v17072_v28 = vpop.f32.mrb[9].mxu1 }
 0xa0a   :  { %18869 = vst [vmem:[#allocation39_spill] sm:$0xff] %v17072_v28  ;;  %v17077_v13 = vpop.f32.mrb[10].mxu1 }
 0xa0b   :  { %18871 = vst [vmem:[#allocation127_spill] sm:$0xff] %v17077_v13  ;;  %v17079_v50 = vpop.f32.mrb[11].mxu1 }
 0xa0c   :  { %18872 = vst [vmem:[#allocation128_spill] sm:$0xff] %v17079_v50  ;;  %v18880_v50 = vld [vmem:[#allocation44_spill] sm:$0xff] }
 0xa0d   :  { %7758 = vmatmul.mubr.bf16.gmra.mrb[184].mxu0 %v18868_v49 }
 0xa0e   :  { %9889 = vmatprep.mubr.msk.bf16.mxu0 %vm12853_vm7, %v18870_v62 }
 0xa10   :  { %v17082_v16 = vpop.f32.mrb[12].mxu1 }
 0xa11   :  { %18873 = vst [vmem:[#allocation129_spill] sm:$0xff] %v17082_v16  ;;  %v17085_v29 = vpop.f32.mrb[13].mxu1  ;;  %v11756_v16 = vld [vmem:[#allocation9 + $0x168] sm:$0xff]  }
 0xa12   :  { %18875 = vst [vmem:[#allocation41_spill] sm:$0xff] %v17085_v29  ;;  %v17090_v28 = vpop.f32.mrb[14].mxu1  ;;  %7977 = vmatpush1.bf16.msra.mxu0 %v11756_v16  ;;  %v18890_v16 = vld [vmem:[#allocation35_spill] sm:$0xff] }
 0xa13   :  { %18877 = vst [vmem:[#allocation130_spill] sm:$0xff] %v17090_v28  ;;  %v17092_v62 = vpop.f32.mrb[15].mxu1  ;;  %7978 = vmatprep.subr.bf16.mxu0 %v18393_v54  ;;  %v18885_v28 = vld [vmem:[#allocation24_spill] sm:$0xff] }
 0xa14   :  { %18878 = vst [vmem:[#allocation131_spill] sm:$0xff] %v17092_v62  ;;  %v18886_v62 = vld [vmem:[#allocation68_spill] sm:$0xff] }
 0xa15   :  { %7766 = vmatmul.mubr.bf16.gmra.mrb[188].mxu0 %v18874_v36 }
 0xa16   :  { %9893 = vmatprep.mubr.msk.bf16.mxu0 %vm12853_vm7, %v18876_v22 }
 0xa1d   :  { %7774 = vmatmul.mubr.bf16.gmra.mrb[192].mxu0 %v18880_v50 }
 0xa1e   :  { %v17094_v13 = vpop.f32.mrb[16].mxu1  ;;  %9897 = vmatprep.mubr.msk.bf16.mxu0 %vm12853_vm7, %v18882_v19  ;;  %v11757_v19 = vld [vmem:[#allocation9 + $0x170] sm:$0xff]  }
 0xa1f   :  { %18879 = vst [vmem:[#allocation132_spill] sm:$0xff] %v17094_v13  ;;  %v17097_v1 = vpop.f32.mrb[17].mxu1  ;;  %v18887_v13 = vld [vmem:[#allocation43_spill] sm:$0xff]  ;;  %7979 = vmatpush1.bf16.msra.mxu0 %v11757_v19 }
 0xa20   :  { %18881 = vst [vmem:[#allocation44_spill] sm:$0xff] %v17097_v1  ;;  %v17102_v29 = vpop.f32.mrb[18].mxu1  ;;  %v18888_v1 = vld [vmem:[#allocation56_spill] sm:$0xff]  ;;  %7980 = vmatprep.subr.bf16.mxu0 %v18393_v54  ;;  %v18894_v19 = vld [vmem:[#allocation107_spill] sm:$0xff] }
 0xa21   :  { %18883 = vst [vmem:[#allocation133_spill] sm:$0xff] %v17102_v29  ;;  %v17104_v11 = vpop.f32.mrb[19].mxu1  ;;  %v18889_v29 = vld [vmem:[#allocation106_spill] sm:$0xff] }
 0xa22   :  { %18884 = vst [vmem:[#allocation134_spill] sm:$0xff] %v17104_v11  ;;  %v18891_v11 = vld [vmem:[#allocation110_spill] sm:$0xff] }
 0xa23   :  { %v17122_v22 = vpack.c.bf16 %v18891_v11, %v18890_v16  ;;  %v18896_v16 = vld [vmem:[#allocation64_spill] sm:$0xff] }
 0xa25   :  { %7782 = vmatmul.mubr.bf16.gmra.mrb[196].mxu0 %v18885_v28  ;;  %18892 = vst [vmem:[#allocation24_spill] sm:$0xff] %v17122_v22 }
 0xa26   :  { %9901 = vmatprep.mubr.msk.bf16.mxu0 %vm12853_vm7, %v18886_v62  ;;  %v18893_v62 = vld [vmem:[#allocation31_spill] sm:$0xff] }
 0xa2d   :  { %7790 = vmatmul.mubr.bf16.gmra.mrb[200].mxu0 %v18887_v13 }
 0xa2e   :  { %9905 = vmatprep.mubr.msk.bf16.mxu0 %vm12853_vm7, %v18888_v1  ;;  %v11758_v1 = vld [vmem:[#allocation9 + $0x178] sm:$0xff]  }
 0xa2f   :  { %7981 = vmatpush1.bf16.msra.mxu0 %v11758_v1  ;;  %v18895_v1 = vld [vmem:[#allocation45_spill] sm:$0xff] }
 0xa30   :  { %8239 = vmatprep.subr.bf16.mxu0 %v18393_v54 }
 0xa35   :  { %7798 = vmatmul.mubr.bf16.gmra.mrb[204].mxu0 %v18889_v29 }
 0xa36   :  { %9909 = vmatprep.mubr.msk.bf16.mxu0 %vm12853_vm7, %v16614_v26 }
 0xa3d   :  { %7806 = vmatmul.mubr.bf16.gmra.mrb[208].mxu0 %v18893_v62 }
 0xa3e   :  { %9913 = vmatprep.mubr.msk.bf16.mxu0 %vm12853_vm7, %v17122_v22  ;;  %v11774_v22 = vld [vmem:[#allocation9 + $0x1f8] sm:$0xff]  }
 0xa45   :  { %7814 = vmatmul.mubr.bf16.gmra.mrb[212].mxu0 %v18894_v19 }
 0xa46   :  { %9917 = vmatprep.mubr.msk.bf16.mxu0 %vm12853_vm7, %v16688_v33  ;;  %v18898_v33 = vld [vmem:[#allocation50_spill] sm:$0xff] }
 0xa4d   :  { %7822 = vmatmul.mubr.bf16.gmra.mrb[216].mxu0 %v18598_v47  ;;  %v18897_v47 = vld [vmem:[#allocation14_spill] sm:$0xff] }
 0xa4e   :  { %9921 = vmatprep.mubr.msk.bf16.mxu0 %vm12853_vm7, %v16696_v43  ;;  %v18922_v43 = vld [vmem:[#allocation71_spill] sm:$0xff] }
 0xa55   :  { %7830 = vmatmul.mubr.bf16.gmra.mrb[220].mxu0 %v16811_v23 }
 0xa56   :  { %9925 = vmatprep.mubr.msk.bf16.mxu0 %vm12853_vm7, %v16710_v46  ;;  %v18899_v46 = vld [vmem:[#allocation29_spill] sm:$0xff] }
 0xa5d   :  { %7838 = vmatmul.mubr.bf16.gmra.mrb[224].mxu0 %v18895_v1 }
 0xa5e   :  { %9929 = vmatprep.mubr.msk.bf16.mxu0 %vm12853_vm7, %v16727_v25  ;;  %v18900_v25 = vld [vmem:[#allocation69_spill] sm:$0xff] }
 0xa65   :  { %7846 = vmatmul.mubr.bf16.gmra.mrb[228].mxu0 %v18896_v16 }
 0xa66   :  { %9933 = vmatprep.mubr.msk.bf16.mxu0 %vm12853_vm7, %v16735_v17  ;;  %v18901_v17 = vld [vmem:[#allocation51_spill] sm:$0xff] }
 0xa6d   :  { %7854 = vmatmul.mubr.bf16.gmra.mrb[232].mxu0 %v18897_v47 }
 0xa6e   :  { %9937 = vmatprep.mubr.msk.bf16.mxu0 %vm12853_vm7, %v16747_v27  ;;  %v18902_v27 = vld [vmem:[#allocation54_spill] sm:$0xff] }
 0xa75   :  { %7862 = vmatmul.mubr.bf16.gmra.mrb[236].mxu0 %v18898_v33 }
 0xa76   :  { %9941 = vmatprep.mubr.msk.bf16.mxu0 %vm12853_vm7, %v16838_v3  ;;  %v18903_v3 = vld [vmem:[#allocation92_spill] sm:$0xff] }
 0xa7d   :  { %7870 = vmatmul.mubr.bf16.gmra.mrb[240].mxu0 %v18899_v46 }
 0xa7e   :  { %9945 = vmatprep.mubr.msk.bf16.mxu0 %vm12853_vm7, %v16762_v40  ;;  %v18904_v40 = vld [vmem:[#allocation53_spill] sm:$0xff] }
 0xa85   :  { %7878 = vmatmul.mubr.bf16.gmra.mrb[244].mxu0 %v18900_v25 }
 0xa86   :  { %9949 = vmatprep.mubr.msk.bf16.mxu0 %vm12853_vm7, %v16857_v41  ;;  %v18905_v41 = vld [vmem:[#allocation55_spill] sm:$0xff] }
 0xa8d   :  { %7886 = vmatmul.mubr.bf16.gmra.mrb[248].mxu0 %v18901_v17 }
 0xa8e   :  { %9953 = vmatprep.mubr.msk.bf16.mxu0 %vm12853_vm7, %v18782_v14 }
 0xa95   :  { %7894 = vmatmul.mubr.bf16.gmra.mrb[252].mxu0 %v18902_v27 }
 0xa96   :  { %9957 = vmatprep.mubr.msk.bf16.mxu0 %vm12853_vm7, %v16876_v56  ;;  %v18907_v56 = vld [vmem:[#allocation36_spill] sm:$0xff] }
 0xa9d   :  { %7902 = vmatmul.mubr.bf16.gmra.mrb[0].mxu0 %v18903_v3 }
 0xa9e   :  { %9961 = vmatprep.mubr.msk.bf16.mxu0 %vm12853_vm7, %v18792_v61  ;;  %v18906_v61 = vld [vmem:[#allocation96_spill] sm:$0xff] }
 0xaa5   :  { %7910 = vmatmul.mubr.bf16.gmra.mrb[4].mxu0 %v18904_v40 }
 0xaa6   :  { %9965 = vmatprep.mubr.msk.bf16.mxu0 %vm12853_vm7, %v16903_v12  ;;  %v11759_v12 = vld [vmem:[#allocation9 + $0x180] sm:$0xff]  }
 0xaad   :  { %7918 = vmatmul.mubr.bf16.gmra.mrb[8].mxu0 %v18905_v41 }
 0xaae   :  { %9969 = vmatprep.mubr.msk.bf16.mxu0 %vm12853_vm7, %v18806_v4  ;;  %v11760_v4 = vld [vmem:[#allocation9 + $0x188] sm:$0xff]  }
 0xab5   :  { %7926 = vmatmul.mubr.bf16.gmra.mrb[12].mxu0 %v16584_v10 }
 0xab6   :  { %9973 = vmatprep.mubr.msk.bf16.mxu0 %vm12853_vm7, %v16938_v2  ;;  %v11761_v2 = vld [vmem:[#allocation9 + $0x190] sm:$0xff]  }
 0xabd   :  { %7934 = vmatmul.mubr.bf16.gmra.mrb[16].mxu0 %v16652_v55 }
 0xabe   :  { %9977 = vmatprep.mubr.msk.bf16.mxu0 %vm12853_vm7, %v16803_v39  ;;  %v11762_v39 = vld [vmem:[#allocation9 + $0x198] sm:$0xff]  }
 0xac5   :  { %7942 = vmatmul.mubr.bf16.gmra.mrb[20].mxu0 %v18750_v5 }
 0xac6   :  { %7982 = vmatprep.mubr.bf16.mxu0 %v16972_v34  ;;  %v11765_v34 = vld [vmem:[#allocation9 + $0x1b0] sm:$0xff]  }
 0xacd   :  { %7983 = vmatmul.mubr.bf16.vlgmr.msra.gmra.mrb[152].mxu0 %v18906_v61  ;;  %v11763_v61 = vld [vmem:[#allocation9 + $0x1a0] sm:$0xff]  }
 0xace   :  { %7990 = vmatprep.mubr.bf16.mxu0 %v18832_v44  ;;  %8240 = vmatpush1.bf16.msra.mxu0 %v11759_v12  ;;  %v18908_v12 = vld [vmem:[#allocation98_spill] sm:$0xff] }
 0xacf   :  { %8241 = vmatprep.subr.bf16.mxu0 %v18393_v54  ;;  %v11768_v44 = vld [vmem:[#allocation9 + $0x1c8] sm:$0xff]  }
 0xad2   :  { %8242 = vmatpush1.bf16.msra.mxu0 %v11760_v4  ;;  %v11764_v4 = vld [vmem:[#allocation9 + $0x1a8] sm:$0xff]  }
 0xad3   :  { %8243 = vmatprep.subr.bf16.mxu0 %v18393_v54 }
 0xad5   :  { %7991 = vmatmul.mubr.bf16.gmra.mrb[156].mxu0 %v18907_v56 }
 0xad6   :  { %7998 = vmatprep.mubr.bf16.mxu0 %v18838_v59  ;;  %8244 = vmatpush1.bf16.msra.mxu0 %v11761_v2  ;;  %v18909_v2 = vld [vmem:[#allocation42_spill] sm:$0xff]  ;;  %v11767_v59 = vld [vmem:[#allocation9 + $0x1c0] sm:$0xff]  }
 0xad7   :  { %8245 = vmatprep.subr.bf16.mxu0 %v18393_v54 }
 0xada   :  { %8246 = vmatpush1.bf16.msra.mxu0 %v11762_v39  ;;  %v11766_v39 = vld [vmem:[#allocation9 + $0x1b8] sm:$0xff]  }
 0xadb   :  { %8247 = vmatprep.subr.bf16.mxu0 %v18393_v54 }
 0xadd   :  { %7999 = vmatmul.mubr.bf16.gmra.mrb[160].mxu0 %v18908_v12 }
 0xade   :  { %8006 = vmatprep.mubr.bf16.mxu0 %v18844_v51  ;;  %8248 = vmatpush1.bf16.msra.mxu0 %v11763_v61  ;;  %v18910_v51 = vld [vmem:[#allocation102_spill] sm:$0xff]  ;;  %v11769_v61 = vld [vmem:[#allocation9 + $0x1d0] sm:$0xff]  }
 0xadf   :  { %8249 = vmatprep.subr.bf16.mxu0 %v18393_v54 }
 0xae2   :  { %8250 = vmatpush1.bf16.msra.mxu0 %v11764_v4  ;;  %v18912_v4 = vld [vmem:[#allocation105_spill] sm:$0xff] }
 0xae3   :  { %8251 = vmatprep.subr.bf16.mxu0 %v18393_v54 }
 0xae5   :  { %8007 = vmatmul.mubr.bf16.gmra.mrb[164].mxu0 %v18909_v2 }
 0xae6   :  { %8014 = vmatprep.mubr.bf16.mxu0 %v18850_v37  ;;  %8252 = vmatpush1.bf16.msra.mxu0 %v11765_v34  ;;  %v18911_v37 = vld [vmem:[#allocation103_spill] sm:$0xff] }
 0xae7   :  { %8253 = vmatprep.subr.bf16.mxu0 %v18393_v54  ;;  %v18913_v34 = vld [vmem:[#allocation27_spill] sm:$0xff] }
 0xaea   :  { %8254 = vmatpush1.bf16.msra.mxu0 %v11766_v39  ;;  %v18914_v39 = vld [vmem:[#allocation112_spill] sm:$0xff] }
 0xaeb   :  { %8255 = vmatprep.subr.bf16.mxu0 %v18393_v54 }
 0xaed   :  { %8015 = vmatmul.mubr.bf16.gmra.mrb[168].mxu0 %v18910_v51 }
 0xaee   :  { %8022 = vmatprep.mubr.bf16.mxu0 %v18856_v20  ;;  %8256 = vmatpush1.bf16.msra.mxu0 %v11767_v59  ;;  %v11770_v20 = vld [vmem:[#allocation9 + $0x1d8] sm:$0xff]   ;;  %v18915_v59 = vld [vmem:[#allocation47_spill] sm:$0xff] }
 0xaef   :  { %8257 = vmatprep.subr.bf16.mxu0 %v18393_v54 }
 0xaf2   :  { %8258 = vmatpush1.bf16.msra.mxu0 %v11768_v44  ;;  %v11772_v44 = vld [vmem:[#allocation9 + $0x1e8] sm:$0xff]  }
 0xaf3   :  { %8259 = vmatprep.subr.bf16.mxu0 %v18393_v54 }
 0xaf5   :  { %8023 = vmatmul.mubr.bf16.gmra.mrb[172].mxu0 %v18911_v37 }
 0xaf6   :  { %8030 = vmatprep.mubr.bf16.mxu0 %v18862_v45  ;;  %8260 = vmatpush1.bf16.msra.mxu0 %v11769_v61  ;;  %v11771_v45 = vld [vmem:[#allocation9 + $0x1e0] sm:$0xff]   ;;  %v11773_v61 = vld [vmem:[#allocation9 + $0x1f0] sm:$0xff]  }
 0xaf7   :  { %8261 = vmatprep.subr.bf16.mxu0 %v18393_v54 }
 0xafa   :  { %8262 = vmatpush1.bf16.msra.mxu0 %v11770_v20 }
 0xafb   :  { %8263 = vmatprep.subr.bf16.mxu0 %v18393_v54 }
 0xafd   :  { %8031 = vmatmul.mubr.bf16.gmra.mrb[176].mxu0 %v18912_v4 }
 0xafe   :  { %8038 = vmatprep.mubr.bf16.mxu0 %v18868_v49  ;;  %8264 = vmatpush1.bf16.msra.mxu0 %v11771_v45  ;;  %v18916_v49 = vld [vmem:[#allocation21_spill] sm:$0xff]  ;;  %v6811_v45 = vrot.slane %v18891_v11, 1 }
 0xaff   :  { %8265 = vmatprep.subr.bf16.mxu0 %v18393_v54 }
 0xb02   :  { %8266 = vmatpush1.bf16.msra.mxu0 %v11772_v44  ;;  %v18921_v44 = vld [vmem:[#allocation111_spill] sm:$0xff] }
 0xb03   :  { %8267 = vmatprep.subr.bf16.mxu0 %v18393_v54  ;;  %v6813_v14 = vrot.slane %v18921_v44, 1 }
 0xb05   :  { %8039 = vmatmul.mubr.bf16.gmra.mrb[180].mxu0 %v18913_v34 }
 0xb06   :  { %8046 = vmatprep.mubr.bf16.mxu0 %v18874_v36  ;;  %v18917_v36 = vld [vmem:[#allocation66_spill] sm:$0xff]  ;;  %8268 = vmatpush1.bf16.msra.mxu0 %v11773_v61  ;;  %v6814_v61 = vsel %vm18925_vm1, %v6811_v45, %v6813_v14  ;;  %v18941_v14 = vld [vmem:[#allocation23_spill] sm:$0xff] }
 0xb07   :  { %8269 = vmatprep.subr.bf16.mxu0 %v18393_v54 }
 0xb0a   :  { %8270 = vmatpush1.bf16.msra.mxu0 %v11774_v22 }
 0xb0d   :  { %8047 = vmatmul.mubr.bf16.gmra.mrb[184].mxu0 %v18914_v39 }
 0xb0e   :  { %8054 = vmatprep.mubr.bf16.mxu0 %v18880_v50  ;;  %v18918_v50 = vld [vmem:[#allocation70_spill] sm:$0xff] }
 0xb15   :  { %8055 = vmatmul.mubr.bf16.gmra.mrb[188].mxu0 %v18915_v59 }
 0xb16   :  { %8062 = vmatprep.mubr.bf16.mxu0 %v18885_v28  ;;  %v18919_v28 = vld [vmem:[#allocation28_spill] sm:$0xff] }
 0xb1d   :  { %8063 = vmatmul.mubr.bf16.gmra.mrb[192].mxu0 %v18916_v49 }
 0xb1e   :  { %8070 = vmatprep.mubr.bf16.mxu0 %v18887_v13  ;;  %v18920_v13 = vld [vmem:[#allocation109_spill] sm:$0xff] }
 0xb1f   :  { %v6810_v20 = vrot.slane %v18920_v13, 1 }
 0xb25   :  { %8071 = vmatmul.mubr.bf16.gmra.mrb[196].mxu0 %v18917_v36 }
 0xb26   :  { %8078 = vmatprep.mubr.bf16.mxu0 %v18889_v29  ;;  %v18923_v29 = vld [vmem:[#allocation114_spill] sm:$0xff] }
 0xb2d   :  { %8079 = vmatmul.mubr.bf16.gmra.mrb[200].mxu0 %v18918_v50 }
 0xb2e   :  { %8086 = vmatprep.mubr.bf16.mxu0 %v18893_v62  ;;  %v6812_v62 = vsel %vm18924_vm13, %v6810_v20, %v6811_v45  ;;  %v18956_v45 = vld [vmem:[#allocation79_spill] sm:$0xff] }
 0xb2f   :  { %v6884_v54 = vpack.c.bf16 %v6814_v61, %v6812_v62 }
 0xb35   :  { %8087 = vmatmul.mubr.bf16.gmra.mrb[204].mxu0 %v18919_v28 }
 0xb36   :  { %8094 = vmatprep.mubr.bf16.mxu0 %v18894_v19  ;;  %v18951_v19 = vld [vmem:[#allocation46_spill] sm:$0xff] }
 0xb3d   :  { %8095 = vmatmul.mubr.bf16.gmra.mrb[208].mxu0 %v18922_v43 }
 0xb3e   :  { %8102 = vmatprep.mubr.bf16.mxu0 %v18923_v29  ;;  %v18957_v29 = vld [vmem:[#allocation88_spill] sm:$0xff] }
 0xb45   :  { %8103 = vmatmul.mubr.bf16.gmra.mrb[212].mxu0 %v6884_v54 }
 0xb46   :  { %8110 = vmatprep.mubr.bf16.mxu0 %v16811_v23  ;;  %v18936_v23 = vld [vmem:[#allocation13_spill] sm:$0xff] }
 0xb4d   :  { %8111 = vmatmul.mubr.bf16.gmra.mrb[216].mxu0 %v16705_v30  ;;  %v18929_v30 = vld [vmem:[#allocation113_spill] sm:$0xff] }
 0xb4e   :  { %8118 = vmatprep.mubr.bf16.mxu0 %v18895_v1 }
 0xb55   :  { %8119 = vmatmul.mubr.bf16.gmra.mrb[220].mxu0 %v16716_v0 }
 0xb56   :  { %8126 = vmatprep.mubr.bf16.mxu0 %v18896_v16 }
 0xb5d   :  { %8127 = vmatmul.mubr.bf16.gmra.mrb[224].mxu0 %v16722_v8 }
 0xb5e   :  { %8134 = vmatprep.mubr.bf16.mxu0 %v18897_v47 }
 0xb65   :  { %8135 = vmatmul.mubr.bf16.gmra.mrb[228].mxu0 %v16741_v31 }
 0xb66   :  { %8142 = vmatprep.mubr.bf16.mxu0 %v18898_v33  ;;  %v18952_v33 = vld [vmem:[#allocation57_spill] sm:$0xff] }
 0xb6d   :  { %8143 = vmatmul.mubr.bf16.gmra.mrb[232].mxu0 %v16750_v7 }
 0xb6e   :  { %8150 = vmatprep.mubr.bf16.mxu0 %v18899_v46  ;;  %v18930_v46 = vld [vmem:[#allocation65_spill] sm:$0xff] }
 0xb75   :  { %8151 = vmatmul.mubr.bf16.gmra.mrb[236].mxu0 %v16755_v21 }
 0xb76   :  { %8158 = vmatprep.mubr.bf16.mxu0 %v18900_v25  ;;  %v18931_v25 = vld [vmem:[#allocation67_spill] sm:$0xff] }
 0xb7d   :  { %8159 = vmatmul.mubr.bf16.gmra.mrb[240].mxu0 %v16830_v60 }
 0xb7e   :  { %8166 = vmatprep.mubr.bf16.mxu0 %v18901_v17  ;;  %v18932_v17 = vld [vmem:[#allocation49_spill] sm:$0xff] }
 0xb85   :  { %8167 = vmatmul.mubr.bf16.gmra.mrb[244].mxu0 %v16770_v6 }
 0xb86   :  { %8174 = vmatprep.mubr.bf16.mxu0 %v18902_v27  ;;  %v18933_v27 = vld [vmem:[#allocation68_spill] sm:$0xff] }
 0xb8d   :  { %8175 = vmatmul.mubr.bf16.gmra.mrb[248].mxu0 %v16849_v63 }
 0xb8e   :  { %8182 = vmatprep.mubr.bf16.mxu0 %v18903_v3  ;;  %v18937_v3 = vld [vmem:[#allocation16_spill] sm:$0xff] }
 0xb95   :  { %8183 = vmatmul.mubr.bf16.gmra.mrb[252].mxu0 %v16781_v15 }
 0xb96   :  { %8190 = vmatprep.mubr.bf16.mxu0 %v18904_v40  ;;  %v18935_v40 = vld [vmem:[#allocation24_spill] sm:$0xff] }
 0xb9d   :  { %8191 = vmatmul.mubr.bf16.gmra.mrb[0].mxu0 %v16868_v58 }
 0xb9e   :  { %8198 = vmatprep.mubr.bf16.mxu0 %v18905_v41  ;;  %v18938_v41 = vld [vmem:[#allocation61_spill] sm:$0xff] }
 0xba5   :  { %8199 = vmatmul.mubr.bf16.gmra.mrb[4].mxu0 %v16788_v18 }
 0xba6   :  { %8206 = vmatprep.mubr.bf16.mxu0 %v16584_v10  ;;  %v18926_v10 = vld [vmem:[#allocation104_spill] sm:$0xff] }
 0xbad   :  { %8207 = vmatmul.mubr.bf16.gmra.mrb[8].mxu0 %v16893_v48 }
 0xbae   :  { %8214 = vmatprep.mubr.bf16.mxu0 %v16652_v55  ;;  %v18928_v55 = vld [vmem:[#allocation108_spill] sm:$0xff] }
 0xbb5   :  { %8215 = vmatmul.mubr.bf16.gmra.mrb[12].mxu0 %v16796_v42 }
 0xbb6   :  { %8222 = vmatprep.mubr.bf16.mxu0 %v18750_v5  ;;  %v18934_v5 = vld [vmem:[#allocation56_spill] sm:$0xff] }
 0xbbd   :  { %8223 = vmatmul.mubr.bf16.gmra.mrb[16].mxu0 %v16924_v32 }
 0xbbe   :  { %8230 = vmatprep.mubr.bf16.mxu0 %v16684_v52  ;;  %v18927_v52 = vld [vmem:[#allocation20_spill] sm:$0xff] }
 0xbc5   :  { %8231 = vmatmul.mubr.bf16.gmra.mrb[20].mxu0 %v16681_v35 }
 0xbc6   :  { %8271 = vmatprep.mubr.bf16.mxu0 %v18907_v56 }
 0xbcd   :  { %9981 = vmatmul.mubr.msk.bf16.vlgmr.msra.gmra.mrb[152].mxu0 %vm12853_vm7, %v18822_v24 }
 0xbce   :  { %8279 = vmatprep.mubr.bf16.mxu0 %v18908_v12 }
 0xbd5   :  { %9985 = vmatmul.mubr.msk.bf16.gmra.mrb[156].mxu0 %vm12853_vm7, %v18828_v57  ;;  %v18950_v57 = vld [vmem:[#allocation25_spill] sm:$0xff] }
 0xbd6   :  { %8287 = vmatprep.mubr.bf16.mxu0 %v18909_v2 }
 0xbdd   :  { %9989 = vmatmul.mubr.msk.bf16.gmra.mrb[160].mxu0 %vm12853_vm7, %v18834_v53 }
 0xbde   :  { %8295 = vmatprep.mubr.bf16.mxu0 %v18910_v51 }
 0xbe5   :  { %9993 = vmatmul.mubr.msk.bf16.gmra.mrb[164].mxu0 %vm12853_vm7, %v18840_v9  ;;  %v18949_v9 = vld [vmem:[#allocation52_spill] sm:$0xff] }
 0xbe6   :  { %8303 = vmatprep.mubr.bf16.mxu0 %v18911_v37  ;;  %v18953_v37 = vld [vmem:[#allocation75_spill] sm:$0xff] }
 0xbed   :  { %9997 = vmatmul.mubr.msk.bf16.gmra.mrb[168].mxu0 %vm12853_vm7, %v18926_v10 }
 0xbee   :  { %8311 = vmatprep.mubr.bf16.mxu0 %v18912_v4 }
 0xbf5   :  { %10001 = vmatmul.mubr.msk.bf16.gmra.mrb[172].mxu0 %vm12853_vm7, %v18927_v52 }
 0xbf6   :  { %8319 = vmatprep.mubr.bf16.mxu0 %v18913_v34  ;;  %v18954_v34 = vld [vmem:[#allocation93_spill] sm:$0xff] }
 0xbfd   :  { %10005 = vmatmul.mubr.msk.bf16.gmra.mrb[176].mxu0 %vm12853_vm7, %v18928_v55 }
 0xbfe   :  { %8327 = vmatprep.mubr.bf16.mxu0 %v18914_v39 }
 0xc05   :  { %10009 = vmatmul.mubr.msk.bf16.gmra.mrb[180].mxu0 %vm12853_vm7, %v18929_v30  ;;  %v18958_v30 = vld [vmem:[#allocation30_spill] sm:$0xff] }
 0xc06   :  { %8335 = vmatprep.mubr.bf16.mxu0 %v18915_v59 }
 0xc0d   :  { %10013 = vmatmul.mubr.msk.bf16.gmra.mrb[184].mxu0 %vm12853_vm7, %v18930_v46 }
 0xc0e   :  { %8343 = vmatprep.mubr.bf16.mxu0 %v18916_v49 }
 0xc15   :  { %10017 = vmatmul.mubr.msk.bf16.gmra.mrb[188].mxu0 %vm12853_vm7, %v18931_v25 }
 0xc16   :  { %8351 = vmatprep.mubr.bf16.mxu0 %v18917_v36 }
 0xc1d   :  { %10021 = vmatmul.mubr.msk.bf16.gmra.mrb[192].mxu0 %vm12853_vm7, %v18932_v17  ;;  %v18959_v17 = vld [vmem:[#allocation32_spill] sm:$0xff] }
 0xc1e   :  { %8359 = vmatprep.mubr.bf16.mxu0 %v18918_v50 }
 0xc25   :  { %10025 = vmatmul.mubr.msk.bf16.gmra.mrb[196].mxu0 %vm12853_vm7, %v18933_v27 }
 0xc26   :  { %8367 = vmatprep.mubr.bf16.mxu0 %v18919_v28  ;;  %v18955_v28 = vld [vmem:[#allocation48_spill] sm:$0xff] }
 0xc2d   :  { %10029 = vmatmul.mubr.msk.bf16.gmra.mrb[200].mxu0 %vm12853_vm7, %v18934_v5  ;;  %v18960_v5 = vld [vmem:[#allocation86_spill] sm:$0xff] }
 0xc2e   :  { %8375 = vmatprep.mubr.bf16.mxu0 %v18922_v43  ;;  %v18940_v43 = vld [vmem:[#allocation74_spill] sm:$0xff] }
 0xc35   :  { %10033 = vmatmul.mubr.msk.bf16.gmra.mrb[204].mxu0 %vm12853_vm7, %v16614_v26  ;;  %v18939_v26 = vld [vmem:[#allocation34_spill] sm:$0xff] }
 0xc36   :  { %8383 = vmatprep.mubr.bf16.mxu0 %v6884_v54 }
 0xc3d   :  { %10037 = vmatmul.mubr.msk.bf16.gmra.mrb[208].mxu0 %vm12853_vm7, %v18935_v40 }
 0xc3e   :  { %8391 = vmatprep.mubr.bf16.mxu0 %v18936_v23 }
 0xc45   :  { %10041 = vmatmul.mubr.msk.bf16.gmra.mrb[212].mxu0 %vm12853_vm7, %v18937_v3 }
 0xc46   :  { %8399 = vmatprep.mubr.bf16.mxu0 %v16716_v0  ;;  %v18942_v0 = vld [vmem:[#allocation58_spill] sm:$0xff] }
 0xc4d   :  { %10045 = vmatmul.mubr.msk.bf16.gmra.mrb[216].mxu0 %vm12853_vm7, %v18938_v41 }
 0xc4e   :  { %8407 = vmatprep.mubr.bf16.mxu0 %v16722_v8  ;;  %v18943_v8 = vld [vmem:[#allocation94_spill] sm:$0xff] }
 0xc55   :  { %10049 = vmatmul.mubr.msk.bf16.gmra.mrb[220].mxu0 %vm12853_vm7, %v18939_v26 }
 0xc56   :  { %8415 = vmatprep.mubr.bf16.mxu0 %v16741_v31  ;;  %v18944_v31 = vld [vmem:[#allocation81_spill] sm:$0xff] }
 0xc5d   :  { %10053 = vmatmul.mubr.msk.bf16.gmra.mrb[224].mxu0 %vm12853_vm7, %v18940_v43 }
 0xc5e   :  { %8423 = vmatprep.mubr.bf16.mxu0 %v16750_v7  ;;  %v18945_v7 = vld [vmem:[#allocation73_spill] sm:$0xff] }
 0xc65   :  { %10057 = vmatmul.mubr.msk.bf16.gmra.mrb[228].mxu0 %vm12853_vm7, %v18941_v14 }
 0xc66   :  { %8431 = vmatprep.mubr.bf16.mxu0 %v16755_v21  ;;  %v18946_v21 = vld [vmem:[#allocation72_spill] sm:$0xff] }
 0xc6d   :  { %10061 = vmatmul.mubr.msk.bf16.gmra.mrb[232].mxu0 %vm12853_vm7, %v18942_v0 }
 0xc6e   :  { %8439 = vmatprep.mubr.bf16.mxu0 %v16830_v60  ;;  %v18947_v60 = vld [vmem:[#allocation60_spill] sm:$0xff] }
 0xc75   :  { %10065 = vmatmul.mubr.msk.bf16.gmra.mrb[236].mxu0 %vm12853_vm7, %v18943_v8  ;;  %v18961_v8 = vld [vmem:[#allocation59_spill] sm:$0xff] }
 0xc76   :  { %8447 = vmatprep.mubr.bf16.mxu0 %v16770_v6  ;;  %v18948_v6 = vld [vmem:[#allocation33_spill] sm:$0xff] }
 0xc7d   :  { %10069 = vmatmul.mubr.msk.bf16.gmra.mrb[240].mxu0 %vm12853_vm7, %v18944_v31 }
 0xc7e   :  { %8455 = vmatprep.mubr.bf16.mxu0 %v16849_v63 }
 0xc85   :  { %10073 = vmatmul.mubr.msk.bf16.gmra.mrb[244].mxu0 %vm12853_vm7, %v18945_v7 }
 0xc86   :  { %8463 = vmatprep.mubr.bf16.mxu0 %v16781_v15  ;;  %v17388_v15 = vld [vmem:[%s17751_s14] ss:$0 sm:$0xff] }
 0xc8d   :  { %10077 = vmatmul.mubr.msk.bf16.gmra.mrb[248].mxu0 %vm12853_vm7, %v18946_v21  ;;  %v18962_v21 = vld [vmem:[#allocation80_spill] sm:$0xff] }
 0xc8e   :  { %8471 = vmatprep.mubr.bf16.mxu0 %v16868_v58 }
 0xc95   :  { %10081 = vmatmul.mubr.msk.bf16.gmra.mrb[252].mxu0 %vm12853_vm7, %v18947_v60 }
 0xc96   :  { %8479 = vmatprep.mubr.bf16.mxu0 %v16788_v18 }
 0xc9d   :  { %10085 = vmatmul.mubr.msk.bf16.gmra.mrb[0].mxu0 %vm12853_vm7, %v18948_v6 }
 0xc9e   :  { %8487 = vmatprep.mubr.bf16.mxu0 %v16893_v48 }
 0xca0   :  { %v8273_v63 = vpop.f32.mrb[152].mxu0 }
 0xca1   :  { %v10714_v58 = vadd.f32 %v17388_v15, %v8273_v63  ;;  %v8275_v56 = vpop.f32.mrb[153].mxu0 }
 0xca2   :  { %v8276_v22 = vpop.f32.mrb[154].mxu0 }
 0xca3   :  { %v8563_v11 = vadd.f32 %v10714_v58, %v18949_v9  ;;  %v10715_v18 = vadd.f32 %v17388_v15, %v8276_v22  ;;  %v8278_v24 = vpop.f32.mrb[155].mxu0 }
 0xca4   :  { %v18964_v24 = vld [vmem:[#allocation83_spill] sm:$0xff] }
 0xca5   :  { %11781 = vtanh.f32 %v8563_v11  ;;  %v8566_v53 = vadd.f32 %v10715_v18, %v18950_v57  ;;  %10089 = vmatmul.mubr.msk.bf16.gmra.mrb[4].mxu0 %vm12853_vm7, %v18951_v19  ;;  %v18963_v11 = vld [vmem:[#allocation85_spill] sm:$0xff] }
 0xca6   :  { %8495 = vmatprep.mubr.bf16.mxu0 %v16796_v42 }
 0xca7   :  { %11783 = vtanh.f32 %v8566_v53 }
 0xca8   :  { %v8281_v48 = vpop.f32.mrb[156].mxu0 }
 0xca9   :  { %v10716_v1 = vadd.f32 %v17388_v15, %v8281_v48  ;;  %v8283_v16 = vpop.f32.mrb[157].mxu0 }
 0xcaa   :  { %v8284_v47 = vpop.f32.mrb[158].mxu0 }
 0xcab   :  { %v8571_v12 = vadd.f32 %v10716_v1, %v18952_v33  ;;  %v10717_v2 = vadd.f32 %v17388_v15, %v8284_v47  ;;  %v8286_v51 = vpop.f32.mrb[159].mxu0  ;;  %v18965_v33 = vld [vmem:[#allocation84_spill] sm:$0xff] }
 0xcad   :  { %11785 = vtanh.f32 %v8571_v12  ;;  %v8574_v4 = vadd.f32 %v10717_v2, %v18953_v37  ;;  %10093 = vmatmul.mubr.msk.bf16.gmra.mrb[8].mxu0 %vm12853_vm7, %v18954_v34  ;;  %v18966_v37 = vld [vmem:[#allocation89_spill] sm:$0xff] }
 0xcae   :  { %8503 = vmatprep.mubr.bf16.mxu0 %v16924_v32 }
 0xcaf   :  { %v11782_v42 = vpop.eup %11781  ;;  %11787 = vtanh.f32 %v8574_v4 }
 0xcb0   :  { %8881 = vst [vmem:[%s17752_s15] sm:$0xff] %v11782_v42  ;;  %v8289_v39 = vpop.f32.mrb[160].mxu0 }
 0xcb1   :  { %v11784_v59 = vpop.eup %11783  ;;  %v10718_v49 = vadd.f32 %v17388_v15, %v8289_v39  ;;  %v8291_v36 = vpop.f32.mrb[161].mxu0 }
 0xcb2   :  { %8882 = vst [vmem:[%s17752_s15 + $0x8] sm:$0xff] %v11784_v59  ;;  %v8292_v50 = vpop.f32.mrb[162].mxu0 }
 0xcb3   :  { %v8579_v13 = vadd.f32 %v10718_v49, %v18955_v28  ;;  %v10719_v32 = vadd.f32 %v17388_v15, %v8292_v50  ;;  %v8294_v20 = vpop.f32.mrb[163].mxu0  ;;  %v18967_v50 = vld [vmem:[#allocation62_spill] sm:$0xff] }
 0xcb4   :  { %v18968_v20 = vld [vmem:[#allocation78_spill] sm:$0xff] }
 0xcb5   :  { %11789 = vtanh.f32 %v8579_v13  ;;  %v8582_v44 = vadd.f32 %v10719_v32, %v18956_v45  ;;  %10097 = vmatmul.mubr.msk.bf16.gmra.mrb[12].mxu0 %vm12853_vm7, %v18957_v29 }
 0xcb6   :  { %8511 = vmatprep.mubr.bf16.mxu0 %v16681_v35 }
 0xcb7   :  { %v11786_v62 = vpop.eup %11785  ;;  %11791 = vtanh.f32 %v8582_v44 }
 0xcb8   :  { %8883 = vst [vmem:[%s17752_s15 + $0x10] sm:$0xff] %v11786_v62  ;;  %v8297_v61 = vpop.f32.mrb[164].mxu0 }
 0xcb9   :  { %v11788_v54 = vpop.eup %11787  ;;  %v10720_v10 = vadd.f32 %v17388_v15, %v8297_v61  ;;  %v8299_v52 = vpop.f32.mrb[165].mxu0 }
 0xcba   :  { %8884 = vst [vmem:[%s17752_s15 + $0x18] sm:$0xff] %v11788_v54  ;;  %v8300_v55 = vpop.f32.mrb[166].mxu0  ;;  %v18969_v52 = vld [vmem:[#allocation90_spill] sm:$0xff] }
 0xcbb   :  { %v8587_v46 = vadd.f32 %v10720_v10, %v18958_v30  ;;  %v10721_v35 = vadd.f32 %v17388_v15, %v8300_v55  ;;  %v8302_v25 = vpop.f32.mrb[167].mxu0 }
 0xcbd   :  { %11793 = vtanh.f32 %v8587_v46  ;;  %v8590_v27 = vadd.f32 %v10721_v35, %v18959_v17  ;;  %10101 = vmatmul.mubr.msk.bf16.gmra.mrb[16].mxu0 %vm12853_vm7, %v18960_v5  ;;  %v18970_v35 = vld [vmem:[#allocation87_spill] sm:$0xff] }
 0xcbe   :  { %8519 = vmatprep.mubr.bf16.mxu0 %v18936_v23 }
 0xcbf   :  { %v11790_v40 = vpop.eup %11789  ;;  %11795 = vtanh.f32 %v8590_v27 }
 0xcc0   :  { %8885 = vst [vmem:[%s17752_s15 + $0x20] sm:$0xff] %v11790_v40  ;;  %v8305_v41 = vpop.f32.mrb[168].mxu0 }
 0xcc1   :  { %v11792_v26 = vpop.eup %11791  ;;  %v10722_v43 = vadd.f32 %v17388_v15, %v8305_v41  ;;  %v8307_v14 = vpop.f32.mrb[169].mxu0 }
 0xcc2   :  { %8886 = vst [vmem:[%s17752_s15 + $0x28] sm:$0xff] %v11792_v26  ;;  %v8308_v0 = vpop.f32.mrb[170].mxu0 }
 0xcc3   :  { %v8595_v31 = vadd.f32 %v10722_v43, %v18961_v8  ;;  %v10723_v23 = vadd.f32 %v17388_v15, %v8308_v0  ;;  %v8310_v7 = vpop.f32.mrb[171].mxu0  ;;  %v18971_v43 = vld [vmem:[#allocation63_spill] sm:$0xff] }
 0xcc5   :  { %11797 = vtanh.f32 %v8595_v31  ;;  %v8598_v60 = vadd.f32 %v10723_v23, %v18962_v21  ;;  %10105 = vmatmul.mubr.msk.bf16.gmra.mrb[20].mxu0 %vm12853_vm7, %v18937_v3  ;;  %v18972_v31 = vld [vmem:[#allocation76_spill] sm:$0xff] }
 0xcc7   :  { %v11794_v6 = vpop.eup %11793  ;;  %11799 = vtanh.f32 %v8598_v60 }
 0xcc8   :  { %8887 = vst [vmem:[%s17752_s15 + $0x30] sm:$0xff] %v11794_v6  ;;  %v8313_v63 = vpop.f32.mrb[172].mxu0 }
 0xcc9   :  { %v11796_v58 = vpop.eup %11795  ;;  %v10724_v56 = vadd.f32 %v17388_v15, %v8313_v63  ;;  %v8315_v22 = vpop.f32.mrb[173].mxu0 }
 0xcca   :  { %8888 = vst [vmem:[%s17752_s15 + $0x38] sm:$0xff] %v11796_v58  ;;  %v8316_v9 = vpop.f32.mrb[174].mxu0 }
 0xccb   :  { %v8603_v18 = vadd.f32 %v10724_v56, %v18963_v11  ;;  %v10725_v38 = vadd.f32 %v17388_v15, %v8316_v9  ;;  %v8318_v3 = vpop.f32.mrb[175].mxu0  ;;  %v18973_v56 = vld [vmem:[#allocation91_spill] sm:$0xff] }
 0xccd   :  { %11801 = vtanh.f32 %v8603_v18  ;;  %v8606_v57 = vadd.f32 %v10725_v38, %v18964_v24  ;;  %v18974_v18 = vld [vmem:[#allocation95_spill] sm:$0xff] }
 0xccf   :  { %v11798_v53 = vpop.eup %11797  ;;  %11803 = vtanh.f32 %v8606_v57 }
 0xcd0   :  { %8889 = vst [vmem:[%s17752_s15 + $0x40] sm:$0xff] %v11798_v53  ;;  %v8321_v19 = vpop.f32.mrb[176].mxu0 }
 0xcd1   :  { %v11800_v48 = vpop.eup %11799  ;;  %v10726_v1 = vadd.f32 %v17388_v15, %v8321_v19  ;;  %v8323_v16 = vpop.f32.mrb[177].mxu0 }
 0xcd2   :  { %8890 = vst [vmem:[%s17752_s15 + $0x48] sm:$0xff] %v11800_v48  ;;  %v8324_v47 = vpop.f32.mrb[178].mxu0 }
 0xcd3   :  { %v8611_v12 = vadd.f32 %v10726_v1, %v18965_v33  ;;  %v10727_v2 = vadd.f32 %v17388_v15, %v8324_v47  ;;  %v8326_v51 = vpop.f32.mrb[179].mxu0  ;;  %v18975_v1 = vld [vmem:[#allocation82_spill] sm:$0xff] }
 0xcd5   :  { %11805 = vtanh.f32 %v8611_v12  ;;  %v8614_v4 = vadd.f32 %v10727_v2, %v18966_v37  ;;  %v18976_v12 = vld [vmem:[#allocation77_spill] sm:$0xff] }
 0xcd7   :  { %v11802_v34 = vpop.eup %11801  ;;  %11807 = vtanh.f32 %v8614_v4 }
 0xcd8   :  { %8891 = vst [vmem:[%s17752_s15 + $0x50] sm:$0xff] %v11802_v34  ;;  %v8329_v42 = vpop.f32.mrb[180].mxu0 }
 0xcd9   :  { %v11804_v39 = vpop.eup %11803  ;;  %v10728_v59 = vadd.f32 %v17388_v15, %v8329_v42  ;;  %v8331_v49 = vpop.f32.mrb[181].mxu0 }
 0xcda   :  { %8892 = vst [vmem:[%s17752_s15 + $0x58] sm:$0xff] %v11804_v39  ;;  %v8332_v36 = vpop.f32.mrb[182].mxu0 }
 0xcdb   :  { %v8619_v28 = vadd.f32 %v10728_v59, %v18967_v50  ;;  %v10729_v13 = vadd.f32 %v17388_v15, %v8332_v36  ;;  %v8334_v32 = vpop.f32.mrb[183].mxu0  ;;  %v18977_v59 = vld [vmem:[#allocation19_spill] sm:$0xff] }
 0xcdd   :  { %11809 = vtanh.f32 %v8619_v28  ;;  %v8622_v45 = vadd.f32 %v10729_v13, %v18968_v20  ;;  %v18978_v28 = vld [vmem:[#allocation17_spill] sm:$0xff] }
 0xcdf   :  { %v11806_v44 = vpop.eup %11805  ;;  %11811 = vtanh.f32 %v8622_v45 }
 0xce0   :  { %8893 = vst [vmem:[%s17752_s15 + $0x60] sm:$0xff] %v11806_v44  ;;  %v8337_v29 = vpop.f32.mrb[184].mxu0 }
 0xce1   :  { %v11808_v62 = vpop.eup %11807  ;;  %v10730_v61 = vadd.f32 %v17388_v15, %v8337_v29  ;;  %v8339_v54 = vpop.f32.mrb[185].mxu0 }
 0xce2   :  { %8894 = vst [vmem:[%s17752_s15 + $0x68] sm:$0xff] %v11808_v62  ;;  %v8340_v10 = vpop.f32.mrb[186].mxu0 }
 0xce3   :  { %v8627_v55 = vadd.f32 %v10730_v61, %v18969_v52  ;;  %v10731_v30 = vadd.f32 %v17388_v15, %v8340_v10  ;;  %v8342_v46 = vpop.f32.mrb[187].mxu0  ;;  %v18979_v61 = vld [vmem:[#allocation37_spill] sm:$0xff] }
 0xce5   :  { %11813 = vtanh.f32 %v8627_v55  ;;  %v8630_v25 = vadd.f32 %v10731_v30, %v18970_v35  ;;  %v18980_v55 = vld [vmem:[#allocation18_spill] sm:$0xff] }
 0xce7   :  { %v11810_v17 = vpop.eup %11809  ;;  %11815 = vtanh.f32 %v8630_v25 }
 0xce8   :  { %8895 = vst [vmem:[%s17752_s15 + $0x70] sm:$0xff] %v11810_v17  ;;  %v8345_v27 = vpop.f32.mrb[188].mxu0 }
 0xce9   :  { %v11812_v5 = vpop.eup %11811  ;;  %v10732_v40 = vadd.f32 %v17388_v15, %v8345_v27  ;;  %v8347_v41 = vpop.f32.mrb[189].mxu0 }
 0xcea   :  { %8896 = vst [vmem:[%s17752_s15 + $0x78] sm:$0xff] %v11812_v5  ;;  %v8348_v26 = vpop.f32.mrb[190].mxu0 }
 0xceb   :  { %v8635_v14 = vadd.f32 %v10732_v40, %v18971_v43  ;;  %v10733_v0 = vadd.f32 %v17388_v15, %v8348_v26  ;;  %v8350_v8 = vpop.f32.mrb[191].mxu0  ;;  %v18981_v40 = vld [vmem:[#allocation97_spill] sm:$0xff] }
 0xced   :  { %11817 = vtanh.f32 %v8635_v14  ;;  %v8638_v23 = vadd.f32 %v10733_v0, %v18972_v31  ;;  %v18982_v14 = vld [vmem:[#allocation22_spill] sm:$0xff] }
 0xcef   :  { %v11814_v7 = vpop.eup %11813  ;;  %11819 = vtanh.f32 %v8638_v23 }
 0xcf0   :  { %8897 = vst [vmem:[%s17752_s15 + $0x80] sm:$0xff] %v11814_v7  ;;  %v8353_v21 = vpop.f32.mrb[192].mxu0 }
 0xcf1   :  { %v11816_v60 = vpop.eup %11815  ;;  %v10734_v6 = vadd.f32 %v17388_v15, %v8353_v21  ;;  %v8355_v63 = vpop.f32.mrb[193].mxu0 }
 0xcf2   :  { %8898 = vst [vmem:[%s17752_s15 + $0x88] sm:$0xff] %v11816_v60  ;;  %v8356_v58 = vpop.f32.mrb[194].mxu0  ;;  %v18983_v63 = vld [vmem:[#allocation99_spill] sm:$0xff] }
 0xcf3   :  { %v8643_v22 = vadd.f32 %v10734_v6, %v18973_v56  ;;  %v10735_v9 = vadd.f32 %v17388_v15, %v8356_v58  ;;  %v8358_v11 = vpop.f32.mrb[195].mxu0  ;;  %v17554_v6 = vpop.f32.mrb[20].mxu1 }
 0xcf4   :  { %v18984_v11 = vld [vmem:[#allocation26_spill] sm:$0xff] }
 0xcf5   :  { %11821 = vtanh.f32 %v8643_v22  ;;  %v8646_v38 = vadd.f32 %v10735_v9, %v18974_v18  ;;  %v17558_v9 = vpop.f32.mrb[21].mxu1 }
 0xcf7   :  { %v11818_v3 = vpop.eup %11817  ;;  %11823 = vtanh.f32 %v8646_v38 }
 0xcf8   :  { %8899 = vst [vmem:[%s17752_s15 + $0x90] sm:$0xff] %v11818_v3  ;;  %v8361_v24 = vpop.f32.mrb[196].mxu0 }
 0xcf9   :  { %v11820_v57 = vpop.eup %11819  ;;  %v10736_v53 = vadd.f32 %v17388_v15, %v8361_v24  ;;  %v8363_v19 = vpop.f32.mrb[197].mxu0 }
 0xcfa   :  { %8900 = vst [vmem:[%s17752_s15 + $0x98] sm:$0xff] %v11820_v57  ;;  %v8364_v48 = vpop.f32.mrb[198].mxu0  ;;  %v17564_v24 = vpop.f32.mrb[22].mxu1 }
 0xcfb   :  { %v8651_v16 = vadd.f32 %v10736_v53, %v18975_v1  ;;  %v10737_v47 = vadd.f32 %v17388_v15, %v8364_v48  ;;  %v8366_v33 = vpop.f32.mrb[199].mxu0  ;;  %v17567_v48 = vpop.f32.mrb[23].mxu1 }
 0xcfd   :  { %11825 = vtanh.f32 %v8651_v16  ;;  %v8654_v2 = vadd.f32 %v10737_v47, %v18976_v12  ;;  %v18985_v16 = vld [vmem:[#allocation38_spill] sm:$0xff] }
 0xcff   :  { %v11822_v51 = vpop.eup %11821  ;;  %11827 = vtanh.f32 %v8654_v2  ;;  %v18986_v2 = vld [vmem:[#allocation116_spill] sm:$0xff] }
 0xd00   :  { %8901 = vst [vmem:[%s17752_s15 + $0xa0] sm:$0xff] %v11822_v51  ;;  %v8369_v37 = vpop.f32.mrb[200].mxu0 }
 0xd01   :  { %v11824_v4 = vpop.eup %11823  ;;  %v10738_v34 = vadd.f32 %v17388_v15, %v8369_v37  ;;  %v8371_v42 = vpop.f32.mrb[201].mxu0 }
 0xd02   :  { %8902 = vst [vmem:[%s17752_s15 + $0xa8] sm:$0xff] %v11824_v4  ;;  %v8372_v39 = vpop.f32.mrb[202].mxu0 }
 0xd03   :  { %v8659_v49 = vadd.f32 %v10738_v34, %v18977_v59  ;;  %v10739_v36 = vadd.f32 %v17388_v15, %v8372_v39  ;;  %v8374_v50 = vpop.f32.mrb[203].mxu0 }
 0xd05   :  { %11829 = vtanh.f32 %v8659_v49  ;;  %v8662_v13 = vadd.f32 %v10739_v36, %v18978_v28  ;;  %v18987_v49 = vld [vmem:[#allocation101_spill] sm:$0xff] }
 0xd07   :  { %v11826_v32 = vpop.eup %11825  ;;  %11831 = vtanh.f32 %v8662_v13  ;;  %v18988_v13 = vld [vmem:[#allocation115_spill] sm:$0xff] }
 0xd08   :  { %8903 = vst [vmem:[%s17752_s15 + $0xb0] sm:$0xff] %v11826_v32  ;;  %v8377_v20 = vpop.f32.mrb[204].mxu0 }
 0xd09   :  { %v11828_v45 = vpop.eup %11827  ;;  %v10740_v44 = vadd.f32 %v17388_v15, %v8377_v20  ;;  %v8379_v29 = vpop.f32.mrb[205].mxu0 }
 0xd0a   :  { %8904 = vst [vmem:[%s17752_s15 + $0xb8] sm:$0xff] %v11828_v45  ;;  %v8380_v62 = vpop.f32.mrb[206].mxu0 }
 0xd0b   :  { %v8667_v54 = vadd.f32 %v10740_v44, %v18979_v61  ;;  %v10741_v10 = vadd.f32 %v17388_v15, %v8380_v62  ;;  %v8382_v52 = vpop.f32.mrb[207].mxu0 }
 0xd0d   :  { %11833 = vtanh.f32 %v8667_v54  ;;  %v8670_v30 = vadd.f32 %v10741_v10, %v18980_v55  ;;  %v18989_v54 = vld [vmem:[#allocation15_spill] sm:$0xff] }
 0xd0f   :  { %v11830_v46 = vpop.eup %11829  ;;  %11835 = vtanh.f32 %v8670_v30  ;;  %v18990_v30 = vld [vmem:[#allocation119_spill] sm:$0xff] }
 0xd10   :  { %8905 = vst [vmem:[%s17752_s15 + $0xc0] sm:$0xff] %v11830_v46  ;;  %v8385_v35 = vpop.f32.mrb[208].mxu0 }
 0xd11   :  { %v11832_v25 = vpop.eup %11831  ;;  %v10742_v17 = vadd.f32 %v17388_v15, %v8385_v35  ;;  %v8387_v27 = vpop.f32.mrb[209].mxu0 }
 0xd12   :  { %8906 = vst [vmem:[%s17752_s15 + $0xc8] sm:$0xff] %v11832_v25  ;;  %v8388_v5 = vpop.f32.mrb[210].mxu0 }
 0xd13   :  { %v8675_v41 = vadd.f32 %v10742_v17, %v18981_v40  ;;  %v10743_v26 = vadd.f32 %v17388_v15, %v8388_v5  ;;  %v8390_v43 = vpop.f32.mrb[211].mxu0 }
 0xd15   :  { %11837 = vtanh.f32 %v8675_v41  ;;  %v8678_v0 = vadd.f32 %v10743_v26, %v18982_v14  ;;  %v18991_v41 = vld [vmem:[#allocation117_spill] sm:$0xff] }
 0xd17   :  { %v11834_v8 = vpop.eup %11833  ;;  %11839 = vtanh.f32 %v8678_v0  ;;  %v18992_v0 = vld [vmem:[#allocation118_spill] sm:$0xff] }
 0xd18   :  { %8907 = vst [vmem:[%s17752_s15 + $0xd0] sm:$0xff] %v11834_v8  ;;  %v8393_v31 = vpop.f32.mrb[212].mxu0 }
 0xd19   :  { %v11836_v23 = vpop.eup %11835  ;;  %v10744_v7 = vadd.f32 %v17388_v15, %v8393_v31  ;;  %v8395_v21 = vpop.f32.mrb[213].mxu0 }
 0xd1a   :  { %8908 = vst [vmem:[%s17752_s15 + $0xd8] sm:$0xff] %v11836_v23  ;;  %v8396_v60 = vpop.f32.mrb[214].mxu0 }
 0xd1b   :  { %v8683_v58 = vadd.f32 %v10744_v7, %v18983_v63  ;;  %v10745_v56 = vadd.f32 %v17388_v15, %v8396_v60  ;;  %v8398_v22 = vpop.f32.mrb[215].mxu0 }
 0xd1d   :  { %11841 = vtanh.f32 %v8683_v58  ;;  %v8686_v18 = vadd.f32 %v10745_v56, %v18984_v11  ;;  %v18993_v58 = vld [vmem:[#allocation40_spill] sm:$0xff] }
 0xd1f   :  { %v11838_v38 = vpop.eup %11837  ;;  %11843 = vtanh.f32 %v8686_v18  ;;  %v18994_v18 = vld [vmem:[#allocation122_spill] sm:$0xff] }
 0xd20   :  { %8909 = vst [vmem:[%s17752_s15 + $0xe0] sm:$0xff] %v11838_v38  ;;  %v8401_v3 = vpop.f32.mrb[216].mxu0 }
 0xd21   :  { %v11840_v57 = vpop.eup %11839  ;;  %v10746_v53 = vadd.f32 %v17388_v15, %v8401_v3  ;;  %v8403_v19 = vpop.f32.mrb[217].mxu0 }
 0xd22   :  { %8910 = vst [vmem:[%s17752_s15 + $0xe8] sm:$0xff] %v11840_v57  ;;  %v8404_v1 = vpop.f32.mrb[218].mxu0 }
 0xd23   :  { %v8691_v47 = vadd.f32 %v10746_v53, %v18985_v16  ;;  %v10747_v33 = vadd.f32 %v17388_v15, %v8404_v1  ;;  %v8406_v12 = vpop.f32.mrb[219].mxu0 }
 0xd25   :  { %11845 = vtanh.f32 %v8691_v47  ;;  %v8694_v51 = vadd.f32 %v10747_v33, %v18986_v2  ;;  %v18995_v47 = vld [vmem:[#allocation120_spill] sm:$0xff] }
 0xd27   :  { %v11842_v37 = vpop.eup %11841  ;;  %11847 = vtanh.f32 %v8694_v51  ;;  %v18996_v51 = vld [vmem:[#allocation121_spill] sm:$0xff] }
 0xd28   :  { %8911 = vst [vmem:[%s17752_s15 + $0xf0] sm:$0xff] %v11842_v37  ;;  %v8409_v4 = vpop.f32.mrb[220].mxu0 }
 0xd29   :  { %v11844_v34 = vpop.eup %11843  ;;  %v10748_v42 = vadd.f32 %v17388_v15, %v8409_v4  ;;  %v8411_v39 = vpop.f32.mrb[221].mxu0 }
 0xd2a   :  { %8912 = vst [vmem:[%s17752_s15 + $0xf8] sm:$0xff] %v11844_v34  ;;  %v8412_v59 = vpop.f32.mrb[222].mxu0 }
 0xd2b   :  { %v8699_v36 = vadd.f32 %v10748_v42, %v18987_v49  ;;  %v10749_v50 = vadd.f32 %v17388_v15, %v8412_v59  ;;  %v8414_v28 = vpop.f32.mrb[223].mxu0 }
 0xd2d   :  { %11849 = vtanh.f32 %v8699_v36  ;;  %v8702_v32 = vadd.f32 %v10749_v50, %v18988_v13  ;;  %v18997_v36 = vld [vmem:[#allocation100_spill] sm:$0xff] }
 0xd2f   :  { %v11846_v20 = vpop.eup %11845  ;;  %11851 = vtanh.f32 %v8702_v32  ;;  %v18998_v32 = vld [vmem:[#allocation125_spill] sm:$0xff] }
 0xd30   :  { %8913 = vst [vmem:[%s17752_s15 + $0x100] sm:$0xff] %v11846_v20  ;;  %v8417_v45 = vpop.f32.mrb[224].mxu0 }
 0xd31   :  { %v11848_v44 = vpop.eup %11847  ;;  %v10750_v29 = vadd.f32 %v17388_v15, %v8417_v45  ;;  %v8419_v62 = vpop.f32.mrb[225].mxu0 }
 0xd32   :  { %8914 = vst [vmem:[%s17752_s15 + $0x108] sm:$0xff] %v11848_v44  ;;  %v8420_v61 = vpop.f32.mrb[226].mxu0 }
 0xd33   :  { %v8707_v10 = vadd.f32 %v10750_v29, %v18989_v54  ;;  %v10751_v52 = vadd.f32 %v17388_v15, %v8420_v61  ;;  %v8422_v55 = vpop.f32.mrb[227].mxu0 }
 0xd35   :  { %11853 = vtanh.f32 %v8707_v10  ;;  %v8710_v46 = vadd.f32 %v10751_v52, %v18990_v30  ;;  %v18999_v10 = vld [vmem:[#allocation123_spill] sm:$0xff] }
 0xd37   :  { %v11850_v35 = vpop.eup %11849  ;;  %11855 = vtanh.f32 %v8710_v46  ;;  %v19000_v46 = vld [vmem:[#allocation124_spill] sm:$0xff] }
 0xd38   :  { %8915 = vst [vmem:[%s17752_s15 + $0x110] sm:$0xff] %v11850_v35  ;;  %v8425_v25 = vpop.f32.mrb[228].mxu0 }
 0xd39   :  { %v11852_v17 = vpop.eup %11851  ;;  %v10752_v27 = vadd.f32 %v17388_v15, %v8425_v25  ;;  %v8427_v5 = vpop.f32.mrb[229].mxu0 }
 0xd3a   :  { %8916 = vst [vmem:[%s17752_s15 + $0x118] sm:$0xff] %v11852_v17  ;;  %v8428_v40 = vpop.f32.mrb[230].mxu0 }
 0xd3b   :  { %v8715_v26 = vadd.f32 %v10752_v27, %v18991_v41  ;;  %v10753_v43 = vadd.f32 %v17388_v15, %v8428_v40  ;;  %v8430_v14 = vpop.f32.mrb[231].mxu0 }
 0xd3d   :  { %11857 = vtanh.f32 %v8715_v26  ;;  %v8718_v8 = vadd.f32 %v10753_v43, %v18992_v0  ;;  %v19001_v26 = vld [vmem:[#allocation39_spill] sm:$0xff] }
 0xd3f   :  { %v11854_v31 = vpop.eup %11853  ;;  %11859 = vtanh.f32 %v8718_v8  ;;  %v19002_v8 = vld [vmem:[#allocation128_spill] sm:$0xff] }
 0xd40   :  { %8917 = vst [vmem:[%s17752_s15 + $0x120] sm:$0xff] %v11854_v31  ;;  %v8433_v23 = vpop.f32.mrb[232].mxu0 }
 0xd41   :  { %v11856_v7 = vpop.eup %11855  ;;  %v10754_v21 = vadd.f32 %v17388_v15, %v8433_v23  ;;  %v8435_v60 = vpop.f32.mrb[233].mxu0 }
 0xd42   :  { %8918 = vst [vmem:[%s17752_s15 + $0x128] sm:$0xff] %v11856_v7  ;;  %v8436_v63 = vpop.f32.mrb[234].mxu0 }
 0xd43   :  { %v8723_v56 = vadd.f32 %v10754_v21, %v18993_v58  ;;  %v10755_v22 = vadd.f32 %v17388_v15, %v8436_v63  ;;  %v8438_v11 = vpop.f32.mrb[235].mxu0 }
 0xd45   :  { %11861 = vtanh.f32 %v8723_v56  ;;  %v8726_v38 = vadd.f32 %v10755_v22, %v18994_v18  ;;  %v19003_v56 = vld [vmem:[#allocation126_spill] sm:$0xff] }
 0xd47   :  { %v11858_v3 = vpop.eup %11857  ;;  %11863 = vtanh.f32 %v8726_v38  ;;  %v19004_v38 = vld [vmem:[#allocation127_spill] sm:$0xff] }
 0xd48   :  { %8919 = vst [vmem:[%s17752_s15 + $0x130] sm:$0xff] %v11858_v3  ;;  %v8441_v57 = vpop.f32.mrb[236].mxu0 }
 0xd49   :  { %v11860_v53 = vpop.eup %11859  ;;  %v10756_v19 = vadd.f32 %v17388_v15, %v8441_v57  ;;  %v8443_v1 = vpop.f32.mrb[237].mxu0 }
 0xd4a   :  { %8920 = vst [vmem:[%s17752_s15 + $0x138] sm:$0xff] %v11860_v53  ;;  %v8444_v16 = vpop.f32.mrb[238].mxu0 }
 0xd4b   :  { %v8731_v33 = vadd.f32 %v10756_v19, %v18995_v47  ;;  %v10757_v12 = vadd.f32 %v17388_v15, %v8444_v16  ;;  %v8446_v2 = vpop.f32.mrb[239].mxu0 }
 0xd4d   :  { %11865 = vtanh.f32 %v8731_v33  ;;  %v8734_v37 = vadd.f32 %v10757_v12, %v18996_v51  ;;  %v19005_v33 = vld [vmem:[#allocation41_spill] sm:$0xff] }
 0xd4f   :  { %v11862_v4 = vpop.eup %11861  ;;  %11867 = vtanh.f32 %v8734_v37  ;;  %v19006_v37 = vld [vmem:[#allocation131_spill] sm:$0xff] }
 0xd50   :  { %8921 = vst [vmem:[%s17752_s15 + $0x140] sm:$0xff] %v11862_v4  ;;  %v8449_v34 = vpop.f32.mrb[240].mxu0 }
 0xd51   :  { %v11864_v42 = vpop.eup %11863  ;;  %v10758_v39 = vadd.f32 %v17388_v15, %v8449_v34  ;;  %v8451_v59 = vpop.f32.mrb[241].mxu0 }
 0xd52   :  { %8922 = vst [vmem:[%s17752_s15 + $0x148] sm:$0xff] %v11864_v42  ;;  %v8452_v49 = vpop.f32.mrb[242].mxu0 }
 0xd53   :  { %v8739_v50 = vadd.f32 %v10758_v39, %v18997_v36  ;;  %v10759_v28 = vadd.f32 %v17388_v15, %v8452_v49  ;;  %v8454_v13 = vpop.f32.mrb[243].mxu0 }
 0xd55   :  { %11869 = vtanh.f32 %v8739_v50  ;;  %v8742_v20 = vadd.f32 %v10759_v28, %v18998_v32  ;;  %v19007_v50 = vld [vmem:[#allocation129_spill] sm:$0xff] }
 0xd57   :  { %v11866_v45 = vpop.eup %11865  ;;  %11871 = vtanh.f32 %v8742_v20  ;;  %v19008_v20 = vld [vmem:[#allocation130_spill] sm:$0xff] }
 0xd58   :  { %8923 = vst [vmem:[%s17752_s15 + $0x150] sm:$0xff] %v11866_v45  ;;  %v8457_v44 = vpop.f32.mrb[244].mxu0 }
 0xd59   :  { %v11868_v29 = vpop.eup %11867  ;;  %v10760_v62 = vadd.f32 %v17388_v15, %v8457_v44  ;;  %v8459_v61 = vpop.f32.mrb[245].mxu0 }
 0xd5a   :  { %8924 = vst [vmem:[%s17752_s15 + $0x158] sm:$0xff] %v11868_v29  ;;  %v8460_v54 = vpop.f32.mrb[246].mxu0 }
 0xd5b   :  { %v8747_v52 = vadd.f32 %v10760_v62, %v18999_v10  ;;  %v10761_v55 = vadd.f32 %v17388_v15, %v8460_v54  ;;  %v8462_v30 = vpop.f32.mrb[247].mxu0 }
 0xd5d   :  { %11873 = vtanh.f32 %v8747_v52  ;;  %v8750_v35 = vadd.f32 %v10761_v55, %v19000_v46  ;;  %v19009_v52 = vld [vmem:[#allocation44_spill] sm:$0xff] }
 0xd5f   :  { %v11870_v25 = vpop.eup %11869  ;;  %11875 = vtanh.f32 %v8750_v35  ;;  %v19010_v35 = vld [vmem:[#allocation134_spill] sm:$0xff] }
 0xd60   :  { %8925 = vst [vmem:[%s17752_s15 + $0x160] sm:$0xff] %v11870_v25  ;;  %v8465_v17 = vpop.f32.mrb[248].mxu0 }
 0xd61   :  { %v11872_v27 = vpop.eup %11871  ;;  %v10762_v5 = vadd.f32 %v17388_v15, %v8465_v17  ;;  %v8467_v40 = vpop.f32.mrb[249].mxu0 }
 0xd62   :  { %8926 = vst [vmem:[%s17752_s15 + $0x168] sm:$0xff] %v11872_v27  ;;  %v8468_v41 = vpop.f32.mrb[250].mxu0 }
 0xd63   :  { %v8755_v43 = vadd.f32 %v10762_v5, %v19001_v26  ;;  %v10763_v14 = vadd.f32 %v17388_v15, %v8468_v41  ;;  %v8470_v0 = vpop.f32.mrb[251].mxu0 }
 0xd65   :  { %11877 = vtanh.f32 %v8755_v43  ;;  %v8758_v31 = vadd.f32 %v10763_v14, %v19002_v8  ;;  %v19011_v43 = vld [vmem:[#allocation132_spill] sm:$0xff] }
 0xd67   :  { %v11874_v23 = vpop.eup %11873  ;;  %11879 = vtanh.f32 %v8758_v31  ;;  %v19012_v31 = vld [vmem:[#allocation133_spill] sm:$0xff] }
 0xd68   :  { %8927 = vst [vmem:[%s17752_s15 + $0x170] sm:$0xff] %v11874_v23  ;;  %v8473_v7 = vpop.f32.mrb[252].mxu0 }
 0xd69   :  { %v11876_v21 = vpop.eup %11875  ;;  %v10764_v60 = vadd.f32 %v17388_v15, %v8473_v7  ;;  %v8475_v63 = vpop.f32.mrb[253].mxu0 }
 0xd6a   :  { %8928 = vst [vmem:[%s17752_s15 + $0x178] sm:$0xff] %v11876_v21  ;;  %v8476_v58 = vpop.f32.mrb[254].mxu0 }
 0xd6b   :  { %v8763_v22 = vadd.f32 %v10764_v60, %v19003_v56  ;;  %v10765_v11 = vadd.f32 %v17388_v15, %v8476_v58  ;;  %v8478_v18 = vpop.f32.mrb[255].mxu0 }
 0xd6d   :  { %11881 = vtanh.f32 %v8763_v22  ;;  %v8766_v3 = vadd.f32 %v10765_v11, %v19004_v38 }
 0xd6f   :  { %v11878_v57 = vpop.eup %11877  ;;  %11883 = vtanh.f32 %v8766_v3 }
 0xd70   :  { %8929 = vst [vmem:[%s17752_s15 + $0x180] sm:$0xff] %v11878_v57  ;;  %v8481_v53 = vpop.f32.mrb[0].mxu0 }
 0xd71   :  { %v11880_v19 = vpop.eup %11879  ;;  %v10766_v1 = vadd.f32 %v17388_v15, %v8481_v53  ;;  %v8483_v16 = vpop.f32.mrb[1].mxu0 }
 0xd72   :  { %8930 = vst [vmem:[%s17752_s15 + $0x188] sm:$0xff] %v11880_v19  ;;  %v8484_v47 = vpop.f32.mrb[2].mxu0 }
 0xd73   :  { %v8771_v12 = vadd.f32 %v10766_v1, %v19005_v33  ;;  %v10767_v2 = vadd.f32 %v17388_v15, %v8484_v47  ;;  %v8486_v51 = vpop.f32.mrb[3].mxu0 }
 0xd75   :  { %11885 = vtanh.f32 %v8771_v12  ;;  %v8774_v4 = vadd.f32 %v10767_v2, %v19006_v37 }
 0xd77   :  { %v11882_v34 = vpop.eup %11881  ;;  %11887 = vtanh.f32 %v8774_v4 }
 0xd78   :  { %8931 = vst [vmem:[%s17752_s15 + $0x190] sm:$0xff] %v11882_v34  ;;  %v8489_v42 = vpop.f32.mrb[4].mxu0 }
 0xd79   :  { %v11884_v39 = vpop.eup %11883  ;;  %v10768_v59 = vadd.f32 %v17388_v15, %v8489_v42  ;;  %v8491_v49 = vpop.f32.mrb[5].mxu0 }
 0xd7a   :  { %8932 = vst [vmem:[%s17752_s15 + $0x198] sm:$0xff] %v11884_v39  ;;  %v8492_v36 = vpop.f32.mrb[6].mxu0 }
 0xd7b   :  { %v8779_v28 = vadd.f32 %v10768_v59, %v19007_v50  ;;  %v10769_v13 = vadd.f32 %v17388_v15, %v8492_v36  ;;  %v8494_v32 = vpop.f32.mrb[7].mxu0 }
 0xd7d   :  { %11889 = vtanh.f32 %v8779_v28  ;;  %v8782_v45 = vadd.f32 %v10769_v13, %v19008_v20 }
 0xd7f   :  { %v11886_v44 = vpop.eup %11885  ;;  %11891 = vtanh.f32 %v8782_v45 }
 0xd80   :  { %8933 = vst [vmem:[%s17752_s15 + $0x1a0] sm:$0xff] %v11886_v44  ;;  %v8497_v29 = vpop.f32.mrb[8].mxu0 }
 0xd81   :  { %v11888_v62 = vpop.eup %11887  ;;  %v10770_v61 = vadd.f32 %v17388_v15, %v8497_v29  ;;  %v8499_v54 = vpop.f32.mrb[9].mxu0 }
 0xd82   :  { %8934 = vst [vmem:[%s17752_s15 + $0x1a8] sm:$0xff] %v11888_v62  ;;  %v8500_v10 = vpop.f32.mrb[10].mxu0 }
 0xd83   :  { %v8787_v55 = vadd.f32 %v10770_v61, %v19009_v52  ;;  %v10771_v30 = vadd.f32 %v17388_v15, %v8500_v10  ;;  %v8502_v46 = vpop.f32.mrb[11].mxu0 }
 0xd85   :  { %11893 = vtanh.f32 %v8787_v55  ;;  %v8790_v25 = vadd.f32 %v10771_v30, %v19010_v35 }
 0xd87   :  { %v11890_v17 = vpop.eup %11889  ;;  %11895 = vtanh.f32 %v8790_v25 }
 0xd88   :  { %8935 = vst [vmem:[%s17752_s15 + $0x1b0] sm:$0xff] %v11890_v17  ;;  %v8505_v27 = vpop.f32.mrb[12].mxu0 }
 0xd89   :  { %v11892_v5 = vpop.eup %11891  ;;  %v10772_v40 = vadd.f32 %v17388_v15, %v8505_v27  ;;  %v8507_v41 = vpop.f32.mrb[13].mxu0 }
 0xd8a   :  { %8936 = vst [vmem:[%s17752_s15 + $0x1b8] sm:$0xff] %v11892_v5  ;;  %v8508_v26 = vpop.f32.mrb[14].mxu0 }
 0xd8b   :  { %v8795_v14 = vadd.f32 %v10772_v40, %v19011_v43  ;;  %v10773_v0 = vadd.f32 %v17388_v15, %v8508_v26  ;;  %v8510_v8 = vpop.f32.mrb[15].mxu0 }
 0xd8d   :  { %11897 = vtanh.f32 %v8795_v14  ;;  %v8798_v23 = vadd.f32 %v10773_v0, %v19012_v31 }
 0xd8f   :  { %v11894_v7 = vpop.eup %11893  ;;  %11899 = vtanh.f32 %v8798_v23 }
 0xd90   :  { %8937 = vst [vmem:[%s17752_s15 + $0x1c0] sm:$0xff] %v11894_v7  ;;  %v8513_v21 = vpop.f32.mrb[16].mxu0 }
 0xd91   :  { %v11896_v60 = vpop.eup %11895  ;;  %v10774_v63 = vadd.f32 %v17388_v15, %v8513_v21  ;;  %v8515_v58 = vpop.f32.mrb[17].mxu0 }
 0xd92   :  { %8938 = vst [vmem:[%s17752_s15 + $0x1c8] sm:$0xff] %v11896_v60  ;;  %v8516_v56 = vpop.f32.mrb[18].mxu0 }
 0xd93   :  { %v10775_v22 = vadd.f32 %v17388_v15, %v8516_v56  ;;  %v8803_v11 = vadd.f32 %v10774_v63, %v17558_v9  ;;  %v8518_v18 = vpop.f32.mrb[19].mxu0 }
 0xd95   :  { %11901 = vtanh.f32 %v8803_v11  ;;  %v8806_v38 = vadd.f32 %v10775_v22, %v17567_v48 }
 0xd97   :  { %v11898_v3 = vpop.eup %11897  ;;  %11903 = vtanh.f32 %v8806_v38 }
 0xd98   :  { %8939 = vst [vmem:[%s17752_s15 + $0x1d0] sm:$0xff] %v11898_v3  ;;  %v8521_v57 = vpop.f32.mrb[20].mxu0 }
 0xd99   :  { %v11900_v53 = vpop.eup %11899  ;;  %v10776_v19 = vadd.f32 %v17388_v15, %v8521_v57  ;;  %v8523_v1 = vpop.f32.mrb[21].mxu0 }
 0xd9a   :  { %8940 = vst [vmem:[%s17752_s15 + $0x1d8] sm:$0xff] %v11900_v53  ;;  %v8524_v9 = vpop.f32.mrb[22].mxu0 }
 0xd9b   :  { %v8811_v16 = vadd.f32 %v10776_v19, %v17554_v6  ;;  %v10777_v48 = vadd.f32 %v17388_v15, %v8524_v9  ;;  %v8526_v47 = vpop.f32.mrb[23].mxu0 }
 0xd9d   :  { %11905 = vtanh.f32 %v8811_v16  ;;  %v8814_v33 = vadd.f32 %v10777_v48, %v17564_v24 }
 0xd9f   :  { %v11902_v12 = vpop.eup %11901  ;;  %11907 = vtanh.f32 %v8814_v33 }
 0xda0   :  { %8941 = vst [vmem:[%s17752_s15 + $0x1e0] sm:$0xff] %v11902_v12 }
 0xda1   :  { %v11904_v2 = vpop.eup %11903 }
 0xda2   :  { %8942 = vst [vmem:[%s17752_s15 + $0x1e8] sm:$0xff] %v11904_v2 }
 0xda7   :  { %v11906_v51 = vpop.eup %11905 }
 0xda8   :  { %8943 = vst [vmem:[%s17752_s15 + $0x1f0] sm:$0xff] %v11906_v51 }
 0xda9   :  { %v11908_v15 = vpop.eup %11907 }
 0xdaa   :  { %8944 = vst [vmem:[%s17752_s15 + $0x1f8] sm:$0xff] %v11908_v15 }
 0xdab   :  { %8949 = vsyncpa [#allocation3], 1 }
 0xdac   :  { %8950 = vsyncpa [#allocation5], 1 }
 0xdad   :  { %8951 = vsyncpa [#allocation8], 1 }

</bundles_post_ra>
